<compile_context>
chip_gen: v7x
topology: tpu7x:2x2x1
jax: 0.10.0
libtpu: 0.0.40
codegen_flags: <defaults>
</compile_context>

<pallas_src>
import jax
import jax.numpy as jnp
import numpy as np
from jax import lax
from jax.experimental import pallas as pl
from jax.experimental.pallas import tpu as pltpu

# VGG config chosen so the flattened feature size is exactly 512 (128 ch * 2 * 2),
# matching the hard-coded Linear(512, n_classes) in the PyTorch module.
LAYERS = [8, 'pool', 16, 'pool', 32, 'pool', 128]
N_CHANNELS = 4
N_CLASSES = 10
BN_EPS = 1e-5
_NEG = float(np.finfo(np.float32).min)   # effective -inf for max pooling


# --------------------------- plan / kernel factory ---------------------------

def _plan(layers, H, W, C):
    """Per-stage shapes for the given layer config."""
    stages = []
    for l in layers:
        if l == 'pool':
            assert H % 2 == 0 and W % 2 == 0
            stages.append(('pool', H, W, C))
            H, W = H // 2, W // 2
        else:
            stages.append(('conv', H, W, C, int(l)))
            C = int(l)
    assert stages[0][0] == 'conv' and stages[-1][0] == 'conv'
    for k, st in enumerate(stages):
        if st[0] == 'pool':
            assert stages[k + 1][0] == 'conv'
    return stages, (H, W, C)


def _build(layers, H0, W0, C0):
    """Build the fused kernel, its VMEM scratch shapes, and the final feature shape."""
    stages, (Hf, Wf, Cf) = _plan(layers, H0, W0, C0)
    n_conv = sum(1 for s in stages if s[0] == 'conv')

    # Scratch layout (all flat 2-D [rows, channels], channels on lanes):
    #   conv k>0 : zero-padded input staging  ((H+2)*(W+2)+8, Cin)
    #   pool     : -inf padded input staging  ((H+2)*(W+2)+8, C)  +  stride-1 3x3 max ((H*(W+2)), C)
    #   final    : last conv output           (Hf*(Wf+2), Cf)
    scratch_shapes = []
    slots = []
    for k, st in enumerate(stages):
        if st[0] == 'conv':
            if k == 0:
                slots.append(None)  # first conv reads its padded input directly from x_ref
            else:
                _, H, W, Cin, _ = st
                slots.append((len(scratch_shapes),))
                scratch_shapes.append(pltpu.VMEM(((H + 2) * (W + 2) + 8, Cin), jnp.float32))
        else:
            _, H, W, C = st
            slots.append((len(scratch_shapes), len(scratch_shapes) + 1))
            scratch_shapes.append(pltpu.VMEM(((H + 2) * (W + 2) + 8, C), jnp.float32))
            scratch_shapes.append(pltpu.VMEM((H * (W + 2), C), jnp.float32))
    yf_slot = len(scratch_shapes)
    scratch_shapes.append(pltpu.VMEM((Hf * (Wf + 2), Cf), jnp.float32))

    def kernel(*refs):
        x_ref = refs[0]                                   # (1, (H0+2)*(W0+2)+8, C0)
        conv_refs = refs[1:1 + 3 * n_conv]                # (w, scale, bias) per conv
        wp_ref, bl_ref, o_ref = refs[1 + 3 * n_conv:4 + 3 * n_conv]
        scratch = refs[4 + 3 * n_conv:]
        yf_ref = scratch[yf_slot]

        # ---- (re)initialize padded staging buffers for this image -----------
        for k, st in enumerate(stages):
            if st[0] == 'conv':
                if k > 0:
                    r = scratch[slots[k][0]]
                    r[...] = jnp.zeros(r.shape, r.dtype)
            else:
                r = scratch[slots[k][0]]
                r[...] = jnp.full(r.shape, _NEG, r.dtype)

        # ---- run the conv/pool stack ----------------------------------------
        ci = 0
        for k, st in enumerate(stages):
            if st[0] == 'conv':
                _, H, W, Cin, Cout = st
                w_ref, sc_ref, bi_ref = conv_refs[3 * ci:3 * ci + 3]
                ci += 1
                L = H * (W + 2)          # flat rows carry (W+2)-wide padded rows

                if k == 0:
                    read = lambda s, L=L: x_ref[0, s:s + L, :]
                else:
                    p_ref = scratch[slots[k][0]]
                    read = lambda s, L=L, p_ref=p_ref: p_ref[s:s + L, :]

                # conv3x3 as 9 shifted matmuls accumulated in f32 (MXU), then
                # fused BatchNorm(eval) affine + ReLU (VPU).
                acc = jnp.zeros((L, Cout), jnp.float32)
                for dh in range(3):
                    for dw in range(3):
                        acc = acc + jnp.dot(read(dh * (W + 2) + dw),
                                            w_ref[dh * 3 + dw],
                                            preferred_element_type=jnp.float32)
                y = jnp.maximum(acc * sc_ref[...] + bi_ref[...], 0.0)

                if k + 1 < len(stages):
                    # next stage is a pool: stage y into the pool's -inf padded
                    # buffer; the two halo columns of each flat row become -inf.
                    pf_ref = scratch[slots[k + 1][0]]
                    col = lax.broadcasted_iota(jnp.int32, (L, Cout), 0) % (W + 2)
                    pf_ref[W + 3:W + 3 + L, :] = jnp.where(col < W, y, _NEG)
                else:
                    yf_ref[...] = y
            else:
                _, H, W, C = st
                Ho, Wo = H // 2, W // 2
                pf_ref = scratch[slots[k][0]]
                f_ref = scratch[slots[k][1]]
                L = H * (W + 2)

                # stride-1 3x3 max: elementwise max of 9 shifted flat slices.
                f = pf_ref[0:L, :]
                for dh in range(3):
                    for dw in range(3):
                        if dh == 0 and dw == 0:
                            continue
                        s = dh * (W + 2) + dw
                        f = jnp.maximum(f, pf_ref[s:s + L, :])
                f_ref[...] = f

                # stride-2 subsample straight into the next conv's padded buffer.
                p_next = scratch[slots[k + 1][0]]
                for i in range(Ho):
                    for j in range(Wo):
                        src = 2 * i * (W + 2) + 2 * j
                        dst = (i + 1) * (Wo + 2) + (j + 1)
                        p_next[dst:dst + 1, :] = f_ref[src:src + 1, :]

        # ---- classifier: Dropout(eval)=id, Linear(512, NC) + Softmax(dim=1) --
        # TODO(synk): training-mode Dropout / BatchNorm batch statistics not implemented.
        logits = bl_ref[...].astype(jnp.float32)          # (1, NC)
        s = 0
        for h in range(Hf):
            for w in range(Wf):
                t = h * (Wf + 2) + w                       # valid flat row of yf
                logits = logits + jnp.dot(yf_ref[t:t + 1, :], wp_ref[s],
                                          preferred_element_type=jnp.float32)
                s += 1
        m = jnp.max(logits, axis=-1, keepdims=True)
        e = jnp.exp(logits - m)
        o_ref[0] = (e / jnp.sum(e, axis=-1, keepdims=True)).astype(o_ref.dtype)

    return kernel, scratch_shapes, (Hf, Wf, Cf)


# --------------------------- wrapper ---------------------------------------

def vgg_forward(x_nchw, params):
    B, C0, H0, W0 = x_nchw.shape
    kernel, scratch_shapes, (Hf, Wf, Cf) = _build(LAYERS, H0, W0, C0)

    # One-off layout glue on the tiny raw input: NCHW -> NHWC, zero-pad the halo,
    # flatten spatial rows, and append a few zero rows so every shifted in-kernel
    # slice stays in bounds.
    x = jnp.transpose(x_nchw, (0, 2, 3, 1)).astype(jnp.float32)
    x = jnp.pad(x, ((0, 0), (1, 1), (1, 1), (0, 0)))
    x = x.reshape(B, (H0 + 2) * (W0 + 2), C0)
    x = jnp.pad(x, ((0, 0), (0, 8), (0, 0)))
    R0 = (H0 + 2) * (W0 + 2) + 8

    args = [x]
    in_specs = [pl.BlockSpec((1, R0, C0), lambda b: (b, 0, 0))]

    # Per-conv weights with BatchNorm (eval running stats) + conv bias folded in.
    for p in params['convs']:
        _, _, cin, cout = p['w'].shape
        scale = p['gamma'] / jnp.sqrt(p['var'] + BN_EPS)
        bias = p['beta'] + scale * (p['b'] - p['mean'])
        args += [p['w'].reshape(9, cin, cout).astype(jnp.float32),
                 scale.reshape(1, cout).astype(jnp.float32),
                 bias.reshape(1, cout).astype(jnp.float32)]
        in_specs += [pl.BlockSpec((9, cin, cout), lambda b: (0, 0, 0)),
                     pl.BlockSpec((1, cout), lambda b: (0, 0)),
                     pl.BlockSpec((1, cout), lambda b: (0, 0))]

    wl = params['linear']['w'].astype(jnp.float32)        # (512, NC)
    bl = params['linear']['b'].astype(jnp.float32)
    D, NC = wl.shape
    assert D == Hf * Wf * Cf
    # torch flattens NCHW: flat[c*(Hf*Wf) + s], s = h*Wf + w.  Permute the
    # classifier weight once so the kernel consumes NHWC feature rows directly.
    wp = wl.reshape(Cf, Hf * Wf, NC).transpose(1, 0, 2)   # (Hf*Wf, Cf, NC)
    args += [wp, bl.reshape(1, NC)]
    in_specs += [pl.BlockSpec((Hf * Wf, Cf, NC), lambda b: (0, 0, 0)),
                 pl.BlockSpec((1, NC), lambda b: (0, 0))]

    out = pl.pallas_call(
        kernel,
        out_shape=jax.ShapeDtypeStruct((B, 1, NC), jnp.float32),
        grid=(B,),
        in_specs=in_specs,
        out_specs=pl.BlockSpec((1, 1, NC), lambda b: (b, 0, 0)),
        scratch_shapes=scratch_shapes,
        compiler_params=pltpu.CompilerParams(
            dimension_semantics=("parallel",)),   # v7x: split batch across TensorCores
    )(*args)
    return out.reshape(B, NC)


# --------------------------- params / reference -----------------------------

def init_params(key):
    params = {'convs': [], 'linear': None}
    in_c = N_CHANNELS
    for layer in LAYERS:
        if layer == 'pool':
            continue
        key, k1, k2, k3, k4 = jax.random.split(key, 5)
        params['convs'].append(dict(
            w=0.1 * jax.random.normal(k1, (3, 3, in_c, layer), jnp.float32),
            b=0.1 * jax.random.normal(k2, (layer,), jnp.float32),
            gamma=1.0 + 0.1 * jax.random.normal(k3, (layer,), jnp.float32),
            beta=0.1 * jax.random.normal(k4, (layer,), jnp.float32),
            mean=jnp.zeros((layer,), jnp.float32),   # fresh BN running stats
            var=jnp.ones((layer,), jnp.float32),
        ))
        in_c = layer
    key, k1, k2 = jax.random.split(key, 3)
    params['linear'] = dict(
        w=0.05 * jax.random.normal(k1, (512, N_CLASSES), jnp.float32),
        b=0.05 * jax.random.normal(k2, (N_CLASSES,), jnp.float32),
    )
    return params


def ref_forward(x_nchw, params):
    """Pure-JAX reference mirroring the PyTorch forward (eval mode)."""
    x = x_nchw
    ci = 0
    for layer in LAYERS:
        if layer == 'pool':
            x = lax.reduce_window(x, -jnp.inf, lax.max,
                                  (1, 1, 3, 3), (1, 1, 2, 2),
                                  ((0, 0), (0, 0), (1, 1), (1, 1)))
        else:
            p = params['convs'][ci]
            ci += 1
            w_oihw = jnp.transpose(p['w'], (3, 2, 0, 1))
            x = lax.conv_general_dilated(
                x, w_oihw, (1, 1), ((1, 1), (1, 1)),
                dimension_numbers=('NCHW', 'OIHW', 'NCHW'))
            x = x + p['b'][None, :, None, None]
            x = ((x - p['mean'][None, :, None, None])
                 / jnp.sqrt(p['var'][None, :, None, None] + BN_EPS)
                 * p['gamma'][None, :, None, None] + p['beta'][None, :, None, None])
            x = jnp.maximum(x, 0.0)
    x = x.reshape(-1, 512)
    logits = x @ params['linear']['w'] + params['linear']['b']
    return jax.nn.softmax(logits, axis=1)


# --------------------------- main -------------------------------------------

if __name__ == "__main__":
    key = jax.random.PRNGKey(0)
    key, kx = jax.random.split(key)
    x = jax.random.normal(kx, (2, N_CHANNELS, 16, 16), jnp.float32)
    params = init_params(key)

    out = jax.block_until_ready(jax.jit(vgg_forward)(x, params))
    ref = jax.block_until_ready(ref_forward(x, params))

    assert out.shape == (2, N_CLASSES), out.shape
    np.testing.assert_allclose(np.asarray(out), np.asarray(ref), rtol=1e-3, atol=1e-5)
    print("KERNEL_OK")
</pallas_src>

<mosaic_0001>
module attributes {stable_mosaic.version = 11 : i64} {
  func.func @kernel(%arg0: i32, %arg1: memref<1x332x4xf32, #tpu.memory_space<vmem>>, %arg2: memref<9x4x8xf32, #tpu.memory_space<vmem>>, %arg3: memref<1x8xf32, #tpu.memory_space<vmem>>, %arg4: memref<1x8xf32, #tpu.memory_space<vmem>>, %arg5: memref<9x8x16xf32, #tpu.memory_space<vmem>>, %arg6: memref<1x16xf32, #tpu.memory_space<vmem>>, %arg7: memref<1x16xf32, #tpu.memory_space<vmem>>, %arg8: memref<9x16x32xf32, #tpu.memory_space<vmem>>, %arg9: memref<1x32xf32, #tpu.memory_space<vmem>>, %arg10: memref<1x32xf32, #tpu.memory_space<vmem>>, %arg11: memref<9x32x128xf32, #tpu.memory_space<vmem>>, %arg12: memref<1x128xf32, #tpu.memory_space<vmem>>, %arg13: memref<1x128xf32, #tpu.memory_space<vmem>>, %arg14: memref<4x128x10xf32, #tpu.memory_space<vmem>>, %arg15: memref<1x10xf32, #tpu.memory_space<vmem>>, %arg16: memref<1x1x10xf32, #tpu.memory_space<vmem>>, %arg17: memref<332x8xf32, #tpu.memory_space<vmem>>, %arg18: memref<288x8xf32, #tpu.memory_space<vmem>>, %arg19: memref<108x8xf32, #tpu.memory_space<vmem>>, %arg20: memref<108x16xf32, #tpu.memory_space<vmem>>, %arg21: memref<80x16xf32, #tpu.memory_space<vmem>>, %arg22: memref<44x16xf32, #tpu.memory_space<vmem>>, %arg23: memref<44x32xf32, #tpu.memory_space<vmem>>, %arg24: memref<24x32xf32, #tpu.memory_space<vmem>>, %arg25: memref<24x32xf32, #tpu.memory_space<vmem>>, %arg26: memref<8x128xf32, #tpu.memory_space<vmem>>) attributes {dimension_semantics = [#tpu.dimension_semantics<parallel>], iteration_bounds = array<i64: 2>, scalar_prefetch = 0 : i64, scratch_operands = 10 : i64, tpu.core_type = #tpu.core_type<tc>, window_params = [{transform_indices = @transform_0, window_bounds = array<i64: 1, 332, 4>}, {pipeline_mode = #tpu.pipeline_mode<synchronous>, transform_indices = @transform_1, window_bounds = array<i64: 9, 4, 8>}, {pipeline_mode = #tpu.pipeline_mode<synchronous>, transform_indices = @transform_2, window_bounds = array<i64: 1, 8>}, {pipeline_mode = #tpu.pipeline_mode<synchronous>, transform_indices = @transform_3, window_bounds = array<i64: 1, 8>}, {pipeline_mode = #tpu.pipeline_mode<synchronous>, transform_indices = @transform_4, window_bounds = array<i64: 9, 8, 16>}, {pipeline_mode = #tpu.pipeline_mode<synchronous>, transform_indices = @transform_5, window_bounds = array<i64: 1, 16>}, {pipeline_mode = #tpu.pipeline_mode<synchronous>, transform_indices = @transform_6, window_bounds = array<i64: 1, 16>}, {pipeline_mode = #tpu.pipeline_mode<synchronous>, transform_indices = @transform_7, window_bounds = array<i64: 9, 16, 32>}, {pipeline_mode = #tpu.pipeline_mode<synchronous>, transform_indices = @transform_8, window_bounds = array<i64: 1, 32>}, {pipeline_mode = #tpu.pipeline_mode<synchronous>, transform_indices = @transform_9, window_bounds = array<i64: 1, 32>}, {pipeline_mode = #tpu.pipeline_mode<synchronous>, transform_indices = @transform_10, window_bounds = array<i64: 9, 32, 128>}, {pipeline_mode = #tpu.pipeline_mode<synchronous>, transform_indices = @transform_11, window_bounds = array<i64: 1, 128>}, {pipeline_mode = #tpu.pipeline_mode<synchronous>, transform_indices = @transform_12, window_bounds = array<i64: 1, 128>}, {pipeline_mode = #tpu.pipeline_mode<synchronous>, transform_indices = @transform_13, window_bounds = array<i64: 4, 128, 10>}, {pipeline_mode = #tpu.pipeline_mode<synchronous>, transform_indices = @transform_14, window_bounds = array<i64: 1, 10>}, {transform_indices = @transform_15, window_bounds = array<i64: 1, 1, 10>}]} {
    %cst = arith.constant -3.40282347E+38 : f32
    %0 = vector.broadcast %cst : f32 to vector<332x8xf32>
    %c0 = arith.constant 0 : index
    %c0_0 = arith.constant 0 : index
    %1 = vector.load %arg17[%c0, %c0_0] : memref<332x8xf32, #tpu.memory_space<vmem>>, vector<332x8xf32>
    tpu.vector_store %arg17[%c0, %c0_0], %0 {strides = array<i32>} : memref<332x8xf32, #tpu.memory_space<vmem>>, vector<332x8xf32>,
    %cst_1 = arith.constant 0.000000e+00 : f32
    %2 = vector.broadcast %cst_1 : f32 to vector<108x8xf32>
    %c0_2 = arith.constant 0 : index
    %c0_3 = arith.constant 0 : index
    %3 = vector.load %arg19[%c0_2, %c0_3] : memref<108x8xf32, #tpu.memory_space<vmem>>, vector<108x8xf32>
    tpu.vector_store %arg19[%c0_2, %c0_3], %2 {strides = array<i32>} : memref<108x8xf32, #tpu.memory_space<vmem>>, vector<108x8xf32>,
    %cst_4 = arith.constant -3.40282347E+38 : f32
    %4 = vector.broadcast %cst_4 : f32 to vector<108x16xf32>
    %c0_5 = arith.constant 0 : index
    %c0_6 = arith.constant 0 : index
    %5 = vector.load %arg20[%c0_5, %c0_6] : memref<108x16xf32, #tpu.memory_space<vmem>>, vector<108x16xf32>
    tpu.vector_store %arg20[%c0_5, %c0_6], %4 {strides = array<i32>} : memref<108x16xf32, #tpu.memory_space<vmem>>, vector<108x16xf32>,
    %cst_7 = arith.constant 0.000000e+00 : f32
    %6 = vector.broadcast %cst_7 : f32 to vector<44x16xf32>
    %c0_8 = arith.constant 0 : index
    %c0_9 = arith.constant 0 : index
    %7 = vector.load %arg22[%c0_8, %c0_9] : memref<44x16xf32, #tpu.memory_space<vmem>>, vector<44x16xf32>
    tpu.vector_store %arg22[%c0_8, %c0_9], %6 {strides = array<i32>} : memref<44x16xf32, #tpu.memory_space<vmem>>, vector<44x16xf32>,
    %cst_10 = arith.constant -3.40282347E+38 : f32
    %8 = vector.broadcast %cst_10 : f32 to vector<44x32xf32>
    %c0_11 = arith.constant 0 : index
    %c0_12 = arith.constant 0 : index
    %9 = vector.load %arg23[%c0_11, %c0_12] : memref<44x32xf32, #tpu.memory_space<vmem>>, vector<44x32xf32>
    tpu.vector_store %arg23[%c0_11, %c0_12], %8 {strides = array<i32>} : memref<44x32xf32, #tpu.memory_space<vmem>>, vector<44x32xf32>,
    %cst_13 = arith.constant 0.000000e+00 : f32
    %10 = vector.broadcast %cst_13 : f32 to vector<24x32xf32>
    %c0_14 = arith.constant 0 : index
    %c0_15 = arith.constant 0 : index
    %11 = vector.load %arg25[%c0_14, %c0_15] : memref<24x32xf32, #tpu.memory_space<vmem>>, vector<24x32xf32>
    tpu.vector_store %arg25[%c0_14, %c0_15], %10 {strides = array<i32>} : memref<24x32xf32, #tpu.memory_space<vmem>>, vector<24x32xf32>,
    %cst_16 = arith.constant 0.000000e+00 : f32
    %12 = vector.broadcast %cst_16 : f32 to vector<288x8xf32>
    %c0_17 = arith.constant 0 : index
    %c0_18 = arith.constant 0 : index
    %c0_19 = arith.constant 0 : index
    %13 = vector.load %arg1[%c0_17, %c0_18, %c0_19] : memref<1x332x4xf32, #tpu.memory_space<vmem>>, vector<1x288x4xf32>
    %14 = vector.shape_cast %13 : vector<1x288x4xf32> to vector<288x4xf32>
    %c0_20 = arith.constant 0 : index
    %c0_21 = arith.constant 0 : index
    %c0_22 = arith.constant 0 : index
    %15 = vector.load %arg2[%c0_20, %c0_21, %c0_22] : memref<9x4x8xf32, #tpu.memory_space<vmem>>, vector<1x4x8xf32>
    %16 = vector.shape_cast %15 : vector<1x4x8xf32> to vector<4x8xf32>
    %cst_23 = arith.constant dense<0.000000e+00> : vector<288x8xf32>
    %17 = tpu.matmul %14, %16, %cst_23 {dimension_numbers = #tpu.dot_dimension_numbers<[1], [0], [0], [1], [0, 0, 1, 1], [], []>} : vector<288x4xf32>, vector<4x8xf32>, vector<288x8xf32> -> vector<288x8xf32>
    %18 = arith.addf %12, %17 : vector<288x8xf32>
    %c0_24 = arith.constant 0 : index
    %c1 = arith.constant 1 : index
    %c0_25 = arith.constant 0 : index
    %19 = vector.load %arg1[%c0_24, %c1, %c0_25] : memref<1x332x4xf32, #tpu.memory_space<vmem>>, vector<1x288x4xf32>
    %20 = vector.shape_cast %19 : vector<1x288x4xf32> to vector<288x4xf32>
    %c1_26 = arith.constant 1 : index
    %c0_27 = arith.constant 0 : index
    %c0_28 = arith.constant 0 : index
    %21 = vector.load %arg2[%c1_26, %c0_27, %c0_28] : memref<9x4x8xf32, #tpu.memory_space<vmem>>, vector<1x4x8xf32>
    %22 = vector.shape_cast %21 : vector<1x4x8xf32> to vector<4x8xf32>
    %cst_29 = arith.constant dense<0.000000e+00> : vector<288x8xf32>
    %23 = tpu.matmul %20, %22, %cst_29 {dimension_numbers = #tpu.dot_dimension_numbers<[1], [0], [0], [1], [0, 0, 1, 1], [], []>} : vector<288x4xf32>, vector<4x8xf32>, vector<288x8xf32> -> vector<288x8xf32>
    %24 = arith.addf %18, %23 : vector<288x8xf32>
    %c0_30 = arith.constant 0 : index
    %c2 = arith.constant 2 : index
    %c0_31 = arith.constant 0 : index
    %25 = vector.load %arg1[%c0_30, %c2, %c0_31] : memref<1x332x4xf32, #tpu.memory_space<vmem>>, vector<1x288x4xf32>
    %26 = vector.shape_cast %25 : vector<1x288x4xf32> to vector<288x4xf32>
    %c2_32 = arith.constant 2 : index
    %c0_33 = arith.constant 0 : index
    %c0_34 = arith.constant 0 : index
    %27 = vector.load %arg2[%c2_32, %c0_33, %c0_34] : memref<9x4x8xf32, #tpu.memory_space<vmem>>, vector<1x4x8xf32>
    %28 = vector.shape_cast %27 : vector<1x4x8xf32> to vector<4x8xf32>
    %cst_35 = arith.constant dense<0.000000e+00> : vector<288x8xf32>
    %29 = tpu.matmul %26, %28, %cst_35 {dimension_numbers = #tpu.dot_dimension_numbers<[1], [0], [0], [1], [0, 0, 1, 1], [], []>} : vector<288x4xf32>, vector<4x8xf32>, vector<288x8xf32> -> vector<288x8xf32>
    %30 = arith.addf %24, %29 : vector<288x8xf32>
    %c0_36 = arith.constant 0 : index
    %c18 = arith.constant 18 : index
    %c0_37 = arith.constant 0 : index
    %31 = vector.load %arg1[%c0_36, %c18, %c0_37] : memref<1x332x4xf32, #tpu.memory_space<vmem>>, vector<1x288x4xf32>
    %32 = vector.shape_cast %31 : vector<1x288x4xf32> to vector<288x4xf32>
    %c3 = arith.constant 3 : index
    %c0_38 = arith.constant 0 : index
    %c0_39 = arith.constant 0 : index
    %33 = vector.load %arg2[%c3, %c0_38, %c0_39] : memref<9x4x8xf32, #tpu.memory_space<vmem>>, vector<1x4x8xf32>
    %34 = vector.shape_cast %33 : vector<1x4x8xf32> to vector<4x8xf32>
    %cst_40 = arith.constant dense<0.000000e+00> : vector<288x8xf32>
    %35 = tpu.matmul %32, %34, %cst_40 {dimension_numbers = #tpu.dot_dimension_numbers<[1], [0], [0], [1], [0, 0, 1, 1], [], []>} : vector<288x4xf32>, vector<4x8xf32>, vector<288x8xf32> -> vector<288x8xf32>
    %36 = arith.addf %30, %35 : vector<288x8xf32>
    %c0_41 = arith.constant 0 : index
    %c19 = arith.constant 19 : index
    %c0_42 = arith.constant 0 : index
    %37 = vector.load %arg1[%c0_41, %c19, %c0_42] : memref<1x332x4xf32, #tpu.memory_space<vmem>>, vector<1x288x4xf32>
    %38 = vector.shape_cast %37 : vector<1x288x4xf32> to vector<288x4xf32>
    %c4 = arith.constant 4 : index
    %c0_43 = arith.constant 0 : index
    %c0_44 = arith.constant 0 : index
    %39 = vector.load %arg2[%c4, %c0_43, %c0_44] : memref<9x4x8xf32, #tpu.memory_space<vmem>>, vector<1x4x8xf32>
    %40 = vector.shape_cast %39 : vector<1x4x8xf32> to vector<4x8xf32>
    %cst_45 = arith.constant dense<0.000000e+00> : vector<288x8xf32>
    %41 = tpu.matmul %38, %40, %cst_45 {dimension_numbers = #tpu.dot_dimension_numbers<[1], [0], [0], [1], [0, 0, 1, 1], [], []>} : vector<288x4xf32>, vector<4x8xf32>, vector<288x8xf32> -> vector<288x8xf32>
    %42 = arith.addf %36, %41 : vector<288x8xf32>
    %c0_46 = arith.constant 0 : index
    %c20 = arith.constant 20 : index
    %c0_47 = arith.constant 0 : index
    %43 = vector.load %arg1[%c0_46, %c20, %c0_47] : memref<1x332x4xf32, #tpu.memory_space<vmem>>, vector<1x288x4xf32>
    %44 = vector.shape_cast %43 : vector<1x288x4xf32> to vector<288x4xf32>
    %c5 = arith.constant 5 : index
    %c0_48 = arith.constant 0 : index
    %c0_49 = arith.constant 0 : index
    %45 = vector.load %arg2[%c5, %c0_48, %c0_49] : memref<9x4x8xf32, #tpu.memory_space<vmem>>, vector<1x4x8xf32>
    %46 = vector.shape_cast %45 : vector<1x4x8xf32> to vector<4x8xf32>
    %cst_50 = arith.constant dense<0.000000e+00> : vector<288x8xf32>
    %47 = tpu.matmul %44, %46, %cst_50 {dimension_numbers = #tpu.dot_dimension_numbers<[1], [0], [0], [1], [0, 0, 1, 1], [], []>} : vector<288x4xf32>, vector<4x8xf32>, vector<288x8xf32> -> vector<288x8xf32>
    %48 = arith.addf %42, %47 : vector<288x8xf32>
    %c0_51 = arith.constant 0 : index
    %c36 = arith.constant 36 : index
    %c0_52 = arith.constant 0 : index
    %49 = vector.load %arg1[%c0_51, %c36, %c0_52] : memref<1x332x4xf32, #tpu.memory_space<vmem>>, vector<1x288x4xf32>
    %50 = vector.shape_cast %49 : vector<1x288x4xf32> to vector<288x4xf32>
    %c6 = arith.constant 6 : index
    %c0_53 = arith.constant 0 : index
    %c0_54 = arith.constant 0 : index
    %51 = vector.load %arg2[%c6, %c0_53, %c0_54] : memref<9x4x8xf32, #tpu.memory_space<vmem>>, vector<1x4x8xf32>
    %52 = vector.shape_cast %51 : vector<1x4x8xf32> to vector<4x8xf32>
    %cst_55 = arith.constant dense<0.000000e+00> : vector<288x8xf32>
    %53 = tpu.matmul %50, %52, %cst_55 {dimension_numbers = #tpu.dot_dimension_numbers<[1], [0], [0], [1], [0, 0, 1, 1], [], []>} : vector<288x4xf32>, vector<4x8xf32>, vector<288x8xf32> -> vector<288x8xf32>
    %54 = arith.addf %48, %53 : vector<288x8xf32>
    %c0_56 = arith.constant 0 : index
    %c37 = arith.constant 37 : index
    %c0_57 = arith.constant 0 : index
    %55 = vector.load %arg1[%c0_56, %c37, %c0_57] : memref<1x332x4xf32, #tpu.memory_space<vmem>>, vector<1x288x4xf32>
    %56 = vector.shape_cast %55 : vector<1x288x4xf32> to vector<288x4xf32>
    %c7 = arith.constant 7 : index
    %c0_58 = arith.constant 0 : index
    %c0_59 = arith.constant 0 : index
    %57 = vector.load %arg2[%c7, %c0_58, %c0_59] : memref<9x4x8xf32, #tpu.memory_space<vmem>>, vector<1x4x8xf32>
    %58 = vector.shape_cast %57 : vector<1x4x8xf32> to vector<4x8xf32>
    %cst_60 = arith.constant dense<0.000000e+00> : vector<288x8xf32>
    %59 = tpu.matmul %56, %58, %cst_60 {dimension_numbers = #tpu.dot_dimension_numbers<[1], [0], [0], [1], [0, 0, 1, 1], [], []>} : vector<288x4xf32>, vector<4x8xf32>, vector<288x8xf32> -> vector<288x8xf32>
    %60 = arith.addf %54, %59 : vector<288x8xf32>
    %c0_61 = arith.constant 0 : index
    %c38 = arith.constant 38 : index
    %c0_62 = arith.constant 0 : index
    %61 = vector.load %arg1[%c0_61, %c38, %c0_62] : memref<1x332x4xf32, #tpu.memory_space<vmem>>, vector<1x288x4xf32>
    %62 = vector.shape_cast %61 : vector<1x288x4xf32> to vector<288x4xf32>
    %c8 = arith.constant 8 : index
    %c0_63 = arith.constant 0 : index
    %c0_64 = arith.constant 0 : index
    %63 = vector.load %arg2[%c8, %c0_63, %c0_64] : memref<9x4x8xf32, #tpu.memory_space<vmem>>, vector<1x4x8xf32>
    %64 = vector.shape_cast %63 : vector<1x4x8xf32> to vector<4x8xf32>
    %cst_65 = arith.constant dense<0.000000e+00> : vector<288x8xf32>
    %65 = tpu.matmul %62, %64, %cst_65 {dimension_numbers = #tpu.dot_dimension_numbers<[1], [0], [0], [1], [0, 0, 1, 1], [], []>} : vector<288x4xf32>, vector<4x8xf32>, vector<288x8xf32> -> vector<288x8xf32>
    %66 = arith.addf %60, %65 : vector<288x8xf32>
    %c0_66 = arith.constant 0 : index
    %c0_67 = arith.constant 0 : index
    %67 = vector.load %arg3[%c0_66, %c0_67] : memref<1x8xf32, #tpu.memory_space<vmem>>, vector<1x8xf32>
    %68 = vector.broadcast %67 : vector<1x8xf32> to vector<288x8xf32>
    %69 = arith.mulf %66, %68 : vector<288x8xf32>
    %c0_68 = arith.constant 0 : index
    %c0_69 = arith.constant 0 : index
    %70 = vector.load %arg4[%c0_68, %c0_69] : memref<1x8xf32, #tpu.memory_space<vmem>>, vector<1x8xf32>
    %71 = vector.broadcast %70 : vector<1x8xf32> to vector<288x8xf32>
    %72 = arith.addf %69, %71 : vector<288x8xf32>
    %cst_70 = arith.constant 0.000000e+00 : f32
    %73 = vector.broadcast %cst_70 : f32 to vector<288x8xf32>
    %74 = arith.maximumf %72, %73 : vector<288x8xf32>
    %75 = tpu.iota {dimensions = array<i32: 0>} : vector<288x8xi32>
    %c18_i32 = arith.constant 18 : i32
    %c0_i32 = arith.constant 0 : i32
    %76 = arith.cmpi eq, %c18_i32, %c0_i32 : i32
    %c1_i32 = arith.constant 1 : i32
    %77 = arith.select %76, %c1_i32, %c18_i32 : i32
    %78 = vector.broadcast %77 : i32 to vector<288x8xi32>
    %79 = arith.remsi %75, %78 : vector<288x8xi32>
    %c0_i32_71 = arith.constant 0 : i32
    %80 = vector.broadcast %c0_i32_71 : i32 to vector<288x8xi32>
    %81 = arith.cmpi ne, %79, %80 : vector<288x8xi32>
    %c0_i32_72 = arith.constant 0 : i32
    %82 = vector.broadcast %c0_i32_72 : i32 to vector<288x8xi32>
    %83 = arith.cmpi slt, %79, %82 : vector<288x8xi32>
    %c0_i32_73 = arith.constant 0 : i32
    %84 = arith.cmpi slt, %77, %c0_i32_73 : i32
    %85 = vector.broadcast %84 : i1 to vector<288x8xi1>
    %86 = vector.broadcast %85 : vector<288x8xi1> to vector<288x8xi1>
    %87 = arith.xori %83, %86 : vector<288x8xi1>
    %88 = arith.andi %87, %81 : vector<288x8xi1>
    %89 = vector.broadcast %77 : i32 to vector<288x8xi32>
    %90 = arith.addi %79, %89 : vector<288x8xi32>
    %91 = arith.select %88, %90, %79 : vector<288x8xi1>, vector<288x8xi32>
    %c16_i32 = arith.constant 16 : i32
    %92 = vector.broadcast %c16_i32 : i32 to vector<288x8xi32>
    %93 = arith.cmpi slt, %91, %92 : vector<288x8xi32>
    %cst_74 = arith.constant -3.40282347E+38 : f32
    %94 = vector.broadcast %cst_74 : f32 to vector<288x8xf32>
    %95 = arith.select %93, %74, %94 : vector<288x8xi1>, vector<288x8xf32>
    %c19_75 = arith.constant 19 : index
    %c0_76 = arith.constant 0 : index
    %96 = vector.load %arg17[%c19_75, %c0_76] : memref<332x8xf32, #tpu.memory_space<vmem>>, vector<288x8xf32>
    tpu.vector_store %arg17[%c19_75, %c0_76], %95 {strides = array<i32>} : memref<332x8xf32, #tpu.memory_space<vmem>>, vector<288x8xf32>,
    %c0_77 = arith.constant 0 : index
    %c0_78 = arith.constant 0 : index
    %97 = vector.load %arg17[%c0_77, %c0_78] : memref<332x8xf32, #tpu.memory_space<vmem>>, vector<288x8xf32>
    %c1_79 = arith.constant 1 : index
    %c0_80 = arith.constant 0 : index
    %98 = vector.load %arg17[%c1_79, %c0_80] : memref<332x8xf32, #tpu.memory_space<vmem>>, vector<288x8xf32>
    %99 = arith.maximumf %97, %98 : vector<288x8xf32>
    %c2_81 = arith.constant 2 : index
    %c0_82 = arith.constant 0 : index
    %100 = vector.load %arg17[%c2_81, %c0_82] : memref<332x8xf32, #tpu.memory_space<vmem>>, vector<288x8xf32>
    %101 = arith.maximumf %99, %100 : vector<288x8xf32>
    %c18_83 = arith.constant 18 : index
    %c0_84 = arith.constant 0 : index
    %102 = vector.load %arg17[%c18_83, %c0_84] : memref<332x8xf32, #tpu.memory_space<vmem>>, vector<288x8xf32>
    %103 = arith.maximumf %101, %102 : vector<288x8xf32>
    %c19_85 = arith.constant 19 : index
    %c0_86 = arith.constant 0 : index
    %104 = vector.load %arg17[%c19_85, %c0_86] : memref<332x8xf32, #tpu.memory_space<vmem>>, vector<288x8xf32>
    %105 = arith.maximumf %103, %104 : vector<288x8xf32>
    %c20_87 = arith.constant 20 : index
    %c0_88 = arith.constant 0 : index
    %106 = vector.load %arg17[%c20_87, %c0_88] : memref<332x8xf32, #tpu.memory_space<vmem>>, vector<288x8xf32>
    %107 = arith.maximumf %105, %106 : vector<288x8xf32>
    %c36_89 = arith.constant 36 : index
    %c0_90 = arith.constant 0 : index
    %108 = vector.load %arg17[%c36_89, %c0_90] : memref<332x8xf32, #tpu.memory_space<vmem>>, vector<288x8xf32>
    %109 = arith.maximumf %107, %108 : vector<288x8xf32>
    %c37_91 = arith.constant 37 : index
    %c0_92 = arith.constant 0 : index
    %110 = vector.load %arg17[%c37_91, %c0_92] : memref<332x8xf32, #tpu.memory_space<vmem>>, vector<288x8xf32>
    %111 = arith.maximumf %109, %110 : vector<288x8xf32>
    %c38_93 = arith.constant 38 : index
    %c0_94 = arith.constant 0 : index
    %112 = vector.load %arg17[%c38_93, %c0_94] : memref<332x8xf32, #tpu.memory_space<vmem>>, vector<288x8xf32>
    %113 = arith.maximumf %111, %112 : vector<288x8xf32>
    %c0_95 = arith.constant 0 : index
    %c0_96 = arith.constant 0 : index
    %114 = vector.load %arg18[%c0_95, %c0_96] : memref<288x8xf32, #tpu.memory_space<vmem>>, vector<288x8xf32>
    tpu.vector_store %arg18[%c0_95, %c0_96], %113 {strides = array<i32>} : memref<288x8xf32, #tpu.memory_space<vmem>>, vector<288x8xf32>,
    %c0_97 = arith.constant 0 : index
    %c0_98 = arith.constant 0 : index
    %115 = vector.load %arg18[%c0_97, %c0_98] : memref<288x8xf32, #tpu.memory_space<vmem>>, vector<1x8xf32>
    %c11 = arith.constant 11 : index
    %c0_99 = arith.constant 0 : index
    %116 = vector.load %arg19[%c11, %c0_99] : memref<108x8xf32, #tpu.memory_space<vmem>>, vector<1x8xf32>
    tpu.vector_store %arg19[%c11, %c0_99], %115 {strides = array<i32>} : memref<108x8xf32, #tpu.memory_space<vmem>>, vector<1x8xf32>,
    %c2_100 = arith.constant 2 : index
    %c0_101 = arith.constant 0 : index
    %117 = vector.load %arg18[%c2_100, %c0_101] : memref<288x8xf32, #tpu.memory_space<vmem>>, vector<1x8xf32>
    %c12 = arith.constant 12 : index
    %c0_102 = arith.constant 0 : index
    %118 = vector.load %arg19[%c12, %c0_102] : memref<108x8xf32, #tpu.memory_space<vmem>>, vector<1x8xf32>
    tpu.vector_store %arg19[%c12, %c0_102], %117 {strides = array<i32>} : memref<108x8xf32, #tpu.memory_space<vmem>>, vector<1x8xf32>,
    %c4_103 = arith.constant 4 : index
    %c0_104 = arith.constant 0 : index
    %119 = vector.load %arg18[%c4_103, %c0_104] : memref<288x8xf32, #tpu.memory_space<vmem>>, vector<1x8xf32>
    %c13 = arith.constant 13 : index
    %c0_105 = arith.constant 0 : index
    %120 = vector.load %arg19[%c13, %c0_105] : memref<108x8xf32, #tpu.memory_space<vmem>>, vector<1x8xf32>
    tpu.vector_store %arg19[%c13, %c0_105], %119 {strides = array<i32>} : memref<108x8xf32, #tpu.memory_space<vmem>>, vector<1x8xf32>,
    %c6_106 = arith.constant 6 : index
    %c0_107 = arith.constant 0 : index
    %121 = vector.load %arg18[%c6_106, %c0_107] : memref<288x8xf32, #tpu.memory_space<vmem>>, vector<1x8xf32>
    %c14 = arith.constant 14 : index
    %c0_108 = arith.constant 0 : index
    %122 = vector.load %arg19[%c14, %c0_108] : memref<108x8xf32, #tpu.memory_space<vmem>>, vector<1x8xf32>
    tpu.vector_store %arg19[%c14, %c0_108], %121 {strides = array<i32>} : memref<108x8xf32, #tpu.memory_space<vmem>>, vector<1x8xf32>,
    %c8_109 = arith.constant 8 : index
    %c0_110 = arith.constant 0 : index
    %123 = vector.load %arg18[%c8_109, %c0_110] : memref<288x8xf32, #tpu.memory_space<vmem>>, vector<1x8xf32>
    %c15 = arith.constant 15 : index
    %c0_111 = arith.constant 0 : index
    %124 = vector.load %arg19[%c15, %c0_111] : memref<108x8xf32, #tpu.memory_space<vmem>>, vector<1x8xf32>
    tpu.vector_store %arg19[%c15, %c0_111], %123 {strides = array<i32>} : memref<108x8xf32, #tpu.memory_space<vmem>>, vector<1x8xf32>,
    %c10 = arith.constant 10 : index
    %c0_112 = arith.constant 0 : index
    %125 = vector.load %arg18[%c10, %c0_112] : memref<288x8xf32, #tpu.memory_space<vmem>>, vector<1x8xf32>
    %c16 = arith.constant 16 : index
    %c0_113 = arith.constant 0 : index
    %126 = vector.load %arg19[%c16, %c0_113] : memref<108x8xf32, #tpu.memory_space<vmem>>, vector<1x8xf32>
    tpu.vector_store %arg19[%c16, %c0_113], %125 {strides = array<i32>} : memref<108x8xf32, #tpu.memory_space<vmem>>, vector<1x8xf32>,
    %c12_114 = arith.constant 12 : index
    %c0_115 = arith.constant 0 : index
    %127 = vector.load %arg18[%c12_114, %c0_115] : memref<288x8xf32, #tpu.memory_space<vmem>>, vector<1x8xf32>
    %c17 = arith.constant 17 : index
    %c0_116 = arith.constant 0 : index
    %128 = vector.load %arg19[%c17, %c0_116] : memref<108x8xf32, #tpu.memory_space<vmem>>, vector<1x8xf32>
    tpu.vector_store %arg19[%c17, %c0_116], %127 {strides = array<i32>} : memref<108x8xf32, #tpu.memory_space<vmem>>, vector<1x8xf32>,
    %c14_117 = arith.constant 14 : index
    %c0_118 = arith.constant 0 : index
    %129 = vector.load %arg18[%c14_117, %c0_118] : memref<288x8xf32, #tpu.memory_space<vmem>>, vector<1x8xf32>
    %c18_119 = arith.constant 18 : index
    %c0_120 = arith.constant 0 : index
    %130 = vector.load %arg19[%c18_119, %c0_120] : memref<108x8xf32, #tpu.memory_space<vmem>>, vector<1x8xf32>
    tpu.vector_store %arg19[%c18_119, %c0_120], %129 {strides = array<i32>} : memref<108x8xf32, #tpu.memory_space<vmem>>, vector<1x8xf32>,
    %c36_121 = arith.constant 36 : index
    %c0_122 = arith.constant 0 : index
    %131 = vector.load %arg18[%c36_121, %c0_122] : memref<288x8xf32, #tpu.memory_space<vmem>>, vector<1x8xf32>
    %c21 = arith.constant 21 : index
    %c0_123 = arith.constant 0 : index
    %132 = vector.load %arg19[%c21, %c0_123] : memref<108x8xf32, #tpu.memory_space<vmem>>, vector<1x8xf32>
    tpu.vector_store %arg19[%c21, %c0_123], %131 {strides = array<i32>} : memref<108x8xf32, #tpu.memory_space<vmem>>, vector<1x8xf32>,
    %c38_124 = arith.constant 38 : index
    %c0_125 = arith.constant 0 : index
    %133 = vector.load %arg18[%c38_124, %c0_125] : memref<288x8xf32, #tpu.memory_space<vmem>>, vector<1x8xf32>
    %c22 = arith.constant 22 : index
    %c0_126 = arith.constant 0 : index
    %134 = vector.load %arg19[%c22, %c0_126] : memref<108x8xf32, #tpu.memory_space<vmem>>, vector<1x8xf32>
    tpu.vector_store %arg19[%c22, %c0_126], %133 {strides = array<i32>} : memref<108x8xf32, #tpu.memory_space<vmem>>, vector<1x8xf32>,
    %c40 = arith.constant 40 : index
    %c0_127 = arith.constant 0 : index
    %135 = vector.load %arg18[%c40, %c0_127] : memref<288x8xf32, #tpu.memory_space<vmem>>, vector<1x8xf32>
    %c23 = arith.constant 23 : index
    %c0_128 = arith.constant 0 : index
    %136 = vector.load %arg19[%c23, %c0_128] : memref<108x8xf32, #tpu.memory_space<vmem>>, vector<1x8xf32>
    tpu.vector_store %arg19[%c23, %c0_128], %135 {strides = array<i32>} : memref<108x8xf32, #tpu.memory_space<vmem>>, vector<1x8xf32>,
    %c42 = arith.constant 42 : index
    %c0_129 = arith.constant 0 : index
    %137 = vector.load %arg18[%c42, %c0_129] : memref<288x8xf32, #tpu.memory_space<vmem>>, vector<1x8xf32>
    %c24 = arith.constant 24 : index
    %c0_130 = arith.constant 0 : index
    %138 = vector.load %arg19[%c24, %c0_130] : memref<108x8xf32, #tpu.memory_space<vmem>>, vector<1x8xf32>
    tpu.vector_store %arg19[%c24, %c0_130], %137 {strides = array<i32>} : memref<108x8xf32, #tpu.memory_space<vmem>>, vector<1x8xf32>,
    %c44 = arith.constant 44 : index
    %c0_131 = arith.constant 0 : index
    %139 = vector.load %arg18[%c44, %c0_131] : memref<288x8xf32, #tpu.memory_space<vmem>>, vector<1x8xf32>
    %c25 = arith.constant 25 : index
    %c0_132 = arith.constant 0 : index
    %140 = vector.load %arg19[%c25, %c0_132] : memref<108x8xf32, #tpu.memory_space<vmem>>, vector<1x8xf32>
    tpu.vector_store %arg19[%c25, %c0_132], %139 {strides = array<i32>} : memref<108x8xf32, #tpu.memory_space<vmem>>, vector<1x8xf32>,
    %c46 = arith.constant 46 : index
    %c0_133 = arith.constant 0 : index
    %141 = vector.load %arg18[%c46, %c0_133] : memref<288x8xf32, #tpu.memory_space<vmem>>, vector<1x8xf32>
    %c26 = arith.constant 26 : index
    %c0_134 = arith.constant 0 : index
    %142 = vector.load %arg19[%c26, %c0_134] : memref<108x8xf32, #tpu.memory_space<vmem>>, vector<1x8xf32>
    tpu.vector_store %arg19[%c26, %c0_134], %141 {strides = array<i32>} : memref<108x8xf32, #tpu.memory_space<vmem>>, vector<1x8xf32>,
    %c48 = arith.constant 48 : index
    %c0_135 = arith.constant 0 : index
    %143 = vector.load %arg18[%c48, %c0_135] : memref<288x8xf32, #tpu.memory_space<vmem>>, vector<1x8xf32>
    %c27 = arith.constant 27 : index
    %c0_136 = arith.constant 0 : index
    %144 = vector.load %arg19[%c27, %c0_136] : memref<108x8xf32, #tpu.memory_space<vmem>>, vector<1x8xf32>
    tpu.vector_store %arg19[%c27, %c0_136], %143 {strides = array<i32>} : memref<108x8xf32, #tpu.memory_space<vmem>>, vector<1x8xf32>,
    %c50 = arith.constant 50 : index
    %c0_137 = arith.constant 0 : index
    %145 = vector.load %arg18[%c50, %c0_137] : memref<288x8xf32, #tpu.memory_space<vmem>>, vector<1x8xf32>
    %c28 = arith.constant 28 : index
    %c0_138 = arith.constant 0 : index
    %146 = vector.load %arg19[%c28, %c0_138] : memref<108x8xf32, #tpu.memory_space<vmem>>, vector<1x8xf32>
    tpu.vector_store %arg19[%c28, %c0_138], %145 {strides = array<i32>} : memref<108x8xf32, #tpu.memory_space<vmem>>, vector<1x8xf32>,
    %c72 = arith.constant 72 : index
    %c0_139 = arith.constant 0 : index
    %147 = vector.load %arg18[%c72, %c0_139] : memref<288x8xf32, #tpu.memory_space<vmem>>, vector<1x8xf32>
    %c31 = arith.constant 31 : index
    %c0_140 = arith.constant 0 : index
    %148 = vector.load %arg19[%c31, %c0_140] : memref<108x8xf32, #tpu.memory_space<vmem>>, vector<1x8xf32>
    tpu.vector_store %arg19[%c31, %c0_140], %147 {strides = array<i32>} : memref<108x8xf32, #tpu.memory_space<vmem>>, vector<1x8xf32>,
    %c74 = arith.constant 74 : index
    %c0_141 = arith.constant 0 : index
    %149 = vector.load %arg18[%c74, %c0_141] : memref<288x8xf32, #tpu.memory_space<vmem>>, vector<1x8xf32>
    %c32 = arith.constant 32 : index
    %c0_142 = arith.constant 0 : index
    %150 = vector.load %arg19[%c32, %c0_142] : memref<108x8xf32, #tpu.memory_space<vmem>>, vector<1x8xf32>
    tpu.vector_store %arg19[%c32, %c0_142], %149 {strides = array<i32>} : memref<108x8xf32, #tpu.memory_space<vmem>>, vector<1x8xf32>,
    %c76 = arith.constant 76 : index
    %c0_143 = arith.constant 0 : index
    %151 = vector.load %arg18[%c76, %c0_143] : memref<288x8xf32, #tpu.memory_space<vmem>>, vector<1x8xf32>
    %c33 = arith.constant 33 : index
    %c0_144 = arith.constant 0 : index
    %152 = vector.load %arg19[%c33, %c0_144] : memref<108x8xf32, #tpu.memory_space<vmem>>, vector<1x8xf32>
    tpu.vector_store %arg19[%c33, %c0_144], %151 {strides = array<i32>} : memref<108x8xf32, #tpu.memory_space<vmem>>, vector<1x8xf32>,
    %c78 = arith.constant 78 : index
    %c0_145 = arith.constant 0 : index
    %153 = vector.load %arg18[%c78, %c0_145] : memref<288x8xf32, #tpu.memory_space<vmem>>, vector<1x8xf32>
    %c34 = arith.constant 34 : index
    %c0_146 = arith.constant 0 : index
    %154 = vector.load %arg19[%c34, %c0_146] : memref<108x8xf32, #tpu.memory_space<vmem>>, vector<1x8xf32>
    tpu.vector_store %arg19[%c34, %c0_146], %153 {strides = array<i32>} : memref<108x8xf32, #tpu.memory_space<vmem>>, vector<1x8xf32>,
    %c80 = arith.constant 80 : index
    %c0_147 = arith.constant 0 : index
    %155 = vector.load %arg18[%c80, %c0_147] : memref<288x8xf32, #tpu.memory_space<vmem>>, vector<1x8xf32>
    %c35 = arith.constant 35 : index
    %c0_148 = arith.constant 0 : index
    %156 = vector.load %arg19[%c35, %c0_148] : memref<108x8xf32, #tpu.memory_space<vmem>>, vector<1x8xf32>
    tpu.vector_store %arg19[%c35, %c0_148], %155 {strides = array<i32>} : memref<108x8xf32, #tpu.memory_space<vmem>>, vector<1x8xf32>,
    %c82 = arith.constant 82 : index
    %c0_149 = arith.constant 0 : index
    %157 = vector.load %arg18[%c82, %c0_149] : memref<288x8xf32, #tpu.memory_space<vmem>>, vector<1x8xf32>
    %c36_150 = arith.constant 36 : index
    %c0_151 = arith.constant 0 : index
    %158 = vector.load %arg19[%c36_150, %c0_151] : memref<108x8xf32, #tpu.memory_space<vmem>>, vector<1x8xf32>
    tpu.vector_store %arg19[%c36_150, %c0_151], %157 {strides = array<i32>} : memref<108x8xf32, #tpu.memory_space<vmem>>, vector<1x8xf32>,
    %c84 = arith.constant 84 : index
    %c0_152 = arith.constant 0 : index
    %159 = vector.load %arg18[%c84, %c0_152] : memref<288x8xf32, #tpu.memory_space<vmem>>, vector<1x8xf32>
    %c37_153 = arith.constant 37 : index
    %c0_154 = arith.constant 0 : index
    %160 = vector.load %arg19[%c37_153, %c0_154] : memref<108x8xf32, #tpu.memory_space<vmem>>, vector<1x8xf32>
    tpu.vector_store %arg19[%c37_153, %c0_154], %159 {strides = array<i32>} : memref<108x8xf32, #tpu.memory_space<vmem>>, vector<1x8xf32>,
    %c86 = arith.constant 86 : index
    %c0_155 = arith.constant 0 : index
    %161 = vector.load %arg18[%c86, %c0_155] : memref<288x8xf32, #tpu.memory_space<vmem>>, vector<1x8xf32>
    %c38_156 = arith.constant 38 : index
    %c0_157 = arith.constant 0 : index
    %162 = vector.load %arg19[%c38_156, %c0_157] : memref<108x8xf32, #tpu.memory_space<vmem>>, vector<1x8xf32>
    tpu.vector_store %arg19[%c38_156, %c0_157], %161 {strides = array<i32>} : memref<108x8xf32, #tpu.memory_space<vmem>>, vector<1x8xf32>,
    %c108 = arith.constant 108 : index
    %c0_158 = arith.constant 0 : index
    %163 = vector.load %arg18[%c108, %c0_158] : memref<288x8xf32, #tpu.memory_space<vmem>>, vector<1x8xf32>
    %c41 = arith.constant 41 : index
    %c0_159 = arith.constant 0 : index
    %164 = vector.load %arg19[%c41, %c0_159] : memref<108x8xf32, #tpu.memory_space<vmem>>, vector<1x8xf32>
    tpu.vector_store %arg19[%c41, %c0_159], %163 {strides = array<i32>} : memref<108x8xf32, #tpu.memory_space<vmem>>, vector<1x8xf32>,
    %c110 = arith.constant 110 : index
    %c0_160 = arith.constant 0 : index
    %165 = vector.load %arg18[%c110, %c0_160] : memref<288x8xf32, #tpu.memory_space<vmem>>, vector<1x8xf32>
    %c42_161 = arith.constant 42 : index
    %c0_162 = arith.constant 0 : index
    %166 = vector.load %arg19[%c42_161, %c0_162] : memref<108x8xf32, #tpu.memory_space<vmem>>, vector<1x8xf32>
    tpu.vector_store %arg19[%c42_161, %c0_162], %165 {strides = array<i32>} : memref<108x8xf32, #tpu.memory_space<vmem>>, vector<1x8xf32>,
    %c112 = arith.constant 112 : index
    %c0_163 = arith.constant 0 : index
    %167 = vector.load %arg18[%c112, %c0_163] : memref<288x8xf32, #tpu.memory_space<vmem>>, vector<1x8xf32>
    %c43 = arith.constant 43 : index
    %c0_164 = arith.constant 0 : index
    %168 = vector.load %arg19[%c43, %c0_164] : memref<108x8xf32, #tpu.memory_space<vmem>>, vector<1x8xf32>
    tpu.vector_store %arg19[%c43, %c0_164], %167 {strides = array<i32>} : memref<108x8xf32, #tpu.memory_space<vmem>>, vector<1x8xf32>,
    %c114 = arith.constant 114 : index
    %c0_165 = arith.constant 0 : index
    %169 = vector.load %arg18[%c114, %c0_165] : memref<288x8xf32, #tpu.memory_space<vmem>>, vector<1x8xf32>
    %c44_166 = arith.constant 44 : index
    %c0_167 = arith.constant 0 : index
    %170 = vector.load %arg19[%c44_166, %c0_167] : memref<108x8xf32, #tpu.memory_space<vmem>>, vector<1x8xf32>
    tpu.vector_store %arg19[%c44_166, %c0_167], %169 {strides = array<i32>} : memref<108x8xf32, #tpu.memory_space<vmem>>, vector<1x8xf32>,
    %c116 = arith.constant 116 : index
    %c0_168 = arith.constant 0 : index
    %171 = vector.load %arg18[%c116, %c0_168] : memref<288x8xf32, #tpu.memory_space<vmem>>, vector<1x8xf32>
    %c45 = arith.constant 45 : index
    %c0_169 = arith.constant 0 : index
    %172 = vector.load %arg19[%c45, %c0_169] : memref<108x8xf32, #tpu.memory_space<vmem>>, vector<1x8xf32>
    tpu.vector_store %arg19[%c45, %c0_169], %171 {strides = array<i32>} : memref<108x8xf32, #tpu.memory_space<vmem>>, vector<1x8xf32>,
    %c118 = arith.constant 118 : index
    %c0_170 = arith.constant 0 : index
    %173 = vector.load %arg18[%c118, %c0_170] : memref<288x8xf32, #tpu.memory_space<vmem>>, vector<1x8xf32>
    %c46_171 = arith.constant 46 : index
    %c0_172 = arith.constant 0 : index
    %174 = vector.load %arg19[%c46_171, %c0_172] : memref<108x8xf32, #tpu.memory_space<vmem>>, vector<1x8xf32>
    tpu.vector_store %arg19[%c46_171, %c0_172], %173 {strides = array<i32>} : memref<108x8xf32, #tpu.memory_space<vmem>>, vector<1x8xf32>,
    %c120 = arith.constant 120 : index
    %c0_173 = arith.constant 0 : index
    %175 = vector.load %arg18[%c120, %c0_173] : memref<288x8xf32, #tpu.memory_space<vmem>>, vector<1x8xf32>
    %c47 = arith.constant 47 : index
    %c0_174 = arith.constant 0 : index
    %176 = vector.load %arg19[%c47, %c0_174] : memref<108x8xf32, #tpu.memory_space<vmem>>, vector<1x8xf32>
    tpu.vector_store %arg19[%c47, %c0_174], %175 {strides = array<i32>} : memref<108x8xf32, #tpu.memory_space<vmem>>, vector<1x8xf32>,
    %c122 = arith.constant 122 : index
    %c0_175 = arith.constant 0 : index
    %177 = vector.load %arg18[%c122, %c0_175] : memref<288x8xf32, #tpu.memory_space<vmem>>, vector<1x8xf32>
    %c48_176 = arith.constant 48 : index
    %c0_177 = arith.constant 0 : index
    %178 = vector.load %arg19[%c48_176, %c0_177] : memref<108x8xf32, #tpu.memory_space<vmem>>, vector<1x8xf32>
    tpu.vector_store %arg19[%c48_176, %c0_177], %177 {strides = array<i32>} : memref<108x8xf32, #tpu.memory_space<vmem>>, vector<1x8xf32>,
    %c144 = arith.constant 144 : index
    %c0_178 = arith.constant 0 : index
    %179 = vector.load %arg18[%c144, %c0_178] : memref<288x8xf32, #tpu.memory_space<vmem>>, vector<1x8xf32>
    %c51 = arith.constant 51 : index
    %c0_179 = arith.constant 0 : index
    %180 = vector.load %arg19[%c51, %c0_179] : memref<108x8xf32, #tpu.memory_space<vmem>>, vector<1x8xf32>
    tpu.vector_store %arg19[%c51, %c0_179], %179 {strides = array<i32>} : memref<108x8xf32, #tpu.memory_space<vmem>>, vector<1x8xf32>,
    %c146 = arith.constant 146 : index
    %c0_180 = arith.constant 0 : index
    %181 = vector.load %arg18[%c146, %c0_180] : memref<288x8xf32, #tpu.memory_space<vmem>>, vector<1x8xf32>
    %c52 = arith.constant 52 : index
    %c0_181 = arith.constant 0 : index
    %182 = vector.load %arg19[%c52, %c0_181] : memref<108x8xf32, #tpu.memory_space<vmem>>, vector<1x8xf32>
    tpu.vector_store %arg19[%c52, %c0_181], %181 {strides = array<i32>} : memref<108x8xf32, #tpu.memory_space<vmem>>, vector<1x8xf32>,
    %c148 = arith.constant 148 : index
    %c0_182 = arith.constant 0 : index
    %183 = vector.load %arg18[%c148, %c0_182] : memref<288x8xf32, #tpu.memory_space<vmem>>, vector<1x8xf32>
    %c53 = arith.constant 53 : index
    %c0_183 = arith.constant 0 : index
    %184 = vector.load %arg19[%c53, %c0_183] : memref<108x8xf32, #tpu.memory_space<vmem>>, vector<1x8xf32>
    tpu.vector_store %arg19[%c53, %c0_183], %183 {strides = array<i32>} : memref<108x8xf32, #tpu.memory_space<vmem>>, vector<1x8xf32>,
    %c150 = arith.constant 150 : index
    %c0_184 = arith.constant 0 : index
    %185 = vector.load %arg18[%c150, %c0_184] : memref<288x8xf32, #tpu.memory_space<vmem>>, vector<1x8xf32>
    %c54 = arith.constant 54 : index
    %c0_185 = arith.constant 0 : index
    %186 = vector.load %arg19[%c54, %c0_185] : memref<108x8xf32, #tpu.memory_space<vmem>>, vector<1x8xf32>
    tpu.vector_store %arg19[%c54, %c0_185], %185 {strides = array<i32>} : memref<108x8xf32, #tpu.memory_space<vmem>>, vector<1x8xf32>,
    %c152 = arith.constant 152 : index
    %c0_186 = arith.constant 0 : index
    %187 = vector.load %arg18[%c152, %c0_186] : memref<288x8xf32, #tpu.memory_space<vmem>>, vector<1x8xf32>
    %c55 = arith.constant 55 : index
    %c0_187 = arith.constant 0 : index
    %188 = vector.load %arg19[%c55, %c0_187] : memref<108x8xf32, #tpu.memory_space<vmem>>, vector<1x8xf32>
    tpu.vector_store %arg19[%c55, %c0_187], %187 {strides = array<i32>} : memref<108x8xf32, #tpu.memory_space<vmem>>, vector<1x8xf32>,
    %c154 = arith.constant 154 : index
    %c0_188 = arith.constant 0 : index
    %189 = vector.load %arg18[%c154, %c0_188] : memref<288x8xf32, #tpu.memory_space<vmem>>, vector<1x8xf32>
    %c56 = arith.constant 56 : index
    %c0_189 = arith.constant 0 : index
    %190 = vector.load %arg19[%c56, %c0_189] : memref<108x8xf32, #tpu.memory_space<vmem>>, vector<1x8xf32>
    tpu.vector_store %arg19[%c56, %c0_189], %189 {strides = array<i32>} : memref<108x8xf32, #tpu.memory_space<vmem>>, vector<1x8xf32>,
    %c156 = arith.constant 156 : index
    %c0_190 = arith.constant 0 : index
    %191 = vector.load %arg18[%c156, %c0_190] : memref<288x8xf32, #tpu.memory_space<vmem>>, vector<1x8xf32>
    %c57 = arith.constant 57 : index
    %c0_191 = arith.constant 0 : index
    %192 = vector.load %arg19[%c57, %c0_191] : memref<108x8xf32, #tpu.memory_space<vmem>>, vector<1x8xf32>
    tpu.vector_store %arg19[%c57, %c0_191], %191 {strides = array<i32>} : memref<108x8xf32, #tpu.memory_space<vmem>>, vector<1x8xf32>,
    %c158 = arith.constant 158 : index
    %c0_192 = arith.constant 0 : index
    %193 = vector.load %arg18[%c158, %c0_192] : memref<288x8xf32, #tpu.memory_space<vmem>>, vector<1x8xf32>
    %c58 = arith.constant 58 : index
    %c0_193 = arith.constant 0 : index
    %194 = vector.load %arg19[%c58, %c0_193] : memref<108x8xf32, #tpu.memory_space<vmem>>, vector<1x8xf32>
    tpu.vector_store %arg19[%c58, %c0_193], %193 {strides = array<i32>} : memref<108x8xf32, #tpu.memory_space<vmem>>, vector<1x8xf32>,
    %c180 = arith.constant 180 : index
    %c0_194 = arith.constant 0 : index
    %195 = vector.load %arg18[%c180, %c0_194] : memref<288x8xf32, #tpu.memory_space<vmem>>, vector<1x8xf32>
    %c61 = arith.constant 61 : index
    %c0_195 = arith.constant 0 : index
    %196 = vector.load %arg19[%c61, %c0_195] : memref<108x8xf32, #tpu.memory_space<vmem>>, vector<1x8xf32>
    tpu.vector_store %arg19[%c61, %c0_195], %195 {strides = array<i32>} : memref<108x8xf32, #tpu.memory_space<vmem>>, vector<1x8xf32>,
    %c182 = arith.constant 182 : index
    %c0_196 = arith.constant 0 : index
    %197 = vector.load %arg18[%c182, %c0_196] : memref<288x8xf32, #tpu.memory_space<vmem>>, vector<1x8xf32>
    %c62 = arith.constant 62 : index
    %c0_197 = arith.constant 0 : index
    %198 = vector.load %arg19[%c62, %c0_197] : memref<108x8xf32, #tpu.memory_space<vmem>>, vector<1x8xf32>
    tpu.vector_store %arg19[%c62, %c0_197], %197 {strides = array<i32>} : memref<108x8xf32, #tpu.memory_space<vmem>>, vector<1x8xf32>,
    %c184 = arith.constant 184 : index
    %c0_198 = arith.constant 0 : index
    %199 = vector.load %arg18[%c184, %c0_198] : memref<288x8xf32, #tpu.memory_space<vmem>>, vector<1x8xf32>
    %c63 = arith.constant 63 : index
    %c0_199 = arith.constant 0 : index
    %200 = vector.load %arg19[%c63, %c0_199] : memref<108x8xf32, #tpu.memory_space<vmem>>, vector<1x8xf32>
    tpu.vector_store %arg19[%c63, %c0_199], %199 {strides = array<i32>} : memref<108x8xf32, #tpu.memory_space<vmem>>, vector<1x8xf32>,
    %c186 = arith.constant 186 : index
    %c0_200 = arith.constant 0 : index
    %201 = vector.load %arg18[%c186, %c0_200] : memref<288x8xf32, #tpu.memory_space<vmem>>, vector<1x8xf32>
    %c64 = arith.constant 64 : index
    %c0_201 = arith.constant 0 : index
    %202 = vector.load %arg19[%c64, %c0_201] : memref<108x8xf32, #tpu.memory_space<vmem>>, vector<1x8xf32>
    tpu.vector_store %arg19[%c64, %c0_201], %201 {strides = array<i32>} : memref<108x8xf32, #tpu.memory_space<vmem>>, vector<1x8xf32>,
    %c188 = arith.constant 188 : index
    %c0_202 = arith.constant 0 : index
    %203 = vector.load %arg18[%c188, %c0_202] : memref<288x8xf32, #tpu.memory_space<vmem>>, vector<1x8xf32>
    %c65 = arith.constant 65 : index
    %c0_203 = arith.constant 0 : index
    %204 = vector.load %arg19[%c65, %c0_203] : memref<108x8xf32, #tpu.memory_space<vmem>>, vector<1x8xf32>
    tpu.vector_store %arg19[%c65, %c0_203], %203 {strides = array<i32>} : memref<108x8xf32, #tpu.memory_space<vmem>>, vector<1x8xf32>,
    %c190 = arith.constant 190 : index
    %c0_204 = arith.constant 0 : index
    %205 = vector.load %arg18[%c190, %c0_204] : memref<288x8xf32, #tpu.memory_space<vmem>>, vector<1x8xf32>
    %c66 = arith.constant 66 : index
    %c0_205 = arith.constant 0 : index
    %206 = vector.load %arg19[%c66, %c0_205] : memref<108x8xf32, #tpu.memory_space<vmem>>, vector<1x8xf32>
    tpu.vector_store %arg19[%c66, %c0_205], %205 {strides = array<i32>} : memref<108x8xf32, #tpu.memory_space<vmem>>, vector<1x8xf32>,
    %c192 = arith.constant 192 : index
    %c0_206 = arith.constant 0 : index
    %207 = vector.load %arg18[%c192, %c0_206] : memref<288x8xf32, #tpu.memory_space<vmem>>, vector<1x8xf32>
    %c67 = arith.constant 67 : index
    %c0_207 = arith.constant 0 : index
    %208 = vector.load %arg19[%c67, %c0_207] : memref<108x8xf32, #tpu.memory_space<vmem>>, vector<1x8xf32>
    tpu.vector_store %arg19[%c67, %c0_207], %207 {strides = array<i32>} : memref<108x8xf32, #tpu.memory_space<vmem>>, vector<1x8xf32>,
    %c194 = arith.constant 194 : index
    %c0_208 = arith.constant 0 : index
    %209 = vector.load %arg18[%c194, %c0_208] : memref<288x8xf32, #tpu.memory_space<vmem>>, vector<1x8xf32>
    %c68 = arith.constant 68 : index
    %c0_209 = arith.constant 0 : index
    %210 = vector.load %arg19[%c68, %c0_209] : memref<108x8xf32, #tpu.memory_space<vmem>>, vector<1x8xf32>
    tpu.vector_store %arg19[%c68, %c0_209], %209 {strides = array<i32>} : memref<108x8xf32, #tpu.memory_space<vmem>>, vector<1x8xf32>,
    %c216 = arith.constant 216 : index
    %c0_210 = arith.constant 0 : index
    %211 = vector.load %arg18[%c216, %c0_210] : memref<288x8xf32, #tpu.memory_space<vmem>>, vector<1x8xf32>
    %c71 = arith.constant 71 : index
    %c0_211 = arith.constant 0 : index
    %212 = vector.load %arg19[%c71, %c0_211] : memref<108x8xf32, #tpu.memory_space<vmem>>, vector<1x8xf32>
    tpu.vector_store %arg19[%c71, %c0_211], %211 {strides = array<i32>} : memref<108x8xf32, #tpu.memory_space<vmem>>, vector<1x8xf32>,
    %c218 = arith.constant 218 : index
    %c0_212 = arith.constant 0 : index
    %213 = vector.load %arg18[%c218, %c0_212] : memref<288x8xf32, #tpu.memory_space<vmem>>, vector<1x8xf32>
    %c72_213 = arith.constant 72 : index
    %c0_214 = arith.constant 0 : index
    %214 = vector.load %arg19[%c72_213, %c0_214] : memref<108x8xf32, #tpu.memory_space<vmem>>, vector<1x8xf32>
    tpu.vector_store %arg19[%c72_213, %c0_214], %213 {strides = array<i32>} : memref<108x8xf32, #tpu.memory_space<vmem>>, vector<1x8xf32>,
    %c220 = arith.constant 220 : index
    %c0_215 = arith.constant 0 : index
    %215 = vector.load %arg18[%c220, %c0_215] : memref<288x8xf32, #tpu.memory_space<vmem>>, vector<1x8xf32>
    %c73 = arith.constant 73 : index
    %c0_216 = arith.constant 0 : index
    %216 = vector.load %arg19[%c73, %c0_216] : memref<108x8xf32, #tpu.memory_space<vmem>>, vector<1x8xf32>
    tpu.vector_store %arg19[%c73, %c0_216], %215 {strides = array<i32>} : memref<108x8xf32, #tpu.memory_space<vmem>>, vector<1x8xf32>,
    %c222 = arith.constant 222 : index
    %c0_217 = arith.constant 0 : index
    %217 = vector.load %arg18[%c222, %c0_217] : memref<288x8xf32, #tpu.memory_space<vmem>>, vector<1x8xf32>
    %c74_218 = arith.constant 74 : index
    %c0_219 = arith.constant 0 : index
    %218 = vector.load %arg19[%c74_218, %c0_219] : memref<108x8xf32, #tpu.memory_space<vmem>>, vector<1x8xf32>
    tpu.vector_store %arg19[%c74_218, %c0_219], %217 {strides = array<i32>} : memref<108x8xf32, #tpu.memory_space<vmem>>, vector<1x8xf32>,
    %c224 = arith.constant 224 : index
    %c0_220 = arith.constant 0 : index
    %219 = vector.load %arg18[%c224, %c0_220] : memref<288x8xf32, #tpu.memory_space<vmem>>, vector<1x8xf32>
    %c75 = arith.constant 75 : index
    %c0_221 = arith.constant 0 : index
    %220 = vector.load %arg19[%c75, %c0_221] : memref<108x8xf32, #tpu.memory_space<vmem>>, vector<1x8xf32>
    tpu.vector_store %arg19[%c75, %c0_221], %219 {strides = array<i32>} : memref<108x8xf32, #tpu.memory_space<vmem>>, vector<1x8xf32>,
    %c226 = arith.constant 226 : index
    %c0_222 = arith.constant 0 : index
    %221 = vector.load %arg18[%c226, %c0_222] : memref<288x8xf32, #tpu.memory_space<vmem>>, vector<1x8xf32>
    %c76_223 = arith.constant 76 : index
    %c0_224 = arith.constant 0 : index
    %222 = vector.load %arg19[%c76_223, %c0_224] : memref<108x8xf32, #tpu.memory_space<vmem>>, vector<1x8xf32>
    tpu.vector_store %arg19[%c76_223, %c0_224], %221 {strides = array<i32>} : memref<108x8xf32, #tpu.memory_space<vmem>>, vector<1x8xf32>,
    %c228 = arith.constant 228 : index
    %c0_225 = arith.constant 0 : index
    %223 = vector.load %arg18[%c228, %c0_225] : memref<288x8xf32, #tpu.memory_space<vmem>>, vector<1x8xf32>
    %c77 = arith.constant 77 : index
    %c0_226 = arith.constant 0 : index
    %224 = vector.load %arg19[%c77, %c0_226] : memref<108x8xf32, #tpu.memory_space<vmem>>, vector<1x8xf32>
    tpu.vector_store %arg19[%c77, %c0_226], %223 {strides = array<i32>} : memref<108x8xf32, #tpu.memory_space<vmem>>, vector<1x8xf32>,
    %c230 = arith.constant 230 : index
    %c0_227 = arith.constant 0 : index
    %225 = vector.load %arg18[%c230, %c0_227] : memref<288x8xf32, #tpu.memory_space<vmem>>, vector<1x8xf32>
    %c78_228 = arith.constant 78 : index
    %c0_229 = arith.constant 0 : index
    %226 = vector.load %arg19[%c78_228, %c0_229] : memref<108x8xf32, #tpu.memory_space<vmem>>, vector<1x8xf32>
    tpu.vector_store %arg19[%c78_228, %c0_229], %225 {strides = array<i32>} : memref<108x8xf32, #tpu.memory_space<vmem>>, vector<1x8xf32>,
    %c252 = arith.constant 252 : index
    %c0_230 = arith.constant 0 : index
    %227 = vector.load %arg18[%c252, %c0_230] : memref<288x8xf32, #tpu.memory_space<vmem>>, vector<1x8xf32>
    %c81 = arith.constant 81 : index
    %c0_231 = arith.constant 0 : index
    %228 = vector.load %arg19[%c81, %c0_231] : memref<108x8xf32, #tpu.memory_space<vmem>>, vector<1x8xf32>
    tpu.vector_store %arg19[%c81, %c0_231], %227 {strides = array<i32>} : memref<108x8xf32, #tpu.memory_space<vmem>>, vector<1x8xf32>,
    %c254 = arith.constant 254 : index
    %c0_232 = arith.constant 0 : index
    %229 = vector.load %arg18[%c254, %c0_232] : memref<288x8xf32, #tpu.memory_space<vmem>>, vector<1x8xf32>
    %c82_233 = arith.constant 82 : index
    %c0_234 = arith.constant 0 : index
    %230 = vector.load %arg19[%c82_233, %c0_234] : memref<108x8xf32, #tpu.memory_space<vmem>>, vector<1x8xf32>
    tpu.vector_store %arg19[%c82_233, %c0_234], %229 {strides = array<i32>} : memref<108x8xf32, #tpu.memory_space<vmem>>, vector<1x8xf32>,
    %c256 = arith.constant 256 : index
    %c0_235 = arith.constant 0 : index
    %231 = vector.load %arg18[%c256, %c0_235] : memref<288x8xf32, #tpu.memory_space<vmem>>, vector<1x8xf32>
    %c83 = arith.constant 83 : index
    %c0_236 = arith.constant 0 : index
    %232 = vector.load %arg19[%c83, %c0_236] : memref<108x8xf32, #tpu.memory_space<vmem>>, vector<1x8xf32>
    tpu.vector_store %arg19[%c83, %c0_236], %231 {strides = array<i32>} : memref<108x8xf32, #tpu.memory_space<vmem>>, vector<1x8xf32>,
    %c258 = arith.constant 258 : index
    %c0_237 = arith.constant 0 : index
    %233 = vector.load %arg18[%c258, %c0_237] : memref<288x8xf32, #tpu.memory_space<vmem>>, vector<1x8xf32>
    %c84_238 = arith.constant 84 : index
    %c0_239 = arith.constant 0 : index
    %234 = vector.load %arg19[%c84_238, %c0_239] : memref<108x8xf32, #tpu.memory_space<vmem>>, vector<1x8xf32>
    tpu.vector_store %arg19[%c84_238, %c0_239], %233 {strides = array<i32>} : memref<108x8xf32, #tpu.memory_space<vmem>>, vector<1x8xf32>,
    %c260 = arith.constant 260 : index
    %c0_240 = arith.constant 0 : index
    %235 = vector.load %arg18[%c260, %c0_240] : memref<288x8xf32, #tpu.memory_space<vmem>>, vector<1x8xf32>
    %c85 = arith.constant 85 : index
    %c0_241 = arith.constant 0 : index
    %236 = vector.load %arg19[%c85, %c0_241] : memref<108x8xf32, #tpu.memory_space<vmem>>, vector<1x8xf32>
    tpu.vector_store %arg19[%c85, %c0_241], %235 {strides = array<i32>} : memref<108x8xf32, #tpu.memory_space<vmem>>, vector<1x8xf32>,
    %c262 = arith.constant 262 : index
    %c0_242 = arith.constant 0 : index
    %237 = vector.load %arg18[%c262, %c0_242] : memref<288x8xf32, #tpu.memory_space<vmem>>, vector<1x8xf32>
    %c86_243 = arith.constant 86 : index
    %c0_244 = arith.constant 0 : index
    %238 = vector.load %arg19[%c86_243, %c0_244] : memref<108x8xf32, #tpu.memory_space<vmem>>, vector<1x8xf32>
    tpu.vector_store %arg19[%c86_243, %c0_244], %237 {strides = array<i32>} : memref<108x8xf32, #tpu.memory_space<vmem>>, vector<1x8xf32>,
    %c264 = arith.constant 264 : index
    %c0_245 = arith.constant 0 : index
    %239 = vector.load %arg18[%c264, %c0_245] : memref<288x8xf32, #tpu.memory_space<vmem>>, vector<1x8xf32>
    %c87 = arith.constant 87 : index
    %c0_246 = arith.constant 0 : index
    %240 = vector.load %arg19[%c87, %c0_246] : memref<108x8xf32, #tpu.memory_space<vmem>>, vector<1x8xf32>
    tpu.vector_store %arg19[%c87, %c0_246], %239 {strides = array<i32>} : memref<108x8xf32, #tpu.memory_space<vmem>>, vector<1x8xf32>,
    %c266 = arith.constant 266 : index
    %c0_247 = arith.constant 0 : index
    %241 = vector.load %arg18[%c266, %c0_247] : memref<288x8xf32, #tpu.memory_space<vmem>>, vector<1x8xf32>
    %c88 = arith.constant 88 : index
    %c0_248 = arith.constant 0 : index
    %242 = vector.load %arg19[%c88, %c0_248] : memref<108x8xf32, #tpu.memory_space<vmem>>, vector<1x8xf32>
    tpu.vector_store %arg19[%c88, %c0_248], %241 {strides = array<i32>} : memref<108x8xf32, #tpu.memory_space<vmem>>, vector<1x8xf32>,
    %cst_249 = arith.constant 0.000000e+00 : f32
    %243 = vector.broadcast %cst_249 : f32 to vector<80x16xf32>
    %c0_250 = arith.constant 0 : index
    %c0_251 = arith.constant 0 : index
    %244 = vector.load %arg19[%c0_250, %c0_251] : memref<108x8xf32, #tpu.memory_space<vmem>>, vector<80x8xf32>
    %c0_252 = arith.constant 0 : index
    %c0_253 = arith.constant 0 : index
    %c0_254 = arith.constant 0 : index
    %245 = vector.load %arg5[%c0_252, %c0_253, %c0_254] : memref<9x8x16xf32, #tpu.memory_space<vmem>>, vector<1x8x16xf32>
    %246 = vector.shape_cast %245 : vector<1x8x16xf32> to vector<8x16xf32>
    %cst_255 = arith.constant dense<0.000000e+00> : vector<80x16xf32>
    %247 = tpu.matmul %244, %246, %cst_255 {dimension_numbers = #tpu.dot_dimension_numbers<[1], [0], [0], [1], [0, 0, 1, 1], [], []>} : vector<80x8xf32>, vector<8x16xf32>, vector<80x16xf32> -> vector<80x16xf32>
    %248 = arith.addf %243, %247 : vector<80x16xf32>
    %c1_256 = arith.constant 1 : index
    %c0_257 = arith.constant 0 : index
    %249 = vector.load %arg19[%c1_256, %c0_257] : memref<108x8xf32, #tpu.memory_space<vmem>>, vector<80x8xf32>
    %c1_258 = arith.constant 1 : index
    %c0_259 = arith.constant 0 : index
    %c0_260 = arith.constant 0 : index
    %250 = vector.load %arg5[%c1_258, %c0_259, %c0_260] : memref<9x8x16xf32, #tpu.memory_space<vmem>>, vector<1x8x16xf32>
    %251 = vector.shape_cast %250 : vector<1x8x16xf32> to vector<8x16xf32>
    %cst_261 = arith.constant dense<0.000000e+00> : vector<80x16xf32>
    %252 = tpu.matmul %249, %251, %cst_261 {dimension_numbers = #tpu.dot_dimension_numbers<[1], [0], [0], [1], [0, 0, 1, 1], [], []>} : vector<80x8xf32>, vector<8x16xf32>, vector<80x16xf32> -> vector<80x16xf32>
    %253 = arith.addf %248, %252 : vector<80x16xf32>
    %c2_262 = arith.constant 2 : index
    %c0_263 = arith.constant 0 : index
    %254 = vector.load %arg19[%c2_262, %c0_263] : memref<108x8xf32, #tpu.memory_space<vmem>>, vector<80x8xf32>
    %c2_264 = arith.constant 2 : index
    %c0_265 = arith.constant 0 : index
    %c0_266 = arith.constant 0 : index
    %255 = vector.load %arg5[%c2_264, %c0_265, %c0_266] : memref<9x8x16xf32, #tpu.memory_space<vmem>>, vector<1x8x16xf32>
    %256 = vector.shape_cast %255 : vector<1x8x16xf32> to vector<8x16xf32>
    %cst_267 = arith.constant dense<0.000000e+00> : vector<80x16xf32>
    %257 = tpu.matmul %254, %256, %cst_267 {dimension_numbers = #tpu.dot_dimension_numbers<[1], [0], [0], [1], [0, 0, 1, 1], [], []>} : vector<80x8xf32>, vector<8x16xf32>, vector<80x16xf32> -> vector<80x16xf32>
    %258 = arith.addf %253, %257 : vector<80x16xf32>
    %c10_268 = arith.constant 10 : index
    %c0_269 = arith.constant 0 : index
    %259 = vector.load %arg19[%c10_268, %c0_269] : memref<108x8xf32, #tpu.memory_space<vmem>>, vector<80x8xf32>
    %c3_270 = arith.constant 3 : index
    %c0_271 = arith.constant 0 : index
    %c0_272 = arith.constant 0 : index
    %260 = vector.load %arg5[%c3_270, %c0_271, %c0_272] : memref<9x8x16xf32, #tpu.memory_space<vmem>>, vector<1x8x16xf32>
    %261 = vector.shape_cast %260 : vector<1x8x16xf32> to vector<8x16xf32>
    %cst_273 = arith.constant dense<0.000000e+00> : vector<80x16xf32>
    %262 = tpu.matmul %259, %261, %cst_273 {dimension_numbers = #tpu.dot_dimension_numbers<[1], [0], [0], [1], [0, 0, 1, 1], [], []>} : vector<80x8xf32>, vector<8x16xf32>, vector<80x16xf32> -> vector<80x16xf32>
    %263 = arith.addf %258, %262 : vector<80x16xf32>
    %c11_274 = arith.constant 11 : index
    %c0_275 = arith.constant 0 : index
    %264 = vector.load %arg19[%c11_274, %c0_275] : memref<108x8xf32, #tpu.memory_space<vmem>>, vector<80x8xf32>
    %c4_276 = arith.constant 4 : index
    %c0_277 = arith.constant 0 : index
    %c0_278 = arith.constant 0 : index
    %265 = vector.load %arg5[%c4_276, %c0_277, %c0_278] : memref<9x8x16xf32, #tpu.memory_space<vmem>>, vector<1x8x16xf32>
    %266 = vector.shape_cast %265 : vector<1x8x16xf32> to vector<8x16xf32>
    %cst_279 = arith.constant dense<0.000000e+00> : vector<80x16xf32>
    %267 = tpu.matmul %264, %266, %cst_279 {dimension_numbers = #tpu.dot_dimension_numbers<[1], [0], [0], [1], [0, 0, 1, 1], [], []>} : vector<80x8xf32>, vector<8x16xf32>, vector<80x16xf32> -> vector<80x16xf32>
    %268 = arith.addf %263, %267 : vector<80x16xf32>
    %c12_280 = arith.constant 12 : index
    %c0_281 = arith.constant 0 : index
    %269 = vector.load %arg19[%c12_280, %c0_281] : memref<108x8xf32, #tpu.memory_space<vmem>>, vector<80x8xf32>
    %c5_282 = arith.constant 5 : index
    %c0_283 = arith.constant 0 : index
    %c0_284 = arith.constant 0 : index
    %270 = vector.load %arg5[%c5_282, %c0_283, %c0_284] : memref<9x8x16xf32, #tpu.memory_space<vmem>>, vector<1x8x16xf32>
    %271 = vector.shape_cast %270 : vector<1x8x16xf32> to vector<8x16xf32>
    %cst_285 = arith.constant dense<0.000000e+00> : vector<80x16xf32>
    %272 = tpu.matmul %269, %271, %cst_285 {dimension_numbers = #tpu.dot_dimension_numbers<[1], [0], [0], [1], [0, 0, 1, 1], [], []>} : vector<80x8xf32>, vector<8x16xf32>, vector<80x16xf32> -> vector<80x16xf32>
    %273 = arith.addf %268, %272 : vector<80x16xf32>
    %c20_286 = arith.constant 20 : index
    %c0_287 = arith.constant 0 : index
    %274 = vector.load %arg19[%c20_286, %c0_287] : memref<108x8xf32, #tpu.memory_space<vmem>>, vector<80x8xf32>
    %c6_288 = arith.constant 6 : index
    %c0_289 = arith.constant 0 : index
    %c0_290 = arith.constant 0 : index
    %275 = vector.load %arg5[%c6_288, %c0_289, %c0_290] : memref<9x8x16xf32, #tpu.memory_space<vmem>>, vector<1x8x16xf32>
    %276 = vector.shape_cast %275 : vector<1x8x16xf32> to vector<8x16xf32>
    %cst_291 = arith.constant dense<0.000000e+00> : vector<80x16xf32>
    %277 = tpu.matmul %274, %276, %cst_291 {dimension_numbers = #tpu.dot_dimension_numbers<[1], [0], [0], [1], [0, 0, 1, 1], [], []>} : vector<80x8xf32>, vector<8x16xf32>, vector<80x16xf32> -> vector<80x16xf32>
    %278 = arith.addf %273, %277 : vector<80x16xf32>
    %c21_292 = arith.constant 21 : index
    %c0_293 = arith.constant 0 : index
    %279 = vector.load %arg19[%c21_292, %c0_293] : memref<108x8xf32, #tpu.memory_space<vmem>>, vector<80x8xf32>
    %c7_294 = arith.constant 7 : index
    %c0_295 = arith.constant 0 : index
    %c0_296 = arith.constant 0 : index
    %280 = vector.load %arg5[%c7_294, %c0_295, %c0_296] : memref<9x8x16xf32, #tpu.memory_space<vmem>>, vector<1x8x16xf32>
    %281 = vector.shape_cast %280 : vector<1x8x16xf32> to vector<8x16xf32>
    %cst_297 = arith.constant dense<0.000000e+00> : vector<80x16xf32>
    %282 = tpu.matmul %279, %281, %cst_297 {dimension_numbers = #tpu.dot_dimension_numbers<[1], [0], [0], [1], [0, 0, 1, 1], [], []>} : vector<80x8xf32>, vector<8x16xf32>, vector<80x16xf32> -> vector<80x16xf32>
    %283 = arith.addf %278, %282 : vector<80x16xf32>
    %c22_298 = arith.constant 22 : index
    %c0_299 = arith.constant 0 : index
    %284 = vector.load %arg19[%c22_298, %c0_299] : memref<108x8xf32, #tpu.memory_space<vmem>>, vector<80x8xf32>
    %c8_300 = arith.constant 8 : index
    %c0_301 = arith.constant 0 : index
    %c0_302 = arith.constant 0 : index
    %285 = vector.load %arg5[%c8_300, %c0_301, %c0_302] : memref<9x8x16xf32, #tpu.memory_space<vmem>>, vector<1x8x16xf32>
    %286 = vector.shape_cast %285 : vector<1x8x16xf32> to vector<8x16xf32>
    %cst_303 = arith.constant dense<0.000000e+00> : vector<80x16xf32>
    %287 = tpu.matmul %284, %286, %cst_303 {dimension_numbers = #tpu.dot_dimension_numbers<[1], [0], [0], [1], [0, 0, 1, 1], [], []>} : vector<80x8xf32>, vector<8x16xf32>, vector<80x16xf32> -> vector<80x16xf32>
    %288 = arith.addf %283, %287 : vector<80x16xf32>
    %c0_304 = arith.constant 0 : index
    %c0_305 = arith.constant 0 : index
    %289 = vector.load %arg6[%c0_304, %c0_305] : memref<1x16xf32, #tpu.memory_space<vmem>>, vector<1x16xf32>
    %290 = vector.broadcast %289 : vector<1x16xf32> to vector<80x16xf32>
    %291 = arith.mulf %288, %290 : vector<80x16xf32>
    %c0_306 = arith.constant 0 : index
    %c0_307 = arith.constant 0 : index
    %292 = vector.load %arg7[%c0_306, %c0_307] : memref<1x16xf32, #tpu.memory_space<vmem>>, vector<1x16xf32>
    %293 = vector.broadcast %292 : vector<1x16xf32> to vector<80x16xf32>
    %294 = arith.addf %291, %293 : vector<80x16xf32>
    %cst_308 = arith.constant 0.000000e+00 : f32
    %295 = vector.broadcast %cst_308 : f32 to vector<80x16xf32>
    %296 = arith.maximumf %294, %295 : vector<80x16xf32>
    %297 = tpu.iota {dimensions = array<i32: 0>} : vector<80x16xi32>
    %c10_i32 = arith.constant 10 : i32
    %c0_i32_309 = arith.constant 0 : i32
    %298 = arith.cmpi eq, %c10_i32, %c0_i32_309 : i32
    %c1_i32_310 = arith.constant 1 : i32
    %299 = arith.select %298, %c1_i32_310, %c10_i32 : i32
    %300 = vector.broadcast %299 : i32 to vector<80x16xi32>
    %301 = arith.remsi %297, %300 : vector<80x16xi32>
    %c0_i32_311 = arith.constant 0 : i32
    %302 = vector.broadcast %c0_i32_311 : i32 to vector<80x16xi32>
    %303 = arith.cmpi ne, %301, %302 : vector<80x16xi32>
    %c0_i32_312 = arith.constant 0 : i32
    %304 = vector.broadcast %c0_i32_312 : i32 to vector<80x16xi32>
    %305 = arith.cmpi slt, %301, %304 : vector<80x16xi32>
    %c0_i32_313 = arith.constant 0 : i32
    %306 = arith.cmpi slt, %299, %c0_i32_313 : i32
    %307 = vector.broadcast %306 : i1 to vector<80x16xi1>
    %308 = vector.broadcast %307 : vector<80x16xi1> to vector<80x16xi1>
    %309 = arith.xori %305, %308 : vector<80x16xi1>
    %310 = arith.andi %309, %303 : vector<80x16xi1>
    %311 = vector.broadcast %299 : i32 to vector<80x16xi32>
    %312 = arith.addi %301, %311 : vector<80x16xi32>
    %313 = arith.select %310, %312, %301 : vector<80x16xi1>, vector<80x16xi32>
    %c8_i32 = arith.constant 8 : i32
    %314 = vector.broadcast %c8_i32 : i32 to vector<80x16xi32>
    %315 = arith.cmpi slt, %313, %314 : vector<80x16xi32>
    %cst_314 = arith.constant -3.40282347E+38 : f32
    %316 = vector.broadcast %cst_314 : f32 to vector<80x16xf32>
    %317 = arith.select %315, %296, %316 : vector<80x16xi1>, vector<80x16xf32>
    %c11_315 = arith.constant 11 : index
    %c0_316 = arith.constant 0 : index
    %318 = vector.load %arg20[%c11_315, %c0_316] : memref<108x16xf32, #tpu.memory_space<vmem>>, vector<80x16xf32>
    tpu.vector_store %arg20[%c11_315, %c0_316], %317 {strides = array<i32>} : memref<108x16xf32, #tpu.memory_space<vmem>>, vector<80x16xf32>,
    %c0_317 = arith.constant 0 : index
    %c0_318 = arith.constant 0 : index
    %319 = vector.load %arg20[%c0_317, %c0_318] : memref<108x16xf32, #tpu.memory_space<vmem>>, vector<80x16xf32>
    %c1_319 = arith.constant 1 : index
    %c0_320 = arith.constant 0 : index
    %320 = vector.load %arg20[%c1_319, %c0_320] : memref<108x16xf32, #tpu.memory_space<vmem>>, vector<80x16xf32>
    %321 = arith.maximumf %319, %320 : vector<80x16xf32>
    %c2_321 = arith.constant 2 : index
    %c0_322 = arith.constant 0 : index
    %322 = vector.load %arg20[%c2_321, %c0_322] : memref<108x16xf32, #tpu.memory_space<vmem>>, vector<80x16xf32>
    %323 = arith.maximumf %321, %322 : vector<80x16xf32>
    %c10_323 = arith.constant 10 : index
    %c0_324 = arith.constant 0 : index
    %324 = vector.load %arg20[%c10_323, %c0_324] : memref<108x16xf32, #tpu.memory_space<vmem>>, vector<80x16xf32>
    %325 = arith.maximumf %323, %324 : vector<80x16xf32>
    %c11_325 = arith.constant 11 : index
    %c0_326 = arith.constant 0 : index
    %326 = vector.load %arg20[%c11_325, %c0_326] : memref<108x16xf32, #tpu.memory_space<vmem>>, vector<80x16xf32>
    %327 = arith.maximumf %325, %326 : vector<80x16xf32>
    %c12_327 = arith.constant 12 : index
    %c0_328 = arith.constant 0 : index
    %328 = vector.load %arg20[%c12_327, %c0_328] : memref<108x16xf32, #tpu.memory_space<vmem>>, vector<80x16xf32>
    %329 = arith.maximumf %327, %328 : vector<80x16xf32>
    %c20_329 = arith.constant 20 : index
    %c0_330 = arith.constant 0 : index
    %330 = vector.load %arg20[%c20_329, %c0_330] : memref<108x16xf32, #tpu.memory_space<vmem>>, vector<80x16xf32>
    %331 = arith.maximumf %329, %330 : vector<80x16xf32>
    %c21_331 = arith.constant 21 : index
    %c0_332 = arith.constant 0 : index
    %332 = vector.load %arg20[%c21_331, %c0_332] : memref<108x16xf32, #tpu.memory_space<vmem>>, vector<80x16xf32>
    %333 = arith.maximumf %331, %332 : vector<80x16xf32>
    %c22_333 = arith.constant 22 : index
    %c0_334 = arith.constant 0 : index
    %334 = vector.load %arg20[%c22_333, %c0_334] : memref<108x16xf32, #tpu.memory_space<vmem>>, vector<80x16xf32>
    %335 = arith.maximumf %333, %334 : vector<80x16xf32>
    %c0_335 = arith.constant 0 : index
    %c0_336 = arith.constant 0 : index
    %336 = vector.load %arg21[%c0_335, %c0_336] : memref<80x16xf32, #tpu.memory_space<vmem>>, vector<80x16xf32>
    tpu.vector_store %arg21[%c0_335, %c0_336], %335 {strides = array<i32>} : memref<80x16xf32, #tpu.memory_space<vmem>>, vector<80x16xf32>,
    %c0_337 = arith.constant 0 : index
    %c0_338 = arith.constant 0 : index
    %337 = vector.load %arg21[%c0_337, %c0_338] : memref<80x16xf32, #tpu.memory_space<vmem>>, vector<1x16xf32>
    %c7_339 = arith.constant 7 : index
    %c0_340 = arith.constant 0 : index
    %338 = vector.load %arg22[%c7_339, %c0_340] : memref<44x16xf32, #tpu.memory_space<vmem>>, vector<1x16xf32>
    tpu.vector_store %arg22[%c7_339, %c0_340], %337 {strides = array<i32>} : memref<44x16xf32, #tpu.memory_space<vmem>>, vector<1x16xf32>,
    %c2_341 = arith.constant 2 : index
    %c0_342 = arith.constant 0 : index
    %339 = vector.load %arg21[%c2_341, %c0_342] : memref<80x16xf32, #tpu.memory_space<vmem>>, vector<1x16xf32>
    %c8_343 = arith.constant 8 : index
    %c0_344 = arith.constant 0 : index
    %340 = vector.load %arg22[%c8_343, %c0_344] : memref<44x16xf32, #tpu.memory_space<vmem>>, vector<1x16xf32>
    tpu.vector_store %arg22[%c8_343, %c0_344], %339 {strides = array<i32>} : memref<44x16xf32, #tpu.memory_space<vmem>>, vector<1x16xf32>,
    %c4_345 = arith.constant 4 : index
    %c0_346 = arith.constant 0 : index
    %341 = vector.load %arg21[%c4_345, %c0_346] : memref<80x16xf32, #tpu.memory_space<vmem>>, vector<1x16xf32>
    %c9 = arith.constant 9 : index
    %c0_347 = arith.constant 0 : index
    %342 = vector.load %arg22[%c9, %c0_347] : memref<44x16xf32, #tpu.memory_space<vmem>>, vector<1x16xf32>
    tpu.vector_store %arg22[%c9, %c0_347], %341 {strides = array<i32>} : memref<44x16xf32, #tpu.memory_space<vmem>>, vector<1x16xf32>,
    %c6_348 = arith.constant 6 : index
    %c0_349 = arith.constant 0 : index
    %343 = vector.load %arg21[%c6_348, %c0_349] : memref<80x16xf32, #tpu.memory_space<vmem>>, vector<1x16xf32>
    %c10_350 = arith.constant 10 : index
    %c0_351 = arith.constant 0 : index
    %344 = vector.load %arg22[%c10_350, %c0_351] : memref<44x16xf32, #tpu.memory_space<vmem>>, vector<1x16xf32>
    tpu.vector_store %arg22[%c10_350, %c0_351], %343 {strides = array<i32>} : memref<44x16xf32, #tpu.memory_space<vmem>>, vector<1x16xf32>,
    %c20_352 = arith.constant 20 : index
    %c0_353 = arith.constant 0 : index
    %345 = vector.load %arg21[%c20_352, %c0_353] : memref<80x16xf32, #tpu.memory_space<vmem>>, vector<1x16xf32>
    %c13_354 = arith.constant 13 : index
    %c0_355 = arith.constant 0 : index
    %346 = vector.load %arg22[%c13_354, %c0_355] : memref<44x16xf32, #tpu.memory_space<vmem>>, vector<1x16xf32>
    tpu.vector_store %arg22[%c13_354, %c0_355], %345 {strides = array<i32>} : memref<44x16xf32, #tpu.memory_space<vmem>>, vector<1x16xf32>,
    %c22_356 = arith.constant 22 : index
    %c0_357 = arith.constant 0 : index
    %347 = vector.load %arg21[%c22_356, %c0_357] : memref<80x16xf32, #tpu.memory_space<vmem>>, vector<1x16xf32>
    %c14_358 = arith.constant 14 : index
    %c0_359 = arith.constant 0 : index
    %348 = vector.load %arg22[%c14_358, %c0_359] : memref<44x16xf32, #tpu.memory_space<vmem>>, vector<1x16xf32>
    tpu.vector_store %arg22[%c14_358, %c0_359], %347 {strides = array<i32>} : memref<44x16xf32, #tpu.memory_space<vmem>>, vector<1x16xf32>,
    %c24_360 = arith.constant 24 : index
    %c0_361 = arith.constant 0 : index
    %349 = vector.load %arg21[%c24_360, %c0_361] : memref<80x16xf32, #tpu.memory_space<vmem>>, vector<1x16xf32>
    %c15_362 = arith.constant 15 : index
    %c0_363 = arith.constant 0 : index
    %350 = vector.load %arg22[%c15_362, %c0_363] : memref<44x16xf32, #tpu.memory_space<vmem>>, vector<1x16xf32>
    tpu.vector_store %arg22[%c15_362, %c0_363], %349 {strides = array<i32>} : memref<44x16xf32, #tpu.memory_space<vmem>>, vector<1x16xf32>,
    %c26_364 = arith.constant 26 : index
    %c0_365 = arith.constant 0 : index
    %351 = vector.load %arg21[%c26_364, %c0_365] : memref<80x16xf32, #tpu.memory_space<vmem>>, vector<1x16xf32>
    %c16_366 = arith.constant 16 : index
    %c0_367 = arith.constant 0 : index
    %352 = vector.load %arg22[%c16_366, %c0_367] : memref<44x16xf32, #tpu.memory_space<vmem>>, vector<1x16xf32>
    tpu.vector_store %arg22[%c16_366, %c0_367], %351 {strides = array<i32>} : memref<44x16xf32, #tpu.memory_space<vmem>>, vector<1x16xf32>,
    %c40_368 = arith.constant 40 : index
    %c0_369 = arith.constant 0 : index
    %353 = vector.load %arg21[%c40_368, %c0_369] : memref<80x16xf32, #tpu.memory_space<vmem>>, vector<1x16xf32>
    %c19_370 = arith.constant 19 : index
    %c0_371 = arith.constant 0 : index
    %354 = vector.load %arg22[%c19_370, %c0_371] : memref<44x16xf32, #tpu.memory_space<vmem>>, vector<1x16xf32>
    tpu.vector_store %arg22[%c19_370, %c0_371], %353 {strides = array<i32>} : memref<44x16xf32, #tpu.memory_space<vmem>>, vector<1x16xf32>,
    %c42_372 = arith.constant 42 : index
    %c0_373 = arith.constant 0 : index
    %355 = vector.load %arg21[%c42_372, %c0_373] : memref<80x16xf32, #tpu.memory_space<vmem>>, vector<1x16xf32>
    %c20_374 = arith.constant 20 : index
    %c0_375 = arith.constant 0 : index
    %356 = vector.load %arg22[%c20_374, %c0_375] : memref<44x16xf32, #tpu.memory_space<vmem>>, vector<1x16xf32>
    tpu.vector_store %arg22[%c20_374, %c0_375], %355 {strides = array<i32>} : memref<44x16xf32, #tpu.memory_space<vmem>>, vector<1x16xf32>,
    %c44_376 = arith.constant 44 : index
    %c0_377 = arith.constant 0 : index
    %357 = vector.load %arg21[%c44_376, %c0_377] : memref<80x16xf32, #tpu.memory_space<vmem>>, vector<1x16xf32>
    %c21_378 = arith.constant 21 : index
    %c0_379 = arith.constant 0 : index
    %358 = vector.load %arg22[%c21_378, %c0_379] : memref<44x16xf32, #tpu.memory_space<vmem>>, vector<1x16xf32>
    tpu.vector_store %arg22[%c21_378, %c0_379], %357 {strides = array<i32>} : memref<44x16xf32, #tpu.memory_space<vmem>>, vector<1x16xf32>,
    %c46_380 = arith.constant 46 : index
    %c0_381 = arith.constant 0 : index
    %359 = vector.load %arg21[%c46_380, %c0_381] : memref<80x16xf32, #tpu.memory_space<vmem>>, vector<1x16xf32>
    %c22_382 = arith.constant 22 : index
    %c0_383 = arith.constant 0 : index
    %360 = vector.load %arg22[%c22_382, %c0_383] : memref<44x16xf32, #tpu.memory_space<vmem>>, vector<1x16xf32>
    tpu.vector_store %arg22[%c22_382, %c0_383], %359 {strides = array<i32>} : memref<44x16xf32, #tpu.memory_space<vmem>>, vector<1x16xf32>,
    %c60 = arith.constant 60 : index
    %c0_384 = arith.constant 0 : index
    %361 = vector.load %arg21[%c60, %c0_384] : memref<80x16xf32, #tpu.memory_space<vmem>>, vector<1x16xf32>
    %c25_385 = arith.constant 25 : index
    %c0_386 = arith.constant 0 : index
    %362 = vector.load %arg22[%c25_385, %c0_386] : memref<44x16xf32, #tpu.memory_space<vmem>>, vector<1x16xf32>
    tpu.vector_store %arg22[%c25_385, %c0_386], %361 {strides = array<i32>} : memref<44x16xf32, #tpu.memory_space<vmem>>, vector<1x16xf32>,
    %c62_387 = arith.constant 62 : index
    %c0_388 = arith.constant 0 : index
    %363 = vector.load %arg21[%c62_387, %c0_388] : memref<80x16xf32, #tpu.memory_space<vmem>>, vector<1x16xf32>
    %c26_389 = arith.constant 26 : index
    %c0_390 = arith.constant 0 : index
    %364 = vector.load %arg22[%c26_389, %c0_390] : memref<44x16xf32, #tpu.memory_space<vmem>>, vector<1x16xf32>
    tpu.vector_store %arg22[%c26_389, %c0_390], %363 {strides = array<i32>} : memref<44x16xf32, #tpu.memory_space<vmem>>, vector<1x16xf32>,
    %c64_391 = arith.constant 64 : index
    %c0_392 = arith.constant 0 : index
    %365 = vector.load %arg21[%c64_391, %c0_392] : memref<80x16xf32, #tpu.memory_space<vmem>>, vector<1x16xf32>
    %c27_393 = arith.constant 27 : index
    %c0_394 = arith.constant 0 : index
    %366 = vector.load %arg22[%c27_393, %c0_394] : memref<44x16xf32, #tpu.memory_space<vmem>>, vector<1x16xf32>
    tpu.vector_store %arg22[%c27_393, %c0_394], %365 {strides = array<i32>} : memref<44x16xf32, #tpu.memory_space<vmem>>, vector<1x16xf32>,
    %c66_395 = arith.constant 66 : index
    %c0_396 = arith.constant 0 : index
    %367 = vector.load %arg21[%c66_395, %c0_396] : memref<80x16xf32, #tpu.memory_space<vmem>>, vector<1x16xf32>
    %c28_397 = arith.constant 28 : index
    %c0_398 = arith.constant 0 : index
    %368 = vector.load %arg22[%c28_397, %c0_398] : memref<44x16xf32, #tpu.memory_space<vmem>>, vector<1x16xf32>
    tpu.vector_store %arg22[%c28_397, %c0_398], %367 {strides = array<i32>} : memref<44x16xf32, #tpu.memory_space<vmem>>, vector<1x16xf32>,
    %cst_399 = arith.constant 0.000000e+00 : f32
    %369 = vector.broadcast %cst_399 : f32 to vector<24x32xf32>
    %c0_400 = arith.constant 0 : index
    %c0_401 = arith.constant 0 : index
    %370 = vector.load %arg22[%c0_400, %c0_401] : memref<44x16xf32, #tpu.memory_space<vmem>>, vector<24x16xf32>
    %c0_402 = arith.constant 0 : index
    %c0_403 = arith.constant 0 : index
    %c0_404 = arith.constant 0 : index
    %371 = vector.load %arg8[%c0_402, %c0_403, %c0_404] : memref<9x16x32xf32, #tpu.memory_space<vmem>>, vector<1x16x32xf32>
    %372 = vector.shape_cast %371 : vector<1x16x32xf32> to vector<16x32xf32>
    %cst_405 = arith.constant dense<0.000000e+00> : vector<24x32xf32>
    %373 = tpu.matmul %370, %372, %cst_405 {dimension_numbers = #tpu.dot_dimension_numbers<[1], [0], [0], [1], [0, 0, 1, 1], [], []>} : vector<24x16xf32>, vector<16x32xf32>, vector<24x32xf32> -> vector<24x32xf32>
    %374 = arith.addf %369, %373 : vector<24x32xf32>
    %c1_406 = arith.constant 1 : index
    %c0_407 = arith.constant 0 : index
    %375 = vector.load %arg22[%c1_406, %c0_407] : memref<44x16xf32, #tpu.memory_space<vmem>>, vector<24x16xf32>
    %c1_408 = arith.constant 1 : index
    %c0_409 = arith.constant 0 : index
    %c0_410 = arith.constant 0 : index
    %376 = vector.load %arg8[%c1_408, %c0_409, %c0_410] : memref<9x16x32xf32, #tpu.memory_space<vmem>>, vector<1x16x32xf32>
    %377 = vector.shape_cast %376 : vector<1x16x32xf32> to vector<16x32xf32>
    %cst_411 = arith.constant dense<0.000000e+00> : vector<24x32xf32>
    %378 = tpu.matmul %375, %377, %cst_411 {dimension_numbers = #tpu.dot_dimension_numbers<[1], [0], [0], [1], [0, 0, 1, 1], [], []>} : vector<24x16xf32>, vector<16x32xf32>, vector<24x32xf32> -> vector<24x32xf32>
    %379 = arith.addf %374, %378 : vector<24x32xf32>
    %c2_412 = arith.constant 2 : index
    %c0_413 = arith.constant 0 : index
    %380 = vector.load %arg22[%c2_412, %c0_413] : memref<44x16xf32, #tpu.memory_space<vmem>>, vector<24x16xf32>
    %c2_414 = arith.constant 2 : index
    %c0_415 = arith.constant 0 : index
    %c0_416 = arith.constant 0 : index
    %381 = vector.load %arg8[%c2_414, %c0_415, %c0_416] : memref<9x16x32xf32, #tpu.memory_space<vmem>>, vector<1x16x32xf32>
    %382 = vector.shape_cast %381 : vector<1x16x32xf32> to vector<16x32xf32>
    %cst_417 = arith.constant dense<0.000000e+00> : vector<24x32xf32>
    %383 = tpu.matmul %380, %382, %cst_417 {dimension_numbers = #tpu.dot_dimension_numbers<[1], [0], [0], [1], [0, 0, 1, 1], [], []>} : vector<24x16xf32>, vector<16x32xf32>, vector<24x32xf32> -> vector<24x32xf32>
    %384 = arith.addf %379, %383 : vector<24x32xf32>
    %c6_418 = arith.constant 6 : index
    %c0_419 = arith.constant 0 : index
    %385 = vector.load %arg22[%c6_418, %c0_419] : memref<44x16xf32, #tpu.memory_space<vmem>>, vector<24x16xf32>
    %c3_420 = arith.constant 3 : index
    %c0_421 = arith.constant 0 : index
    %c0_422 = arith.constant 0 : index
    %386 = vector.load %arg8[%c3_420, %c0_421, %c0_422] : memref<9x16x32xf32, #tpu.memory_space<vmem>>, vector<1x16x32xf32>
    %387 = vector.shape_cast %386 : vector<1x16x32xf32> to vector<16x32xf32>
    %cst_423 = arith.constant dense<0.000000e+00> : vector<24x32xf32>
    %388 = tpu.matmul %385, %387, %cst_423 {dimension_numbers = #tpu.dot_dimension_numbers<[1], [0], [0], [1], [0, 0, 1, 1], [], []>} : vector<24x16xf32>, vector<16x32xf32>, vector<24x32xf32> -> vector<24x32xf32>
    %389 = arith.addf %384, %388 : vector<24x32xf32>
    %c7_424 = arith.constant 7 : index
    %c0_425 = arith.constant 0 : index
    %390 = vector.load %arg22[%c7_424, %c0_425] : memref<44x16xf32, #tpu.memory_space<vmem>>, vector<24x16xf32>
    %c4_426 = arith.constant 4 : index
    %c0_427 = arith.constant 0 : index
    %c0_428 = arith.constant 0 : index
    %391 = vector.load %arg8[%c4_426, %c0_427, %c0_428] : memref<9x16x32xf32, #tpu.memory_space<vmem>>, vector<1x16x32xf32>
    %392 = vector.shape_cast %391 : vector<1x16x32xf32> to vector<16x32xf32>
    %cst_429 = arith.constant dense<0.000000e+00> : vector<24x32xf32>
    %393 = tpu.matmul %390, %392, %cst_429 {dimension_numbers = #tpu.dot_dimension_numbers<[1], [0], [0], [1], [0, 0, 1, 1], [], []>} : vector<24x16xf32>, vector<16x32xf32>, vector<24x32xf32> -> vector<24x32xf32>
    %394 = arith.addf %389, %393 : vector<24x32xf32>
    %c8_430 = arith.constant 8 : index
    %c0_431 = arith.constant 0 : index
    %395 = vector.load %arg22[%c8_430, %c0_431] : memref<44x16xf32, #tpu.memory_space<vmem>>, vector<24x16xf32>
    %c5_432 = arith.constant 5 : index
    %c0_433 = arith.constant 0 : index
    %c0_434 = arith.constant 0 : index
    %396 = vector.load %arg8[%c5_432, %c0_433, %c0_434] : memref<9x16x32xf32, #tpu.memory_space<vmem>>, vector<1x16x32xf32>
    %397 = vector.shape_cast %396 : vector<1x16x32xf32> to vector<16x32xf32>
    %cst_435 = arith.constant dense<0.000000e+00> : vector<24x32xf32>
    %398 = tpu.matmul %395, %397, %cst_435 {dimension_numbers = #tpu.dot_dimension_numbers<[1], [0], [0], [1], [0, 0, 1, 1], [], []>} : vector<24x16xf32>, vector<16x32xf32>, vector<24x32xf32> -> vector<24x32xf32>
    %399 = arith.addf %394, %398 : vector<24x32xf32>
    %c12_436 = arith.constant 12 : index
    %c0_437 = arith.constant 0 : index
    %400 = vector.load %arg22[%c12_436, %c0_437] : memref<44x16xf32, #tpu.memory_space<vmem>>, vector<24x16xf32>
    %c6_438 = arith.constant 6 : index
    %c0_439 = arith.constant 0 : index
    %c0_440 = arith.constant 0 : index
    %401 = vector.load %arg8[%c6_438, %c0_439, %c0_440] : memref<9x16x32xf32, #tpu.memory_space<vmem>>, vector<1x16x32xf32>
    %402 = vector.shape_cast %401 : vector<1x16x32xf32> to vector<16x32xf32>
    %cst_441 = arith.constant dense<0.000000e+00> : vector<24x32xf32>
    %403 = tpu.matmul %400, %402, %cst_441 {dimension_numbers = #tpu.dot_dimension_numbers<[1], [0], [0], [1], [0, 0, 1, 1], [], []>} : vector<24x16xf32>, vector<16x32xf32>, vector<24x32xf32> -> vector<24x32xf32>
    %404 = arith.addf %399, %403 : vector<24x32xf32>
    %c13_442 = arith.constant 13 : index
    %c0_443 = arith.constant 0 : index
    %405 = vector.load %arg22[%c13_442, %c0_443] : memref<44x16xf32, #tpu.memory_space<vmem>>, vector<24x16xf32>
    %c7_444 = arith.constant 7 : index
    %c0_445 = arith.constant 0 : index
    %c0_446 = arith.constant 0 : index
    %406 = vector.load %arg8[%c7_444, %c0_445, %c0_446] : memref<9x16x32xf32, #tpu.memory_space<vmem>>, vector<1x16x32xf32>
    %407 = vector.shape_cast %406 : vector<1x16x32xf32> to vector<16x32xf32>
    %cst_447 = arith.constant dense<0.000000e+00> : vector<24x32xf32>
    %408 = tpu.matmul %405, %407, %cst_447 {dimension_numbers = #tpu.dot_dimension_numbers<[1], [0], [0], [1], [0, 0, 1, 1], [], []>} : vector<24x16xf32>, vector<16x32xf32>, vector<24x32xf32> -> vector<24x32xf32>
    %409 = arith.addf %404, %408 : vector<24x32xf32>
    %c14_448 = arith.constant 14 : index
    %c0_449 = arith.constant 0 : index
    %410 = vector.load %arg22[%c14_448, %c0_449] : memref<44x16xf32, #tpu.memory_space<vmem>>, vector<24x16xf32>
    %c8_450 = arith.constant 8 : index
    %c0_451 = arith.constant 0 : index
    %c0_452 = arith.constant 0 : index
    %411 = vector.load %arg8[%c8_450, %c0_451, %c0_452] : memref<9x16x32xf32, #tpu.memory_space<vmem>>, vector<1x16x32xf32>
    %412 = vector.shape_cast %411 : vector<1x16x32xf32> to vector<16x32xf32>
    %cst_453 = arith.constant dense<0.000000e+00> : vector<24x32xf32>
    %413 = tpu.matmul %410, %412, %cst_453 {dimension_numbers = #tpu.dot_dimension_numbers<[1], [0], [0], [1], [0, 0, 1, 1], [], []>} : vector<24x16xf32>, vector<16x32xf32>, vector<24x32xf32> -> vector<24x32xf32>
    %414 = arith.addf %409, %413 : vector<24x32xf32>
    %c0_454 = arith.constant 0 : index
    %c0_455 = arith.constant 0 : index
    %415 = vector.load %arg9[%c0_454, %c0_455] : memref<1x32xf32, #tpu.memory_space<vmem>>, vector<1x32xf32>
    %416 = vector.broadcast %415 : vector<1x32xf32> to vector<24x32xf32>
    %417 = arith.mulf %414, %416 : vector<24x32xf32>
    %c0_456 = arith.constant 0 : index
    %c0_457 = arith.constant 0 : index
    %418 = vector.load %arg10[%c0_456, %c0_457] : memref<1x32xf32, #tpu.memory_space<vmem>>, vector<1x32xf32>
    %419 = vector.broadcast %418 : vector<1x32xf32> to vector<24x32xf32>
    %420 = arith.addf %417, %419 : vector<24x32xf32>
    %cst_458 = arith.constant 0.000000e+00 : f32
    %421 = vector.broadcast %cst_458 : f32 to vector<24x32xf32>
    %422 = arith.maximumf %420, %421 : vector<24x32xf32>
    %423 = tpu.iota {dimensions = array<i32: 0>} : vector<24x32xi32>
    %c6_i32 = arith.constant 6 : i32
    %c0_i32_459 = arith.constant 0 : i32
    %424 = arith.cmpi eq, %c6_i32, %c0_i32_459 : i32
    %c1_i32_460 = arith.constant 1 : i32
    %425 = arith.select %424, %c1_i32_460, %c6_i32 : i32
    %426 = vector.broadcast %425 : i32 to vector<24x32xi32>
    %427 = arith.remsi %423, %426 : vector<24x32xi32>
    %c0_i32_461 = arith.constant 0 : i32
    %428 = vector.broadcast %c0_i32_461 : i32 to vector<24x32xi32>
    %429 = arith.cmpi ne, %427, %428 : vector<24x32xi32>
    %c0_i32_462 = arith.constant 0 : i32
    %430 = vector.broadcast %c0_i32_462 : i32 to vector<24x32xi32>
    %431 = arith.cmpi slt, %427, %430 : vector<24x32xi32>
    %c0_i32_463 = arith.constant 0 : i32
    %432 = arith.cmpi slt, %425, %c0_i32_463 : i32
    %433 = vector.broadcast %432 : i1 to vector<24x32xi1>
    %434 = vector.broadcast %433 : vector<24x32xi1> to vector<24x32xi1>
    %435 = arith.xori %431, %434 : vector<24x32xi1>
    %436 = arith.andi %435, %429 : vector<24x32xi1>
    %437 = vector.broadcast %425 : i32 to vector<24x32xi32>
    %438 = arith.addi %427, %437 : vector<24x32xi32>
    %439 = arith.select %436, %438, %427 : vector<24x32xi1>, vector<24x32xi32>
    %c4_i32 = arith.constant 4 : i32
    %440 = vector.broadcast %c4_i32 : i32 to vector<24x32xi32>
    %441 = arith.cmpi slt, %439, %440 : vector<24x32xi32>
    %cst_464 = arith.constant -3.40282347E+38 : f32
    %442 = vector.broadcast %cst_464 : f32 to vector<24x32xf32>
    %443 = arith.select %441, %422, %442 : vector<24x32xi1>, vector<24x32xf32>
    %c7_465 = arith.constant 7 : index
    %c0_466 = arith.constant 0 : index
    %444 = vector.load %arg23[%c7_465, %c0_466] : memref<44x32xf32, #tpu.memory_space<vmem>>, vector<24x32xf32>
    tpu.vector_store %arg23[%c7_465, %c0_466], %443 {strides = array<i32>} : memref<44x32xf32, #tpu.memory_space<vmem>>, vector<24x32xf32>,
    %c0_467 = arith.constant 0 : index
    %c0_468 = arith.constant 0 : index
    %445 = vector.load %arg23[%c0_467, %c0_468] : memref<44x32xf32, #tpu.memory_space<vmem>>, vector<24x32xf32>
    %c1_469 = arith.constant 1 : index
    %c0_470 = arith.constant 0 : index
    %446 = vector.load %arg23[%c1_469, %c0_470] : memref<44x32xf32, #tpu.memory_space<vmem>>, vector<24x32xf32>
    %447 = arith.maximumf %445, %446 : vector<24x32xf32>
    %c2_471 = arith.constant 2 : index
    %c0_472 = arith.constant 0 : index
    %448 = vector.load %arg23[%c2_471, %c0_472] : memref<44x32xf32, #tpu.memory_space<vmem>>, vector<24x32xf32>
    %449 = arith.maximumf %447, %448 : vector<24x32xf32>
    %c6_473 = arith.constant 6 : index
    %c0_474 = arith.constant 0 : index
    %450 = vector.load %arg23[%c6_473, %c0_474] : memref<44x32xf32, #tpu.memory_space<vmem>>, vector<24x32xf32>
    %451 = arith.maximumf %449, %450 : vector<24x32xf32>
    %c7_475 = arith.constant 7 : index
    %c0_476 = arith.constant 0 : index
    %452 = vector.load %arg23[%c7_475, %c0_476] : memref<44x32xf32, #tpu.memory_space<vmem>>, vector<24x32xf32>
    %453 = arith.maximumf %451, %452 : vector<24x32xf32>
    %c8_477 = arith.constant 8 : index
    %c0_478 = arith.constant 0 : index
    %454 = vector.load %arg23[%c8_477, %c0_478] : memref<44x32xf32, #tpu.memory_space<vmem>>, vector<24x32xf32>
    %455 = arith.maximumf %453, %454 : vector<24x32xf32>
    %c12_479 = arith.constant 12 : index
    %c0_480 = arith.constant 0 : index
    %456 = vector.load %arg23[%c12_479, %c0_480] : memref<44x32xf32, #tpu.memory_space<vmem>>, vector<24x32xf32>
    %457 = arith.maximumf %455, %456 : vector<24x32xf32>
    %c13_481 = arith.constant 13 : index
    %c0_482 = arith.constant 0 : index
    %458 = vector.load %arg23[%c13_481, %c0_482] : memref<44x32xf32, #tpu.memory_space<vmem>>, vector<24x32xf32>
    %459 = arith.maximumf %457, %458 : vector<24x32xf32>
    %c14_483 = arith.constant 14 : index
    %c0_484 = arith.constant 0 : index
    %460 = vector.load %arg23[%c14_483, %c0_484] : memref<44x32xf32, #tpu.memory_space<vmem>>, vector<24x32xf32>
    %461 = arith.maximumf %459, %460 : vector<24x32xf32>
    %c0_485 = arith.constant 0 : index
    %c0_486 = arith.constant 0 : index
    %462 = vector.load %arg24[%c0_485, %c0_486] : memref<24x32xf32, #tpu.memory_space<vmem>>, vector<24x32xf32>
    tpu.vector_store %arg24[%c0_485, %c0_486], %461 {strides = array<i32>} : memref<24x32xf32, #tpu.memory_space<vmem>>, vector<24x32xf32>,
    %c0_487 = arith.constant 0 : index
    %c0_488 = arith.constant 0 : index
    %463 = vector.load %arg24[%c0_487, %c0_488] : memref<24x32xf32, #tpu.memory_space<vmem>>, vector<1x32xf32>
    %c5_489 = arith.constant 5 : index
    %c0_490 = arith.constant 0 : index
    %464 = vector.load %arg25[%c5_489, %c0_490] : memref<24x32xf32, #tpu.memory_space<vmem>>, vector<1x32xf32>
    tpu.vector_store %arg25[%c5_489, %c0_490], %463 {strides = array<i32>} : memref<24x32xf32, #tpu.memory_space<vmem>>, vector<1x32xf32>,
    %c2_491 = arith.constant 2 : index
    %c0_492 = arith.constant 0 : index
    %465 = vector.load %arg24[%c2_491, %c0_492] : memref<24x32xf32, #tpu.memory_space<vmem>>, vector<1x32xf32>
    %c6_493 = arith.constant 6 : index
    %c0_494 = arith.constant 0 : index
    %466 = vector.load %arg25[%c6_493, %c0_494] : memref<24x32xf32, #tpu.memory_space<vmem>>, vector<1x32xf32>
    tpu.vector_store %arg25[%c6_493, %c0_494], %465 {strides = array<i32>} : memref<24x32xf32, #tpu.memory_space<vmem>>, vector<1x32xf32>,
    %c12_495 = arith.constant 12 : index
    %c0_496 = arith.constant 0 : index
    %467 = vector.load %arg24[%c12_495, %c0_496] : memref<24x32xf32, #tpu.memory_space<vmem>>, vector<1x32xf32>
    %c9_497 = arith.constant 9 : index
    %c0_498 = arith.constant 0 : index
    %468 = vector.load %arg25[%c9_497, %c0_498] : memref<24x32xf32, #tpu.memory_space<vmem>>, vector<1x32xf32>
    tpu.vector_store %arg25[%c9_497, %c0_498], %467 {strides = array<i32>} : memref<24x32xf32, #tpu.memory_space<vmem>>, vector<1x32xf32>,
    %c14_499 = arith.constant 14 : index
    %c0_500 = arith.constant 0 : index
    %469 = vector.load %arg24[%c14_499, %c0_500] : memref<24x32xf32, #tpu.memory_space<vmem>>, vector<1x32xf32>
    %c10_501 = arith.constant 10 : index
    %c0_502 = arith.constant 0 : index
    %470 = vector.load %arg25[%c10_501, %c0_502] : memref<24x32xf32, #tpu.memory_space<vmem>>, vector<1x32xf32>
    tpu.vector_store %arg25[%c10_501, %c0_502], %469 {strides = array<i32>} : memref<24x32xf32, #tpu.memory_space<vmem>>, vector<1x32xf32>,
    %cst_503 = arith.constant 0.000000e+00 : f32
    %471 = vector.broadcast %cst_503 : f32 to vector<8x128xf32>
    %c0_504 = arith.constant 0 : index
    %c0_505 = arith.constant 0 : index
    %472 = vector.load %arg25[%c0_504, %c0_505] : memref<24x32xf32, #tpu.memory_space<vmem>>, vector<8x32xf32>
    %c0_506 = arith.constant 0 : index
    %c0_507 = arith.constant 0 : index
    %c0_508 = arith.constant 0 : index
    %473 = vector.load %arg11[%c0_506, %c0_507, %c0_508] : memref<9x32x128xf32, #tpu.memory_space<vmem>>, vector<1x32x128xf32>
    %474 = vector.shape_cast %473 : vector<1x32x128xf32> to vector<32x128xf32>
    %cst_509 = arith.constant dense<0.000000e+00> : vector<8x128xf32>
    %475 = tpu.matmul %472, %474, %cst_509 {dimension_numbers = #tpu.dot_dimension_numbers<[1], [0], [0], [1], [0, 0, 1, 1], [], []>} : vector<8x32xf32>, vector<32x128xf32>, vector<8x128xf32> -> vector<8x128xf32>
    %476 = arith.addf %471, %475 : vector<8x128xf32>
    %c1_510 = arith.constant 1 : index
    %c0_511 = arith.constant 0 : index
    %477 = vector.load %arg25[%c1_510, %c0_511] : memref<24x32xf32, #tpu.memory_space<vmem>>, vector<8x32xf32>
    %c1_512 = arith.constant 1 : index
    %c0_513 = arith.constant 0 : index
    %c0_514 = arith.constant 0 : index
    %478 = vector.load %arg11[%c1_512, %c0_513, %c0_514] : memref<9x32x128xf32, #tpu.memory_space<vmem>>, vector<1x32x128xf32>
    %479 = vector.shape_cast %478 : vector<1x32x128xf32> to vector<32x128xf32>
    %cst_515 = arith.constant dense<0.000000e+00> : vector<8x128xf32>
    %480 = tpu.matmul %477, %479, %cst_515 {dimension_numbers = #tpu.dot_dimension_numbers<[1], [0], [0], [1], [0, 0, 1, 1], [], []>} : vector<8x32xf32>, vector<32x128xf32>, vector<8x128xf32> -> vector<8x128xf32>
    %481 = arith.addf %476, %480 : vector<8x128xf32>
    %c2_516 = arith.constant 2 : index
    %c0_517 = arith.constant 0 : index
    %482 = vector.load %arg25[%c2_516, %c0_517] : memref<24x32xf32, #tpu.memory_space<vmem>>, vector<8x32xf32>
    %c2_518 = arith.constant 2 : index
    %c0_519 = arith.constant 0 : index
    %c0_520 = arith.constant 0 : index
    %483 = vector.load %arg11[%c2_518, %c0_519, %c0_520] : memref<9x32x128xf32, #tpu.memory_space<vmem>>, vector<1x32x128xf32>
    %484 = vector.shape_cast %483 : vector<1x32x128xf32> to vector<32x128xf32>
    %cst_521 = arith.constant dense<0.000000e+00> : vector<8x128xf32>
    %485 = tpu.matmul %482, %484, %cst_521 {dimension_numbers = #tpu.dot_dimension_numbers<[1], [0], [0], [1], [0, 0, 1, 1], [], []>} : vector<8x32xf32>, vector<32x128xf32>, vector<8x128xf32> -> vector<8x128xf32>
    %486 = arith.addf %481, %485 : vector<8x128xf32>
    %c4_522 = arith.constant 4 : index
    %c0_523 = arith.constant 0 : index
    %487 = vector.load %arg25[%c4_522, %c0_523] : memref<24x32xf32, #tpu.memory_space<vmem>>, vector<8x32xf32>
    %c3_524 = arith.constant 3 : index
    %c0_525 = arith.constant 0 : index
    %c0_526 = arith.constant 0 : index
    %488 = vector.load %arg11[%c3_524, %c0_525, %c0_526] : memref<9x32x128xf32, #tpu.memory_space<vmem>>, vector<1x32x128xf32>
    %489 = vector.shape_cast %488 : vector<1x32x128xf32> to vector<32x128xf32>
    %cst_527 = arith.constant dense<0.000000e+00> : vector<8x128xf32>
    %490 = tpu.matmul %487, %489, %cst_527 {dimension_numbers = #tpu.dot_dimension_numbers<[1], [0], [0], [1], [0, 0, 1, 1], [], []>} : vector<8x32xf32>, vector<32x128xf32>, vector<8x128xf32> -> vector<8x128xf32>
    %491 = arith.addf %486, %490 : vector<8x128xf32>
    %c5_528 = arith.constant 5 : index
    %c0_529 = arith.constant 0 : index
    %492 = vector.load %arg25[%c5_528, %c0_529] : memref<24x32xf32, #tpu.memory_space<vmem>>, vector<8x32xf32>
    %c4_530 = arith.constant 4 : index
    %c0_531 = arith.constant 0 : index
    %c0_532 = arith.constant 0 : index
    %493 = vector.load %arg11[%c4_530, %c0_531, %c0_532] : memref<9x32x128xf32, #tpu.memory_space<vmem>>, vector<1x32x128xf32>
    %494 = vector.shape_cast %493 : vector<1x32x128xf32> to vector<32x128xf32>
    %cst_533 = arith.constant dense<0.000000e+00> : vector<8x128xf32>
    %495 = tpu.matmul %492, %494, %cst_533 {dimension_numbers = #tpu.dot_dimension_numbers<[1], [0], [0], [1], [0, 0, 1, 1], [], []>} : vector<8x32xf32>, vector<32x128xf32>, vector<8x128xf32> -> vector<8x128xf32>
    %496 = arith.addf %491, %495 : vector<8x128xf32>
    %c6_534 = arith.constant 6 : index
    %c0_535 = arith.constant 0 : index
    %497 = vector.load %arg25[%c6_534, %c0_535] : memref<24x32xf32, #tpu.memory_space<vmem>>, vector<8x32xf32>
    %c5_536 = arith.constant 5 : index
    %c0_537 = arith.constant 0 : index
    %c0_538 = arith.constant 0 : index
    %498 = vector.load %arg11[%c5_536, %c0_537, %c0_538] : memref<9x32x128xf32, #tpu.memory_space<vmem>>, vector<1x32x128xf32>
    %499 = vector.shape_cast %498 : vector<1x32x128xf32> to vector<32x128xf32>
    %cst_539 = arith.constant dense<0.000000e+00> : vector<8x128xf32>
    %500 = tpu.matmul %497, %499, %cst_539 {dimension_numbers = #tpu.dot_dimension_numbers<[1], [0], [0], [1], [0, 0, 1, 1], [], []>} : vector<8x32xf32>, vector<32x128xf32>, vector<8x128xf32> -> vector<8x128xf32>
    %501 = arith.addf %496, %500 : vector<8x128xf32>
    %c8_540 = arith.constant 8 : index
    %c0_541 = arith.constant 0 : index
    %502 = vector.load %arg25[%c8_540, %c0_541] : memref<24x32xf32, #tpu.memory_space<vmem>>, vector<8x32xf32>
    %c6_542 = arith.constant 6 : index
    %c0_543 = arith.constant 0 : index
    %c0_544 = arith.constant 0 : index
    %503 = vector.load %arg11[%c6_542, %c0_543, %c0_544] : memref<9x32x128xf32, #tpu.memory_space<vmem>>, vector<1x32x128xf32>
    %504 = vector.shape_cast %503 : vector<1x32x128xf32> to vector<32x128xf32>
    %cst_545 = arith.constant dense<0.000000e+00> : vector<8x128xf32>
    %505 = tpu.matmul %502, %504, %cst_545 {dimension_numbers = #tpu.dot_dimension_numbers<[1], [0], [0], [1], [0, 0, 1, 1], [], []>} : vector<8x32xf32>, vector<32x128xf32>, vector<8x128xf32> -> vector<8x128xf32>
    %506 = arith.addf %501, %505 : vector<8x128xf32>
    %c9_546 = arith.constant 9 : index
    %c0_547 = arith.constant 0 : index
    %507 = vector.load %arg25[%c9_546, %c0_547] : memref<24x32xf32, #tpu.memory_space<vmem>>, vector<8x32xf32>
    %c7_548 = arith.constant 7 : index
    %c0_549 = arith.constant 0 : index
    %c0_550 = arith.constant 0 : index
    %508 = vector.load %arg11[%c7_548, %c0_549, %c0_550] : memref<9x32x128xf32, #tpu.memory_space<vmem>>, vector<1x32x128xf32>
    %509 = vector.shape_cast %508 : vector<1x32x128xf32> to vector<32x128xf32>
    %cst_551 = arith.constant dense<0.000000e+00> : vector<8x128xf32>
    %510 = tpu.matmul %507, %509, %cst_551 {dimension_numbers = #tpu.dot_dimension_numbers<[1], [0], [0], [1], [0, 0, 1, 1], [], []>} : vector<8x32xf32>, vector<32x128xf32>, vector<8x128xf32> -> vector<8x128xf32>
    %511 = arith.addf %506, %510 : vector<8x128xf32>
    %c10_552 = arith.constant 10 : index
    %c0_553 = arith.constant 0 : index
    %512 = vector.load %arg25[%c10_552, %c0_553] : memref<24x32xf32, #tpu.memory_space<vmem>>, vector<8x32xf32>
    %c8_554 = arith.constant 8 : index
    %c0_555 = arith.constant 0 : index
    %c0_556 = arith.constant 0 : index
    %513 = vector.load %arg11[%c8_554, %c0_555, %c0_556] : memref<9x32x128xf32, #tpu.memory_space<vmem>>, vector<1x32x128xf32>
    %514 = vector.shape_cast %513 : vector<1x32x128xf32> to vector<32x128xf32>
    %cst_557 = arith.constant dense<0.000000e+00> : vector<8x128xf32>
    %515 = tpu.matmul %512, %514, %cst_557 {dimension_numbers = #tpu.dot_dimension_numbers<[1], [0], [0], [1], [0, 0, 1, 1], [], []>} : vector<8x32xf32>, vector<32x128xf32>, vector<8x128xf32> -> vector<8x128xf32>
    %516 = arith.addf %511, %515 : vector<8x128xf32>
    %c0_558 = arith.constant 0 : index
    %c0_559 = arith.constant 0 : index
    %517 = vector.load %arg12[%c0_558, %c0_559] : memref<1x128xf32, #tpu.memory_space<vmem>>, vector<1x128xf32>
    %518 = vector.broadcast %517 : vector<1x128xf32> to vector<8x128xf32>
    %519 = arith.mulf %516, %518 : vector<8x128xf32>
    %c0_560 = arith.constant 0 : index
    %c0_561 = arith.constant 0 : index
    %520 = vector.load %arg13[%c0_560, %c0_561] : memref<1x128xf32, #tpu.memory_space<vmem>>, vector<1x128xf32>
    %521 = vector.broadcast %520 : vector<1x128xf32> to vector<8x128xf32>
    %522 = arith.addf %519, %521 : vector<8x128xf32>
    %cst_562 = arith.constant 0.000000e+00 : f32
    %523 = vector.broadcast %cst_562 : f32 to vector<8x128xf32>
    %524 = arith.maximumf %522, %523 : vector<8x128xf32>
    %c0_563 = arith.constant 0 : index
    %c0_564 = arith.constant 0 : index
    %525 = vector.load %arg26[%c0_563, %c0_564] : memref<8x128xf32, #tpu.memory_space<vmem>>, vector<8x128xf32>
    tpu.vector_store %arg26[%c0_563, %c0_564], %524 {strides = array<i32>} : memref<8x128xf32, #tpu.memory_space<vmem>>, vector<8x128xf32>,
    %c0_565 = arith.constant 0 : index
    %c0_566 = arith.constant 0 : index
    %526 = vector.load %arg15[%c0_565, %c0_566] : memref<1x10xf32, #tpu.memory_space<vmem>>, vector<1x10xf32>
    %c0_567 = arith.constant 0 : index
    %c0_568 = arith.constant 0 : index
    %527 = vector.load %arg26[%c0_567, %c0_568] : memref<8x128xf32, #tpu.memory_space<vmem>>, vector<1x128xf32>
    %c0_569 = arith.constant 0 : index
    %c0_570 = arith.constant 0 : index
    %c0_571 = arith.constant 0 : index
    %528 = vector.load %arg14[%c0_569, %c0_570, %c0_571] : memref<4x128x10xf32, #tpu.memory_space<vmem>>, vector<1x128x10xf32>
    %529 = vector.shape_cast %528 : vector<1x128x10xf32> to vector<128x10xf32>
    %cst_572 = arith.constant dense<0.000000e+00> : vector<1x10xf32>
    %530 = tpu.matmul %527, %529, %cst_572 {dimension_numbers = #tpu.dot_dimension_numbers<[1], [0], [0], [1], [0, 0, 1, 1], [], []>} : vector<1x128xf32>, vector<128x10xf32>, vector<1x10xf32> -> vector<1x10xf32>
    %531 = arith.addf %526, %530 : vector<1x10xf32>
    %c1_573 = arith.constant 1 : index
    %c0_574 = arith.constant 0 : index
    %532 = vector.load %arg26[%c1_573, %c0_574] : memref<8x128xf32, #tpu.memory_space<vmem>>, vector<1x128xf32>
    %c1_575 = arith.constant 1 : index
    %c0_576 = arith.constant 0 : index
    %c0_577 = arith.constant 0 : index
    %533 = vector.load %arg14[%c1_575, %c0_576, %c0_577] : memref<4x128x10xf32, #tpu.memory_space<vmem>>, vector<1x128x10xf32>
    %534 = vector.shape_cast %533 : vector<1x128x10xf32> to vector<128x10xf32>
    %cst_578 = arith.constant dense<0.000000e+00> : vector<1x10xf32>
    %535 = tpu.matmul %532, %534, %cst_578 {dimension_numbers = #tpu.dot_dimension_numbers<[1], [0], [0], [1], [0, 0, 1, 1], [], []>} : vector<1x128xf32>, vector<128x10xf32>, vector<1x10xf32> -> vector<1x10xf32>
    %536 = arith.addf %531, %535 : vector<1x10xf32>
    %c4_579 = arith.constant 4 : index
    %c0_580 = arith.constant 0 : index
    %537 = vector.load %arg26[%c4_579, %c0_580] : memref<8x128xf32, #tpu.memory_space<vmem>>, vector<1x128xf32>
    %c2_581 = arith.constant 2 : index
    %c0_582 = arith.constant 0 : index
    %c0_583 = arith.constant 0 : index
    %538 = vector.load %arg14[%c2_581, %c0_582, %c0_583] : memref<4x128x10xf32, #tpu.memory_space<vmem>>, vector<1x128x10xf32>
    %539 = vector.shape_cast %538 : vector<1x128x10xf32> to vector<128x10xf32>
    %cst_584 = arith.constant dense<0.000000e+00> : vector<1x10xf32>
    %540 = tpu.matmul %537, %539, %cst_584 {dimension_numbers = #tpu.dot_dimension_numbers<[1], [0], [0], [1], [0, 0, 1, 1], [], []>} : vector<1x128xf32>, vector<128x10xf32>, vector<1x10xf32> -> vector<1x10xf32>
    %541 = arith.addf %536, %540 : vector<1x10xf32>
    %c5_585 = arith.constant 5 : index
    %c0_586 = arith.constant 0 : index
    %542 = vector.load %arg26[%c5_585, %c0_586] : memref<8x128xf32, #tpu.memory_space<vmem>>, vector<1x128xf32>
    %c3_587 = arith.constant 3 : index
    %c0_588 = arith.constant 0 : index
    %c0_589 = arith.constant 0 : index
    %543 = vector.load %arg14[%c3_587, %c0_588, %c0_589] : memref<4x128x10xf32, #tpu.memory_space<vmem>>, vector<1x128x10xf32>
    %544 = vector.shape_cast %543 : vector<1x128x10xf32> to vector<128x10xf32>
    %cst_590 = arith.constant dense<0.000000e+00> : vector<1x10xf32>
    %545 = tpu.matmul %542, %544, %cst_590 {dimension_numbers = #tpu.dot_dimension_numbers<[1], [0], [0], [1], [0, 0, 1, 1], [], []>} : vector<1x128xf32>, vector<128x10xf32>, vector<1x10xf32> -> vector<1x10xf32>
    %546 = arith.addf %541, %545 : vector<1x10xf32>
    %cst_591 = arith.constant dense<0xFF800000> : vector<1xf32>
    %547 = vector.multi_reduction <maximumf>, %546, %cst_591 [1] : vector<1x10xf32> to vector<1xf32>
    %548 = vector.shape_cast %547 : vector<1xf32> to vector<1x1xf32>
    %549 = vector.broadcast %548 : vector<1x1xf32> to vector<1x10xf32>
    %550 = arith.subf %546, %549 : vector<1x10xf32>
    %551 = math.exp %550 : vector<1x10xf32>
    %cst_592 = arith.constant dense<0.000000e+00> : vector<1xf32>
    %552 = vector.multi_reduction <add>, %551, %cst_592 [1] : vector<1x10xf32> to vector<1xf32>
    %553 = vector.shape_cast %552 : vector<1xf32> to vector<1x1xf32>
    %554 = vector.broadcast %553 : vector<1x1xf32> to vector<1x10xf32>
    %555 = arith.divf %551, %554 : vector<1x10xf32>
    %c0_593 = arith.constant 0 : index
    %c0_594 = arith.constant 0 : index
    %c0_595 = arith.constant 0 : index
    %556 = vector.load %arg16[%c0_593, %c0_594, %c0_595] : memref<1x1x10xf32, #tpu.memory_space<vmem>>, vector<1x1x10xf32>
    %557 = vector.shape_cast %556 : vector<1x1x10xf32> to vector<1x10xf32>
    %558 = vector.shape_cast %555 : vector<1x10xf32> to vector<1x1x10xf32>
    tpu.vector_store %arg16[%c0_593, %c0_594, %c0_595], %558 {strides = array<i32>} : memref<1x1x10xf32, #tpu.memory_space<vmem>>, vector<1x1x10xf32>,
    return
  }
  func.func @transform_0(%arg0: i32) -> (i32, i32, i32) {
    %c0_i32 = arith.constant 0 : i32
    %c0_i32_0 = arith.constant 0 : i32
    %c0_i32_1 = arith.constant 0 : i32
    return %arg0, %c0_i32, %c0_i32_0 : i32, i32, i32
  }
  func.func @transform_1(%arg0: i32) -> (i32, i32, i32) {
    %c0_i32 = arith.constant 0 : i32
    %c0_i32_0 = arith.constant 0 : i32
    %c0_i32_1 = arith.constant 0 : i32
    %c0_i32_2 = arith.constant 0 : i32
    return %c0_i32, %c0_i32_0, %c0_i32_1 : i32, i32, i32
  }
  func.func @transform_2(%arg0: i32) -> (i32, i32) {
    %c0_i32 = arith.constant 0 : i32
    %c0_i32_0 = arith.constant 0 : i32
    %c0_i32_1 = arith.constant 0 : i32
    return %c0_i32, %c0_i32_0 : i32, i32
  }
  func.func @transform_3(%arg0: i32) -> (i32, i32) {
    %c0_i32 = arith.constant 0 : i32
    %c0_i32_0 = arith.constant 0 : i32
    %c0_i32_1 = arith.constant 0 : i32
    return %c0_i32, %c0_i32_0 : i32, i32
  }
  func.func @transform_4(%arg0: i32) -> (i32, i32, i32) {
    %c0_i32 = arith.constant 0 : i32
    %c0_i32_0 = arith.constant 0 : i32
    %c0_i32_1 = arith.constant 0 : i32
    %c0_i32_2 = arith.constant 0 : i32
    return %c0_i32, %c0_i32_0, %c0_i32_1 : i32, i32, i32
  }
  func.func @transform_5(%arg0: i32) -> (i32, i32) {
    %c0_i32 = arith.constant 0 : i32
    %c0_i32_0 = arith.constant 0 : i32
    %c0_i32_1 = arith.constant 0 : i32
    return %c0_i32, %c0_i32_0 : i32, i32
  }
  func.func @transform_6(%arg0: i32) -> (i32, i32) {
    %c0_i32 = arith.constant 0 : i32
    %c0_i32_0 = arith.constant 0 : i32
    %c0_i32_1 = arith.constant 0 : i32
    return %c0_i32, %c0_i32_0 : i32, i32
  }
  func.func @transform_7(%arg0: i32) -> (i32, i32, i32) {
    %c0_i32 = arith.constant 0 : i32
    %c0_i32_0 = arith.constant 0 : i32
    %c0_i32_1 = arith.constant 0 : i32
    %c0_i32_2 = arith.constant 0 : i32
    return %c0_i32, %c0_i32_0, %c0_i32_1 : i32, i32, i32
  }
  func.func @transform_8(%arg0: i32) -> (i32, i32) {
    %c0_i32 = arith.constant 0 : i32
    %c0_i32_0 = arith.constant 0 : i32
    %c0_i32_1 = arith.constant 0 : i32
    return %c0_i32, %c0_i32_0 : i32, i32
  }
  func.func @transform_9(%arg0: i32) -> (i32, i32) {
    %c0_i32 = arith.constant 0 : i32
    %c0_i32_0 = arith.constant 0 : i32
    %c0_i32_1 = arith.constant 0 : i32
    return %c0_i32, %c0_i32_0 : i32, i32
  }
  func.func @transform_10(%arg0: i32) -> (i32, i32, i32) {
    %c0_i32 = arith.constant 0 : i32
    %c0_i32_0 = arith.constant 0 : i32
    %c0_i32_1 = arith.constant 0 : i32
    %c0_i32_2 = arith.constant 0 : i32
    return %c0_i32, %c0_i32_0, %c0_i32_1 : i32, i32, i32
  }
  func.func @transform_11(%arg0: i32) -> (i32, i32) {
    %c0_i32 = arith.constant 0 : i32
    %c0_i32_0 = arith.constant 0 : i32
    %c0_i32_1 = arith.constant 0 : i32
    return %c0_i32, %c0_i32_0 : i32, i32
  }
  func.func @transform_12(%arg0: i32) -> (i32, i32) {
    %c0_i32 = arith.constant 0 : i32
    %c0_i32_0 = arith.constant 0 : i32
    %c0_i32_1 = arith.constant 0 : i32
    return %c0_i32, %c0_i32_0 : i32, i32
  }
  func.func @transform_13(%arg0: i32) -> (i32, i32, i32) {
    %c0_i32 = arith.constant 0 : i32
    %c0_i32_0 = arith.constant 0 : i32
    %c0_i32_1 = arith.constant 0 : i32
    %c0_i32_2 = arith.constant 0 : i32
    return %c0_i32, %c0_i32_0, %c0_i32_1 : i32, i32, i32
  }
  func.func @transform_14(%arg0: i32) -> (i32, i32) {
    %c0_i32 = arith.constant 0 : i32
    %c0_i32_0 = arith.constant 0 : i32
    %c0_i32_1 = arith.constant 0 : i32
    return %c0_i32, %c0_i32_0 : i32, i32
  }
  func.func @transform_15(%arg0: i32) -> (i32, i32, i32) {
    %c0_i32 = arith.constant 0 : i32
    %c0_i32_0 = arith.constant 0 : i32
    %c0_i32_1 = arith.constant 0 : i32
    return %arg0, %c0_i32, %c0_i32_0 : i32, i32, i32
  }
}

</mosaic_0001>

<bundles_post_ra>
// kernel: vgg_forward.1
= control target key start
LH: loop header
LB: loop body
LE: loop exit
PB: predicated region body
PF: predicated region fallthrough
CT: control target
= control target key end

     0   :  { %s17053_s0 = inlined_call_operand.vmem [shape: f32[2,332,4], index: 0, kind: input, shape index: {}]   ;;  %s17054_s1 = inlined_call_operand.vmem [shape: f32[9,4,8], index: 1, kind: input, shape index: {}]   ;;  %s17055_s2 = inlined_call_operand.vmem [shape: f32[1,8], index: 2, kind: input, shape index: {}]   ;;  %s17056_s3 = inlined_call_operand.vmem [shape: f32[1,8], index: 3, kind: input, shape index: {}]   ;;  %s17057_s4 = inlined_call_operand.vmem [shape: f32[9,8,16], index: 4, kind: input, shape index: {}]   ;;  %s17058_s5 = inlined_call_operand.vmem [shape: f32[1,16], index: 5, kind: input, shape index: {}]   ;;  %s17059_s6 = inlined_call_operand.vmem [shape: f32[1,16], index: 6, kind: input, shape index: {}]   ;;  %s17060_s7 = inlined_call_operand.vmem [shape: f32[9,16,32], index: 7, kind: input, shape index: {}]   ;;  %s17061_s8 = inlined_call_operand.vmem [shape: f32[1,32], index: 8, kind: input, shape index: {}]   ;;  %s17062_s9 = inlined_call_operand.vmem [shape: f32[1,32], index: 9, kind: input, shape index: {}]   ;;  %s17063_s10 = inlined_call_operand.vmem [shape: f32[9,32,128], index: 10, kind: input, shape index: {}]   ;;  %s17064_s11 = inlined_call_operand.vmem [shape: f32[1,128], index: 11, kind: input, shape index: {}]   ;;  %s17065_s12 = inlined_call_operand.vmem [shape: f32[1,128], index: 12, kind: input, shape index: {}]   ;;  %s17066_s13 = inlined_call_operand.vmem [shape: f32[4,128,10], index: 13, kind: input, shape index: {}]   ;;  %s17067_s14 = inlined_call_operand.vmem [shape: f32[1,10], index: 14, kind: input, shape index: {}]   ;;  %s17068_s15 = inlined_call_operand.hbm [shape: f32[2,1,10], index: 15, kind: output, shape index: {}]  }
   0x1   :  { %17190 = sst [smem:[#allocation116_spill]] %s17053_s0 }
   0x2   :  { %17191 = sst [smem:[#allocation117_spill]] %s17054_s1 }
   0x3   :  { %17192 = sst [smem:[#allocation118_spill]] %s17055_s2 }
   0x4   :  { %17193 = sst [smem:[#allocation119_spill]] %s17056_s3 }
   0x5   :  { %20 = vsyncpa [#allocation13], 0 }
   0x6   :  { %22 = vsyncpa [#allocation13 + $0x1], 0  ;;  %s13137_s18 = smov 0   ;;  %s13139_s19 = smov 0  }
   0x7   :  { %s13141_s20 = smov 0   ;;  %s13143_s21 = smov 0  }
   0x8 LB: > { %s13158_s22 = sadd.s32 4294967295, %s13050_s21   ;;  %s10031_s23 = sadd.s32 4294967294, %s13050_s21   ;;  %s13050_s21 = sphi %s13143_s21, %s17917_s21   ;;  %s13046_s20 = sphi %s13141_s20, %s17916_s20   ;;  %s13042_s19 = sphi %s13139_s19, %s17915_s19   ;;  %s13038_s18 = sphi %s13137_s18, %s17914_s18  }
   0x9   : > { %s13162_s24 = sadd.s32 1, %s13050_s21   ;;  %s355_s25 = sadd.s32 1, %s13046_s20 }
   0xa   : > { %s352_s26 = ssub.s32 %s13050_s21, %s13162_s24  ;;  %p365_p0 = scmp.ne.s32.totalorder %s13046_s20, %s13042_s19 }
   0xb   : > { %p353_p1 = scmp.eq.s32.totalorder %s352_s26, 0  ;;  %p366_p2 = scmp.eq.s32.totalorder %s13158_s22, 1 }
   0xc   : > { %p371_p3 = scmp.ne.s32.totalorder %s13042_s19, %s13038_s18  ;;  %p372_p4 = scmp.eq.s32.totalorder %s10031_s23, 1 }
   0xd   : > { %s13173_s27 = scalar_select %p353_p1, %s13046_s20, %s355_s25  }
   0xe   : > { %p13175_p5 = por %p366_p2, %p365_p0  ;;  %p13179_p6 = por %p372_p4, %p371_p3 }
   0xf   : > { %17194 = sst [smem:[#allocation15_spill]] %s13173_s27  ;;  %p10034_p7 = scmp.ge.s32.totalorder %s13050_s21, 1 }
  0x10   : > { %p440_p8 = scmp.lt.s32.totalorder %s13050_s21, 3 }
  0x12   : > { %p441_p9 = pnand %p10034_p7, %p440_p8 }
  0x14   : > { %444 = sbr.rel (%p441_p9) target bundleno = 2614 (0xa36), region = 80 }
  0x1b   : > { %s17197_s1 = sld [smem:[#allocation117_spill]]  ;;  %vm767_vm0 = vcmask 1043456   ;;  %p487_p10 = scmp.lt.s32.totalorder %s13158_s22, 1  ;;  %vm658_vm1 = vcmask 31744   ;;  %vm17089_vm2 = vcmask 64512  }
  0x1c   : > { %s17198_s0 = sld [smem:[#allocation116_spill]]  ;;  %s17403_s2 = sld [smem:[#allocation118_spill]] }
  0x1d   : > { %s488_s25 = scalar_select %p487_p10, %s13158_s22, 1 }
  0x1e   : > { %s17405_s3 = sld [smem:[#allocation119_spill]]  ;;  %s485_s30 = sand.u32 1, %s13042_s19  }
  0x1f   : > { %s12839_s26 = smul.u32 336, %s488_s25  ;;  %s486_s16 = scalar_lea.vmem [#allocation12], %s485_s30 }
  0x20   : > { %s9964_s25 = scalar_lea.sflag [#allocation13], %s485_s30 }
  0x21   : > { %v13188_v0 = vld [vmem:[%s17197_s1] sm:$0xf]  ;;  %v10111_v1 = vld [vmem:[%s17197_s1 + $0x8] sm:$0xf]  ;;  %v13212_v5 = vld [vmem:[%s17197_s1 + $0xc] sm:$0xf] }
  0x22   : > { %11264 = vmatprep.subr.msk.mxu0 %vm767_vm0, %v13188_v0  ;;  %s13203_s27 = scalar_lea.vmem %s17198_s0, %s12839_s26  ;;  %v13286_v38 = vld [vmem:[%s17197_s1 + $0x10] sm:$0xf]  ;;  %s9976_s0 = sshll.u32 %s486_s16, 4  ;;  %s17012_s0 = int_to_ptr.vmem [resolvable:$true] %s9976_s0 }
  0x23   : > { %11265 = vmatpush3.msk.msra.mxu0 %vm767_vm0, %v13188_v0  ;;  %v583_v2 = vld [vmem:[%s13203_s27] sm:$0xff]  ;;  %v584_v3 = vld [vmem:[%s13203_s27 + $0x8] sm:$0xff]  ;;  %v585_v4 = vld [vmem:[%s13203_s27 + $0x10] sm:$0xff]  ;;  %s12988_s26 = scalar_lea.vmem %s17012_s0, 16 }
  0x24   : > { %11320 = vmatprep.subr.msk.mxu0 %vm767_vm0, %v10111_v1  ;;  %11266 = vmatprep.mubr.msk.f32.mxu0 %vm658_vm1, %v583_v2  ;;  %v586_v6 = vld [vmem:[%s13203_s27 + $0x18] sm:$0xff]  ;;  %v587_v7 = vld [vmem:[%s13203_s27 + $0x20] sm:$0xff]  ;;  %v588_v8 = vld [vmem:[%s13203_s27 + $0x28] sm:$0xff]  ;;  %p12989_p11 = scmp.ne.s32.totalorder %s17012_s0, %s12988_s26 }
  0x25   : > { %11267 = vmatmul.mubr.msk.f32.vlgmr.msra.gmra.mrb[0].mxu0 %vm658_vm1, %v584_v3  ;;  %v589_v9 = vld [vmem:[%s13203_s27 + $0x30] sm:$0xff]  ;;  %v590_v10 = vld [vmem:[%s13203_s27 + $0x38] sm:$0xff]  ;;  %v591_v11 = vld [vmem:[%s13203_s27 + $0x40] sm:$0xff] }
  0x26   : > { %11321 = vmatpush3.msk.msra.mxu0 %vm767_vm0, %v10111_v1  ;;  %11269 = vmatprep.mubr.msk.f32.mxu0 %vm658_vm1, %v585_v4  ;;  %v592_v12 = vld [vmem:[%s13203_s27 + $0x48] sm:$0xff]  ;;  %v593_v13 = vld [vmem:[%s13203_s27 + $0x50] sm:$0xff]  ;;  %v594_v14 = vld [vmem:[%s13203_s27 + $0x58] sm:$0xff]  ;;  %p12990_p12 = pnand %p12989_p11, %p13175_p5 }
  0x27   : > { %11376 = vmatprep.subr.msk.mxu0 %vm767_vm0, %v13212_v5  ;;  %v595_v15 = vld [vmem:[%s13203_s27 + $0x60] sm:$0xff]  ;;  %v596_v16 = vld [vmem:[%s13203_s27 + $0x68] sm:$0xff]  ;;  %v597_v17 = vld [vmem:[%s13203_s27 + $0x70] sm:$0xff] }
  0x28   : > { %v598_v18 = vld [vmem:[%s13203_s27 + $0x78] sm:$0xff]  ;;  %v599_v19 = vld [vmem:[%s13203_s27 + $0x80] sm:$0xff]  ;;  %v600_v20 = vld [vmem:[%s13203_s27 + $0x88] sm:$0xff]  ;;  %p12991_p13 = pneg %p12990_p12 }
  0x29   : > { %11270 = vmatmul.mubr.msk.f32.gmra.mrb[2].mxu0 %vm658_vm1, %v586_v6  ;;  %v601_v21 = vld [vmem:[%s13203_s27 + $0x90] sm:$0xff]  ;;  %v602_v22 = vld [vmem:[%s13203_s27 + $0x98] sm:$0xff]  ;;  %v603_v23 = vld [vmem:[%s13203_s27 + $0xa0] sm:$0xff] }
  0x2a   : > { %11272 = vmatprep.mubr.msk.f32.mxu0 %vm658_vm1, %v587_v7  ;;  %v604_v24 = vld [vmem:[%s13203_s27 + $0xa8] sm:$0xff]  ;;  %v605_v25 = vld [vmem:[%s13203_s27 + $0xb0] sm:$0xff]  ;;  %v606_v26 = vld [vmem:[%s13203_s27 + $0xb8] sm:$0xff] }
  0x2b   : > { %v607_v27 = vld [vmem:[%s13203_s27 + $0xc0] sm:$0xff]  ;;  %v608_v28 = vld [vmem:[%s13203_s27 + $0xc8] sm:$0xff]  ;;  %v609_v29 = vld [vmem:[%s13203_s27 + $0xd0] sm:$0xff] }
  0x2c   : > { %v610_v30 = vld [vmem:[%s13203_s27 + $0xd8] sm:$0xff]  ;;  %v611_v31 = vld [vmem:[%s13203_s27 + $0xe0] sm:$0xff]  ;;  %v612_v32 = vld [vmem:[%s13203_s27 + $0xe8] sm:$0xff] }
  0x2d   : > { %11273 = vmatmul.mubr.msk.f32.gmra.mrb[4].mxu0 %vm658_vm1, %v588_v8  ;;  %v613_v33 = vld [vmem:[%s13203_s27 + $0xf0] sm:$0xff]  ;;  %v614_v34 = vld [vmem:[%s13203_s27 + $0xf8] sm:$0xff]  ;;  %v1372_v35 = vld [vmem:[%s13203_s27 + $0x2] sm:$0xff] }
  0x2e   : > { %11275 = vmatprep.mubr.msk.f32.mxu0 %vm658_vm1, %v589_v9  ;;  %v1373_v36 = vld [vmem:[%s13203_s27 + $0xa] sm:$0xff]  ;;  %v13281_v37 = vld [vmem:[%s13203_s27 + $0x12] sm:$0xff]  ;;  %v13294_v39 = vld [vmem:[%s13203_s27 + $0x1a] sm:$0xff] }
  0x2f   : > { %v13297_v40 = vld [vmem:[%s13203_s27 + $0x22] sm:$0xff]  ;;  %v13306_v41 = vld [vmem:[%s13203_s27 + $0x2a] sm:$0xff]  ;;  %v13309_v42 = vld [vmem:[%s13203_s27 + $0x32] sm:$0xff] }
  0x30   : > { %v13316_v43 = vld [vmem:[%s13203_s27 + $0x3a] sm:$0xff]  ;;  %v13319_v44 = vld [vmem:[%s13203_s27 + $0x42] sm:$0xff]  ;;  %v13326_v45 = vld [vmem:[%s13203_s27 + $0x4a] sm:$0xff] }
  0x31   : > { %11276 = vmatmul.mubr.msk.f32.gmra.mrb[6].mxu0 %vm658_vm1, %v590_v10  ;;  %v13329_v46 = vld [vmem:[%s13203_s27 + $0x52] sm:$0xff]  ;;  %v1383_v47 = vld [vmem:[%s13203_s27 + $0x5a] sm:$0xff]  ;;  %v1384_v48 = vld [vmem:[%s13203_s27 + $0x62] sm:$0xff] }
  0x32   : > { %11278 = vmatprep.mubr.msk.f32.mxu0 %vm658_vm1, %v591_v11  ;;  %v1385_v49 = vld [vmem:[%s13203_s27 + $0x6a] sm:$0xff]  ;;  %v1386_v50 = vld [vmem:[%s13203_s27 + $0x72] sm:$0xff]  ;;  %v1387_v51 = vld [vmem:[%s13203_s27 + $0x7a] sm:$0xff] }
  0x33   : > { %v1388_v52 = vld [vmem:[%s13203_s27 + $0x82] sm:$0xff]  ;;  %v1389_v53 = vld [vmem:[%s13203_s27 + $0x8a] sm:$0xff]  ;;  %v1390_v54 = vld [vmem:[%s13203_s27 + $0x92] sm:$0xff] }
  0x34   : > { %v1391_v55 = vld [vmem:[%s13203_s27 + $0x9a] sm:$0xff]  ;;  %v1392_v56 = vld [vmem:[%s13203_s27 + $0xa2] sm:$0xff]  ;;  %v1393_v57 = vld [vmem:[%s13203_s27 + $0xaa] sm:$0xff] }
  0x35   : > { %11279 = vmatmul.mubr.msk.f32.gmra.mrb[8].mxu0 %vm658_vm1, %v592_v12  ;;  %v1394_v58 = vld [vmem:[%s13203_s27 + $0xb2] sm:$0xff]  ;;  %v1395_v59 = vld [vmem:[%s13203_s27 + $0xba] sm:$0xff]  ;;  %v1396_v60 = vld [vmem:[%s13203_s27 + $0xc2] sm:$0xff] }
  0x36   : > { %11281 = vmatprep.mubr.msk.f32.mxu0 %vm658_vm1, %v593_v13  ;;  %v1397_v61 = vld [vmem:[%s13203_s27 + $0xca] sm:$0xff]  ;;  %v1398_v62 = vld [vmem:[%s13203_s27 + $0xd2] sm:$0xff]  ;;  %v1399_v63 = vld [vmem:[%s13203_s27 + $0xda] sm:$0xff] }
  0x37   : > { %v1400_v1 = vld [vmem:[%s13203_s27 + $0xe2] sm:$0xff]  ;;  %v1401_v2 = vld [vmem:[%s13203_s27 + $0xea] sm:$0xff]  ;;  %v1402_v3 = vld [vmem:[%s13203_s27 + $0xf2] sm:$0xff] }
  0x38   : > { %v1403_v4 = vld [vmem:[%s13203_s27 + $0xfa] sm:$0xff]  ;;  %v1405_v6 = vld [vmem:[%s13203_s27 + $0x10a] sm:$0xff]  ;;  %v1406_v7 = vld [vmem:[%s13203_s27 + $0x112] sm:$0xff] }
  0x39   : > { %11282 = vmatmul.mubr.msk.f32.gmra.mrb[10].mxu0 %vm658_vm1, %v594_v14  ;;  %v1407_v8 = vld [vmem:[%s13203_s27 + $0x11a] sm:$0xff]  ;;  %v10225_v9 = vld [vmem:[%s17197_s1 + $0x14] sm:$0xf]  ;;  %v1836_v10 = vld [vmem:[%s13203_s27 + $0x122] sm:$0xff] }
  0x3a   : > { %11284 = vmatprep.mubr.msk.f32.mxu0 %vm658_vm1, %v595_v15  ;;  %v1837_v11 = vld [vmem:[%s13203_s27 + $0x12a] sm:$0xff]  ;;  %v2232_v12 = vld [vmem:[%s13203_s27 + $0x13] sm:$0xff]  ;;  %v2233_v13 = vld [vmem:[%s13203_s27 + $0x1b] sm:$0xff] }
  0x3b   : > { %v2234_v14 = vld [vmem:[%s13203_s27 + $0x23] sm:$0xff]  ;;  %v13445_v15 = vld [vmem:[%s17197_s1 + $0x18] sm:$0xf] }
  0x3d   : > { %11285 = vmatmul.mubr.msk.f32.gmra.mrb[12].mxu0 %vm658_vm1, %v596_v16  ;;  %v2235_v16 = vld [vmem:[%s13203_s27 + $0x2b] sm:$0xff] }
  0x3e   : > { %11287 = vmatprep.mubr.msk.f32.mxu0 %vm658_vm1, %v597_v17  ;;  %v2236_v17 = vld [vmem:[%s13203_s27 + $0x33] sm:$0xff] }
  0x41   : > { %11288 = vmatmul.mubr.msk.f32.gmra.mrb[14].mxu0 %vm658_vm1, %v598_v18  ;;  %v2237_v18 = vld [vmem:[%s13203_s27 + $0x3b] sm:$0xff] }
  0x42   : > { %11290 = vmatprep.mubr.msk.f32.mxu0 %vm658_vm1, %v599_v19  ;;  %v2238_v19 = vld [vmem:[%s13203_s27 + $0x43] sm:$0xff] }
  0x45   : > { %11291 = vmatmul.mubr.msk.f32.gmra.mrb[16].mxu0 %vm658_vm1, %v600_v20  ;;  %v2239_v20 = vld [vmem:[%s13203_s27 + $0x4b] sm:$0xff] }
  0x46   : > { %11293 = vmatprep.mubr.msk.f32.mxu0 %vm658_vm1, %v601_v21  ;;  %v2240_v21 = vld [vmem:[%s13203_s27 + $0x53] sm:$0xff] }
  0x49   : > { %11294 = vmatmul.mubr.msk.f32.gmra.mrb[18].mxu0 %vm658_vm1, %v602_v22  ;;  %v2241_v22 = vld [vmem:[%s13203_s27 + $0x5b] sm:$0xff] }
  0x4a   : > { %11296 = vmatprep.mubr.msk.f32.mxu0 %vm658_vm1, %v603_v23  ;;  %v2242_v23 = vld [vmem:[%s13203_s27 + $0x63] sm:$0xff] }
  0x4d   : > { %11297 = vmatmul.mubr.msk.f32.gmra.mrb[20].mxu0 %vm658_vm1, %v604_v24  ;;  %v2243_v24 = vld [vmem:[%s13203_s27 + $0x6b] sm:$0xff] }
  0x4e   : > { %11299 = vmatprep.mubr.msk.f32.mxu0 %vm658_vm1, %v605_v25  ;;  %v2244_v25 = vld [vmem:[%s13203_s27 + $0x73] sm:$0xff] }
  0x51   : > { %11300 = vmatmul.mubr.msk.f32.gmra.mrb[22].mxu0 %vm658_vm1, %v606_v26  ;;  %v2245_v26 = vld [vmem:[%s13203_s27 + $0x7b] sm:$0xff] }
  0x52   : > { %11302 = vmatprep.mubr.msk.f32.mxu0 %vm658_vm1, %v607_v27  ;;  %v2246_v27 = vld [vmem:[%s13203_s27 + $0x83] sm:$0xff] }
  0x55   : > { %11303 = vmatmul.mubr.msk.f32.gmra.mrb[24].mxu0 %vm658_vm1, %v608_v28  ;;  %v2247_v28 = vld [vmem:[%s13203_s27 + $0x8b] sm:$0xff] }
  0x56   : > { %11305 = vmatprep.mubr.msk.f32.mxu0 %vm658_vm1, %v609_v29  ;;  %v2248_v29 = vld [vmem:[%s13203_s27 + $0x93] sm:$0xff] }
  0x59   : > { %11306 = vmatmul.mubr.msk.f32.gmra.mrb[26].mxu0 %vm658_vm1, %v610_v30  ;;  %v2249_v30 = vld [vmem:[%s13203_s27 + $0x9b] sm:$0xff] }
  0x5a   : > { %11308 = vmatprep.mubr.msk.f32.mxu0 %vm658_vm1, %v611_v31  ;;  %v2250_v31 = vld [vmem:[%s13203_s27 + $0xa3] sm:$0xff] }
  0x5d   : > { %11309 = vmatmul.mubr.msk.f32.gmra.mrb[28].mxu0 %vm658_vm1, %v612_v32  ;;  %v2251_v32 = vld [vmem:[%s13203_s27 + $0xab] sm:$0xff] }
  0x5e   : > { %11311 = vmatprep.mubr.msk.f32.mxu0 %vm658_vm1, %v613_v33  ;;  %v2252_v33 = vld [vmem:[%s13203_s27 + $0xb3] sm:$0xff] }
  0x61   : > { %11312 = vmatmul.mubr.msk.f32.gmra.mrb[30].mxu0 %vm658_vm1, %v614_v34  ;;  %v2253_v34 = vld [vmem:[%s13203_s27 + $0xbb] sm:$0xff] }
  0x62   : > { %11322 = vmatprep.mubr.msk.f32.mxu0 %vm658_vm1, %v1372_v35  ;;  %v2254_v35 = vld [vmem:[%s13203_s27 + $0xc3] sm:$0xff] }
  0x65   : > { %11323 = vmatmul.mubr.msk.f32.vlgmr.msra.gmra.mrb[0].mxu0 %vm658_vm1, %v1373_v36  ;;  %v2255_v36 = vld [vmem:[%s13203_s27 + $0xcb] sm:$0xff] }
  0x66   : > { %11377 = vmatpush3.msk.msra.mxu0 %vm767_vm0, %v13212_v5  ;;  %11325 = vmatprep.mubr.msk.f32.mxu0 %vm658_vm1, %v13281_v37  ;;  %v1404_v5 = vld [vmem:[%s13203_s27 + $0x102] sm:$0xff] }
  0x67   : > { %11432 = vmatprep.subr.msk.mxu0 %vm767_vm0, %v13286_v38 }
  0x69   : > { %11326 = vmatmul.mubr.msk.f32.gmra.mrb[2].mxu0 %vm658_vm1, %v13294_v39 }
  0x6a   : > { %11328 = vmatprep.mubr.msk.f32.mxu0 %vm658_vm1, %v13297_v40 }
  0x6d   : > { %11329 = vmatmul.mubr.msk.f32.gmra.mrb[4].mxu0 %vm658_vm1, %v13306_v41 }
  0x6e   : > { %11331 = vmatprep.mubr.msk.f32.mxu0 %vm658_vm1, %v13309_v42 }
  0x71   : > { %11332 = vmatmul.mubr.msk.f32.gmra.mrb[6].mxu0 %vm658_vm1, %v13316_v43 }
  0x72   : > { %11334 = vmatprep.mubr.msk.f32.mxu0 %vm658_vm1, %v13319_v44 }
  0x75   : > { %11335 = vmatmul.mubr.msk.f32.gmra.mrb[8].mxu0 %vm658_vm1, %v13326_v45 }
  0x76   : > { %11337 = vmatprep.mubr.msk.f32.mxu0 %vm658_vm1, %v13329_v46 }
  0x79   : > { %11338 = vmatmul.mubr.msk.f32.gmra.mrb[10].mxu0 %vm658_vm1, %v1383_v47 }
  0x7a   : > { %11340 = vmatprep.mubr.msk.f32.mxu0 %vm658_vm1, %v1384_v48 }
  0x7d   : > { %11341 = vmatmul.mubr.msk.f32.gmra.mrb[12].mxu0 %vm658_vm1, %v1385_v49 }
  0x7e   : > { %11343 = vmatprep.mubr.msk.f32.mxu0 %vm658_vm1, %v1386_v50 }
  0x81   : > { %11344 = vmatmul.mubr.msk.f32.gmra.mrb[14].mxu0 %vm658_vm1, %v1387_v51 }
  0x82   : > { %11346 = vmatprep.mubr.msk.f32.mxu0 %vm658_vm1, %v1388_v52 }
  0x85   : > { %11347 = vmatmul.mubr.msk.f32.gmra.mrb[16].mxu0 %vm658_vm1, %v1389_v53 }
  0x86   : > { %11349 = vmatprep.mubr.msk.f32.mxu0 %vm658_vm1, %v1390_v54 }
  0x89   : > { %11350 = vmatmul.mubr.msk.f32.gmra.mrb[18].mxu0 %vm658_vm1, %v1391_v55 }
  0x8a   : > { %11352 = vmatprep.mubr.msk.f32.mxu0 %vm658_vm1, %v1392_v56 }
  0x8d   : > { %11353 = vmatmul.mubr.msk.f32.gmra.mrb[20].mxu0 %vm658_vm1, %v1393_v57 }
  0x8e   : > { %11355 = vmatprep.mubr.msk.f32.mxu0 %vm658_vm1, %v1394_v58 }
  0x91   : > { %11356 = vmatmul.mubr.msk.f32.gmra.mrb[22].mxu0 %vm658_vm1, %v1395_v59 }
  0x92   : > { %11358 = vmatprep.mubr.msk.f32.mxu0 %vm658_vm1, %v1396_v60 }
  0x95   : > { %11359 = vmatmul.mubr.msk.f32.gmra.mrb[24].mxu0 %vm658_vm1, %v1397_v61 }
  0x96   : > { %11361 = vmatprep.mubr.msk.f32.mxu0 %vm658_vm1, %v1398_v62 }
  0x99   : > { %11362 = vmatmul.mubr.msk.f32.gmra.mrb[26].mxu0 %vm658_vm1, %v1399_v63 }
  0x9a   : > { %11364 = vmatprep.mubr.msk.f32.mxu0 %vm658_vm1, %v1400_v1 }
  0x9d   : > { %11365 = vmatmul.mubr.msk.f32.gmra.mrb[28].mxu0 %vm658_vm1, %v1401_v2 }
  0x9e   : > { %11367 = vmatprep.mubr.msk.f32.mxu0 %vm658_vm1, %v1402_v3 }
  0xa1   : > { %11368 = vmatmul.mubr.msk.f32.gmra.mrb[30].mxu0 %vm658_vm1, %v1403_v4 }
  0xa2   : > { %11370 = vmatprep.mubr.msk.f32.mxu0 %vm658_vm1, %v1404_v5 }
  0xa5   : > { %11371 = vmatmul.mubr.msk.f32.gmra.mrb[32].mxu0 %vm658_vm1, %v1405_v6 }
  0xa6   : > { %11373 = vmatprep.mubr.msk.f32.mxu0 %vm658_vm1, %v1406_v7 }
  0xa9   : > { %11374 = vmatmul.mubr.msk.f32.gmra.mrb[34].mxu0 %vm658_vm1, %v1407_v8 }
  0xaa   : > { %11378 = vmatprep.mubr.msk.f32.mxu0 %vm658_vm1, %v13281_v37  ;;  %v2256_v37 = vld [vmem:[%s13203_s27 + $0xd3] sm:$0xff] }
  0xad   : > { %11379 = vmatmul.mubr.msk.f32.vlgmr.msra.gmra.mrb[0].mxu0 %vm658_vm1, %v13294_v39  ;;  %v2258_v39 = vld [vmem:[%s13203_s27 + $0xe3] sm:$0xff] }
  0xae   : > { %11433 = vmatpush3.msk.msra.mxu0 %vm767_vm0, %v13286_v38  ;;  %11381 = vmatprep.mubr.msk.f32.mxu0 %vm658_vm1, %v13297_v40  ;;  %v2257_v38 = vld [vmem:[%s13203_s27 + $0xdb] sm:$0xff]  ;;  %v2259_v40 = vld [vmem:[%s13203_s27 + $0xeb] sm:$0xff] }
  0xaf   : > { %11488 = vmatprep.subr.msk.mxu0 %vm767_vm0, %v10225_v9 }
  0xb1   : > { %11382 = vmatmul.mubr.msk.f32.gmra.mrb[2].mxu0 %vm658_vm1, %v13306_v41  ;;  %v2260_v41 = vld [vmem:[%s13203_s27 + $0xf3] sm:$0xff] }
  0xb2   : > { %11384 = vmatprep.mubr.msk.f32.mxu0 %vm658_vm1, %v13309_v42  ;;  %v2261_v42 = vld [vmem:[%s13203_s27 + $0xfb] sm:$0xff] }
  0xb5   : > { %11385 = vmatmul.mubr.msk.f32.gmra.mrb[4].mxu0 %vm658_vm1, %v13316_v43  ;;  %v2262_v43 = vld [vmem:[%s13203_s27 + $0x103] sm:$0xff] }
  0xb6   : > { %11387 = vmatprep.mubr.msk.f32.mxu0 %vm658_vm1, %v13319_v44  ;;  %v2263_v44 = vld [vmem:[%s13203_s27 + $0x10b] sm:$0xff] }
  0xb9   : > { %11388 = vmatmul.mubr.msk.f32.gmra.mrb[6].mxu0 %vm658_vm1, %v13326_v45  ;;  %v2264_v45 = vld [vmem:[%s13203_s27 + $0x113] sm:$0xff] }
  0xba   : > { %11390 = vmatprep.mubr.msk.f32.mxu0 %vm658_vm1, %v13329_v46  ;;  %v2265_v46 = vld [vmem:[%s13203_s27 + $0x11b] sm:$0xff] }
  0xbd   : > { %11391 = vmatmul.mubr.msk.f32.gmra.mrb[8].mxu0 %vm658_vm1, %v1383_v47  ;;  %v2266_v47 = vld [vmem:[%s13203_s27 + $0x123] sm:$0xff] }
  0xbe   : > { %11393 = vmatprep.mubr.msk.f32.mxu0 %vm658_vm1, %v1384_v48  ;;  %v2267_v48 = vld [vmem:[%s13203_s27 + $0x12b] sm:$0xff] }
  0xc1   : > { %11394 = vmatmul.mubr.msk.f32.gmra.mrb[10].mxu0 %vm658_vm1, %v1385_v49  ;;  %v2662_v49 = vld [vmem:[%s13203_s27 + $0x14] sm:$0xff] }
  0xc2   : > { %11396 = vmatprep.mubr.msk.f32.mxu0 %vm658_vm1, %v1386_v50  ;;  %v2663_v50 = vld [vmem:[%s13203_s27 + $0x1c] sm:$0xff] }
  0xc5   : > { %11397 = vmatmul.mubr.msk.f32.gmra.mrb[12].mxu0 %vm658_vm1, %v1387_v51  ;;  %v13522_v51 = vld [vmem:[%s13203_s27 + $0x24] sm:$0xff] }
  0xc6   : > { %11399 = vmatprep.mubr.msk.f32.mxu0 %vm658_vm1, %v1388_v52  ;;  %v13527_v52 = vld [vmem:[%s17197_s1 + $0x1c] sm:$0xf] }
  0xc9   : > { %11400 = vmatmul.mubr.msk.f32.gmra.mrb[14].mxu0 %vm658_vm1, %v1389_v53  ;;  %v13535_v53 = vld [vmem:[%s13203_s27 + $0x2c] sm:$0xff] }
  0xca   : > { %11402 = vmatprep.mubr.msk.f32.mxu0 %vm658_vm1, %v1390_v54  ;;  %v13538_v54 = vld [vmem:[%s13203_s27 + $0x34] sm:$0xff] }
  0xcd   : > { %11403 = vmatmul.mubr.msk.f32.gmra.mrb[16].mxu0 %vm658_vm1, %v1391_v55  ;;  %v13547_v55 = vld [vmem:[%s13203_s27 + $0x3c] sm:$0xff] }
  0xce   : > { %11405 = vmatprep.mubr.msk.f32.mxu0 %vm658_vm1, %v1392_v56  ;;  %v13550_v56 = vld [vmem:[%s13203_s27 + $0x44] sm:$0xff] }
  0xd1   : > { %11406 = vmatmul.mubr.msk.f32.gmra.mrb[18].mxu0 %vm658_vm1, %v1393_v57  ;;  %v13557_v57 = vld [vmem:[%s13203_s27 + $0x4c] sm:$0xff] }
  0xd2   : > { %11408 = vmatprep.mubr.msk.f32.mxu0 %vm658_vm1, %v1394_v58  ;;  %v13560_v58 = vld [vmem:[%s13203_s27 + $0x54] sm:$0xff] }
  0xd5   : > { %11409 = vmatmul.mubr.msk.f32.gmra.mrb[20].mxu0 %vm658_vm1, %v1395_v59  ;;  %v13567_v59 = vld [vmem:[%s13203_s27 + $0x5c] sm:$0xff] }
  0xd6   : > { %11411 = vmatprep.mubr.msk.f32.mxu0 %vm658_vm1, %v1396_v60  ;;  %v13570_v60 = vld [vmem:[%s13203_s27 + $0x64] sm:$0xff] }
  0xd9   : > { %11412 = vmatmul.mubr.msk.f32.gmra.mrb[22].mxu0 %vm658_vm1, %v1397_v61  ;;  %v13577_v61 = vld [vmem:[%s13203_s27 + $0x6c] sm:$0xff] }
  0xda   : > { %11414 = vmatprep.mubr.msk.f32.mxu0 %vm658_vm1, %v1398_v62  ;;  %v13580_v62 = vld [vmem:[%s13203_s27 + $0x74] sm:$0xff] }
  0xdd   : > { %11415 = vmatmul.mubr.msk.f32.gmra.mrb[24].mxu0 %vm658_vm1, %v1399_v63  ;;  %v13587_v63 = vld [vmem:[%s13203_s27 + $0x7c] sm:$0xff] }
  0xde   : > { %11417 = vmatprep.mubr.msk.f32.mxu0 %vm658_vm1, %v1400_v1  ;;  %v13590_v1 = vld [vmem:[%s13203_s27 + $0x84] sm:$0xff] }
  0xe1   : > { %11418 = vmatmul.mubr.msk.f32.gmra.mrb[26].mxu0 %vm658_vm1, %v1401_v2  ;;  %v13597_v2 = vld [vmem:[%s13203_s27 + $0x8c] sm:$0xff] }
  0xe2   : > { %11420 = vmatprep.mubr.msk.f32.mxu0 %vm658_vm1, %v1402_v3  ;;  %v13600_v3 = vld [vmem:[%s13203_s27 + $0x94] sm:$0xff] }
  0xe5   : > { %11421 = vmatmul.mubr.msk.f32.gmra.mrb[28].mxu0 %vm658_vm1, %v1403_v4  ;;  %v13607_v4 = vld [vmem:[%s13203_s27 + $0x9c] sm:$0xff] }
  0xe6   : > { %11423 = vmatprep.mubr.msk.f32.mxu0 %vm658_vm1, %v1404_v5  ;;  %v13610_v5 = vld [vmem:[%s13203_s27 + $0xa4] sm:$0xff] }
  0xe9   : > { %11424 = vmatmul.mubr.msk.f32.gmra.mrb[30].mxu0 %vm658_vm1, %v1405_v6  ;;  %v13617_v6 = vld [vmem:[%s13203_s27 + $0xac] sm:$0xff] }
  0xea   : > { %11426 = vmatprep.mubr.msk.f32.mxu0 %vm658_vm1, %v1406_v7  ;;  %v13620_v7 = vld [vmem:[%s13203_s27 + $0xb4] sm:$0xff] }
  0xed   : > { %11427 = vmatmul.mubr.msk.f32.gmra.mrb[32].mxu0 %vm658_vm1, %v1407_v8  ;;  %v13627_v8 = vld [vmem:[%s13203_s27 + $0xbc] sm:$0xff] }
  0xee   : > { %11429 = vmatprep.mubr.msk.f32.mxu0 %vm658_vm1, %v1836_v10  ;;  %v13637_v10 = vld [vmem:[%s13203_s27 + $0xcc] sm:$0xff] }
  0xf1   : > { %11430 = vmatmul.mubr.msk.f32.gmra.mrb[34].mxu0 %vm658_vm1, %v1837_v11  ;;  %v13640_v11 = vld [vmem:[%s13203_s27 + $0xd4] sm:$0xff] }
  0xf2   : > { %11434 = vmatprep.mubr.msk.f32.mxu0 %vm658_vm1, %v2232_v12  ;;  %v13647_v12 = vld [vmem:[%s13203_s27 + $0xdc] sm:$0xff] }
  0xf5   : > { %11435 = vmatmul.mubr.msk.f32.vlgmr.msra.gmra.mrb[0].mxu0 %vm658_vm1, %v2233_v13  ;;  %v13650_v13 = vld [vmem:[%s13203_s27 + $0xe4] sm:$0xff] }
  0xf6   : > { %11489 = vmatpush3.msk.msra.mxu0 %vm767_vm0, %v10225_v9  ;;  %11437 = vmatprep.mubr.msk.f32.mxu0 %vm658_vm1, %v2234_v14  ;;  %v13630_v9 = vld [vmem:[%s13203_s27 + $0xc4] sm:$0xff]  ;;  %v13657_v14 = vld [vmem:[%s13203_s27 + $0xec] sm:$0xff] }
  0xf7   : > { %11544 = vmatprep.subr.msk.mxu0 %vm767_vm0, %v13445_v15 }
  0xf9   : > { %11438 = vmatmul.mubr.msk.f32.gmra.mrb[2].mxu0 %vm658_vm1, %v2235_v16  ;;  %v13667_v16 = vld [vmem:[%s13203_s27 + $0xfc] sm:$0xff] }
  0xfa   : > { %11440 = vmatprep.mubr.msk.f32.mxu0 %vm658_vm1, %v2236_v17  ;;  %v13670_v17 = vld [vmem:[%s13203_s27 + $0x104] sm:$0xff] }
  0xfd   : > { %11441 = vmatmul.mubr.msk.f32.gmra.mrb[4].mxu0 %vm658_vm1, %v2237_v18  ;;  %v13677_v18 = vld [vmem:[%s13203_s27 + $0x10c] sm:$0xff] }
  0xfe   : > { %11443 = vmatprep.mubr.msk.f32.mxu0 %vm658_vm1, %v2238_v19  ;;  %v13680_v19 = vld [vmem:[%s13203_s27 + $0x114] sm:$0xff] }
 0x101   : > { %11444 = vmatmul.mubr.msk.f32.gmra.mrb[6].mxu0 %vm658_vm1, %v2239_v20  ;;  %v13687_v20 = vld [vmem:[%s13203_s27 + $0x11c] sm:$0xff] }
 0x102   : > { %11446 = vmatprep.mubr.msk.f32.mxu0 %vm658_vm1, %v2240_v21  ;;  %v13690_v21 = vld [vmem:[%s13203_s27 + $0x124] sm:$0xff] }
 0x105   : > { %11447 = vmatmul.mubr.msk.f32.gmra.mrb[8].mxu0 %vm658_vm1, %v2241_v22  ;;  %v13697_v22 = vld [vmem:[%s13203_s27 + $0x12c] sm:$0xff] }
 0x106   : > { %11449 = vmatprep.mubr.msk.f32.mxu0 %vm658_vm1, %v2242_v23  ;;  %v13706_v23 = vld [vmem:[%s17197_s1 + $0x20] sm:$0xf] }
 0x109   : > { %11450 = vmatmul.mubr.msk.f32.gmra.mrb[10].mxu0 %vm658_vm1, %v2243_v24  ;;  %v10036_v24 = vld [vmem:[%s17197_s1 + $0x4] sm:$0xf]  ;;  %s10615_s1 = sshll.u32 %s13158_s22, 4  ;;  %s13056_s22 = smov [#allocation12]  }
 0x10a   : > { %11452 = vmatprep.mubr.msk.f32.mxu0 %vm658_vm1, %v2244_v25  ;;  %v620_v25 = vld [vmem:[%s13203_s27 + $0x1] sm:$0xff]  ;;  %11208 = vmatprep.subr.msk.mxu1 %vm767_vm0, %v10036_v24 }
 0x10b   : > { %11209 = vmatpush3.msk.msra.mxu1 %vm767_vm0, %v10036_v24  ;;  %11210 = vmatprep.mubr.msk.f32.mxu1 %vm658_vm1, %v620_v25  ;;  %v3542_v24 = vld [vmem:[%s13203_s27 + $0xc5] sm:$0xff]  ;;  %v3543_v25 = vld [vmem:[%s13203_s27 + $0xcd] sm:$0xff] }
 0x10c   : > { %12398 = vmatprep.subr.msk.mxu1 %vm767_vm0, %v13188_v0 }
 0x10d   : > { %11453 = vmatmul.mubr.msk.f32.gmra.mrb[12].mxu0 %vm658_vm1, %v2245_v26  ;;  %v621_v26 = vld [vmem:[%s13203_s27 + $0x9] sm:$0xff] }
 0x10e   : > { %11455 = vmatprep.mubr.msk.f32.mxu0 %vm658_vm1, %v2246_v27  ;;  %11211 = vmatmul.mubr.msk.f32.vlgmr.msra.gmra.mrb[0].mxu1 %vm658_vm1, %v621_v26  ;;  %v622_v27 = vld [vmem:[%s13203_s27 + $0x11] sm:$0xff] }
 0x10f   : > { %12399 = vmatpush3.msk.msra.mxu1 %vm767_vm0, %v13188_v0  ;;  %11213 = vmatprep.mubr.msk.f32.mxu1 %vm658_vm1, %v622_v27  ;;  %v625_v0 = vld [vmem:[%s13203_s27 + $0x29] sm:$0xff]  ;;  %v3544_v26 = vld [vmem:[%s13203_s27 + $0xd5] sm:$0xff]  ;;  %v3545_v27 = vld [vmem:[%s13203_s27 + $0xdd] sm:$0xff] }
 0x111   : > { %11456 = vmatmul.mubr.msk.f32.gmra.mrb[14].mxu0 %vm658_vm1, %v2247_v28  ;;  %v623_v28 = vld [vmem:[%s13203_s27 + $0x19] sm:$0xff] }
 0x112   : > { %11458 = vmatprep.mubr.msk.f32.mxu0 %vm658_vm1, %v2248_v29  ;;  %11214 = vmatmul.mubr.msk.f32.gmra.mrb[2].mxu1 %vm658_vm1, %v623_v28  ;;  %v624_v29 = vld [vmem:[%s13203_s27 + $0x21] sm:$0xff] }
 0x113   : > { %11216 = vmatprep.mubr.msk.f32.mxu1 %vm658_vm1, %v624_v29  ;;  %v3546_v28 = vld [vmem:[%s13203_s27 + $0xe5] sm:$0xff]  ;;  %v3547_v29 = vld [vmem:[%s13203_s27 + $0xed] sm:$0xff] }
 0x115   : > { %11459 = vmatmul.mubr.msk.f32.gmra.mrb[16].mxu0 %vm658_vm1, %v2249_v30  ;;  %v626_v30 = vld [vmem:[%s13203_s27 + $0x31] sm:$0xff] }
 0x116   : > { %11461 = vmatprep.mubr.msk.f32.mxu0 %vm658_vm1, %v2250_v31  ;;  %11217 = vmatmul.mubr.msk.f32.gmra.mrb[4].mxu1 %vm658_vm1, %v625_v0  ;;  %v627_v31 = vld [vmem:[%s13203_s27 + $0x39] sm:$0xff] }
 0x117   : > { %11219 = vmatprep.mubr.msk.f32.mxu1 %vm658_vm1, %v626_v30  ;;  %v3548_v0 = vld [vmem:[%s13203_s27 + $0xf5] sm:$0xff]  ;;  %v3549_v30 = vld [vmem:[%s13203_s27 + $0xfd] sm:$0xff] }
 0x119   : > { %11462 = vmatmul.mubr.msk.f32.gmra.mrb[18].mxu0 %vm658_vm1, %v2251_v32  ;;  %v628_v32 = vld [vmem:[%s13203_s27 + $0x41] sm:$0xff] }
 0x11a   : > { %11464 = vmatprep.mubr.msk.f32.mxu0 %vm658_vm1, %v2252_v33  ;;  %11220 = vmatmul.mubr.msk.f32.gmra.mrb[6].mxu1 %vm658_vm1, %v627_v31  ;;  %v629_v33 = vld [vmem:[%s13203_s27 + $0x49] sm:$0xff] }
 0x11b   : > { %11222 = vmatprep.mubr.msk.f32.mxu1 %vm658_vm1, %v628_v32  ;;  %v3550_v31 = vld [vmem:[%s13203_s27 + $0x105] sm:$0xff]  ;;  %v3551_v32 = vld [vmem:[%s13203_s27 + $0x10d] sm:$0xff] }
 0x11d   : > { %11465 = vmatmul.mubr.msk.f32.gmra.mrb[20].mxu0 %vm658_vm1, %v2253_v34  ;;  %v630_v34 = vld [vmem:[%s13203_s27 + $0x51] sm:$0xff] }
 0x11e   : > { %11467 = vmatprep.mubr.msk.f32.mxu0 %vm658_vm1, %v2254_v35  ;;  %11223 = vmatmul.mubr.msk.f32.gmra.mrb[8].mxu1 %vm658_vm1, %v629_v33  ;;  %v631_v35 = vld [vmem:[%s13203_s27 + $0x59] sm:$0xff] }
 0x11f   : > { %11225 = vmatprep.mubr.msk.f32.mxu1 %vm658_vm1, %v630_v34  ;;  %v3552_v33 = vld [vmem:[%s13203_s27 + $0x115] sm:$0xff]  ;;  %v3553_v34 = vld [vmem:[%s13203_s27 + $0x11d] sm:$0xff] }
 0x121   : > { %11468 = vmatmul.mubr.msk.f32.gmra.mrb[22].mxu0 %vm658_vm1, %v2255_v36  ;;  %v632_v36 = vld [vmem:[%s13203_s27 + $0x61] sm:$0xff] }
 0x122   : > { %11470 = vmatprep.mubr.msk.f32.mxu0 %vm658_vm1, %v2256_v37  ;;  %11226 = vmatmul.mubr.msk.f32.gmra.mrb[10].mxu1 %vm658_vm1, %v631_v35  ;;  %v633_v37 = vld [vmem:[%s13203_s27 + $0x69] sm:$0xff] }
 0x123   : > { %11228 = vmatprep.mubr.msk.f32.mxu1 %vm658_vm1, %v632_v36  ;;  %v3554_v35 = vld [vmem:[%s13203_s27 + $0x125] sm:$0xff]  ;;  %v3555_v36 = vld [vmem:[%s13203_s27 + $0x12d] sm:$0xff] }
 0x125   : > { %11471 = vmatmul.mubr.msk.f32.gmra.mrb[24].mxu0 %vm658_vm1, %v2257_v38  ;;  %v634_v38 = vld [vmem:[%s13203_s27 + $0x71] sm:$0xff] }
 0x126   : > { %11473 = vmatprep.mubr.msk.f32.mxu0 %vm658_vm1, %v2258_v39  ;;  %11229 = vmatmul.mubr.msk.f32.gmra.mrb[12].mxu1 %vm658_vm1, %v633_v37  ;;  %v635_v39 = vld [vmem:[%s13203_s27 + $0x79] sm:$0xff] }
 0x127   : > { %11231 = vmatprep.mubr.msk.f32.mxu1 %vm658_vm1, %v634_v38  ;;  %v3556_v37 = vld [vmem:[%s13203_s27 + $0x135] sm:$0xff]  ;;  %v3557_v38 = vld [vmem:[%s13203_s27 + $0x13d] sm:$0xff] }
 0x129   : > { %11474 = vmatmul.mubr.msk.f32.gmra.mrb[26].mxu0 %vm658_vm1, %v2259_v40  ;;  %v636_v40 = vld [vmem:[%s13203_s27 + $0x81] sm:$0xff] }
 0x12a   : > { %11476 = vmatprep.mubr.msk.f32.mxu0 %vm658_vm1, %v2260_v41  ;;  %11232 = vmatmul.mubr.msk.f32.gmra.mrb[14].mxu1 %vm658_vm1, %v635_v39  ;;  %v637_v41 = vld [vmem:[%s13203_s27 + $0x89] sm:$0xff] }
 0x12b   : > { %11234 = vmatprep.mubr.msk.f32.mxu1 %vm658_vm1, %v636_v40  ;;  %v3952_v39 = vld [vmem:[%s13203_s27 + $0x26] sm:$0xff]  ;;  %v3953_v40 = vld [vmem:[%s13203_s27 + $0x2e] sm:$0xff] }
 0x12d   : > { %11477 = vmatmul.mubr.msk.f32.gmra.mrb[28].mxu0 %vm658_vm1, %v2261_v42  ;;  %v638_v42 = vld [vmem:[%s13203_s27 + $0x91] sm:$0xff] }
 0x12e   : > { %11479 = vmatprep.mubr.msk.f32.mxu0 %vm658_vm1, %v2262_v43  ;;  %11235 = vmatmul.mubr.msk.f32.gmra.mrb[16].mxu1 %vm658_vm1, %v637_v41  ;;  %v639_v43 = vld [vmem:[%s13203_s27 + $0x99] sm:$0xff] }
 0x12f   : > { %11237 = vmatprep.mubr.msk.f32.mxu1 %vm658_vm1, %v638_v42  ;;  %v3954_v41 = vld [vmem:[%s13203_s27 + $0x36] sm:$0xff]  ;;  %v3955_v42 = vld [vmem:[%s13203_s27 + $0x3e] sm:$0xff] }
 0x131   : > { %11480 = vmatmul.mubr.msk.f32.gmra.mrb[30].mxu0 %vm658_vm1, %v2263_v44  ;;  %v640_v44 = vld [vmem:[%s13203_s27 + $0xa1] sm:$0xff] }
 0x132   : > { %11482 = vmatprep.mubr.msk.f32.mxu0 %vm658_vm1, %v2264_v45  ;;  %11238 = vmatmul.mubr.msk.f32.gmra.mrb[18].mxu1 %vm658_vm1, %v639_v43  ;;  %v641_v45 = vld [vmem:[%s13203_s27 + $0xa9] sm:$0xff] }
 0x133   : > { %11240 = vmatprep.mubr.msk.f32.mxu1 %vm658_vm1, %v640_v44  ;;  %v3956_v43 = vld [vmem:[%s13203_s27 + $0x46] sm:$0xff]  ;;  %v3957_v44 = vld [vmem:[%s13203_s27 + $0x4e] sm:$0xff] }
 0x135   : > { %11483 = vmatmul.mubr.msk.f32.gmra.mrb[32].mxu0 %vm658_vm1, %v2265_v46  ;;  %v642_v46 = vld [vmem:[%s13203_s27 + $0xb1] sm:$0xff] }
 0x136   : > { %11485 = vmatprep.mubr.msk.f32.mxu0 %vm658_vm1, %v2266_v47  ;;  %11241 = vmatmul.mubr.msk.f32.gmra.mrb[20].mxu1 %vm658_vm1, %v641_v45  ;;  %v643_v47 = vld [vmem:[%s13203_s27 + $0xb9] sm:$0xff] }
 0x137   : > { %11243 = vmatprep.mubr.msk.f32.mxu1 %vm658_vm1, %v642_v46  ;;  %v3958_v45 = vld [vmem:[%s13203_s27 + $0x56] sm:$0xff]  ;;  %v3959_v46 = vld [vmem:[%s13203_s27 + $0x5e] sm:$0xff] }
 0x139   : > { %11486 = vmatmul.mubr.msk.f32.gmra.mrb[34].mxu0 %vm658_vm1, %v2267_v48  ;;  %v644_v48 = vld [vmem:[%s13203_s27 + $0xc1] sm:$0xff] }
 0x13a   : > { %11490 = vmatprep.mubr.msk.f32.mxu0 %vm658_vm1, %v2662_v49  ;;  %11244 = vmatmul.mubr.msk.f32.gmra.mrb[22].mxu1 %vm658_vm1, %v643_v47  ;;  %v645_v49 = vld [vmem:[%s13203_s27 + $0xc9] sm:$0xff] }
 0x13b   : > { %11246 = vmatprep.mubr.msk.f32.mxu1 %vm658_vm1, %v644_v48  ;;  %v3960_v47 = vld [vmem:[%s13203_s27 + $0x66] sm:$0xff]  ;;  %v3961_v48 = vld [vmem:[%s13203_s27 + $0x6e] sm:$0xff] }
 0x13d   : > { %11491 = vmatmul.mubr.msk.f32.vlgmr.msra.gmra.mrb[0].mxu0 %vm658_vm1, %v2663_v50  ;;  %v646_v50 = vld [vmem:[%s13203_s27 + $0xd1] sm:$0xff] }
 0x13e   : > { %11545 = vmatpush3.msk.msra.mxu0 %vm767_vm0, %v13445_v15  ;;  %11493 = vmatprep.mubr.msk.f32.mxu0 %vm658_vm1, %v13522_v51  ;;  %v13660_v15 = vld [vmem:[%s13203_s27 + $0xf4] sm:$0xff] }
 0x13f   : > { %11600 = vmatprep.subr.msk.mxu0 %vm767_vm0, %v13527_v52  ;;  %11247 = vmatmul.mubr.msk.f32.gmra.mrb[24].mxu1 %vm658_vm1, %v645_v49  ;;  %v3962_v49 = vld [vmem:[%s13203_s27 + $0x76] sm:$0xff] }
 0x140   : > { %11249 = vmatprep.mubr.msk.f32.mxu1 %vm658_vm1, %v646_v50  ;;  %v3963_v50 = vld [vmem:[%s13203_s27 + $0x7e] sm:$0xff] }
 0x141   : > { %11494 = vmatmul.mubr.msk.f32.gmra.mrb[2].mxu0 %vm658_vm1, %v13535_v53 }
 0x142   : > { %11496 = vmatprep.mubr.msk.f32.mxu0 %vm658_vm1, %v13538_v54 }
 0x145   : > { %11497 = vmatmul.mubr.msk.f32.gmra.mrb[4].mxu0 %vm658_vm1, %v13547_v55 }
 0x146   : > { %11499 = vmatprep.mubr.msk.f32.mxu0 %vm658_vm1, %v13550_v56 }
 0x149   : > { %11500 = vmatmul.mubr.msk.f32.gmra.mrb[6].mxu0 %vm658_vm1, %v13557_v57 }
 0x14a   : > { %11502 = vmatprep.mubr.msk.f32.mxu0 %vm658_vm1, %v13560_v58 }
 0x14d   : > { %11503 = vmatmul.mubr.msk.f32.gmra.mrb[8].mxu0 %vm658_vm1, %v13567_v59 }
 0x14e   : > { %11505 = vmatprep.mubr.msk.f32.mxu0 %vm658_vm1, %v13570_v60 }
 0x151   : > { %11506 = vmatmul.mubr.msk.f32.gmra.mrb[10].mxu0 %vm658_vm1, %v13577_v61 }
 0x152   : > { %11508 = vmatprep.mubr.msk.f32.mxu0 %vm658_vm1, %v13580_v62 }
 0x155   : > { %11509 = vmatmul.mubr.msk.f32.gmra.mrb[12].mxu0 %vm658_vm1, %v13587_v63 }
 0x156   : > { %11511 = vmatprep.mubr.msk.f32.mxu0 %vm658_vm1, %v13590_v1 }
 0x159   : > { %11512 = vmatmul.mubr.msk.f32.gmra.mrb[14].mxu0 %vm658_vm1, %v13597_v2 }
 0x15a   : > { %11514 = vmatprep.mubr.msk.f32.mxu0 %vm658_vm1, %v13600_v3 }
 0x15d   : > { %11515 = vmatmul.mubr.msk.f32.gmra.mrb[16].mxu0 %vm658_vm1, %v13607_v4 }
 0x15e   : > { %11517 = vmatprep.mubr.msk.f32.mxu0 %vm658_vm1, %v13610_v5 }
 0x161   : > { %11518 = vmatmul.mubr.msk.f32.gmra.mrb[18].mxu0 %vm658_vm1, %v13617_v6 }
 0x162   : > { %11520 = vmatprep.mubr.msk.f32.mxu0 %vm658_vm1, %v13620_v7 }
 0x165   : > { %11521 = vmatmul.mubr.msk.f32.gmra.mrb[20].mxu0 %vm658_vm1, %v13627_v8 }
 0x166   : > { %11523 = vmatprep.mubr.msk.f32.mxu0 %vm658_vm1, %v13630_v9 }
 0x169   : > { %11524 = vmatmul.mubr.msk.f32.gmra.mrb[22].mxu0 %vm658_vm1, %v13637_v10 }
 0x16a   : > { %11526 = vmatprep.mubr.msk.f32.mxu0 %vm658_vm1, %v13640_v11 }
 0x16d   : > { %11527 = vmatmul.mubr.msk.f32.gmra.mrb[24].mxu0 %vm658_vm1, %v13647_v12 }
 0x16e   : > { %11529 = vmatprep.mubr.msk.f32.mxu0 %vm658_vm1, %v13650_v13 }
 0x171   : > { %11530 = vmatmul.mubr.msk.f32.gmra.mrb[26].mxu0 %vm658_vm1, %v13657_v14 }
 0x172   : > { %11532 = vmatprep.mubr.msk.f32.mxu0 %vm658_vm1, %v13660_v15 }
 0x175   : > { %11533 = vmatmul.mubr.msk.f32.gmra.mrb[28].mxu0 %vm658_vm1, %v13667_v16 }
 0x176   : > { %11535 = vmatprep.mubr.msk.f32.mxu0 %vm658_vm1, %v13670_v17 }
 0x179   : > { %11536 = vmatmul.mubr.msk.f32.gmra.mrb[30].mxu0 %vm658_vm1, %v13677_v18 }
 0x17a   : > { %11538 = vmatprep.mubr.msk.f32.mxu0 %vm658_vm1, %v13680_v19 }
 0x17d   : > { %11539 = vmatmul.mubr.msk.f32.gmra.mrb[32].mxu0 %vm658_vm1, %v13687_v20 }
 0x17e   : > { %11541 = vmatprep.mubr.msk.f32.mxu0 %vm658_vm1, %v13690_v21 }
 0x181   : > { %11542 = vmatmul.mubr.msk.f32.gmra.mrb[34].mxu0 %vm658_vm1, %v13697_v22 }
 0x182   : > { %11546 = vmatprep.mubr.msk.f32.mxu0 %vm658_vm1, %v13522_v51  ;;  %v647_v51 = vld [vmem:[%s13203_s27 + $0xd9] sm:$0xff] }
 0x183   : > { %11250 = vmatmul.mubr.msk.f32.gmra.mrb[26].mxu1 %vm658_vm1, %v647_v51  ;;  %v3964_v51 = vld [vmem:[%s13203_s27 + $0x86] sm:$0xff] }
 0x185   : > { %11547 = vmatmul.mubr.msk.f32.vlgmr.msra.gmra.mrb[0].mxu0 %vm658_vm1, %v13535_v53  ;;  %v649_v53 = vld [vmem:[%s13203_s27 + $0xe9] sm:$0xff] }
 0x186   : > { %11601 = vmatpush3.msk.msra.mxu0 %vm767_vm0, %v13527_v52  ;;  %11549 = vmatprep.mubr.msk.f32.mxu0 %vm658_vm1, %v13538_v54  ;;  %v648_v52 = vld [vmem:[%s13203_s27 + $0xe1] sm:$0xff]  ;;  %v3126_v54 = vld [vmem:[%s13203_s27 + $0x134] sm:$0xff] }
 0x187   : > { %11656 = vmatprep.subr.msk.mxu0 %vm767_vm0, %v13706_v23  ;;  %11252 = vmatprep.mubr.msk.f32.mxu1 %vm658_vm1, %v648_v52  ;;  %v3965_v52 = vld [vmem:[%s13203_s27 + $0x8e] sm:$0xff] }
 0x188   : > { %11253 = vmatmul.mubr.msk.f32.gmra.mrb[28].mxu1 %vm658_vm1, %v649_v53  ;;  %v3966_v53 = vld [vmem:[%s13203_s27 + $0x96] sm:$0xff] }
 0x189   : > { %11550 = vmatmul.mubr.msk.f32.gmra.mrb[2].mxu0 %vm658_vm1, %v13547_v55  ;;  %v650_v55 = vld [vmem:[%s13203_s27 + $0xf1] sm:$0xff] }
 0x18a   : > { %11552 = vmatprep.mubr.msk.f32.mxu0 %vm658_vm1, %v13550_v56  ;;  %v3127_v56 = vld [vmem:[%s13203_s27 + $0x13c] sm:$0xff]  ;;  %11255 = vmatprep.mubr.msk.f32.mxu1 %vm658_vm1, %v650_v55  ;;  %v3968_v55 = vld [vmem:[%s13203_s27 + $0xa6] sm:$0xff] }
 0x18d   : > { %11553 = vmatmul.mubr.msk.f32.gmra.mrb[4].mxu0 %vm658_vm1, %v13557_v57  ;;  %v651_v57 = vld [vmem:[%s13203_s27 + $0xf9] sm:$0xff] }
 0x18e   : > { %11555 = vmatprep.mubr.msk.f32.mxu0 %vm658_vm1, %v13560_v58  ;;  %v3522_v58 = vld [vmem:[%s13203_s27 + $0x25] sm:$0xff]  ;;  %11256 = vmatmul.mubr.msk.f32.gmra.mrb[30].mxu1 %vm658_vm1, %v651_v57  ;;  %v3970_v57 = vld [vmem:[%s13203_s27 + $0xb6] sm:$0xff] }
 0x191   : > { %11556 = vmatmul.mubr.msk.f32.gmra.mrb[6].mxu0 %vm658_vm1, %v13567_v59  ;;  %v652_v59 = vld [vmem:[%s13203_s27 + $0x101] sm:$0xff] }
 0x192   : > { %11558 = vmatprep.mubr.msk.f32.mxu0 %vm658_vm1, %v13570_v60  ;;  %v3523_v60 = vld [vmem:[%s13203_s27 + $0x2d] sm:$0xff]  ;;  %11258 = vmatprep.mubr.msk.f32.mxu1 %vm658_vm1, %v652_v59 }
 0x193   : > { %v3972_v59 = vld [vmem:[%s13203_s27 + $0xc6] sm:$0xff] }
 0x195   : > { %11559 = vmatmul.mubr.msk.f32.gmra.mrb[8].mxu0 %vm658_vm1, %v13577_v61  ;;  %v653_v61 = vld [vmem:[%s13203_s27 + $0x109] sm:$0xff] }
 0x196   : > { %11561 = vmatprep.mubr.msk.f32.mxu0 %vm658_vm1, %v13580_v62  ;;  %v3524_v62 = vld [vmem:[%s13203_s27 + $0x35] sm:$0xff]  ;;  %11259 = vmatmul.mubr.msk.f32.gmra.mrb[32].mxu1 %vm658_vm1, %v653_v61 }
 0x197   : > { %v3974_v61 = vld [vmem:[%s13203_s27 + $0xd6] sm:$0xff] }
 0x199   : > { %11562 = vmatmul.mubr.msk.f32.gmra.mrb[10].mxu0 %vm658_vm1, %v13587_v63  ;;  %v654_v63 = vld [vmem:[%s13203_s27 + $0x111] sm:$0xff] }
 0x19a   : > { %11564 = vmatprep.mubr.msk.f32.mxu0 %vm658_vm1, %v13590_v1  ;;  %v3525_v1 = vld [vmem:[%s13203_s27 + $0x3d] sm:$0xff]  ;;  %11261 = vmatprep.mubr.msk.f32.mxu1 %vm658_vm1, %v654_v63  ;;  %v3976_v63 = vld [vmem:[%s13203_s27 + $0xe6] sm:$0xff] }
 0x19d   : > { %11565 = vmatmul.mubr.msk.f32.gmra.mrb[12].mxu0 %vm658_vm1, %v13597_v2  ;;  %v655_v2 = vld [vmem:[%s13203_s27 + $0x119] sm:$0xff] }
 0x19e   : > { %11567 = vmatprep.mubr.msk.f32.mxu0 %vm658_vm1, %v13600_v3  ;;  %v3526_v3 = vld [vmem:[%s13203_s27 + $0x45] sm:$0xff]  ;;  %11262 = vmatmul.mubr.msk.f32.gmra.mrb[34].mxu1 %vm658_vm1, %v655_v2  ;;  %v3978_v2 = vld [vmem:[%s13203_s27 + $0xf6] sm:$0xff] }
 0x1a1   : > { %11568 = vmatmul.mubr.msk.f32.gmra.mrb[14].mxu0 %vm658_vm1, %v13607_v4  ;;  %v615_v4 = vld [vmem:[%s13203_s27 + $0x100] sm:$0xff] }
 0x1a2   : > { %11570 = vmatprep.mubr.msk.f32.mxu0 %vm658_vm1, %v13610_v5  ;;  %v3527_v5 = vld [vmem:[%s13203_s27 + $0x4d] sm:$0xff]  ;;  %11314 = vmatprep.mubr.msk.f32.mxu1 %vm658_vm1, %v615_v4 }
 0x1a3   : > { %v3980_v4 = vld [vmem:[%s13203_s27 + $0x106] sm:$0xff] }
 0x1a5   : > { %11571 = vmatmul.mubr.msk.f32.gmra.mrb[16].mxu0 %vm658_vm1, %v13617_v6  ;;  %v616_v6 = vld [vmem:[%s13203_s27 + $0x108] sm:$0xff] }
 0x1a6   : > { %11573 = vmatprep.mubr.msk.f32.mxu0 %vm658_vm1, %v13620_v7  ;;  %v3528_v7 = vld [vmem:[%s13203_s27 + $0x55] sm:$0xff]  ;;  %11315 = vmatmul.mubr.msk.f32.vlgmr.msra.gmra.mrb[32].mxu1 %vm658_vm1, %v616_v6 }
 0x1a7   : > { %v3982_v6 = vld [vmem:[%s13203_s27 + $0x116] sm:$0xff] }
 0x1a9   : > { %11574 = vmatmul.mubr.msk.f32.gmra.mrb[18].mxu0 %vm658_vm1, %v13627_v8  ;;  %v617_v8 = vld [vmem:[%s13203_s27 + $0x110] sm:$0xff] }
 0x1aa   : > { %11576 = vmatprep.mubr.msk.f32.mxu0 %vm658_vm1, %v13630_v9  ;;  %v3529_v9 = vld [vmem:[%s13203_s27 + $0x5d] sm:$0xff]  ;;  %11317 = vmatprep.mubr.msk.f32.mxu1 %vm658_vm1, %v617_v8  ;;  %v3984_v8 = vld [vmem:[%s13203_s27 + $0x126] sm:$0xff] }
 0x1ad   : > { %11577 = vmatmul.mubr.msk.f32.gmra.mrb[20].mxu0 %vm658_vm1, %v13637_v10  ;;  %v618_v10 = vld [vmem:[%s13203_s27 + $0x118] sm:$0xff] }
 0x1ae   : > { %11579 = vmatprep.mubr.msk.f32.mxu0 %vm658_vm1, %v13640_v11  ;;  %v3530_v11 = vld [vmem:[%s13203_s27 + $0x65] sm:$0xff]  ;;  %11318 = vmatmul.mubr.msk.f32.gmra.mrb[34].mxu1 %vm658_vm1, %v618_v10  ;;  %v3986_v10 = vld [vmem:[%s13203_s27 + $0x136] sm:$0xff] }
 0x1b1   : > { %11580 = vmatmul.mubr.msk.f32.gmra.mrb[22].mxu0 %vm658_vm1, %v13647_v12  ;;  %v3531_v12 = vld [vmem:[%s13203_s27 + $0x6d] sm:$0xff] }
 0x1b2   : > { %11582 = vmatprep.mubr.msk.f32.mxu0 %vm658_vm1, %v13650_v13  ;;  %v3532_v13 = vld [vmem:[%s13203_s27 + $0x75] sm:$0xff] }
 0x1b5   : > { %11583 = vmatmul.mubr.msk.f32.gmra.mrb[24].mxu0 %vm658_vm1, %v13657_v14  ;;  %v3533_v14 = vld [vmem:[%s13203_s27 + $0x7d] sm:$0xff] }
 0x1b6   : > { %11585 = vmatprep.mubr.msk.f32.mxu0 %vm658_vm1, %v13660_v15  ;;  %v3534_v15 = vld [vmem:[%s13203_s27 + $0x85] sm:$0xff] }
 0x1b9   : > { %11586 = vmatmul.mubr.msk.f32.gmra.mrb[26].mxu0 %vm658_vm1, %v13667_v16  ;;  %v17069_v16 = vmov -3.4028235e+38  }
 0x1ba   : > { %11588 = vmatprep.mubr.msk.f32.mxu0 %vm658_vm1, %v13670_v17  ;;  %496 = vst.msk [vmem:[#allocation2 + $0x18] sm:$0xff] %vm17089_vm2, %v17069_v16  ;;  %497 = vst.msk [vmem:[#allocation2 + $0x20] sm:$0xff] %vm17089_vm2, %v17069_v16  ;;  %v3535_v17 = vld [vmem:[%s13203_s27 + $0x8d] sm:$0xff] }
 0x1bb   : > { %493 = vst.msk [vmem:[#allocation2] sm:$0xff] %vm17089_vm2, %v17069_v16  ;;  %494 = vst.msk [vmem:[#allocation2 + $0x8] sm:$0xff] %vm17089_vm2, %v17069_v16 }
 0x1bc   : > { %495 = vst.msk [vmem:[#allocation2 + $0x10] sm:$0xff] %vm17089_vm2, %v17069_v16  ;;  %498 = vst.msk [vmem:[#allocation2 + $0x28] sm:$0xff] %vm17089_vm2, %v17069_v16 }
 0x1bd   : > { %11589 = vmatmul.mubr.msk.f32.gmra.mrb[28].mxu0 %vm658_vm1, %v13677_v18  ;;  %499 = vst.msk [vmem:[#allocation2 + $0x30] sm:$0xff] %vm17089_vm2, %v17069_v16  ;;  %500 = vst.msk [vmem:[#allocation2 + $0x38] sm:$0xff] %vm17089_vm2, %v17069_v16  ;;  %v3536_v18 = vld [vmem:[%s13203_s27 + $0x95] sm:$0xff] }
 0x1be   : > { %11591 = vmatprep.mubr.msk.f32.mxu0 %vm658_vm1, %v13680_v19  ;;  %501 = vst.msk [vmem:[#allocation2 + $0x40] sm:$0xff] %vm17089_vm2, %v17069_v16  ;;  %502 = vst.msk [vmem:[#allocation2 + $0x48] sm:$0xff] %vm17089_vm2, %v17069_v16  ;;  %v3537_v19 = vld [vmem:[%s13203_s27 + $0x9d] sm:$0xff] }
 0x1bf   : > { %503 = vst.msk [vmem:[#allocation2 + $0x50] sm:$0xff] %vm17089_vm2, %v17069_v16  ;;  %504 = vst.msk [vmem:[#allocation2 + $0x58] sm:$0xff] %vm17089_vm2, %v17069_v16 }
 0x1c0   : > { %505 = vst.msk [vmem:[#allocation2 + $0x60] sm:$0xff] %vm17089_vm2, %v17069_v16  ;;  %506 = vst.msk [vmem:[#allocation2 + $0x68] sm:$0xff] %vm17089_vm2, %v17069_v16 }
 0x1c1   : > { %11592 = vmatmul.mubr.msk.f32.gmra.mrb[30].mxu0 %vm658_vm1, %v13687_v20  ;;  %507 = vst.msk [vmem:[#allocation2 + $0x70] sm:$0xff] %vm17089_vm2, %v17069_v16  ;;  %508 = vst.msk [vmem:[#allocation2 + $0x78] sm:$0xff] %vm17089_vm2, %v17069_v16  ;;  %v3538_v20 = vld [vmem:[%s13203_s27 + $0xa5] sm:$0xff] }
 0x1c2   : > { %11594 = vmatprep.mubr.msk.f32.mxu0 %vm658_vm1, %v13690_v21  ;;  %509 = vst.msk [vmem:[#allocation2 + $0x80] sm:$0xff] %vm17089_vm2, %v17069_v16  ;;  %510 = vst.msk [vmem:[#allocation2 + $0x88] sm:$0xff] %vm17089_vm2, %v17069_v16  ;;  %v3539_v21 = vld [vmem:[%s13203_s27 + $0xad] sm:$0xff] }
 0x1c3   : > { %511 = vst.msk [vmem:[#allocation2 + $0x90] sm:$0xff] %vm17089_vm2, %v17069_v16  ;;  %512 = vst.msk [vmem:[#allocation2 + $0x98] sm:$0xff] %vm17089_vm2, %v17069_v16 }
 0x1c4   : > { %513 = vst.msk [vmem:[#allocation2 + $0xa0] sm:$0xff] %vm17089_vm2, %v17069_v16  ;;  %514 = vst.msk [vmem:[#allocation2 + $0xa8] sm:$0xff] %vm17089_vm2, %v17069_v16 }
 0x1c5   : > { %11595 = vmatmul.mubr.msk.f32.gmra.mrb[32].mxu0 %vm658_vm1, %v13697_v22  ;;  %515 = vst.msk [vmem:[#allocation2 + $0xb0] sm:$0xff] %vm17089_vm2, %v17069_v16  ;;  %516 = vst.msk [vmem:[#allocation2 + $0xb8] sm:$0xff] %vm17089_vm2, %v17069_v16  ;;  %v3540_v22 = vld [vmem:[%s13203_s27 + $0xb5] sm:$0xff] }
 0x1c6   : > { %11597 = vmatprep.mubr.msk.f32.mxu0 %vm658_vm1, %v3126_v54  ;;  %517 = vst.msk [vmem:[#allocation2 + $0xc0] sm:$0xff] %vm17089_vm2, %v17069_v16  ;;  %518 = vst.msk [vmem:[#allocation2 + $0xc8] sm:$0xff] %vm17089_vm2, %v17069_v16  ;;  %v3967_v54 = vld [vmem:[%s13203_s27 + $0x9e] sm:$0xff] }
 0x1c7   : > { %519 = vst.msk [vmem:[#allocation2 + $0xd0] sm:$0xff] %vm17089_vm2, %v17069_v16  ;;  %520 = vst.msk [vmem:[#allocation2 + $0xd8] sm:$0xff] %vm17089_vm2, %v17069_v16 }
 0x1c8   : > { %521 = vst.msk [vmem:[#allocation2 + $0xe0] sm:$0xff] %vm17089_vm2, %v17069_v16  ;;  %522 = vst.msk [vmem:[#allocation2 + $0xe8] sm:$0xff] %vm17089_vm2, %v17069_v16 }
 0x1c9   : > { %11598 = vmatmul.mubr.msk.f32.gmra.mrb[34].mxu0 %vm658_vm1, %v3127_v56  ;;  %523 = vst.msk [vmem:[#allocation2 + $0xf0] sm:$0xff] %vm17089_vm2, %v17069_v16  ;;  %524 = vst.msk [vmem:[#allocation2 + $0xf8] sm:$0xff] %vm17089_vm2, %v17069_v16  ;;  %v3969_v56 = vld [vmem:[%s13203_s27 + $0xae] sm:$0xff] }
 0x1ca   : > { %11602 = vmatprep.mubr.msk.f32.mxu0 %vm658_vm1, %v3522_v58  ;;  %525 = vst.msk [vmem:[#allocation2 + $0x100] sm:$0xff] %vm17089_vm2, %v17069_v16  ;;  %526 = vst.msk [vmem:[#allocation2 + $0x108] sm:$0xff] %vm17089_vm2, %v17069_v16  ;;  %v3971_v58 = vld [vmem:[%s13203_s27 + $0xbe] sm:$0xff] }
 0x1cb   : > { %527 = vst.msk [vmem:[#allocation2 + $0x110] sm:$0xff] %vm17089_vm2, %v17069_v16  ;;  %528 = vst.msk [vmem:[#allocation2 + $0x118] sm:$0xff] %vm17089_vm2, %v17069_v16 }
 0x1cc   : > { %529 = vst.msk [vmem:[#allocation2 + $0x120] sm:$0xff] %vm17089_vm2, %v17069_v16  ;;  %530 = vst.msk [vmem:[#allocation2 + $0x128] sm:$0xff] %vm17089_vm2, %v17069_v16 }
 0x1cd   : > { %11603 = vmatmul.mubr.msk.f32.vlgmr.msra.gmra.mrb[0].mxu0 %vm658_vm1, %v3523_v60  ;;  %531 = vst.msk [vmem:[#allocation2 + $0x130] sm:$0xff] %vm17089_vm2, %v17069_v16  ;;  %532 = vst.msk [vmem:[#allocation2 + $0x138] sm:$0xff] %vm17089_vm2, %v17069_v16  ;;  %v3973_v60 = vld [vmem:[%s13203_s27 + $0xce] sm:$0xff] }
 0x1ce   : > { %11657 = vmatpush3.msk.msra.mxu0 %vm767_vm0, %v13706_v23  ;;  %11605 = vmatprep.mubr.msk.f32.mxu0 %vm658_vm1, %v3524_v62  ;;  %533 = vst.msk [vmem:[#allocation2 + $0x140] sm:$0xff] %vm17089_vm2, %v17069_v16  ;;  %v3541_v23 = vld [vmem:[%s13203_s27 + $0xbd] sm:$0xff] }
 0x1cf   : > { %v3975_v62 = vld [vmem:[%s13203_s27 + $0xde] sm:$0xff] }
 0x1d1   : > { %11606 = vmatmul.mubr.msk.f32.gmra.mrb[2].mxu0 %vm658_vm1, %v3525_v1  ;;  %v3977_v1 = vld [vmem:[%s13203_s27 + $0xee] sm:$0xff] }
 0x1d2   : > { %11608 = vmatprep.mubr.msk.f32.mxu0 %vm658_vm1, %v3526_v3  ;;  %v3979_v3 = vld [vmem:[%s13203_s27 + $0xfe] sm:$0xff] }
 0x1d5   : > { %11609 = vmatmul.mubr.msk.f32.gmra.mrb[4].mxu0 %vm658_vm1, %v3527_v5  ;;  %v3981_v5 = vld [vmem:[%s13203_s27 + $0x10e] sm:$0xff] }
 0x1d6   : > { %11611 = vmatprep.mubr.msk.f32.mxu0 %vm658_vm1, %v3528_v7  ;;  %v3983_v7 = vld [vmem:[%s13203_s27 + $0x11e] sm:$0xff] }
 0x1d9   : > { %11612 = vmatmul.mubr.msk.f32.gmra.mrb[6].mxu0 %vm658_vm1, %v3529_v9  ;;  %v3985_v9 = vld [vmem:[%s13203_s27 + $0x12e] sm:$0xff] }
 0x1da   : > { %11614 = vmatprep.mubr.msk.f32.mxu0 %vm658_vm1, %v3530_v11  ;;  %v3987_v11 = vld [vmem:[%s13203_s27 + $0x13e] sm:$0xff]  ;;  %s17010_s27 = scalar_lea.hbm %s17068_s15, %s10615_s1 }
 0x1dd   : > { %11615 = vmatmul.mubr.msk.f32.gmra.mrb[8].mxu0 %vm658_vm1, %v3531_v12 }
 0x1de   : > { %11617 = vmatprep.mubr.msk.f32.mxu0 %vm658_vm1, %v3532_v13 }
 0x1e1   : > { %11618 = vmatmul.mubr.msk.f32.gmra.mrb[10].mxu0 %vm658_vm1, %v3533_v14  ;;  %v14099_v12 = vpop.f32.mrb[0].mxu1 }
 0x1e2   : > { %11620 = vmatprep.mubr.msk.f32.mxu0 %vm658_vm1, %v3534_v15  ;;  %v14101_v13 = vpop.f32.mrb[1].mxu1 }
 0x1e5   : > { %11621 = vmatmul.mubr.msk.f32.gmra.mrb[12].mxu0 %vm658_vm1, %v3535_v17  ;;  %v14103_v14 = vpop.f32.mrb[2].mxu1 }
 0x1e6   : > { %11623 = vmatprep.mubr.msk.f32.mxu0 %vm658_vm1, %v3536_v18  ;;  %v14105_v15 = vpop.f32.mrb[3].mxu1 }
 0x1e7   : > { %17199 = vst [vmem:[#allocation16_spill] sm:$0xff] %v14105_v15 }
 0x1e9   : > { %11624 = vmatmul.mubr.msk.f32.gmra.mrb[14].mxu0 %vm658_vm1, %v3537_v19  ;;  %v14107_v17 = vpop.f32.mrb[4].mxu1 }
 0x1ea   : > { %11626 = vmatprep.mubr.msk.f32.mxu0 %vm658_vm1, %v3538_v20  ;;  %17200 = vst [vmem:[#allocation17_spill] sm:$0xff] %v14107_v17  ;;  %v14109_v18 = vpop.f32.mrb[5].mxu1 }
 0x1eb   : > { %17201 = vst [vmem:[#allocation18_spill] sm:$0xff] %v14109_v18 }
 0x1ed   : > { %11627 = vmatmul.mubr.msk.f32.gmra.mrb[16].mxu0 %vm658_vm1, %v3539_v21  ;;  %v14111_v19 = vpop.f32.mrb[6].mxu1 }
 0x1ee   : > { %11629 = vmatprep.mubr.msk.f32.mxu0 %vm658_vm1, %v3540_v22  ;;  %17202 = vst [vmem:[#allocation19_spill] sm:$0xff] %v14111_v19  ;;  %v14113_v20 = vpop.f32.mrb[7].mxu1  ;;  %v4504_v22 = vlaneseq }
 0x1ef   : > { %17203 = vst [vmem:[#allocation20_spill] sm:$0xff] %v14113_v20 }
 0x1f1   : > { %11630 = vmatmul.mubr.msk.f32.gmra.mrb[18].mxu0 %vm658_vm1, %v3541_v23  ;;  %v14115_v21 = vpop.f32.mrb[8].mxu1 }
 0x1f2   : > { %11632 = vmatprep.mubr.msk.f32.mxu0 %vm658_vm1, %v3542_v24  ;;  %17204 = vst [vmem:[#allocation21_spill] sm:$0xff] %v14115_v21  ;;  %v14117_v23 = vpop.f32.mrb[9].mxu1  ;;  %v14119_v24 = vshrl.u32 %v4504_v22, 7  ;;  %v17267_v21 = vmov 0 }
 0x1f3   : > { %17205 = vst [vmem:[#allocation22_spill] sm:$0xff] %v14117_v23 }
 0x1f4   : > { %17206 = vst [vmem:[#allocation23_spill] sm:$0xff] %v14119_v24  ;;  %v14231_v22 = vadd.s32 80, %v14119_v24 }
 0x1f5   : > { %11633 = vmatmul.mubr.msk.f32.gmra.mrb[20].mxu0 %vm658_vm1, %v3543_v25  ;;  %v14121_v25 = vpop.f32.mrb[10].mxu1 }
 0x1f6   : > { %11635 = vmatprep.mubr.msk.f32.mxu0 %vm658_vm1, %v3544_v26  ;;  %17207 = vst [vmem:[#allocation24_spill] sm:$0xff] %v14121_v25  ;;  %v14123_v26 = vpop.f32.mrb[11].mxu1  ;;  %v17261_v25 = vmov 0 }
 0x1f7   : > { %17208 = vst [vmem:[#allocation25_spill] sm:$0xff] %v14123_v26  ;;  %v10379_v26 = vld [vmem:[%s17057_s4 + $0x8] sm:$0xff] }
 0x1f8   : > { %11712 = vmatprep.subr.mxu1 %v10379_v26 }
 0x1f9   : > { %11636 = vmatmul.mubr.msk.f32.gmra.mrb[22].mxu0 %vm658_vm1, %v3545_v27  ;;  %v14126_v27 = vadd.s32 8, %v14119_v24  ;;  %11713 = vmatpush3.msra.mxu1 %v10379_v26 }
 0x1fa   : > { %11638 = vmatprep.mubr.msk.f32.mxu0 %vm658_vm1, %v3546_v28  ;;  %v14129_v28 = vadd.s32 24, %v14119_v24 }
 0x1fb   : > { %17209 = vst [vmem:[#allocation26_spill] sm:$0xff] %v14126_v27 }
 0x1fc   : > { %17210 = vst [vmem:[#allocation27_spill] sm:$0xff] %v14129_v28 }
 0x1fd   : > { %11639 = vmatmul.mubr.msk.f32.gmra.mrb[24].mxu0 %vm658_vm1, %v3547_v29 }
 0x1fe   : > { %11641 = vmatprep.mubr.msk.f32.mxu0 %vm658_vm1, %v3548_v0  ;;  %v14132_v29 = vmul.u32.u64.low 3817748708, %v14126_v27  ;;  %v14133_v0 = vmul.u32.u64.high 3817748708, %v14126_v27, %v14132_v29 }
 0x201   : > { %11642 = vmatmul.mubr.msk.f32.gmra.mrb[26].mxu0 %vm658_vm1, %v3549_v30  ;;  %v14136_v30 = vadd.s32 16, %v14119_v24 }
 0x202   : > { %11644 = vmatprep.mubr.msk.f32.mxu0 %vm658_vm1, %v3550_v31 }
 0x203   : > { %17211 = vst [vmem:[#allocation28_spill] sm:$0xff] %v14136_v30 }
 0x205   : > { %11645 = vmatmul.mubr.msk.f32.gmra.mrb[28].mxu0 %vm658_vm1, %v3551_v32  ;;  %v14139_v31 = vmul.u32.u64.low 3817748708, %v14119_v24  ;;  %v14140_v32 = vmul.u32.u64.high 3817748708, %v14119_v24, %v14139_v31 }
 0x206   : > { %11647 = vmatprep.mubr.msk.f32.mxu0 %vm658_vm1, %v3552_v33 }
 0x209   : > { %11648 = vmatmul.mubr.msk.f32.gmra.mrb[30].mxu0 %vm658_vm1, %v3553_v34  ;;  %v14143_v33 = vmul.u32.u64.low 3817748708, %v14129_v28  ;;  %v14144_v34 = vmul.u32.u64.high 3817748708, %v14129_v28, %v14143_v33 }
 0x20a   : > { %11650 = vmatprep.mubr.msk.f32.mxu0 %vm658_vm1, %v3554_v35 }
 0x20d   : > { %11651 = vmatmul.mubr.msk.f32.gmra.mrb[32].mxu0 %vm658_vm1, %v3555_v36  ;;  %v14147_v35 = vmul.u32.u64.low 3817748708, %v14136_v30  ;;  %v14148_v36 = vmul.u32.u64.high 3817748708, %v14136_v30, %v14147_v35 }
 0x20e   : > { %11653 = vmatprep.mubr.msk.f32.mxu0 %vm658_vm1, %v3556_v37  ;;  %v14150_v37 = vpop.f32.mrb[12].mxu1 }
 0x20f   : > { %17212 = vst [vmem:[#allocation29_spill] sm:$0xff] %v14150_v37 }
 0x211   : > { %11654 = vmatmul.mubr.msk.f32.gmra.mrb[34].mxu0 %vm658_vm1, %v3557_v38  ;;  %v4558_v38 = vshrl.u32 %v14133_v0, 4 }
 0x212   : > { %11658 = vmatprep.mubr.msk.f32.mxu0 %vm658_vm1, %v3952_v39  ;;  %v14153_v39 = vpop.f32.mrb[13].mxu1 }
 0x213   : > { %17213 = vst [vmem:[#allocation30_spill] sm:$0xff] %v14153_v39 }
 0x215   : > { %11659 = vmatmul.mubr.msk.f32.vlgmr.msra.gmra.mrb[0].mxu0 %vm658_vm1, %v3953_v40  ;;  %v14156_v40 = vadd.s32 40, %v14119_v24 }
 0x216   : > { %11661 = vmatprep.mubr.msk.f32.mxu0 %vm658_vm1, %v3954_v41  ;;  %v4547_v41 = vshrl.u32 %v14140_v32, 4 }
 0x217   : > { %17214 = vst [vmem:[#allocation31_spill] sm:$0xff] %v14156_v40 }
 0x219   : > { %11662 = vmatmul.mubr.msk.f32.gmra.mrb[2].mxu0 %vm658_vm1, %v3955_v42  ;;  %v4580_v42 = vshrl.u32 %v14144_v34, 4 }
 0x21a   : > { %11664 = vmatprep.mubr.msk.f32.mxu0 %vm658_vm1, %v3956_v43  ;;  %v4559_v43 = vmul.u32 18, %v4558_v38 }
 0x21d   : > { %11665 = vmatmul.mubr.msk.f32.gmra.mrb[4].mxu0 %vm658_vm1, %v3957_v44  ;;  %v14160_v44 = vpop.f32.mrb[14].mxu1 }
 0x21e   : > { %11667 = vmatprep.mubr.msk.f32.mxu0 %vm658_vm1, %v3958_v45  ;;  %17215 = vst [vmem:[#allocation32_spill] sm:$0xff] %v14160_v44  ;;  %v4569_v45 = vshrl.u32 %v14148_v36, 4 }
 0x221   : > { %11668 = vmatmul.mubr.msk.f32.gmra.mrb[6].mxu0 %vm658_vm1, %v3959_v46 }
 0x222   : > { %11670 = vmatprep.mubr.msk.f32.mxu0 %vm658_vm1, %v3960_v47  ;;  %v14164_v46 = vmul.u32.u64.low 3817748708, %v14156_v40  ;;  %v14165_v47 = vmul.u32.u64.high 3817748708, %v14156_v40, %v14164_v46 }
 0x225   : > { %11671 = vmatmul.mubr.msk.f32.gmra.mrb[8].mxu0 %vm658_vm1, %v3961_v48  ;;  %v14168_v48 = vadd.s32 32, %v14119_v24 }
 0x226   : > { %11673 = vmatprep.mubr.msk.f32.mxu0 %vm658_vm1, %v3962_v49  ;;  %v14170_v49 = vpop.f32.mrb[15].mxu1 }
 0x227   : > { %17216 = vst [vmem:[#allocation33_spill] sm:$0xff] %v14168_v48  ;;  %17217 = vst [vmem:[#allocation34_spill] sm:$0xff] %v14170_v49 }
 0x229   : > { %11674 = vmatmul.mubr.msk.f32.gmra.mrb[10].mxu0 %vm658_vm1, %v3963_v50  ;;  %v4548_v50 = vmul.u32 18, %v4547_v41 }
 0x22a   : > { %11676 = vmatprep.mubr.msk.f32.mxu0 %vm658_vm1, %v3964_v51  ;;  %v4581_v51 = vmul.u32 18, %v4580_v42 }
 0x22d   : > { %11677 = vmatmul.mubr.msk.f32.gmra.mrb[12].mxu0 %vm658_vm1, %v3965_v52  ;;  %v14173_v52 = vadd.s32 56, %v14119_v24 }
 0x22e   : > { %11679 = vmatprep.mubr.msk.f32.mxu0 %vm658_vm1, %v3966_v53  ;;  %v14176_v53 = vsub.s32 %v14126_v27, %v4559_v43 }
 0x22f   : > { %17218 = vst [vmem:[#allocation35_spill] sm:$0xff] %v14173_v52 }
 0x230   : > { %vm4938_vm3 = vcmp.ne.s32.totalorder %v14176_v53, 0  ;;  %vm4974_vm4 = vcmp.lt.s32.totalorder %v14176_v53, 0  ;;  %v14255_v38 = vadd.s32 18, %v14176_v53 }
 0x231   : > { %11680 = vmatmul.mubr.msk.f32.gmra.mrb[14].mxu0 %vm658_vm1, %v3967_v54  ;;  %v4570_v54 = vmul.u32 18, %v4569_v45  ;;  %vm14240_vm11 = vmand %vm4974_vm4, %vm4938_vm3 }
 0x232   : > { %11682 = vmatprep.mubr.msk.f32.mxu0 %vm658_vm1, %v3968_v55 }
 0x235   : > { %11683 = vmatmul.mubr.msk.f32.gmra.mrb[16].mxu0 %vm658_vm1, %v3969_v56  ;;  %v14179_v55 = vmul.u32.u64.low 3817748708, %v14168_v48  ;;  %v14180_v56 = vmul.u32.u64.high 3817748708, %v14168_v48, %v14179_v55 }
 0x236   : > { %11685 = vmatprep.mubr.msk.f32.mxu0 %vm658_vm1, %v3970_v57  ;;  %v14182_v57 = vpop.f32.mrb[16].mxu1  ;;  %v14289_v55 = vld [vmem:[#allocation2] sm:$0xff] }
 0x237   : > { %17219 = vst [vmem:[#allocation36_spill] sm:$0xff] %v14182_v57  ;;  %v4591_v0 = vshrl.u32 %v14180_v56, 4  ;;  %v17234_v56 = vmov 0  ;;  %v17257_v57 = vmov 0 }
 0x239   : > { %11686 = vmatmul.mubr.msk.f32.gmra.mrb[18].mxu0 %vm658_vm1, %v3971_v58  ;;  %v14185_v58 = vsub.s32 %v14119_v24, %v4548_v50 }
 0x23a   : > { %11688 = vmatprep.mubr.msk.f32.mxu0 %vm658_vm1, %v3972_v59  ;;  %v14187_v59 = vpop.f32.mrb[17].mxu1 }
 0x23b   : > { %17220 = vst [vmem:[#allocation37_spill] sm:$0xff] %v14187_v59  ;;  %vm4937_vm5 = vcmp.ne.s32.totalorder %v14185_v58, 0  ;;  %vm4973_vm6 = vcmp.lt.s32.totalorder %v14185_v58, 0  ;;  %v14266_v42 = vadd.s32 18, %v14185_v58 }
 0x23c   : > { %vm14261_vm12 = vmand %vm4973_vm6, %vm4937_vm5 }
 0x23d   : > { %11689 = vmatmul.mubr.msk.f32.gmra.mrb[20].mxu0 %vm658_vm1, %v3973_v60  ;;  %v14190_v60 = vsub.s32 %v14129_v28, %v4581_v51 }
 0x23e   : > { %11691 = vmatprep.mubr.msk.f32.mxu0 %vm658_vm1, %v3974_v61  ;;  %v14193_v61 = vadd.s32 48, %v14119_v24 }
 0x23f   : > { %vm4940_vm7 = vcmp.ne.s32.totalorder %v14190_v60, 0  ;;  %vm4976_vm8 = vcmp.lt.s32.totalorder %v14190_v60, 0  ;;  %v14269_v43 = vadd.s32 18, %v14190_v60 }
 0x240   : > { %17221 = vst [vmem:[#allocation38_spill] sm:$0xff] %v14193_v61  ;;  %vm14277_vm13 = vmand %vm4976_vm8, %vm4940_vm7 }
 0x241   : > { %11692 = vmatmul.mubr.msk.f32.gmra.mrb[22].mxu0 %vm658_vm1, %v3975_v62 }
 0x242   : > { %11694 = vmatprep.mubr.msk.f32.mxu0 %vm658_vm1, %v3976_v63  ;;  %v14196_v62 = vmul.u32.u64.low 3817748708, %v14173_v52  ;;  %v14197_v63 = vmul.u32.u64.high 3817748708, %v14173_v52, %v14196_v62 }
 0x243   : > { %v4592_v62 = vmul.u32 18, %v4591_v0 }
 0x244   : > { %v4624_v50 = vshrl.u32 %v14197_v63, 4  ;;  %v14303_v63 = vld [vmem:[#allocation2 + $0x9] sm:$0xff] }
 0x245   : > { %11695 = vmatmul.mubr.msk.f32.gmra.mrb[24].mxu0 %vm658_vm1, %v3977_v1  ;;  %v14200_v1 = vadd.s32 72, %v14119_v24  ;;  %v14336_v28 = vsub.s32 %v14168_v48, %v4592_v62  ;;  %v14352_v62 = vadd.s32 120, %v14119_v24 }
 0x246   : > { %11697 = vmatprep.mubr.msk.f32.mxu0 %vm658_vm1, %v3978_v2  ;;  %v14204_v2 = vsub.s32 %v14136_v30, %v4570_v54  ;;  %v14286_v51 = vmul.u32.u64.low 3817748708, %v14231_v22  ;;  %v14287_v54 = vmul.u32.u64.high 3817748708, %v14231_v22, %v14286_v51 }
 0x247   : > { %17222 = vst [vmem:[#allocation39_spill] sm:$0xff] %v14200_v1  ;;  %v14318_v51 = vadd.s32 104, %v14119_v24  ;;  %17238 = vst [vmem:[#allocation47_spill] sm:$0xff] %v14336_v28  ;;  %vm4977_vm3 = vcmp.lt.s32.totalorder %v14336_v28, 0 }
 0x248   : > { %vm4939_vm9 = vcmp.ne.s32.totalorder %v14204_v2, 0  ;;  %vm4975_vm10 = vcmp.lt.s32.totalorder %v14204_v2, 0 }
 0x249   : > { %11698 = vmatmul.mubr.msk.f32.gmra.mrb[26].mxu0 %vm658_vm1, %v3979_v3  ;;  %v4602_v3 = vshrl.u32 %v14165_v47, 4  ;;  %v14282_v47 = vadd.s32 18, %v14204_v2  ;;  %vm14295_vm14 = vmand %vm4975_vm10, %vm4939_vm9 }
 0x24a   : > { %11700 = vmatprep.mubr.msk.f32.mxu0 %vm658_vm1, %v3980_v4  ;;  %v14207_v4 = vpop.f32.mrb[18].mxu1  ;;  %v17235_v56 = vsel %vm14295_vm14, 4294967295, %v17234_v56 }
 0x24b   : > { %17223 = vst [vmem:[#allocation40_spill] sm:$0xff] %v14207_v4  ;;  %v4603_v29 = vmul.u32 18, %v4602_v3  ;;  %v14299_v3 = vld [vmem:[#allocation2 + $0x8] sm:$0xff] }
 0x24d   : > { %11701 = vmatmul.mubr.msk.f32.gmra.mrb[28].mxu0 %vm658_vm1, %v3981_v5  ;;  %v14212_v5 = vadd.s32 64, %v14119_v24 }
 0x24e   : > { %11703 = vmatprep.mubr.msk.f32.mxu0 %vm658_vm1, %v3982_v6  ;;  %v14215_v6 = vadd.s32 88, %v14119_v24 }
 0x24f   : > { %17224 = vst [vmem:[#allocation41_spill] sm:$0xff] %v14212_v5  ;;  %v14245_v32 = vmul.u32.u64.low 3817748708, %v14212_v5  ;;  %v14246_v33 = vmul.u32.u64.high 3817748708, %v14212_v5, %v14245_v32 }
 0x250   : > { %v14249_v34 = vmul.u32.u64.low 3817748708, %v14215_v6  ;;  %v14250_v35 = vmul.u32.u64.high 3817748708, %v14215_v6, %v14249_v34  ;;  %v4625_v32 = vmul.u32 18, %v4624_v50 }
 0x251   : > { %11704 = vmatmul.mubr.msk.f32.gmra.mrb[30].mxu0 %vm658_vm1, %v3983_v7  ;;  %v14217_v7 = vpop.f32.mrb[19].mxu1 }
 0x252   : > { %11706 = vmatprep.mubr.msk.f32.mxu0 %vm658_vm1, %v3984_v8  ;;  %17225 = vst [vmem:[#allocation42_spill] sm:$0xff] %v14217_v7  ;;  %v14252_v36 = vpop.f32.mrb[20].mxu1  ;;  %v4668_v50 = vshrl.u32 %v14250_v35, 4  ;;  %v14370_v7 = vadd.s32 136, %v14119_v24 }
 0x253   : > { %17228 = vst [vmem:[#allocation43_spill] sm:$0xff] %v14252_v36  ;;  %v14271_v45 = vpop.f32.mrb[21].mxu1 }
 0x254   : > { %17231 = vst [vmem:[#allocation44_spill] sm:$0xff] %v14271_v45  ;;  %v14329_v30 = vpop.f32.mrb[22].mxu1  ;;  %v4657_v45 = vshrl.u32 %v14287_v54, 4  ;;  %v4669_v36 = vmul.u32 18, %v4668_v50 }
 0x255   : > { %11707 = vmatmul.mubr.msk.f32.gmra.mrb[32].mxu0 %vm658_vm1, %v3985_v9  ;;  %v14222_v8 = vmul.u32.u64.low 3817748708, %v14193_v61  ;;  %v14223_v9 = vmul.u32.u64.high 3817748708, %v14193_v61, %v14222_v8  ;;  %17237 = vst [vmem:[#allocation46_spill] sm:$0xff] %v14329_v30  ;;  %v14341_v27 = vpop.f32.mrb[23].mxu1 }
 0x256   : > { %11709 = vmatprep.mubr.msk.f32.mxu0 %vm658_vm1, %v3986_v10  ;;  %v14301_v8 = vld [vmem:[#allocation2 + $0x1] sm:$0xff]  ;;  %17239 = vst [vmem:[#allocation48_spill] sm:$0xff] %v14341_v27  ;;  %v14358_v27 = vsub.s32 %v14173_v52, %v4625_v32  ;;  %v14377_v54 = vmul.u32.u64.low 3817748708, %v14352_v62  ;;  %v14378_v32 = vmul.u32.u64.high 3817748708, %v14352_v62, %v14377_v54  ;;  %v17085_v52 = vmov 0.0  }
 0x257   : > { %v4613_v0 = vshrl.u32 %v14223_v9, 4  ;;  %v14348_v9 = vmul.u32.u64.low 3817748708, %v14318_v51  ;;  %v14349_v34 = vmul.u32.u64.high 3817748708, %v14318_v51, %v14348_v9  ;;  %536 = vst.msk [vmem:[#allocation4] sm:$0xff] %vm17089_vm2, %v17085_v52  ;;  %537 = vst.msk [vmem:[#allocation4 + $0x8] sm:$0xff] %vm17089_vm2, %v17085_v52  ;;  %v4658_v50 = vmul.u32 18, %v4657_v45 }
 0x258   : > { %17241 = vst [vmem:[#allocation50_spill] sm:$0xff] %v14358_v27  ;;  %538 = vst.msk [vmem:[#allocation4 + $0x10] sm:$0xff] %vm17089_vm2, %v17085_v52  ;;  %vm4944_vm4 = vcmp.ne.s32.totalorder %v14358_v27, 0  ;;  %vm4980_vm5 = vcmp.lt.s32.totalorder %v14358_v27, 0  ;;  %v14425_v4 = vsub.s32 %v14215_v6, %v4669_v36  ;;  %v14445_v36 = vadd.s32 152, %v14119_v24 }
 0x259   : > { %11710 = vmatmul.mubr.msk.f32.gmra.mrb[34].mxu0 %vm658_vm1, %v3987_v11  ;;  %v14227_v10 = vmul.u32.u64.low 3817748708, %v14200_v1  ;;  %v14228_v11 = vmul.u32.u64.high 3817748708, %v14200_v1, %v14227_v10  ;;  %v4614_v16 = vmul.u32 18, %v4613_v0  ;;  %vm4941_vm1 = vcmp.ne.s32.totalorder %v14336_v28, 0  ;;  %539 = vst.msk [vmem:[#allocation4 + $0x18] sm:$0xff] %vm17089_vm2, %v17085_v52  ;;  %540 = vst.msk [vmem:[#allocation4 + $0x20] sm:$0xff] %vm17089_vm2, %v17085_v52 }
 0x25a   : > { %v14306_v10 = vsub.s32 %v14156_v40, %v4603_v29  ;;  %v14339_v29 = vadd.s32 96, %v14119_v24  ;;  %v14367_v0 = vadd.s32 112, %v14119_v24  ;;  %541 = vst.msk [vmem:[#allocation4 + $0x28] sm:$0xff] %vm17089_vm2, %v17085_v52  ;;  %542 = vst.msk [vmem:[#allocation4 + $0x30] sm:$0xff] %vm17089_vm2, %v17085_v52  ;;  %v4690_v45 = vshrl.u32 %v14349_v34, 4 }
 0x25b   : > { %v4646_v40 = vshrl.u32 %v14228_v11, 4  ;;  %v4635_v11 = vshrl.u32 %v14246_v33, 4  ;;  %543 = vst.msk [vmem:[#allocation4 + $0x38] sm:$0xff] %vm17089_vm2, %v17085_v52  ;;  %544 = vst.msk [vmem:[#allocation4 + $0x40] sm:$0xff] %vm17089_vm2, %v17085_v52  ;;  %v14442_v6 = vsub.s32 %v14231_v22, %v4658_v50  ;;  %v14461_v22 = vadd.s32 144, %v14119_v24  ;;  %v5333_v50 = vld [vmem:[#allocation2 + $0x2] sm:$0xff] }
 0x25c   : > { %17236 = vst [vmem:[#allocation45_spill] sm:$0xff] %v14306_v10  ;;  %vm4942_vm15 = vcmp.ne.s32.totalorder %v14306_v10, 0  ;;  %vm4978_vm0 = vcmp.lt.s32.totalorder %v14306_v10, 0  ;;  %v14355_v48 = vadd.s32 18, %v14306_v10  ;;  %545 = vst.msk [vmem:[#allocation4 + $0x48] sm:$0xff] %vm17089_vm2, %v17085_v52  ;;  %v4691_v49 = vmul.u32 18, %v4690_v45 }
 0x25d   : > { %v4647_v30 = vmul.u32 18, %v4646_v40  ;;  %v14363_v33 = vmul.u32.u64.low 3817748708, %v14339_v29  ;;  %v14364_v35 = vmul.u32.u64.high 3817748708, %v14339_v29, %v14363_v33  ;;  %v14374_v40 = vsub.s32 %v14193_v61, %v4614_v16  ;;  %546 = vst.msk [vmem:[#allocation4 + $0x50] sm:$0xff] %vm17089_vm2, %v17085_v52  ;;  %547 = vst.msk [vmem:[#allocation4 + $0x58] sm:$0xff] %vm17089_vm2, %v17085_v52 }
 0x25e   : > { %17240 = vst [vmem:[#allocation49_spill] sm:$0xff] %v14355_v48  ;;  %v4636_v9 = vmul.u32 18, %v4635_v11  ;;  %548 = vst.msk [vmem:[#allocation4 + $0x60] sm:$0xff] %vm17089_vm2, %v17085_v52  ;;  %v14407_v16 = vadd.s32 18, %v14336_v28  ;;  %v14415_v33 = vadd.s32 18, %v14358_v27  ;;  %v4712_v44 = vshrl.u32 %v14378_v32, 4 }
 0x25f   : > { %17242 = vst [vmem:[#allocation51_spill] sm:$0xff] %v14374_v40  ;;  %v14411_v11 = vsub.s32 %v14200_v1, %v4647_v30  ;;  %v14418_v54 = vmul.u32.u64.low 3817748708, %v14367_v0  ;;  %v14419_v61 = vmul.u32.u64.high 3817748708, %v14367_v0, %v14418_v54  ;;  %17247 = vst [vmem:[#allocation56_spill] sm:$0xff] %v14425_v4  ;;  %vm4943_vm6 = vcmp.ne.s32.totalorder %v14374_v40, 0  ;;  %v5945_v23 = vld [vmem:[#allocation4 + $0x1] sm:$0xff] }
 0x260   : > { %17243 = vst [vmem:[#allocation52_spill] sm:$0xff] %v14407_v16  ;;  %17245 = vst [vmem:[#allocation54_spill] sm:$0xff] %v14415_v33  ;;  %v14422_v52 = vsub.s32 %v14212_v5, %v4636_v9  ;;  %v14428_v59 = vmul.u32.u64.low 3817748708, %v14370_v7  ;;  %v14429_v30 = vmul.u32.u64.high 3817748708, %v14370_v7, %v14428_v59  ;;  %v14435_v1 = vadd.s32 128, %v14119_v24 }
 0x261   : > { %17244 = vst [vmem:[#allocation53_spill] sm:$0xff] %v14411_v11  ;;  %v14438_v54 = vadd.s32 18, %v14374_v40  ;;  %17249 = vst [vmem:[#allocation58_spill] sm:$0xff] %v14442_v6  ;;  %v17250_v59 = vmov 0  ;;  %v14457_v34 = vadd.s32 18, %v14411_v11  ;;  %v4679_v9 = vshrl.u32 %v14364_v35, 4 }
 0x262   : > { %17246 = vst [vmem:[#allocation55_spill] sm:$0xff] %v14422_v52  ;;  %vm14451_vm9 = vmand %vm4978_vm0, %vm4942_vm15  ;;  %v17254_v5 = vmov 0  ;;  %vm4945_vm15 = vcmp.ne.s32.totalorder %v14422_v52, 0  ;;  %vm4981_vm0 = vcmp.lt.s32.totalorder %v14422_v52, 0  ;;  %v5334_v35 = vld [vmem:[#allocation2 + $0xa] sm:$0xff]  ;;  %vm17265_vm8 = vcmp.ne.s32.totalorder %v14411_v11, 0 }
 0x263   : > { %17248 = vst [vmem:[#allocation57_spill] sm:$0xff] %v14438_v54  ;;  %v17251_v59 = vsel %vm14451_vm9, 4294967295, %v17250_v59  ;;  %17253 = vst [vmem:[#allocation60_spill] sm:$0xff] %v14457_v34  ;;  %v14485_v39 = vmul.u32.u64.low 3817748708, %v14435_v1  ;;  %v14486_v37 = vmul.u32.u64.high 3817748708, %v14435_v1, %v14485_v39  ;;  %vm17266_vm10 = vcmp.lt.s32.totalorder %v14411_v11, 0 }
 0x264   : > { %17252 = vst [vmem:[#allocation59_spill] sm:$0xff] %v17251_v59  ;;  %vm14467_vm2 = vmand %vm4977_vm3, %vm4941_vm1  ;;  %vm17260_vm1 = vcmp.lt.s32.totalorder %v14374_v40, 0  ;;  %v14502_v32 = vmul.u32.u64.low 3817748708, %v14445_v36  ;;  %v14503_v45 = vmul.u32.u64.high 3817748708, %v14445_v36, %v14502_v32  ;;  %v14505_v39 = vpop.f32.mrb[24].mxu1  ;;  %v4680_v20 = vmul.u32 18, %v4679_v9 }
 0x265   : > { %v17255_v5 = vsel %vm14467_vm2, 4294967295, %v17254_v5  ;;  %vm14479_vm7 = vmand %vm4980_vm5, %vm4944_vm4  ;;  %vm4947_vm4 = vcmp.ne.s32.totalorder %v14442_v6, 0  ;;  %vm4983_vm5 = vcmp.lt.s32.totalorder %v14442_v6, 0  ;;  %17264 = vst [vmem:[#allocation64_spill] sm:$0xff] %v14505_v39  ;;  %v4701_v19 = vshrl.u32 %v14419_v61, 4  ;;  %v14520_v32 = vpop.f32.mrb[25].mxu1 }
 0x266   : > { %17256 = vst [vmem:[#allocation61_spill] sm:$0xff] %v17255_v5  ;;  %v17258_v57 = vsel %vm14479_vm7, 4294967295, %v17257_v57  ;;  %vm14495_vm3 = vmand %vm17260_vm1, %vm4943_vm6  ;;  %v14517_v18 = vmul.u32.u64.low 3817748708, %v14461_v22  ;;  %v14518_v17 = vmul.u32.u64.high 3817748708, %v14461_v22, %v14517_v18  ;;  %vm17271_vm1 = vcmask 64512  }
 0x267   : > { %17259 = vst [vmem:[#allocation62_spill] sm:$0xff] %v17258_v57  ;;  %v17262_v25 = vsel %vm14495_vm3, 4294967295, %v17261_v25  ;;  %vm14511_vm6 = vmand %vm17266_vm10, %vm17265_vm8  ;;  %11714 = vmatprep.mubr.msk.f32.mxu1 %vm17271_vm1, %v5945_v23  ;;  %v17272_v39 = vmax.f32 %v14289_v55, %v14301_v8  ;;  %v17274_v61 = vmov 0  ;;  %v14537_v18 = vadd.s32 18, %v14422_v52 }
 0x268   : > { %17263 = vst [vmem:[#allocation63_spill] sm:$0xff] %v17262_v25  ;;  %v17268_v21 = vsel %vm14511_vm6, 4294967295, %v17267_v21  ;;  %17270 = vst [vmem:[#allocation66_spill] sm:$0xff] %v14520_v32  ;;  %v14540_v26 = vadd.s32 18, %v14425_v4  ;;  %v4734_v23 = vshrl.u32 %v14429_v30, 4  ;;  %v17279_v55 = vmax.f32 %v14299_v3, %v14303_v63 }
 0x269   : > { %17269 = vst [vmem:[#allocation65_spill] sm:$0xff] %v17268_v21  ;;  %v14526_v15 = vmax.f32 %v17272_v39, %v5333_v50  ;;  %vm14532_vm8 = vmand %vm4981_vm0, %vm4945_vm15  ;;  %vm17281_vm10 = vcmp.ne.s32.totalorder %v14425_v4, 0  ;;  %vm17282_vm15 = vcmp.lt.s32.totalorder %v14425_v4, 0  ;;  %v17283_v9 = vmov 0 }
 0x26a   : > { %v17275_v61 = vsel %vm14532_vm8, 4294967295, %v17274_v61  ;;  %17277 = vst [vmem:[#allocation69_spill] sm:$0xff] %v14537_v18  ;;  %17278 = vst [vmem:[#allocation70_spill] sm:$0xff] %v14540_v26  ;;  %v14546_v8 = vmax.f32 %v17279_v55, %v5334_v35  ;;  %v14557_v50 = vadd.s32 18, %v14442_v6  ;;  %v14560_v39 = vsub.s32 %v14318_v51, %v4691_v49  ;;  %v14585_v51 = vpop.f32.mrb[26].mxu1 }
 0x26b   : > { %17273 = vst [vmem:[#allocation67_spill] sm:$0xff] %v14526_v15  ;;  %17276 = vst [vmem:[#allocation68_spill] sm:$0xff] %v17275_v61  ;;  %v4713_v30 = vmul.u32 18, %v4712_v44  ;;  %v17287_v44 = vmov 0  ;;  %v14583_v49 = vadd.s32 168, %v14119_v24  ;;  %v14596_v63 = vsub.s32 %v14339_v29, %v4680_v20  ;;  %v14598_v32 = vpop.f32.mrb[27].mxu1 }
 0x26c   : > { %17280 = vst [vmem:[#allocation71_spill] sm:$0xff] %v14546_v8  ;;  %vm14552_vm0 = vmand %vm17282_vm15, %vm17281_vm10  ;;  %v4702_v3 = vmul.u32 18, %v4701_v19  ;;  %v4735_v8 = vmul.u32 18, %v4734_v23  ;;  %v14609_v15 = vadd.s32 160, %v14119_v24  ;;  %v4723_v29 = vshrl.u32 %v14486_v37, 4 }
 0x26d   : > { %v17284_v9 = vsel %vm14552_vm0, 4294967295, %v17283_v9  ;;  %17286 = vst [vmem:[#allocation73_spill] sm:$0xff] %v14557_v50  ;;  %vm14578_vm1 = vmand %vm4983_vm5, %vm4947_vm4  ;;  %v14617_v20 = vsub.s32 %v14352_v62, %v4713_v30  ;;  %v4756_v55 = vshrl.u32 %v14503_v45, 4  ;;  %v14627_v35 = vadd.s32 18, %v14560_v39  ;;  %v14634_v30 = vpop.f32.mrb[28].mxu1 }
 0x26e   : > { %17285 = vst [vmem:[#allocation72_spill] sm:$0xff] %v17284_v9  ;;  %v17288_v44 = vsel %vm14578_vm1, 4294967295, %v17287_v44  ;;  %17290 = vst [vmem:[#allocation75_spill] sm:$0xff] %v14585_v51  ;;  %v14623_v23 = vmul.u32.u64.low 3817748708, %v14583_v49  ;;  %v14624_v51 = vmul.u32.u64.high 3817748708, %v14583_v49, %v14623_v23  ;;  %v14631_v19 = vsub.s32 %v14367_v0, %v4702_v3 }
 0x26f   : > { %17289 = vst [vmem:[#allocation74_spill] sm:$0xff] %v17288_v44  ;;  %17291 = vst [vmem:[#allocation76_spill] sm:$0xff] %v14598_v32  ;;  %v4745_v62 = vshrl.u32 %v14518_v17, 4  ;;  %v14638_v37 = vsub.s32 %v14370_v7, %v4735_v8  ;;  %v14641_v45 = vmul.u32.u64.low 3817748708, %v14609_v15  ;;  %v14642_v23 = vmul.u32.u64.high 3817748708, %v14609_v15, %v14641_v45  ;;  %v14644_v32 = vpop.f32.mrb[29].mxu1 }
 0x270   : > { %17292 = vst [vmem:[#allocation77_spill] sm:$0xff] %v14631_v19  ;;  %17293 = vst [vmem:[#allocation78_spill] sm:$0xff] %v14634_v30  ;;  %v14647_v6 = vadd.s32 18, %v14596_v63  ;;  %v4724_v0 = vmul.u32 18, %v4723_v29  ;;  %v14651_v17 = vadd.s32 184, %v14119_v24  ;;  %v14655_v7 = vadd.s32 18, %v14617_v20 }
 0x271   : > { %17294 = vst [vmem:[#allocation79_spill] sm:$0xff] %v14638_v37  ;;  %17295 = vst [vmem:[#allocation80_spill] sm:$0xff] %v14644_v32  ;;  %v4757_v8 = vmul.u32 18, %v4756_v55  ;;  %v14658_v3 = vadd.s32 176, %v14119_v24  ;;  %v4746_v45 = vmul.u32 18, %v4745_v62  ;;  %v14663_v32 = vadd.s32 200, %v14119_v24 }
 0x272   : > { %v14666_v29 = vadd.s32 18, %v14631_v19  ;;  %v14671_v55 = vadd.s32 192, %v14119_v24  ;;  %v14674_v30 = vadd.s32 18, %v14638_v37  ;;  %v14677_v50 = vsub.s32 %v14435_v1, %v4724_v0  ;;  %v14683_v4 = vpop.f32.mrb[30].mxu1 }
 0x273   : > { %v14680_v62 = vmul.u32.u64.low 3817748708, %v14651_v17  ;;  %v14681_v44 = vmul.u32.u64.high 3817748708, %v14651_v17, %v14680_v62  ;;  %17299 = vst [vmem:[#allocation84_spill] sm:$0xff] %v14683_v4  ;;  %v14686_v26 = vsub.s32 %v14445_v36, %v4757_v8  ;;  %v4778_v9 = vshrl.u32 %v14624_v51, 4  ;;  %v14693_v61 = vpop.f32.mrb[31].mxu1 }
 0x274   : > { %17296 = vst [vmem:[#allocation81_spill] sm:$0xff] %v14666_v29  ;;  %17297 = vst [vmem:[#allocation82_spill] sm:$0xff] %v14674_v30  ;;  %v14690_v52 = vmul.u32.u64.low 3817748708, %v14658_v3  ;;  %v14691_v18 = vmul.u32.u64.high 3817748708, %v14658_v3, %v14690_v52  ;;  %v14696_v1 = vsub.s32 %v14461_v22, %v4746_v45  ;;  %v14703_v62 = vadd.s32 216, %v14119_v24 }
 0x275   : > { %17298 = vst [vmem:[#allocation83_spill] sm:$0xff] %v14677_v50  ;;  %17300 = vst [vmem:[#allocation85_spill] sm:$0xff] %v14686_v26  ;;  %v14699_v0 = vmul.u32.u64.low 3817748708, %v14663_v32  ;;  %v14700_v11 = vmul.u32.u64.high 3817748708, %v14663_v32, %v14699_v0  ;;  %vm17303_vm10 = vcmp.ne.s32.totalorder %v14560_v39, 0  ;;  %vm17304_vm15 = vcmp.lt.s32.totalorder %v14560_v39, 0 }
 0x276   : > { %17301 = vst [vmem:[#allocation86_spill] sm:$0xff] %v14693_v61  ;;  %17302 = vst [vmem:[#allocation87_spill] sm:$0xff] %v14696_v1  ;;  %v17305_v36 = vmov 0  ;;  %v4767_v52 = vshrl.u32 %v14642_v23, 4  ;;  %v14715_v22 = vmul.u32.u64.low 3817748708, %v14671_v55  ;;  %v14716_v51 = vmul.u32.u64.high 3817748708, %v14671_v55, %v14715_v22 }
 0x277   : > { %vm14709_vm4 = vmand %vm17304_vm15, %vm17303_vm10  ;;  %v14719_v8 = vadd.s32 208, %v14119_v24  ;;  %vm17307_vm5 = vcmp.ne.s32.totalorder %v14596_v63, 0  ;;  %vm17308_vm1 = vcmp.lt.s32.totalorder %v14596_v63, 0  ;;  %v17309_v45 = vmov 0 }
 0x278   : > { %v17306_v36 = vsel %vm14709_vm4, 4294967295, %v17305_v36  ;;  %vm14725_vm0 = vmand %vm17308_vm1, %vm17307_vm5  ;;  %v14732_v23 = vadd.s32 18, %v14677_v50  ;;  %v14735_v0 = vadd.s32 232, %v14119_v24  ;;  %vm17313_vm8 = vcmp.ne.s32.totalorder %v14617_v20, 0 }
 0x279   : > { %v17310_v45 = vsel %vm14725_vm0, 4294967295, %v17309_v45  ;;  %v14737_v22 = vpop.f32.mrb[32].mxu1  ;;  %vm17314_vm6 = vcmp.lt.s32.totalorder %v14617_v20, 0  ;;  %v17315_v61 = vmov 0  ;;  %v4779_v4 = vmul.u32 18, %v4778_v9 }
 0x27a   : > { %17311 = vst [vmem:[#allocation88_spill] sm:$0xff] %v14732_v23  ;;  %17312 = vst [vmem:[#allocation89_spill] sm:$0xff] %v14737_v22  ;;  %v14750_v34 = vadd.s32 224, %v14119_v24  ;;  %v14752_v21 = vpop.f32.mrb[33].mxu1  ;;  %vm17318_vm10 = vcmp.ne.s32.totalorder %v14631_v19, 0  ;;  %vm17319_vm3 = vcmp.lt.s32.totalorder %v14631_v19, 0 }
 0x27b   : > { %vm14743_vm1 = vmand %vm17314_vm6, %vm17313_vm8  ;;  %17317 = vst [vmem:[#allocation90_spill] sm:$0xff] %v14752_v21  ;;  %v17320_v22 = vmov 0  ;;  %v14763_v40 = vadd.s32 18, %v14686_v26  ;;  %v14767_v9 = vmul.u32.u64.low 3817748708, %v14703_v62  ;;  %v14768_v54 = vmul.u32.u64.high 3817748708, %v14703_v62, %v14767_v9 }
 0x27c   : > { %v17316_v61 = vsel %vm14743_vm1, 4294967295, %v17315_v61  ;;  %vm14758_vm7 = vmand %vm17319_vm3, %vm17318_vm10  ;;  %vm17324_vm8 = vcmp.ne.s32.totalorder %v14638_v37, 0  ;;  %vm17325_vm15 = vcmp.lt.s32.totalorder %v14638_v37, 0  ;;  %v17326_v21 = vmov 0 }
 0x27d   : > { %v17321_v22 = vsel %vm14758_vm7, 4294967295, %v17320_v22  ;;  %17323 = vst [vmem:[#allocation92_spill] sm:$0xff] %v14763_v40  ;;  %vm14774_vm5 = vmand %vm17325_vm15, %vm17324_vm8  ;;  %v4768_v25 = vmul.u32 18, %v4767_v52  ;;  %v14780_v27 = vmul.u32.u64.low 3817748708, %v14719_v8  ;;  %v14781_v33 = vmul.u32.u64.high 3817748708, %v14719_v8, %v14780_v27 }
 0x27e   : > { %17322 = vst [vmem:[#allocation91_spill] sm:$0xff] %v17321_v22  ;;  %v17327_v21 = vsel %vm14774_vm5, 4294967295, %v17326_v21  ;;  %vm17329_vm10 = vcmp.ne.s32.totalorder %v14677_v50, 0  ;;  %vm17330_vm6 = vcmp.lt.s32.totalorder %v14677_v50, 0  ;;  %v17331_v9 = vmov 0 }
 0x27f   : > { %17328 = vst [vmem:[#allocation93_spill] sm:$0xff] %v17327_v21  ;;  %vm14787_vm2 = vmand %vm17330_vm6, %vm17329_vm10  ;;  %v14792_v57 = vadd.s32 18, %v14696_v1  ;;  %v4800_v28 = vshrl.u32 %v14681_v44, 4  ;;  %v14796_v16 = vmul.u32.u64.low 3817748708, %v14735_v0  ;;  %v14797_v52 = vmul.u32.u64.high 3817748708, %v14735_v0, %v14796_v16 }
 0x280   : > { %v17332_v9 = vsel %vm14787_vm2, 4294967295, %v17331_v9  ;;  %vm17335_vm15 = vcmp.ne.s32.totalorder %v14686_v26, 0  ;;  %vm17336_vm8 = vcmp.lt.s32.totalorder %v14686_v26, 0  ;;  %v17337_v27 = vmov 0 }
 0x281   : > { %17333 = vst [vmem:[#allocation94_spill] sm:$0xff] %v17332_v9  ;;  %17334 = vst [vmem:[#allocation95_spill] sm:$0xff] %v14792_v57  ;;  %v14808_v5 = vsub.s32 %v14583_v49, %v4779_v4  ;;  %v4789_v10 = vshrl.u32 %v14691_v18, 4  ;;  %v14812_v48 = vmul.u32.u64.low 3817748708, %v14750_v34  ;;  %v14813_v44 = vmul.u32.u64.high 3817748708, %v14750_v34, %v14812_v48 }
 0x282   : > { %vm14803_vm3 = vmand %vm17336_vm8, %vm17335_vm15  ;;  %vm17341_vm6 = vcmp.ne.s32.totalorder %v14696_v1, 0  ;;  %vm17342_vm10 = vcmp.lt.s32.totalorder %v14696_v1, 0  ;;  %v17343_v48 = vmov 0  ;;  %v4822_v18 = vshrl.u32 %v14700_v11, 4 }
 0x283   : > { %v17338_v27 = vsel %vm14803_vm3, 4294967295, %v17337_v27  ;;  %17340 = vst [vmem:[#allocation97_spill] sm:$0xff] %v14808_v5  ;;  %vm14831_vm15 = vmand %vm17342_vm10, %vm17341_vm6  ;;  %v14845_v59 = vsub.s32 %v14609_v15, %v4768_v25  ;;  %v4811_v16 = vshrl.u32 %v14716_v51, 4  ;;  %v4801_v19 = vmul.u32 18, %v4800_v28 }
 0x284   : > { %17339 = vst [vmem:[#allocation96_spill] sm:$0xff] %v17338_v27  ;;  %v17344_v48 = vsel %vm14831_vm15, 4294967295, %v17343_v48  ;;  %v14857_v29 = vadd.s32 248, %v14119_v24  ;;  %v4790_v25 = vmul.u32 18, %v4789_v10  ;;  %v14865_v51 = vadd.s32 240, %v14119_v24 }
 0x285   : > { %17345 = vst [vmem:[#allocation98_spill] sm:$0xff] %v17344_v48  ;;  %17346 = vst [vmem:[#allocation99_spill] sm:$0xff] %v14845_v59  ;;  %v14869_v11 = vadd.s32 18, %v14808_v5  ;;  %v4823_v28 = vmul.u32 18, %v4822_v18  ;;  %v4844_v49 = vshrl.u32 %v14768_v54, 4  ;;  %v4812_v4 = vmul.u32 18, %v4811_v16 }
 0x286   : > { %v4833_v48 = vshrl.u32 %v14781_v33, 4  ;;  %v14875_v15 = vadd.s32 264, %v14119_v24  ;;  %v14878_v10 = vsub.s32 %v14651_v17, %v4801_v19  ;;  %v4866_v1 = vshrl.u32 %v14797_v52, 4 }
 0x287   : > { %17347 = vst [vmem:[#allocation100_spill] sm:$0xff] %v14869_v11  ;;  %v14882_v57 = vmul.u32.u64.low 3817748708, %v14857_v29  ;;  %v14883_v26 = vmul.u32.u64.high 3817748708, %v14857_v29, %v14882_v57  ;;  %v14886_v18 = vsub.s32 %v14658_v3, %v4790_v25  ;;  %v4855_v54 = vshrl.u32 %v14813_v44, 4 }
 0x288   : > { %v14890_v16 = vmul.u32.u64.low 3817748708, %v14865_v51  ;;  %v14891_v33 = vmul.u32.u64.high 3817748708, %v14865_v51, %v14890_v16  ;;  %v14895_v19 = vsub.s32 %v14663_v32, %v4823_v28  ;;  %v4845_v17 = vmul.u32 18, %v4844_v49 }
 0x289   : > { %17348 = vst [vmem:[#allocation101_spill] sm:$0xff] %v14886_v18  ;;  %v14898_v52 = vadd.s32 256, %v14119_v24  ;;  %v14901_v57 = vsub.s32 %v14671_v55, %v4812_v4  ;;  %v4834_v3 = vmul.u32 18, %v4833_v48  ;;  %v4867_v16 = vmul.u32 18, %v4866_v1 }
 0x28a   : > { %v14904_v25 = vmul.u32.u64.low 3817748708, %v14875_v15  ;;  %v14905_v44 = vmul.u32.u64.high 3817748708, %v14875_v15, %v14904_v25  ;;  %v14910_v32 = vadd.s32 280, %v14119_v24  ;;  %v4856_v49 = vmul.u32 18, %v4855_v54 }
 0x28b   : > { %v14915_v55 = vadd.s32 272, %v14119_v24  ;;  %v14919_v4 = vsub.s32 %v14703_v62, %v4845_v17  ;;  %v14922_v48 = vmul.u32.u64.low 3817748708, %v14898_v52  ;;  %v14923_v28 = vmul.u32.u64.high 3817748708, %v14898_v52, %v14922_v48 }
 0x28c   : > { %vm17349_vm8 = vcmp.ne.s32.totalorder %v14808_v5, 0  ;;  %vm17350_vm6 = vcmp.lt.s32.totalorder %v14808_v5, 0  ;;  %v14937_v62 = vsub.s32 %v14719_v8, %v4834_v3  ;;  %vm17353_vm5 = vcmp.ne.s32.totalorder %v14845_v59, 0  ;;  %v17440_v5 = vld [vmem:[#allocation54_spill] sm:$0xff] }
 0x28d   : > { %vm14929_vm10 = vmand %vm17350_vm6, %vm17349_vm8  ;;  %vm17354_vm7 = vcmp.lt.s32.totalorder %v14845_v59, 0  ;;  %v14948_v17 = vsub.s32 %v14735_v0, %v4867_v16  ;;  %v4888_v25 = vshrl.u32 %v14883_v26, 4  ;;  %vm17358_vm8 = vcmp.ne.s32.totalorder %v14878_v10, 0  ;;  %v14967_v16 = vpop.f32.mrb[34].mxu1 }
 0x28e   : > { %vm14943_vm1 = vmand %vm17354_vm7, %vm17353_vm5  ;;  %v14952_v48 = vmul.u32.u64.low 3817748708, %v14910_v32  ;;  %v14953_v24 = vmul.u32.u64.high 3817748708, %v14910_v32, %v14952_v48  ;;  %vm17359_vm6 = vcmp.lt.s32.totalorder %v14878_v10, 0  ;;  %v17360_v8 = vmov 0  ;;  %17363 = vst [vmem:[#allocation104_spill] sm:$0xff] %v14967_v16 }
 0x28f   : > { %17357 = vst [vmem:[#allocation102_spill] sm:$0xff] %v14948_v17  ;;  %vm14959_vm3 = vmand %vm17359_vm6, %vm17358_vm8  ;;  %v14964_v3 = vsub.s32 %v14750_v34, %v4856_v49  ;;  %v4877_v0 = vshrl.u32 %v14891_v33, 4  ;;  %v14970_v26 = vmul.u32.u64.low 3817748708, %v14915_v55  ;;  %v14971_v40 = vmul.u32.u64.high 3817748708, %v14915_v55, %v14970_v26  ;;  %v14989_v33 = vpop.f32.mrb[35].mxu1 }
 0x290   : > { %v17361_v8 = vsel %vm14959_vm3, 4294967295, %v17360_v8  ;;  %v14974_v48 = vadd.s32 18, %v14845_v59  ;;  %v14977_v27 = vadd.s32 18, %v14878_v10  ;;  %vm17365_vm7 = vcmp.ne.s32.totalorder %v14886_v18, 0  ;;  %17369 = vst [vmem:[#allocation106_spill] sm:$0xff] %v14989_v33 }
 0x291   : > { %17362 = vst [vmem:[#allocation103_spill] sm:$0xff] %v14964_v3  ;;  %vm17366_vm5 = vcmp.lt.s32.totalorder %v14886_v18, 0  ;;  %v17367_v34 = vmov 0  ;;  %v14992_v49 = vadd.s32 18, %v14886_v18  ;;  %vm17371_vm15 = vcmp.ne.s32.totalorder %v14895_v19, 0 }
 0x292   : > { %17364 = vst [vmem:[#allocation105_spill] sm:$0xff] %v14974_v48  ;;  %vm14983_vm8 = vmand %vm17366_vm5, %vm17365_vm7  ;;  %vm17372_vm0 = vcmp.lt.s32.totalorder %v14895_v19, 0  ;;  %v17373_v26 = vmov 0  ;;  %v4910_v16 = vshrl.u32 %v14905_v44, 4  ;;  %v15006_v50 = vadd.s32 18, %v14895_v19  ;;  %v17419_v48 = vld [vmem:[#allocation49_spill] sm:$0xff] }
 0x293   : > { %v17368_v34 = vsel %vm14983_vm8, 4294967295, %v17367_v34  ;;  %17370 = vst [vmem:[#allocation107_spill] sm:$0xff] %v14992_v49  ;;  %vm14998_vm4 = vmand %vm17372_vm0, %vm17371_vm15  ;;  %vm17375_vm2 = vcmp.ne.s32.totalorder %v14901_v57, 0  ;;  %vm17376_vm6 = vcmp.lt.s32.totalorder %v14901_v57, 0  ;;  %v17377_v33 = vmov 0  ;;  %v17420_v49 = vld [vmem:[#allocation45_spill] sm:$0xff] }
 0x294   : > { %v17374_v26 = vsel %vm14998_vm4, 4294967295, %v17373_v26  ;;  %vm15012_vm9 = vmand %vm17376_vm6, %vm17375_vm2  ;;  %vm4966_vm0 = vcmp.ne.s32.totalorder %v14948_v17, 0  ;;  %v4889_v23 = vmul.u32 18, %v4888_v25  ;;  %v15019_v9 = vadd.s32 18, %v14901_v57 }
 0x295   : > { %v17378_v33 = vsel %vm15012_vm9, 4294967295, %v17377_v33  ;;  %vm17380_vm5 = vcmp.ne.s32.totalorder %v14919_v4, 0  ;;  %vm17381_vm7 = vcmp.lt.s32.totalorder %v14919_v4, 0  ;;  %v17382_v44 = vmov 0 }
 0x296   : > { %17379 = vst [vmem:[#allocation108_spill] sm:$0xff] %v17378_v33  ;;  %vm15025_vm14 = vmand %vm17381_vm7, %vm17380_vm5  ;;  %vm4965_vm2 = vcmp.ne.s32.totalorder %v14964_v3, 0  ;;  %v4878_v37 = vmul.u32 18, %v4877_v0  ;;  %v15036_v30 = vadd.s32 18, %v14919_v4  ;;  %vm17384_vm15 = vcmp.ne.s32.totalorder %v14937_v62, 0 }
 0x297   : > { %v17383_v44 = vsel %vm15025_vm14, 4294967295, %v17382_v44  ;;  %vm17385_vm7 = vcmp.lt.s32.totalorder %v14937_v62, 0  ;;  %v17386_v21 = vmov 0  ;;  %v15047_v22 = vadd.s32 18, %v14937_v62 }
 0x298   : > { %vm15042_vm5 = vmand %vm17385_vm7, %vm17384_vm15  ;;  %v4899_v0 = vshrl.u32 %v14923_v28, 4  ;;  %v17388_v25 = vsel %vm14240_vm11, %v14255_v38, %v14176_v53  ;;  %vm17391_vm15 = vcmp.lt.s32.totalorder %v14948_v17, 0  ;;  %v17392_v28 = vmov 0 }
 0x299   : > { %v17387_v21 = vsel %vm15042_vm5, 4294967295, %v17386_v21  ;;  %vm15055_vm6 = vcmp.lt.s32.totalorder %v17388_v25, 16  ;;  %vm15067_vm7 = vmand %vm17391_vm15, %vm4966_vm0  ;;  %v15072_v31 = vadd.s32 18, %v14948_v17  ;;  %v15075_v53 = vadd.s32 18, %v14964_v3 }
 0x29a   : > { %v17393_v28 = vsel %vm15067_vm7, 4294967295, %v17392_v28  ;;  %v4911_v38 = vmul.u32 18, %v4910_v16  ;;  %v17395_v25 = vsel %vm14261_vm12, %v14266_v42, %v14185_v58  ;;  %vm17398_vm0 = vcmp.lt.s32.totalorder %v14964_v3, 0  ;;  %v17437_v3 = vld [vmem:[#allocation18_spill] sm:$0xff] }
 0x29b   : > { %17394 = vst [vmem:[#allocation109_spill] sm:$0xff] %v15075_v53  ;;  %vm15082_vm11 = vcmp.lt.s32.totalorder %v17395_v25, 16  ;;  %vm15098_vm15 = vmand %vm17398_vm0, %vm4965_vm2  ;;  %v17399_v58 = vmov 0  ;;  %v15103_v41 = vsub.s32 %v14857_v29, %v4889_v23  ;;  %v4932_v42 = vshrl.u32 %v14953_v24, 4  ;;  %v15109_v25 = vld [vmem:[%s17403_s2] ss:$0 sm:$0xff] }
 0x29c   : > { %v17400_v58 = vsel %vm15098_vm15, 4294967295, %v17399_v58  ;;  %v15120_v29 = vsub.s32 %v14865_v51, %v4878_v37  ;;  %v4921_v24 = vshrl.u32 %v14971_v40, 4  ;;  %v4900_v33 = vmul.u32 18, %v4899_v0  ;;  %v15135_v37 = vld [vmem:[%s17405_s3] ss:$0 sm:$0xff]  ;;  %v17417_v0 = vld [vmem:[#allocation59_spill] sm:$0xff] }
 0x29d   : > { %17401 = vst [vmem:[#allocation110_spill] sm:$0xff] %v17400_v58  ;;  %17402 = vst [vmem:[#allocation111_spill] sm:$0xff] %v15103_v41  ;;  %vm17418_vm7 = vnez %v17417_v0  ;;  %vm17436_vm5 = vcmask 64512   ;;  %vm17454_vm9 = vcmp.lt.s32.totalorder %v15103_v41, 0 }
 0x29e   : > { %17404 = vst [vmem:[#allocation112_spill] sm:$0xff] %v15120_v29  ;;  %v17421_v59 = vsel %vm17418_vm7, %v17419_v48, %v17420_v49  ;;  %v17427_v48 = vld [vmem:[#allocation52_spill] sm:$0xff]  ;;  %vm17445_vm14 = vmmov %vm17436_vm5 }
 0x29f   : > { %vm15188_vm15 = vcmp.lt.s32.totalorder %v17421_v59, 16  ;;  %v17428_v59 = vld [vmem:[#allocation47_spill] sm:$0xff] }
 0x2e8   : > { %v11660_v16 = vpop.f32.mrb[0].mxu0 }
 0x2e9   : > { %v12400_v23 = vadd.f32 %v11660_v16, %v14099_v12  ;;  %v4167_v18 = vpop.f32.mrb[1].mxu0  ;;  %v17406_v12 = vsel %vm14277_vm13, %v14269_v43, %v14190_v60  ;;  %vm17410_vm13 = vnez %v17235_v56  ;;  %v4922_v56 = vmul.u32 18, %v4921_v24 }
 0x2ea   : > { %v12401_v40 = vadd.f32 %v4167_v18, %v14101_v13  ;;  %vm15143_vm12 = vcmp.lt.s32.totalorder %v17406_v12, 16  ;;  %v15156_v13 = vsub.s32 %v14875_v15, %v4911_v38  ;;  %v17411_v60 = vsel %vm17410_vm13, %v14282_v47, %v14204_v2 }
 0x2eb   : > { %v4390_v46 = vmul.f32 %v12400_v23, %v15109_v25  ;;  %vm15164_vm2 = vcmp.lt.s32.totalorder %v17411_v60, 16  ;;  %v4933_v18 = vmul.u32 18, %v4932_v42  ;;  %v15172_v38 = vadd.s32 18, %v15103_v41 }
 0x2ec   : > { %17409 = vst [vmem:[#allocation113_spill] sm:$0xff] %v15156_v13  ;;  %v4389_v12 = vmul.f32 %v12401_v40, %v15109_v25  ;;  %v11663_v15 = vpop.f32.mrb[2].mxu0  ;;  %v15179_v60 = vsub.s32 %v14898_v52, %v4900_v33  ;;  %v17416_v40 = vld [vmem:[#allocation16_spill] sm:$0xff]  ;;  %vm17465_vm3 = vcmp.lt.s32.totalorder %v15156_v13, 0  ;;  %v17480_v43 = vmov 0 }
 0x2ed   : > { %17414 = vst [vmem:[#allocation114_spill] sm:$0xff] %v15172_v38  ;;  %v4433_v2 = vadd.f32 %v15135_v37, %v4390_v46  ;;  %v12402_v47 = vadd.f32 %v11663_v15, %v14103_v14  ;;  %v4177_v23 = vpop.f32.mrb[3].mxu0  ;;  %v15193_v14 = vadd.s32 18, %v15120_v29  ;;  %v15199_v52 = vld [vmem:[%s17057_s4] sm:$0xff]  ;;  %v15213_v15 = vsub.s32 %v14910_v32, %v4933_v18 }
 0x2ee   : > { %17415 = vst [vmem:[#allocation115_spill] sm:$0xff] %v15179_v60  ;;  %v4432_v42 = vadd.f32 %v15135_v37, %v4389_v12  ;;  %v12403_v16 = vadd.f32 %v4177_v23, %v17416_v40  ;;  %v17425_v46 = vld [vmem:[#allocation61_spill] sm:$0xff]  ;;  %11729 = vmatprep.subr.mxu1 %v15199_v52  ;;  %v15218_v40 = vadd.s32 18, %v15156_v13 }
 0x2ef   : > { %17424 = vst [vmem:[#allocation16_spill] sm:$0xff] %v15193_v14  ;;  %v4469_v33 = vmax.f32 %v4433_v2, 0.0  ;;  %v4392_v0 = vmul.f32 %v12402_v47, %v15109_v25  ;;  %vm17426_vm0 = vnez %v17425_v46  ;;  %17432 = vst [vmem:[#allocation59_spill] sm:$0xff] %v15213_v15  ;;  %v15221_v46 = vsub.s32 %v14915_v55, %v4922_v56  ;;  %v17438_v56 = vld [vmem:[#allocation62_spill] sm:$0xff] }
 0x2f0   : > { %v17429_v49 = vsel %vm17426_vm0, %v17427_v48, %v17428_v59  ;;  %v4468_v23 = vmax.f32 %v4432_v42, 0.0  ;;  %v4391_v2 = vmul.f32 %v12403_v16, %v15109_v25  ;;  %v11666_v47 = vpop.f32.mrb[4].mxu0  ;;  %17433 = vst [vmem:[#allocation49_spill] sm:$0xff] %v15218_v40  ;;  %vm17439_vm13 = vnez %v17438_v56 }
 0x2f1   : > { %vm15207_vm7 = vcmp.lt.s32.totalorder %v17429_v49, 16  ;;  %17434 = vst [vmem:[#allocation45_spill] sm:$0xff] %v15221_v46  ;;  %v5154_v48 = vsel %vm15055_vm6, %v4469_v33, -3.4028235e+38  ;;  %v4435_v59 = vadd.f32 %v15135_v37, %v4392_v0  ;;  %v17435_v49 = vld [vmem:[#allocation17_spill] sm:$0xff]  ;;  %v4187_v18 = vpop.f32.mrb[5].mxu0 }
 0x2f2   : > { %v12404_v32 = vadd.f32 %v11666_v47, %v17435_v49  ;;  %5190 = vst.msk [vmem:[#allocation2 + $0x1b] sm:$0xff] %vm17436_vm5, %v5154_v48  ;;  %v5153_v16 = vsel %vm15082_vm11, %v4468_v23, -3.4028235e+38  ;;  %v4434_v42 = vadd.f32 %v15135_v37, %v4391_v2  ;;  %v12405_v55 = vadd.f32 %v4187_v18, %v17437_v3  ;;  %v17441_v33 = vld [vmem:[#allocation50_spill] sm:$0xff]  ;;  %v17446_v23 = vld [vmem:[#allocation63_spill] sm:$0xff]  ;;  %v17448_v2 = vld [vmem:[#allocation57_spill] sm:$0xff] }
 0x2f3   : > { %v17442_v53 = vsel %vm17439_vm13, %v17440_v5, %v17441_v33  ;;  %5189 = vst.msk [vmem:[#allocation2 + $0x13] sm:$0xff] %vm17445_vm14, %v5153_v16  ;;  %v4471_v47 = vmax.f32 %v4435_v59, 0.0  ;;  %vm17447_vm5 = vnez %v17446_v23  ;;  %v17449_v3 = vld [vmem:[#allocation51_spill] sm:$0xff]  ;;  %vm17453_vm13 = vcmp.ne.s32.totalorder %v15103_v41, 0 }
 0x2f4   : > { %vm15238_vm6 = vcmp.lt.s32.totalorder %v17442_v53, 16  ;;  %v4394_v11 = vmul.f32 %v12404_v32, %v15109_v25  ;;  %v17450_v48 = vsel %vm17447_vm5, %v17448_v2, %v17449_v3  ;;  %vm15258_vm4 = vmand %vm17454_vm9, %vm17453_vm13  ;;  %v17455_v53 = vmov 0  ;;  %v11669_v16 = vpop.f32.mrb[6].mxu0  ;;  %v17463_v33 = vld [vmem:[#allocation19_spill] sm:$0xff] }
 0x2f5   : > { %vm15250_vm11 = vcmp.lt.s32.totalorder %v17450_v48, 16  ;;  %v17456_v53 = vsel %vm15258_vm4, 4294967295, %v17455_v53  ;;  %v15263_v59 = vadd.s32 18, %v15179_v60  ;;  %v4470_v32 = vmax.f32 %v4434_v42, 0.0  ;;  %v4197_v23 = vpop.f32.mrb[7].mxu0  ;;  %v17471_v48 = vld [vmem:[#allocation65_spill] sm:$0xff] }
 0x2f6   : > { %v4393_v18 = vmul.f32 %v12405_v55, %v15109_v25  ;;  %vm17458_vm5 = vcmp.ne.s32.totalorder %v15120_v29, 0  ;;  %vm17459_vm0 = vcmp.lt.s32.totalorder %v15120_v29, 0  ;;  %v17460_v56 = vmov 0  ;;  %v17512_v29 = vld [vmem:[#allocation72_spill] sm:$0xff] }
 0x2f7   : > { %17457 = vst [vmem:[#allocation61_spill] sm:$0xff] %v15263_v59  ;;  %vm15271_vm8 = vmand %vm17459_vm0, %vm17458_vm5  ;;  %v5156_v5 = vsel %vm15143_vm12, %v4471_v47, -3.4028235e+38  ;;  %v4437_v42 = vadd.f32 %v15135_v37, %v4394_v11  ;;  %v12406_v55 = vadd.f32 %v11669_v16, %v17463_v33  ;;  %vm17464_vm14 = vcmp.ne.s32.totalorder %v15156_v13, 0  ;;  %v17470_v11 = vld [vmem:[#allocation20_spill] sm:$0xff]  ;;  %v17474_v33 = vld [vmem:[#allocation53_spill] sm:$0xff] }
 0x2f8   : > { %v17461_v56 = vsel %vm15271_vm8, 4294967295, %v17460_v56  ;;  %vm15285_vm0 = vmand %vm17465_vm3, %vm17464_vm14  ;;  %v17466_v2 = vmov 0  ;;  %vm17469_vm9 = vcmask 64512   ;;  %v5155_v51 = vsel %vm15164_vm2, %v4470_v32, -3.4028235e+38  ;;  %v17473_v16 = vld [vmem:[#allocation60_spill] sm:$0xff] }
 0x2f9   : > { %17462 = vst [vmem:[#allocation52_spill] sm:$0xff] %v17461_v56  ;;  %v17467_v2 = vsel %vm15285_vm0, 4294967295, %v17466_v2  ;;  %5192 = vst.msk [vmem:[#allocation2 + $0x2b] sm:$0xff] %vm17469_vm9, %v5156_v5  ;;  %v4436_v47 = vadd.f32 %v15135_v37, %v4393_v18  ;;  %v12407_v3 = vadd.f32 %v4197_v23, %v17470_v11  ;;  %vm17472_vm12 = vnez %v17471_v48  ;;  %v17491_v48 = vld [vmem:[#allocation68_spill] sm:$0xff]  ;;  %v17522_v56 = vld [vmem:[#allocation74_spill] sm:$0xff] }
 0x2fa   : > { %17468 = vst [vmem:[#allocation47_spill] sm:$0xff] %v17467_v2  ;;  %v17475_v58 = vsel %vm17472_vm12, %v17473_v16, %v17474_v33  ;;  %vm17478_vm14 = vcmp.ne.s32.totalorder %v15179_v60, 0  ;;  %vm17479_vm9 = vcmp.lt.s32.totalorder %v15179_v60, 0  ;;  %v15313_v32 = vadd.s32 18, %v15213_v15  ;;  %v17493_v16 = vld [vmem:[#allocation69_spill] sm:$0xff]  ;;  %v17494_v33 = vld [vmem:[#allocation55_spill] sm:$0xff] }
 0x2fb   : > { %vm15300_vm3 = vcmp.lt.s32.totalorder %v17475_v58, 16  ;;  %vm15308_vm5 = vmand %vm17479_vm9, %vm17478_vm14  ;;  %vm17484_vm2 = vcmask 64512   ;;  %v4473_v18 = vmax.f32 %v4437_v42, 0.0  ;;  %v4396_v5 = vmul.f32 %v12406_v55, %v15109_v25  ;;  %v11672_v55 = vpop.f32.mrb[8].mxu0  ;;  %v17505_v2 = vld [vmem:[#allocation22_spill] sm:$0xff] }
 0x2fc   : > { %v17481_v43 = vsel %vm15308_vm5, 4294967295, %v17480_v43  ;;  %17483 = vst [vmem:[#allocation18_spill] sm:$0xff] %v15313_v32  ;;  %5191 = vst.msk [vmem:[#allocation2 + $0x23] sm:$0xff] %vm17484_vm2, %v5155_v51  ;;  %vm17485_vm12 = vcmp.ne.s32.totalorder %v15213_v15, 0  ;;  %vm17486_vm14 = vcmp.lt.s32.totalorder %v15213_v15, 0  ;;  %v17487_v23 = vmov 0 }
 0x2fd   : > { %17482 = vst [vmem:[#allocation17_spill] sm:$0xff] %v17481_v43  ;;  %vm15325_vm9 = vmand %vm17486_vm14, %vm17485_vm12  ;;  %v15330_v11 = vadd.s32 18, %v15221_v46  ;;  %v4472_v51 = vmax.f32 %v4436_v47, 0.0  ;;  %v4395_v42 = vmul.f32 %v12407_v3, %v15109_v25  ;;  %vm17492_vm2 = vnez %v17491_v48  ;;  %v4207_v38 = vpop.f32.mrb[9].mxu0  ;;  %v5515_v15 = vld [vmem:[#allocation2 + $0x14] sm:$0xff] }
 0x2fe   : > { %v17488_v23 = vsel %vm15325_vm9, 4294967295, %v17487_v23  ;;  %v17495_v58 = vsel %vm17492_vm2, %v17493_v16, %v17494_v33  ;;  %vm17498_vm12 = vcmp.ne.s32.totalorder %v15221_v46, 0  ;;  %vm17499_vm14 = vcmp.lt.s32.totalorder %v15221_v46, 0  ;;  %v17503_v16 = vld [vmem:[#allocation21_spill] sm:$0xff]  ;;  %v11675_v60 = vpop.f32.mrb[10].mxu0 }
 0x2ff   : > { %17489 = vst [vmem:[#allocation62_spill] sm:$0xff] %v17488_v23  ;;  %17490 = vst [vmem:[#allocation54_spill] sm:$0xff] %v15330_v11  ;;  %vm15338_vm13 = vcmp.lt.s32.totalorder %v17495_v58, 16  ;;  %v17500_v3 = vmov 0  ;;  %v5158_v58 = vsel %vm15188_vm15, %v4473_v18, -3.4028235e+38  ;;  %v4439_v48 = vadd.f32 %v15135_v37, %v4396_v5 }
 0x300   : > { %vm15354_vm4 = vmand %vm17499_vm14, %vm17498_vm12  ;;  %v12408_v33 = vadd.f32 %v11672_v55, %v17503_v16  ;;  %vm17504_vm2 = vcmask 64512   ;;  %v5157_v13 = vsel %vm15207_vm7, %v4472_v51, -3.4028235e+38  ;;  %v4438_v40 = vadd.f32 %v15135_v37, %v4395_v42  ;;  %v5335_v5 = vld [vmem:[#allocation2 + $0x12] sm:$0xff]  ;;  %v5336_v55 = vld [vmem:[#allocation2 + $0x1a] sm:$0xff]  ;;  %v4217_v32 = vpop.f32.mrb[11].mxu0 }
 0x301   : > { %v17501_v3 = vsel %vm15354_vm4, 4294967295, %v17500_v3  ;;  %5194 = vst.msk [vmem:[#allocation2 + $0x3b] sm:$0xff] %vm17504_vm2, %v5158_v58  ;;  %v12409_v24 = vadd.f32 %v4207_v38, %v17505_v2  ;;  %vm17506_vm15 = vmmov %vm17504_vm2  ;;  %v4475_v16 = vmax.f32 %v4439_v48, 0.0  ;;  %v17507_v51 = vld [vmem:[#allocation67_spill] sm:$0xff]  ;;  %v5444_v23 = vld [vmem:[#allocation2 + $0x1b] sm:$0xff] }
 0x302   : > { %17502 = vst [vmem:[#allocation50_spill] sm:$0xff] %v17501_v3  ;;  %5193 = vst.msk [vmem:[#allocation2 + $0x33] sm:$0xff] %vm17506_vm15, %v5157_v13  ;;  %v4398_v47 = vmul.f32 %v12408_v33, %v15109_v25  ;;  %v5407_v42 = vmax.f32 %v17507_v51, %v5335_v5  ;;  %v17508_v38 = vld [vmem:[#allocation71_spill] sm:$0xff]  ;;  %v4474_v58 = vmax.f32 %v4438_v40, 0.0 }
 0x303   : > { %v5408_v2 = vmax.f32 %v17508_v38, %v5336_v55  ;;  %v5443_v18 = vld [vmem:[#allocation2 + $0x13] sm:$0xff]  ;;  %v5160_v13 = vsel %vm15238_vm6, %v4475_v16, -3.4028235e+38  ;;  %v4397_v33 = vmul.f32 %v12409_v24, %v15109_v25  ;;  %v5229_v3 = vld [vmem:[#allocation2 + $0x20] sm:$0xff]  ;;  %v5230_v12 = vld [vmem:[#allocation2 + $0x28] sm:$0xff] }
 0x304   : > { %v4441_v48 = vadd.f32 %v15135_v37, %v4398_v47  ;;  %v5479_v59 = vmax.f32 %v5407_v42, %v5443_v18  ;;  %v5265_v46 = vld [vmem:[#allocation2 + $0x21] sm:$0xff]  ;;  %vm17509_vm7 = vmmov %vm17504_vm2  ;;  %v5159_v40 = vsel %vm15250_vm11, %v4474_v58, -3.4028235e+38  ;;  %v5266_v55 = vld [vmem:[#allocation2 + $0x29] sm:$0xff]  ;;  %vm17513_vm11 = vnez %v17512_v29 }
 0x305   : > { %v5480_v5 = vmax.f32 %v5408_v2, %v5444_v23  ;;  %5196 = vst.msk [vmem:[#allocation2 + $0x4b] sm:$0xff] %vm17509_vm7, %v5160_v13  ;;  %v5301_v51 = vmax.f32 %v5229_v3, %v5265_v46  ;;  %v5337_v38 = vld [vmem:[#allocation2 + $0x22] sm:$0xff]  ;;  %v5338_v0 = vld [vmem:[#allocation2 + $0x2a] sm:$0xff]  ;;  %vm17510_vm6 = vmmov %vm17504_vm2  ;;  %v4440_v24 = vadd.f32 %v15135_v37, %v4397_v33  ;;  %v5302_v11 = vmax.f32 %v5230_v12, %v5266_v55  ;;  %v15393_v23 = vpop.f32.mrb[12].mxu0 }
 0x306   : > { %5195 = vst.msk [vmem:[#allocation2 + $0x43] sm:$0xff] %vm17510_vm6, %v5159_v40  ;;  %v4477_v47 = vmax.f32 %v4441_v48, 0.0  ;;  %v17511_v16 = vld [vmem:[#allocation24_spill] sm:$0xff]  ;;  %v5551_v42 = vmax.f32 %v5479_v59, %v5515_v15  ;;  %v5517_v13 = vld [vmem:[#allocation2 + $0x24] sm:$0xff]  ;;  %vm17519_vm14 = vmmov %vm17504_vm2 }
 0x307   : > { %v12410_v18 = vadd.f32 %v11675_v60, %v17511_v16  ;;  %v5516_v43 = vld [vmem:[#allocation2 + $0x1c] sm:$0xff]  ;;  %v5373_v2 = vmax.f32 %v5301_v51, %v5337_v38  ;;  %v5625_v58 = vld [vmem:[#allocation2 + $0x25] sm:$0xff]  ;;  %v4476_v3 = vmax.f32 %v4440_v24, 0.0  ;;  %v5374_v15 = vmax.f32 %v5302_v11, %v5338_v0 }
 0x308   : > { %v5552_v49 = vmax.f32 %v5480_v5, %v5516_v43  ;;  %v5162_v46 = vsel %vm15300_vm3, %v4477_v47, -3.4028235e+38  ;;  %v17514_v48 = vld [vmem:[#allocation70_spill] sm:$0xff]  ;;  %v17515_v40 = vld [vmem:[#allocation56_spill] sm:$0xff]  ;;  %v5589_v59 = vmax.f32 %v5551_v42, %v5517_v13  ;;  %v4227_v43 = vpop.f32.mrb[13].mxu0  ;;  %v17520_v47 = vld [vmem:[#allocation25_spill] sm:$0xff] }
 0x309   : > { %v17516_v33 = vsel %vm17513_vm11, %v17514_v48, %v17515_v40  ;;  %v5231_v12 = vld [vmem:[#allocation2 + $0x30] sm:$0xff]  ;;  %5198 = vst.msk [vmem:[#allocation2 + $0x5b] sm:$0xff] %vm17519_vm14, %v5162_v46  ;;  %v5340_v51 = vld [vmem:[#allocation2 + $0x3a] sm:$0xff]  ;;  %v5161_v29 = vsel %vm15338_vm13, %v4476_v3, -3.4028235e+38  ;;  %v4400_v38 = vmul.f32 %v12410_v18, %v15109_v25  ;;  %v12411_v24 = vadd.f32 %v4217_v32, %v17520_v47  ;;  %v5697_v48 = vld [vmem:[#allocation2 + $0x26] sm:$0xff] }
 0x30a   : > { %vm15402_vm12 = vcmp.lt.s32.totalorder %v17516_v33, 16  ;;  %v5267_v55 = vld [vmem:[#allocation2 + $0x31] sm:$0xff]  ;;  %v5661_v16 = vmax.f32 %v5589_v59, %v5625_v58  ;;  %vm17521_vm3 = vmmov %vm17504_vm2  ;;  %v15412_v0 = vpop.f32.mrb[14].mxu0  ;;  %v5448_v42 = vld [vmem:[#allocation2 + $0x3b] sm:$0xff]  ;;  %v5412_v46 = vmax.f32 %v5374_v15, %v5340_v51  ;;  %vm17187_vm13 = vcmask 57344  }
 0x30b   : > { %v5303_v5 = vmax.f32 %v5231_v12, %v5267_v55  ;;  %v5339_v17 = vld [vmem:[#allocation2 + $0x32] sm:$0xff]  ;;  %5197 = vst.msk [vmem:[#allocation2 + $0x53] sm:$0xff] %vm17521_vm3, %v5161_v29  ;;  %v15414_v41 = vpop.f32.mrb[15].mxu0  ;;  %v4443_v29 = vadd.f32 %v15135_v37, %v4400_v38  ;;  %v4399_v14 = vmul.f32 %v12411_v24, %v15109_v25  ;;  %vm17523_vm2 = vnez %v17522_v56  ;;  %v17524_v15 = vld [vmem:[#allocation73_spill] sm:$0xff]  ;;  %vm17529_vm7 = vmmov %vm17521_vm3 }
 0x30c   : > { %v5411_v40 = vmax.f32 %v5373_v2, %v5339_v17  ;;  %v5518_v11 = vld [vmem:[#allocation2 + $0x2c] sm:$0xff]  ;;  %v5519_v12 = vld [vmem:[#allocation2 + $0x34] sm:$0xff]  ;;  %v5733_v18 = vmax.f32 %v5661_v16, %v5697_v48  ;;  %v5484_v47 = vmax.f32 %v5412_v46, %v5448_v42  ;;  %v15428_v42 = vpop.f32.mrb[16].mxu0  ;;  %vm17530_vm6 = vmmov %vm17521_vm3  ;;  %vm17532_vm11 = vnez %v17306_v36 }
 0x30d   : > { %v5375_v13 = vmax.f32 %v5303_v5, %v5339_v17  ;;  %v5447_v33 = vld [vmem:[#allocation2 + $0x33] sm:$0xff]  ;;  %v5590_v55 = vmax.f32 %v5552_v49, %v5518_v11  ;;  %v5234_v59 = vld [vmem:[#allocation2 + $0x48] sm:$0xff]  ;;  %v5520_v46 = vld [vmem:[#allocation2 + $0x3c] sm:$0xff]  ;;  %v4479_v56 = vmax.f32 %v4443_v29, 0.0  ;;  %vm17537_vm3 = vnez %v17310_v45 }
 0x30e   : > { %v5483_v3 = vmax.f32 %v5411_v40, %v5447_v33  ;;  %v5626_v32 = vld [vmem:[#allocation2 + $0x2d] sm:$0xff]  ;;  %5769 = vst.msk [vmem:[#allocation3] sm:$0xff] %vm17529_vm7, %v5733_v18  ;;  %v5341_v40 = vld [vmem:[#allocation2 + $0x42] sm:$0xff]  ;;  %v15430_v33 = vpop.f32.mrb[17].mxu0  ;;  %v17538_v60 = vsel %vm17537_vm3, %v14647_v6, %v14596_v63  ;;  %vm17542_vm7 = vnez %v17316_v61 }
 0x30f   : > { %v5662_v58 = vmax.f32 %v5590_v55, %v5626_v32  ;;  %v5270_v2 = vld [vmem:[#allocation2 + $0x49] sm:$0xff]  ;;  %v5413_v24 = vmax.f32 %v5375_v13, %v5341_v40  ;;  %v4442_v13 = vadd.f32 %v15135_v37, %v4399_v14 }
 0x310   : > { %v17525_v5 = vld [vmem:[#allocation58_spill] sm:$0xff]  ;;  %v5555_v51 = vmax.f32 %v5483_v3, %v5519_v12  ;;  %v5306_v48 = vmax.f32 %v5234_v59, %v5270_v2  ;;  %v17531_v29 = vld [vmem:[#allocation29_spill] sm:$0xff] }
 0x311   : > { %v17526_v17 = vsel %vm17523_vm2, %v17524_v15, %v17525_v5  ;;  %v5698_v16 = vld [vmem:[#allocation2 + $0x2e] sm:$0xff]  ;;  %v5449_v32 = vld [vmem:[#allocation2 + $0x43] sm:$0xff]  ;;  %v5556_v5 = vmax.f32 %v5484_v47, %v5520_v46  ;;  %v17533_v47 = vsel %vm17532_vm11, %v14627_v35, %v14560_v39  ;;  %vm17541_vm2 = vmmov %vm17530_vm6 }
 0x312   : > { %vm15423_vm15 = vcmp.lt.s32.totalorder %v17526_v17, 16  ;;  %v5342_v11 = vld [vmem:[#allocation2 + $0x4a] sm:$0xff]  ;;  %v5734_v38 = vmax.f32 %v5662_v58, %v5698_v16  ;;  %v5485_v18 = vmax.f32 %v5413_v24, %v5449_v32  ;;  %v5343_v17 = vld [vmem:[#allocation2 + $0x52] sm:$0xff]  ;;  %v5164_v58 = vsel %vm15402_vm12, %v4479_v56, -3.4028235e+38  ;;  %v5344_v35 = vld [vmem:[#allocation2 + $0x5a] sm:$0xff] }
 0x313   : > { %v5378_v55 = vmax.f32 %v5306_v48, %v5342_v11  ;;  %v5521_v15 = vld [vmem:[#allocation2 + $0x44] sm:$0xff]  ;;  %v5235_v59 = vld [vmem:[#allocation2 + $0x50] sm:$0xff]  ;;  %v12412_v16 = vadd.f32 %v15393_v23, %v17531_v29  ;;  %vm15443_vm14 = vcmp.lt.s32.totalorder %v17533_v47, 16  ;;  %vm15453_vm12 = vcmp.lt.s32.totalorder %v17538_v60, 16  ;;  %v15457_v23 = vpop.f32.mrb[18].mxu0  ;;  %5200 = vst.msk [vmem:[#allocation2 + $0x6b] sm:$0xff] %vm17541_vm2, %v5164_v58 }
 0x314   : > { %5770 = vst.msk [vmem:[#allocation3 + $0x8] sm:$0xff] %vm17530_vm6, %v5734_v38  ;;  %v5593_v12 = vmax.f32 %v5555_v51, %v5521_v15  ;;  %v5629_v3 = vld [vmem:[#allocation2 + $0x45] sm:$0xff]  ;;  %v5271_v2 = vld [vmem:[#allocation2 + $0x51] sm:$0xff]  ;;  %v5557_v36 = vmax.f32 %v5485_v18, %v5521_v15  ;;  %v15460_v24 = vpop.f32.mrb[19].mxu0  ;;  %v5452_v45 = vld [vmem:[#allocation2 + $0x5b] sm:$0xff]  ;;  %v17543_v15 = vsel %vm17542_vm7, %v14655_v7, %v14617_v20 }
 0x315   : > { %v17536_v51 = vld [vmem:[#allocation30_spill] sm:$0xff]  ;;  %v5307_v39 = vmax.f32 %v5235_v59, %v5271_v2  ;;  %v5416_v46 = vmax.f32 %v5378_v55, %v5344_v35  ;;  %v5523_v63 = vld [vmem:[#allocation2 + $0x54] sm:$0xff]  ;;  %vm15469_vm6 = vcmp.lt.s32.totalorder %v17543_v15, 16  ;;  %v4478_v59 = vmax.f32 %v4442_v13, 0.0  ;;  %v17548_v55 = vld [vmem:[#allocation81_spill] sm:$0xff]  ;;  %v15482_v61 = vpop.f32.mrb[20].mxu0 }
 0x316   : > { %v12413_v40 = vadd.f32 %v4227_v43, %v17536_v51  ;;  %v5665_v11 = vmax.f32 %v5593_v12, %v5629_v3  ;;  %v5522_v38 = vld [vmem:[#allocation2 + $0x4c] sm:$0xff]  ;;  %v5595_v3 = vmax.f32 %v5557_v36, %v5523_v63  ;;  %v5810_v7 = vld [vmem:[#allocation3 + $0x4] sm:$0x1]  ;;  %v5631_v47 = vld [vmem:[#allocation2 + $0x55] sm:$0xff]  ;;  %v4402_v36 = vmul.f32 %v12412_v16, %v15109_v25  ;;  %v4267_v15 = vpop.f32.mrb[21].mxu0 }
 0x317   : > { %v5701_v43 = vld [vmem:[#allocation2 + $0x46] sm:$0xff]  ;;  %v15462_v6 = vmax.f32 %v5307_v39, %v5343_v17  ;;  %v5594_v32 = vmax.f32 %v5556_v5, %v5522_v38  ;;  %v5805_v12 = vld [vmem:[#allocation3] sm:$0x1]  ;;  %v17546_v2 = vld [vmem:[#allocation91_spill] sm:$0xff]  ;;  %v15486_v60 = vmax.f32 %v5416_v46, %v5452_v45  ;;  %5811 = vst.msk [vmem:[#allocation4 + $0xd] sm:$0x1] %vm17187_vm13, %v5810_v7 }
 0x318   : > { %v5737_v56 = vmax.f32 %v5665_v11, %v5701_v43  ;;  %v5630_v29 = vld [vmem:[#allocation2 + $0x4d] sm:$0xff]  ;;  %vm17547_vm11 = vnez %v17546_v2  ;;  %v17549_v17 = vld [vmem:[#allocation77_spill] sm:$0xff]  ;;  %5807 = vst.msk [vmem:[#allocation4 + $0xb] sm:$0x1] %vm17187_vm13, %v5805_v12  ;;  %v4401_v11 = vmul.f32 %v12413_v40, %v15109_v25  ;;  %v5812_v45 = vld [vmem:[#allocation3 + $0x6] sm:$0x1]  ;;  %v5667_v46 = vmax.f32 %v5595_v3, %v5631_v47 }
 0x319   : > { %v17550_v58 = vsel %vm17547_vm11, %v17548_v55, %v17549_v17  ;;  %v5808_v20 = vld [vmem:[#allocation3 + $0x2] sm:$0x1]  ;;  %v5666_v51 = vmax.f32 %v5594_v32, %v5630_v29  ;;  %v17553_v39 = vld [vmem:[#allocation93_spill] sm:$0xff]  ;;  %v17555_v35 = vld [vmem:[#allocation82_spill] sm:$0xff]  ;;  %v5163_v16 = vsel %vm15423_vm15, %v4478_v59, -3.4028235e+38  ;;  %v4445_v55 = vadd.f32 %v15135_v37, %v4402_v36 }
 0x31a   : > { %vm15478_vm3 = vcmp.lt.s32.totalorder %v17550_v58, 16  ;;  %5773 = vst.msk [vmem:[#allocation3 + $0x20] sm:$0xff] %vm17541_vm2, %v5737_v56  ;;  %v5702_v13 = vld [vmem:[#allocation2 + $0x4e] sm:$0xff]  ;;  %vm17554_vm7 = vnez %v17553_v39  ;;  %v17560_v40 = vld [vmem:[#allocation32_spill] sm:$0xff]  ;;  %5199 = vst.msk [vmem:[#allocation2 + $0x63] sm:$0xff] %vm17541_vm2, %v5163_v16  ;;  %v4444_v17 = vadd.f32 %v15135_v37, %v4401_v11 }
 0x31b   : > { %v17556_v38 = vld [vmem:[#allocation79_spill] sm:$0xff]  ;;  %5809 = vst.msk [vmem:[#allocation4 + $0xc] sm:$0x1] %vm17187_vm13, %v5808_v20  ;;  %v12414_v56 = vadd.f32 %v15412_v0, %v17560_v40  ;;  %5813 = vst.msk [vmem:[#allocation4 + $0xe] sm:$0x1] %vm17187_vm13, %v5812_v45  ;;  %v5738_v2 = vmax.f32 %v5666_v51, %v5702_v13  ;;  %v17561_v58 = vld [vmem:[#allocation34_spill] sm:$0xff] }
 0x31c   : > { %v17557_v43 = vsel %vm17554_vm7, %v17555_v35, %v17556_v38  ;;  %v5814_v32 = vld [vmem:[#allocation3 + $0x8] sm:$0x1]  ;;  %v5816_v29 = vld [vmem:[#allocation3 + $0xa] sm:$0x1]  ;;  %v12415_v3 = vadd.f32 %v15414_v41, %v17561_v58  ;;  %v17562_v49 = vld [vmem:[#allocation94_spill] sm:$0xff]  ;;  %v11693_v38 = vpop.f32.mrb[22].mxu0 }
 0x31d   : > { %vm15495_vm11 = vcmp.lt.s32.totalorder %v17557_v43, 16  ;;  %v5703_v12 = vld [vmem:[#allocation2 + $0x56] sm:$0xff]  ;;  %vm17563_vm15 = vnez %v17562_v49  ;;  %5815 = vst.msk [vmem:[#allocation4 + $0xf] sm:$0x1] %vm17187_vm13, %v5814_v32  ;;  %5817 = vst.msk [vmem:[#allocation4 + $0x10] sm:$0x1] %vm17187_vm13, %v5816_v29  ;;  %v4404_v36 = vmul.f32 %v12414_v56, %v15109_v25 }
 0x31e   : > { %v17564_v59 = vld [vmem:[#allocation88_spill] sm:$0xff]  ;;  %v17565_v20 = vld [vmem:[#allocation83_spill] sm:$0xff]  ;;  %v5739_v13 = vmax.f32 %v5667_v46, %v5703_v12  ;;  %v17570_v39 = vld [vmem:[#allocation37_spill] sm:$0xff]  ;;  %5774 = vst.msk [vmem:[#allocation3 + $0x28] sm:$0xff] %vm17541_vm2, %v5738_v2  ;;  %v4481_v43 = vmax.f32 %v4445_v55, 0.0  ;;  %v4480_v45 = vmax.f32 %v4444_v17, 0.0  ;;  %v4403_v16 = vmul.f32 %v12415_v3, %v15109_v25 }
 0x31f   : > { %v17566_v0 = vsel %vm17563_vm15, %v17564_v59, %v17565_v20  ;;  %v5818_v47 = vld [vmem:[#allocation3 + $0xc] sm:$0x1]  ;;  %v5820_v51 = vld [vmem:[#allocation3 + $0xe] sm:$0x1]  ;;  %v12417_v35 = vadd.f32 %v15430_v33, %v17570_v39  ;;  %v15533_v56 = vpop.f32.mrb[23].mxu0  ;;  %vm17572_vm15 = vmmov %vm17541_vm2 }
 0x320   : > { %vm15516_vm7 = vcmp.lt.s32.totalorder %v17566_v0, 16  ;;  %v17569_v11 = vld [vmem:[#allocation36_spill] sm:$0xff]  ;;  %5819 = vst.msk [vmem:[#allocation4 + $0x11] sm:$0x1] %vm17187_vm13, %v5818_v47  ;;  %5821 = vst.msk [vmem:[#allocation4 + $0x12] sm:$0x1] %vm17187_vm13, %v5820_v51 }
 0x321   : > { %v12416_v41 = vadd.f32 %v15428_v42, %v17569_v11  ;;  %v17571_v46 = vld [vmem:[#allocation40_spill] sm:$0xff]  ;;  %5775 = vst.msk [vmem:[#allocation3 + $0x30] sm:$0xff] %vm17572_vm15, %v5739_v13  ;;  %v4447_v42 = vadd.f32 %v15135_v37, %v4404_v36  ;;  %v4405_v32 = vmul.f32 %v12417_v35, %v15109_v25  ;;  %v17573_v29 = vld [vmem:[#allocation42_spill] sm:$0xff]  ;;  %v5166_v2 = vsel %vm15443_vm14, %v4481_v43, -3.4028235e+38  ;;  %vm17574_vm15 = vmmov %vm17541_vm2  ;;  %v15561_v47 = vpop.f32.mrb[24].mxu0 }
 0x322   : > { %v12418_v40 = vadd.f32 %v15457_v23, %v17571_v46  ;;  %v12419_v12 = vadd.f32 %v15460_v24, %v17573_v29  ;;  %v5165_v55 = vsel %vm15453_vm12, %v4480_v45, -3.4028235e+38  ;;  %v4446_v23 = vadd.f32 %v15135_v37, %v4403_v16  ;;  %5202 = vst.msk [vmem:[#allocation2 + $0x7b] sm:$0xff] %vm17541_vm2, %v5166_v2  ;;  %v17575_v24 = vld [vmem:[#allocation96_spill] sm:$0xff]  ;;  %v17578_v59 = vld [vmem:[#allocation85_spill] sm:$0xff]  ;;  %v17584_v39 = vld [vmem:[#allocation95_spill] sm:$0xff] }
 0x323   : > { %v4406_v33 = vmul.f32 %v12416_v41, %v15109_v25  ;;  %5201 = vst.msk [vmem:[#allocation2 + $0x73] sm:$0xff] %vm17574_vm15, %v5165_v55  ;;  %v4483_v58 = vmax.f32 %v4447_v42, 0.0  ;;  %v4448_v49 = vadd.f32 %v15135_v37, %v4405_v32  ;;  %vm17576_vm13 = vnez %v17575_v24  ;;  %v17577_v48 = vld [vmem:[#allocation92_spill] sm:$0xff]  ;;  %v5822_v51 = vld [vmem:[#allocation3 + $0x24] sm:$0x1]  ;;  %v17582_v41 = vld [vmem:[#allocation98_spill] sm:$0xff] }
 0x324   : > { %v4408_v17 = vmul.f32 %v12418_v40, %v15109_v25  ;;  %v17579_v20 = vsel %vm17576_vm13, %v17577_v48, %v17578_v59  ;;  %v4407_v0 = vmul.f32 %v12419_v12, %v15109_v25  ;;  %v5824_v13 = vld [vmem:[#allocation3 + $0x26] sm:$0x1]  ;;  %v4482_v36 = vmax.f32 %v4446_v23, 0.0  ;;  %v17590_v40 = vld [vmem:[#allocation44_spill] sm:$0xff]  ;;  %v5238_v32 = vld [vmem:[#allocation2 + $0x68] sm:$0xff] }
 0x325   : > { %v4449_v3 = vadd.f32 %v15135_v37, %v4406_v33  ;;  %vm15556_vm14 = vcmp.lt.s32.totalorder %v17579_v20, 16  ;;  %vm17583_vm12 = vnez %v17582_v41  ;;  %v17585_v35 = vld [vmem:[#allocation87_spill] sm:$0xff]  ;;  %v12421_v42 = vadd.f32 %v4267_v15, %v17590_v40  ;;  %v15578_v33 = vpop.f32.mrb[25].mxu0  ;;  %v17593_v55 = vld [vmem:[#allocation46_spill] sm:$0xff]  ;;  %v17597_v63 = vld [vmem:[#allocation100_spill] sm:$0xff] }
 0x326   : > { %v15564_v11 = vadd.f32 %v15135_v37, %v4408_v17  ;;  %v17586_v43 = vsel %vm17583_vm12, %v17584_v39, %v17585_v35  ;;  %v17589_v16 = vld [vmem:[#allocation43_spill] sm:$0xff]  ;;  %vm17591_vm2 = vcmask 57344   ;;  %v5168_v29 = vsel %vm15469_vm6, %v4483_v58, -3.4028235e+38  ;;  %v5274_v17 = vld [vmem:[#allocation2 + $0x69] sm:$0xff]  ;;  %v5524_v58 = vld [vmem:[#allocation2 + $0x5c] sm:$0xff] }
 0x327   : > { %vm15571_vm13 = vcmp.lt.s32.totalorder %v17586_v43, 16  ;;  %v12420_v46 = vadd.f32 %v15482_v61, %v17589_v16  ;;  %5823 = vst.msk [vmem:[#allocation4 + $0x15] sm:$0x1] %vm17591_vm2, %v5822_v51  ;;  %vm17592_vm15 = vmmov %vm17591_vm2  ;;  %v4485_v12 = vmax.f32 %v4449_v3, 0.0  ;;  %v15585_v2 = vadd.f32 %v15135_v37, %v4407_v0  ;;  %v5345_v61 = vld [vmem:[#allocation2 + $0x62] sm:$0xff]  ;;  %v5346_v24 = vld [vmem:[#allocation2 + $0x6a] sm:$0xff] }
 0x328   : > { %5825 = vst.msk [vmem:[#allocation4 + $0x16] sm:$0x1] %vm17592_vm15, %v5824_v13  ;;  %v12422_v23 = vadd.f32 %v11693_v38, %v17593_v55  ;;  %vm17594_vm12 = vcmask 64512   ;;  %v5167_v15 = vsel %vm15478_vm3, %v4482_v36, -3.4028235e+38  ;;  %v4484_v48 = vmax.f32 %v4448_v49, 0.0 }
 0x329   : > { %5204 = vst.msk [vmem:[#allocation2 + $0x8b] sm:$0xff] %vm17594_vm12, %v5168_v29  ;;  %v4410_v59 = vmul.f32 %v12420_v46, %v15109_v25  ;;  %v5310_v20 = vmax.f32 %v5238_v32, %v5274_v17  ;;  %v5417_v18 = vmax.f32 %v15462_v6, %v5345_v61  ;;  %v5525_v3 = vld [vmem:[#allocation2 + $0x64] sm:$0xff]  ;;  %vm17595_vm6 = vmmov %vm17594_vm12  ;;  %v5170_v38 = vsel %vm15495_vm11, %v4485_v12, -3.4028235e+38  ;;  %v15596_v0 = vpop.f32.mrb[26].mxu0  ;;  %v10400_v5 = vld [vmem:[%s17057_s4 + $0x10] sm:$0xff] }
 0x32a   : > { %5203 = vst.msk [vmem:[#allocation2 + $0x83] sm:$0xff] %vm17595_vm6, %v5167_v15  ;;  %v5453_v51 = vld [vmem:[#allocation2 + $0x63] sm:$0xff]  ;;  %v5560_v49 = vmax.f32 %v15486_v60, %v5524_v58  ;;  %vm17596_vm3 = vmmov %vm17595_vm6  ;;  %v15603_v13 = vpop.f32.mrb[27].mxu0  ;;  %v5169_v41 = vsel %vm15516_vm7, %v4484_v48, -3.4028235e+38  ;;  %v5946_v16 = vld [vmem:[#allocation4 + $0x9] sm:$0xff]  ;;  %v4409_v61 = vmul.f32 %v12421_v42, %v15109_v25 }
 0x32b   : > { %5206 = vst.msk [vmem:[#allocation2 + $0x9b] sm:$0xff] %vm17596_vm3, %v5170_v38  ;;  %v5382_v6 = vmax.f32 %v5310_v20, %v5346_v24  ;;  %v5489_v36 = vmax.f32 %v5417_v18, %v5453_v51  ;;  %v17598_v39 = vld [vmem:[#allocation97_spill] sm:$0xff]  ;;  %v5826_v60 = vld [vmem:[#allocation3 + $0x28] sm:$0x1]  ;;  %v5239_v46 = vld [vmem:[#allocation2 + $0x70] sm:$0xff]  ;;  %v4487_v32 = vmax.f32 %v15564_v11, 0.0  ;;  %v4453_v17 = vadd.f32 %v15135_v37, %v4410_v59 }
 0x32c   : > { %v17599_v35 = vsel %vm14929_vm10, %v17597_v63, %v17598_v39  ;;  %v5240_v40 = vld [vmem:[#allocation2 + $0x78] sm:$0xff]  ;;  %vm17602_vm2 = vmmov %vm17596_vm3  ;;  %v4486_v7 = vmax.f32 %v15585_v2, 0.0  ;;  %5827 = vst.msk [vmem:[#allocation4 + $0x17] sm:$0x1] %vm17592_vm15, %v5826_v60  ;;  %v17604_v24 = vld [vmem:[#allocation105_spill] sm:$0xff]  ;;  %v4412_v2 = vmul.f32 %v12422_v23, %v15109_v25  ;;  %v15633_v20 = vpop.f32.mrb[28].mxu0 }
 0x32d   : > { %vm15612_vm11 = vcmp.lt.s32.totalorder %v17599_v35, 16  ;;  %5205 = vst.msk [vmem:[#allocation2 + $0x93] sm:$0xff] %vm17602_vm2, %v5169_v41  ;;  %vm17603_vm7 = vmmov %vm17602_vm2  ;;  %v5561_v1 = vmax.f32 %v5489_v36, %v5525_v3  ;;  %v5275_v29 = vld [vmem:[#allocation2 + $0x71] sm:$0xff]  ;;  %v5276_v12 = vld [vmem:[#allocation2 + $0x79] sm:$0xff]  ;;  %v15636_v42 = vpop.f32.mrb[29].mxu0 }
 0x32e   : > { %11715 = vmatmul.mubr.msk.f32.vlgmr.msra.gmra.mrb[36].mxu1 %vm17603_vm7, %v5946_v16  ;;  %v5347_v55 = vld [vmem:[#allocation2 + $0x72] sm:$0xff]  ;;  %v5311_v18 = vmax.f32 %v5239_v46, %v5275_v29  ;;  %v5312_v58 = vmax.f32 %v5240_v40, %v5276_v12  ;;  %v5348_v59 = vld [vmem:[#allocation2 + $0x7a] sm:$0xff]  ;;  %v15643_v46 = vpop.f32.mrb[30].mxu0  ;;  %v4452_v29 = vadd.f32 %v15135_v37, %v4409_v61  ;;  %vm17621_vm7 = vnez %v17368_v34 }
 0x32f   : > { %v17605_v15 = vld [vmem:[#allocation99_spill] sm:$0xff]  ;;  %11730 = vmatpush3.msra.mxu1 %v15199_v52  ;;  %v5456_v54 = vld [vmem:[#allocation2 + $0x7b] sm:$0xff]  ;;  %v5420_v38 = vmax.f32 %v5382_v6, %v5348_v59  ;;  %v5172_v52 = vsel %vm15556_vm14, %v4487_v32, -3.4028235e+38  ;;  %v15647_v12 = vpop.f32.mrb[31].mxu0 }
 0x330   : > { %v17606_v48 = vsel %vm14943_vm1, %v17604_v24, %v17605_v15  ;;  %v5526_v3 = vld [vmem:[#allocation2 + $0x6c] sm:$0xff]  ;;  %11746 = vmatprep.subr.mxu1 %v10400_v5  ;;  %v5527_v51 = vld [vmem:[#allocation2 + $0x74] sm:$0xff]  ;;  %v5383_v41 = vmax.f32 %v5311_v18, %v5347_v55  ;;  %v5384_v63 = vmax.f32 %v5312_v58, %v5348_v59  ;;  %vm17609_vm1 = vmmov %vm17602_vm2  ;;  %v5171_v5 = vsel %vm15571_vm13, %v4486_v7, -3.4028235e+38 }
 0x331   : > { %vm15628_vm10 = vcmp.lt.s32.totalorder %v17606_v48, 16  ;;  %v5598_v36 = vmax.f32 %v5560_v49, %v5526_v3  ;;  %v5599_v39 = vmax.f32 %v5561_v1, %v5527_v51  ;;  %v5634_v35 = vld [vmem:[#allocation2 + $0x6d] sm:$0xff]  ;;  %v5635_v25 = vld [vmem:[#allocation2 + $0x75] sm:$0xff]  ;;  %v5492_v60 = vmax.f32 %v5420_v38, %v5456_v54  ;;  %5208 = vst.msk [vmem:[#allocation2 + $0xab] sm:$0xff] %vm17609_vm1, %v5172_v52  ;;  %v5349_v49 = vld [vmem:[#allocation2 + $0x82] sm:$0xff]  ;;  %v15659_v54 = vpop.f32.mrb[32].mxu0 }
 0x332   : > { %v5706_v23 = vld [vmem:[#allocation2 + $0x6e] sm:$0xff]  ;;  %vm17610_vm12 = vmmov %vm17609_vm1  ;;  %v4489_v1 = vmax.f32 %v4453_v17, 0.0  ;;  %v5707_v14 = vld [vmem:[#allocation2 + $0x76] sm:$0xff]  ;;  %v5421_v55 = vmax.f32 %v5383_v41, %v5349_v49  ;;  %vm17612_vm13 = vnez %v17361_v8  ;;  %v4455_v8 = vadd.f32 %v15135_v37, %v4412_v2 }
 0x333   : > { %v5670_v16 = vmax.f32 %v5598_v36, %v5634_v35  ;;  %v5671_v6 = vmax.f32 %v5599_v39, %v5635_v25  ;;  %v5350_v40 = vld [vmem:[#allocation2 + $0x8a] sm:$0xff]  ;;  %5207 = vst.msk [vmem:[#allocation2 + $0xa3] sm:$0xff] %vm17610_vm12, %v5171_v5  ;;  %v5528_v24 = vld [vmem:[#allocation2 + $0x7c] sm:$0xff]  ;;  %vm17611_vm14 = vmmov %vm17609_vm1  ;;  %v17613_v17 = vsel %vm17612_vm13, %v14977_v27, %v14878_v10  ;;  %v4488_v39 = vmax.f32 %v4452_v29, 0.0 }
 0x334   : > { %v5458_v48 = vld [vmem:[#allocation2 + $0x8b] sm:$0xff]  ;;  %v5422_v45 = vmax.f32 %v5384_v63, %v5350_v40  ;;  %v5457_v7 = vld [vmem:[#allocation2 + $0x83] sm:$0xff]  ;;  %v5564_v58 = vmax.f32 %v5492_v60, %v5528_v24  ;;  %vm15655_vm6 = vcmp.lt.s32.totalorder %v17613_v17, 16  ;;  %vm17616_vm3 = vmmov %vm17609_vm1  ;;  %v5174_v63 = vsel %vm15612_vm11, %v4489_v1, -3.4028235e+38 }
 0x335   : > { %v5742_v32 = vmax.f32 %v5670_v16, %v5706_v23  ;;  %v5743_v15 = vmax.f32 %v5671_v6, %v5707_v14  ;;  %v5529_v18 = vld [vmem:[#allocation2 + $0x84] sm:$0xff]  ;;  %v5493_v59 = vmax.f32 %v5421_v55, %v5457_v7  ;;  %v5243_v3 = vld [vmem:[#allocation2 + $0x90] sm:$0xff]  ;;  %v5244_v38 = vld [vmem:[#allocation2 + $0x98] sm:$0xff]  ;;  %v15666_v23 = vpop.f32.mrb[33].mxu0  ;;  %v5173_v60 = vsel %vm15628_vm10, %v4488_v39, -3.4028235e+38 }
 0x336   : > { %v5279_v51 = vld [vmem:[#allocation2 + $0x91] sm:$0xff]  ;;  %v5280_v36 = vld [vmem:[#allocation2 + $0x99] sm:$0xff]  ;;  %v5494_v41 = vmax.f32 %v5422_v45, %v5458_v48  ;;  %vm17617_vm2 = vmmov %vm17609_vm1  ;;  %v15671_v37 = vpop.f32.mrb[34].mxu0  ;;  %v4491_v55 = vmax.f32 %v4455_v8, 0.0  ;;  %vm17627_vm10 = vnez %v17374_v26 }
 0x337   : > { %5778 = vst.msk [vmem:[#allocation3 + $0x48] sm:$0xff] %vm17611_vm14, %v5742_v32  ;;  %v5565_v35 = vmax.f32 %v5493_v59, %v5529_v18  ;;  %v5315_v27 = vmax.f32 %v5243_v3, %v5279_v51  ;;  %v5351_v10 = vld [vmem:[#allocation2 + $0x92] sm:$0xff]  ;;  %v5352_v25 = vld [vmem:[#allocation2 + $0x9a] sm:$0xff]  ;;  %v5316_v52 = vmax.f32 %v5244_v38, %v5280_v36  ;;  %vm17618_vm11 = vmmov %vm17609_vm1  ;;  %v15673_v14 = vpop.f32.mrb[35].mxu0 }
 0x338   : > { %5779 = vst.msk [vmem:[#allocation3 + $0x50] sm:$0xff] %vm17616_vm3, %v5743_v15  ;;  %v5530_v16 = vld [vmem:[#allocation2 + $0x8c] sm:$0xff]  ;;  %v5531_v6 = vld [vmem:[#allocation2 + $0x94] sm:$0xff]  ;;  %vm17631_vm12 = vmmov %vm17617_vm2 }
 0x339   : > { %5210 = vst.msk [vmem:[#allocation2 + $0xbb] sm:$0xff] %vm17617_vm2, %v5174_v63  ;;  %v5387_v5 = vmax.f32 %v5315_v27, %v5351_v10  ;;  %v5566_v43 = vmax.f32 %v5494_v41, %v5530_v16  ;;  %v5638_v49 = vld [vmem:[#allocation2 + $0x8d] sm:$0xff]  ;;  %v5388_v2 = vmax.f32 %v5316_v52, %v5352_v25  ;;  %v5602_v40 = vmax.f32 %v5564_v58, %v5530_v16  ;;  %v5639_v29 = vld [vmem:[#allocation2 + $0x95] sm:$0xff]  ;;  %v17623_v63 = vld [vmem:[#allocation101_spill] sm:$0xff] }
 0x33a   : > { %5209 = vst.msk [vmem:[#allocation2 + $0xb3] sm:$0xff] %vm17618_vm11, %v5173_v60  ;;  %v5603_v1 = vmax.f32 %v5565_v35, %v5531_v6  ;;  %v5353_v32 = vld [vmem:[#allocation2 + $0xa2] sm:$0xff]  ;;  %v17619_v24 = vld [vmem:[#allocation48_spill] sm:$0xff]  ;;  %v5710_v18 = vld [vmem:[#allocation2 + $0x8e] sm:$0xff]  ;;  %v17628_v25 = vsel %vm17627_vm10, %v15006_v50, %v14895_v19  ;;  %v5176_v50 = vsel %vm15655_vm6, %v4491_v55, -3.4028235e+38  ;;  %vm17643_vm10 = vnez %v17383_v44 }
 0x33b   : > { %v12423_v11 = vadd.f32 %v15533_v56, %v17619_v24  ;;  %v17620_v15 = vld [vmem:[#allocation64_spill] sm:$0xff]  ;;  %v5674_v45 = vmax.f32 %v5602_v40, %v5638_v49  ;;  %v5354_v59 = vld [vmem:[#allocation2 + $0xaa] sm:$0xff]  ;;  %v5425_v58 = vmax.f32 %v5387_v5, %v5353_v32  ;;  %v17622_v41 = vld [vmem:[#allocation107_spill] sm:$0xff]  ;;  %vm15693_vm1 = vcmp.lt.s32.totalorder %v17628_v25, 16 }
 0x33c   : > { %v12424_v48 = vadd.f32 %v15561_v47, %v17620_v15  ;;  %v5675_v7 = vmax.f32 %v5603_v1, %v5639_v29  ;;  %v5532_v3 = vld [vmem:[#allocation2 + $0x9c] sm:$0xff]  ;;  %v5462_v38 = vld [vmem:[#allocation2 + $0xab] sm:$0xff]  ;;  %v5426_v51 = vmax.f32 %v5388_v2, %v5354_v59  ;;  %v17624_v39 = vsel %vm17621_vm7, %v17622_v41, %v17623_v63  ;;  %v5828_v5 = vld [vmem:[#allocation3 + $0x2a] sm:$0x1] }
 0x33d   : > { %v5711_v17 = vld [vmem:[#allocation2 + $0x96] sm:$0xff]  ;;  %v5461_v36 = vld [vmem:[#allocation2 + $0xa3] sm:$0xff]  ;;  %vm15684_vm15 = vcmp.lt.s32.totalorder %v17624_v39, 16  ;;  %v5746_v47 = vmax.f32 %v5674_v45, %v5710_v18  ;;  %v5604_v27 = vmax.f32 %v5566_v43, %v5532_v3  ;;  %v5832_v49 = vld [vmem:[#allocation3 + $0x2e] sm:$0x1] }
 0x33e   : > { %v5747_v8 = vmax.f32 %v5675_v7, %v5711_v17  ;;  %v5533_v35 = vld [vmem:[#allocation2 + $0xa4] sm:$0xff]  ;;  %v5497_v34 = vmax.f32 %v5425_v58, %v5461_v36  ;;  %v15697_v60 = vmax.f32 %v5426_v51, %v5462_v38  ;;  %v5830_v6 = vld [vmem:[#allocation3 + $0x2c] sm:$0x1]  ;;  %vm17632_vm14 = vmmov %vm17617_vm2  ;;  %vm17638_vm2 = vcmask 57344  }
 0x33f   : > { %v5640_v10 = vld [vmem:[#allocation2 + $0x9d] sm:$0xff]  ;;  %5782 = vst.msk [vmem:[#allocation3 + $0x68] sm:$0xff] %vm17631_vm12, %v5746_v47  ;;  %vm17639_vm6 = vmmov %vm17638_vm2  ;;  %v17642_v7 = vld [vmem:[#allocation66_spill] sm:$0xff]  ;;  %v17644_v51 = vsel %vm17643_vm10, %v15036_v30, %v14919_v4 }
 0x340   : > { %v5712_v16 = vld [vmem:[#allocation2 + $0x9e] sm:$0xff]  ;;  %5783 = vst.msk [vmem:[#allocation3 + $0x70] sm:$0xff] %vm17632_vm14, %v5747_v8  ;;  %v5676_v43 = vmax.f32 %v5604_v27, %v5640_v10  ;;  %vm17640_vm11 = vmmov %vm17638_vm2  ;;  %v5569_v61 = vmax.f32 %v5497_v34, %v5533_v35  ;;  %v17653_v27 = vld [vmem:[#allocation102_spill] sm:$0xff] }
 0x341   : > { %v5247_v26 = vld [vmem:[#allocation2 + $0xb0] sm:$0xff]  ;;  %v5248_v2 = vld [vmem:[#allocation2 + $0xb8] sm:$0xff]  ;;  %v15706_v19 = vld [vmem:[%s17403_s2] ss:$0 sm:$0xff]  ;;  %5829 = vst.msk [vmem:[#allocation4 + $0x18] sm:$0x1] %vm17638_vm2, %v5828_v5 }
 0x342   : > { %v5283_v40 = vld [vmem:[#allocation2 + $0xb1] sm:$0xff]  ;;  %v4411_v1 = vmul.f32 %v15706_v19, %v12423_v11  ;;  %v4414_v29 = vmul.f32 %v15706_v19, %v12424_v48  ;;  %v17633_v32 = vld [vmem:[#allocation108_spill] sm:$0xff]  ;;  %5831 = vst.msk [vmem:[#allocation4 + $0x19] sm:$0x1] %vm17639_vm6, %v5830_v6  ;;  %vm17641_vm7 = vmmov %vm17631_vm12  ;;  %vm15736_vm12 = vcmp.lt.s32.totalorder %v17644_v51, 16  ;;  %vm17652_vm6 = vnez %v17393_v28  ;;  %s12992_s2 = sshll.u32 %s13056_s22, 4  ;;  %s12993_s2 = int_to_ptr.vmem [resolvable:$false] %s12992_s2 }
 0x343   : > { %vm17634_vm13 = vnez %v17633_v32  ;;  %5833 = vst.msk [vmem:[#allocation4 + $0x1a] sm:$0x1] %vm17640_vm11, %v5832_v49  ;;  %v5284_v55 = vld [vmem:[#allocation2 + $0xb9] sm:$0xff]  ;;  %v5319_v11 = vmax.f32 %v5247_v26, %v5283_v40  ;;  %v15725_v59 = vld [vmem:[#allocation2 + $0xac] sm:$0xff]  ;;  %vm17647_vm14 = vmmov %vm17641_vm7  ;;  %v17654_v10 = vsel %vm17652_vm6, %v15072_v31, %v17653_v27  ;;  %p12995_p0 = scmp.lt.s32.totalorder %s17012_s0, %s12993_s2 }
 0x344   : > { %v17635_v24 = vsel %vm17634_vm13, %v15019_v9, %v14901_v57  ;;  %v5355_v45 = vld [vmem:[#allocation2 + $0xb2] sm:$0xff]  ;;  %v5356_v48 = vld [vmem:[#allocation2 + $0xba] sm:$0xff]  ;;  %5212 = vst.msk [vmem:[#allocation2 + $0xcb] sm:$0xff] %vm17641_vm7, %v5176_v50  ;;  %v12425_v9 = vadd.f32 %v15578_v33, %v17642_v7  ;;  %v5748_v57 = vmax.f32 %v5676_v43, %v5712_v16  ;;  %v5320_v18 = vmax.f32 %v5248_v2, %v5284_v55  ;;  %v5836_v47 = vld [vmem:[#allocation3 + $0x32] sm:$0x1] }
 0x345   : > { %vm15715_vm3 = vcmp.lt.s32.totalorder %v17635_v24, 16  ;;  %v15727_v3 = vmax.f32 %v5319_v11, %v5355_v45  ;;  %v5535_v17 = vld [vmem:[#allocation2 + $0xb4] sm:$0xff]  ;;  %v5570_v38 = vmax.f32 %v15697_v60, %v15725_v59  ;;  %v15746_v63 = vld [vmem:[%s17405_s3] ss:$0 sm:$0xff]  ;;  %vm17648_vm13 = vnez %v17387_v21  ;;  %v5842_v25 = vld [vmem:[#allocation3 + $0x4c] sm:$0x1] }
 0x346   : > { %v5643_v58 = vld [vmem:[#allocation2 + $0xb5] sm:$0xff]  ;;  %5784 = vst.msk [vmem:[#allocation3 + $0x78] sm:$0xff] %vm17647_vm14, %v5748_v57  ;;  %v15741_v33 = vmax.f32 %v5320_v18, %v5356_v48  ;;  %v5607_v41 = vmax.f32 %v5569_v61, %v5535_v17  ;;  %v4454_v39 = vadd.f32 %v15746_v63, %v4411_v1  ;;  %v17649_v30 = vsel %vm17648_vm13, %v15047_v22, %v14937_v62  ;;  %v5834_v44 = vld [vmem:[#allocation3 + $0x30] sm:$0x1]  ;;  %v17660_v49 = vld [vmem:[#allocation110_spill] sm:$0xff]  ;;  %s12994_s3 = scalar_lea.vmem %s12993_s2, 32 }
 0x347   : > { %vm15754_vm2 = vcmp.lt.s32.totalorder %v17649_v30, 16  ;;  %v4457_v8 = vadd.f32 %v15746_v63, %v4414_v29  ;;  %v4413_v35 = vmul.f32 %v15706_v19, %v12425_v9  ;;  %vm15765_vm11 = vcmp.lt.s32.totalorder %v17654_v10, 16  ;;  %v5838_v22 = vld [vmem:[#allocation3 + $0x48] sm:$0x1]  ;;  %v5840_v62 = vld [vmem:[#allocation3 + $0x4a] sm:$0x1]  ;;  %p12996_p1 = scmp.lt.s32.totalorder %s12994_s3, %s12988_s26 }
 0x348   : > { %vm17657_vm7 = vcmask 57344   ;;  %v5679_v34 = vmax.f32 %v5607_v41, %v5643_v58  ;;  %v5715_v16 = vld [vmem:[#allocation2 + $0xb6] sm:$0xff]  ;;  %v4490_v5 = vmax.f32 %v4454_v39, 0.0  ;;  %vm17661_vm14 = vnez %v17660_v49  ;;  %v17662_v31 = vld [vmem:[#allocation109_spill] sm:$0xff]  ;;  %v5844_v40 = vld [vmem:[#allocation3 + $0x4e] sm:$0x1] }
 0x349   : > { %5835 = vst.msk [vmem:[#allocation4 + $0x1b] sm:$0x1] %vm17657_vm7, %v5834_v44  ;;  %vm17658_vm10 = vmmov %vm17657_vm7  ;;  %v17659_v6 = vld [vmem:[#allocation75_spill] sm:$0xff]  ;;  %v5846_v50 = vld [vmem:[#allocation3 + $0x50] sm:$0x1]  ;;  %v4493_v1 = vmax.f32 %v4457_v8, 0.0  ;;  %p12997_p2 = por %p12996_p1, %p12995_p0 }
 0x34a   : > { %5837 = vst.msk [vmem:[#allocation4 + $0x1c] sm:$0x1] %vm17658_vm10, %v5836_v47  ;;  %v12426_v28 = vadd.f32 %v15596_v0, %v17659_v6  ;;  %v17663_v43 = vld [vmem:[#allocation103_spill] sm:$0xff]  ;;  %vm17667_vm6 = vmmov %vm17657_vm7  ;;  %v4456_v0 = vadd.f32 %v15746_v63, %v4413_v35  ;;  %v17670_v29 = vld [vmem:[#allocation76_spill] sm:$0xff]  ;;  %v5751_v9 = vmax.f32 %v5679_v34, %v5715_v16 }
 0x34b   : > { %v17664_v26 = vsel %vm17661_vm14, %v17662_v31, %v17663_v43  ;;  %5839 = vst.msk [vmem:[#allocation4 + $0x1f] sm:$0x1] %vm17667_vm6, %v5838_v22  ;;  %vm17668_vm7 = vmmov %vm17667_vm6  ;;  %v12427_v32 = vadd.f32 %v15603_v13, %v17670_v29  ;;  %v5947_v24 = vld [vmem:[#allocation4 + $0x11] sm:$0xff]  ;;  %vm17671_vm14 = vnez %v17456_v53  ;;  %v17672_v61 = vld [vmem:[#allocation114_spill] sm:$0xff]  ;;  %v5175_v13 = vsel %vm15684_vm15, %v4490_v5, -3.4028235e+38  ;;  %p12998_p3 = pnand %p12997_p2, %p12991_p13 }
 0x34c   : > { %vm15778_vm13 = vcmp.lt.s32.totalorder %v17664_v26, 16  ;;  %5841 = vst.msk [vmem:[#allocation4 + $0x20] sm:$0x1] %vm17668_vm7, %v5840_v62  ;;  %vm17669_vm10 = vmmov %vm17667_vm6  ;;  %v17673_v55 = vld [vmem:[#allocation111_spill] sm:$0xff]  ;;  %v5848_v48 = vld [vmem:[#allocation3 + $0x52] sm:$0x1]  ;;  %v4416_v57 = vmul.f32 %v15706_v19, %v12426_v28 }
 0x34d   : > { %5843 = vst.msk [vmem:[#allocation4 + $0x21] sm:$0x1] %vm17669_vm10, %v5842_v25  ;;  %v17674_v11 = vsel %vm17671_vm14, %v17672_v61, %v17673_v55  ;;  %vm17677_vm7 = vmmov %vm17667_vm6  ;;  %v5850_v7 = vld [vmem:[#allocation3 + $0x54] sm:$0x1]  ;;  %v17678_v53 = vld [vmem:[#allocation78_spill] sm:$0xff]  ;;  %vm17679_vm10 = vcmask 64512   ;;  %v4415_v56 = vmul.f32 %v15706_v19, %v12427_v32 }
 0x34e   : > { %vm15793_vm4 = vcmp.lt.s32.totalorder %v17674_v11, 16  ;;  %5845 = vst.msk [vmem:[#allocation4 + $0x22] sm:$0x1] %vm17667_vm6, %v5844_v40  ;;  %v12428_v18 = vadd.f32 %v15633_v20, %v17678_v53  ;;  %11717 = vmatprep.mubr.msk.f32.mxu1 %vm17679_vm10, %v5947_v24  ;;  %vm17680_vm14 = vmmov %vm17667_vm6  ;;  %v5852_v17 = vld [vmem:[#allocation3 + $0x56] sm:$0x1]  ;;  %v4492_v51 = vmax.f32 %v4456_v0, 0.0  ;;  %v4459_v52 = vadd.f32 %v15746_v63, %v4416_v57 }
 0x34f   : > { %5847 = vst.msk [vmem:[#allocation4 + $0x23] sm:$0x1] %vm17677_vm7, %v5846_v50  ;;  %vm17681_vm9 = vmmov %vm17667_vm6  ;;  %v5178_v58 = vsel %vm15693_vm1, %v4493_v1, -3.4028235e+38  ;;  %v17683_v41 = vld [vmem:[#allocation80_spill] sm:$0xff]  ;;  %v17694_v22 = vld [vmem:[#allocation86_spill] sm:$0xff]  ;;  %v4458_v6 = vadd.f32 %v15746_v63, %v4415_v56 }
 0x350   : > { %5849 = vst.msk [vmem:[#allocation4 + $0x24] sm:$0x1] %vm17680_vm14, %v5848_v48  ;;  %vm17682_vm6 = vmmov %vm17679_vm10  ;;  %v12429_v39 = vadd.f32 %v15636_v42, %v17683_v41  ;;  %v17685_v20 = vld [vmem:[#allocation16_spill] sm:$0xff]  ;;  %v4418_v42 = vmul.f32 %v15706_v19, %v12428_v18  ;;  %v12431_v62 = vadd.f32 %v15647_v12, %v17694_v22  ;;  %v5860_v16 = vld [vmem:[#allocation3 + $0x72] sm:$0x1]  ;;  %v4495_v43 = vmax.f32 %v4459_v52, 0.0 }
 0x351   : > { %5851 = vst.msk [vmem:[#allocation4 + $0x25] sm:$0x1] %vm17681_vm9, %v5850_v7  ;;  %v17686_v44 = vld [vmem:[#allocation112_spill] sm:$0xff]  ;;  %vm17690_vm9 = vmmov %vm17677_vm7  ;;  %v5177_v5 = vsel %vm15715_vm3, %v4492_v51, -3.4028235e+38  ;;  %v17696_v49 = vld [vmem:[#allocation89_spill] sm:$0xff] }
 0x352   : > { %5211 = vst.msk [vmem:[#allocation2 + $0xc3] sm:$0xff] %vm17682_vm6, %v5175_v13  ;;  %v17687_v47 = vsel %vm15271_vm8, %v17685_v20, %v17686_v44  ;;  %v5854_v35 = vld [vmem:[#allocation3 + $0x6c] sm:$0x1]  ;;  %vm17691_vm7 = vmmov %vm17682_vm6  ;;  %v5856_v25 = vld [vmem:[#allocation3 + $0x6e] sm:$0x1]  ;;  %v4417_v28 = vmul.f32 %v15706_v19, %v12429_v39  ;;  %v12432_v31 = vadd.f32 %v15659_v54, %v17696_v49  ;;  %v4461_v15 = vadd.f32 %v15746_v63, %v4418_v42 }
 0x353   : > { %vm15818_vm15 = vcmp.lt.s32.totalorder %v17687_v47, 16  ;;  %5853 = vst.msk [vmem:[#allocation4 + $0x26] sm:$0x1] %vm17690_vm9, %v5852_v17  ;;  %vm17692_vm1 = vmmov %vm17682_vm6  ;;  %v17693_v27 = vld [vmem:[#allocation84_spill] sm:$0xff]  ;;  %v5864_v12 = vld [vmem:[#allocation3 + $0x76] sm:$0x1]  ;;  %v4419_v40 = vmul.f32 %v15706_v19, %v12431_v62 }
 0x354   : > { %5787 = vst.msk [vmem:[#allocation3 + $0x90] sm:$0xff] %vm17691_vm7, %v5751_v9  ;;  %v12430_v10 = vadd.f32 %v15643_v46, %v17693_v27  ;;  %vm17695_vm8 = vmmov %vm17690_vm9  ;;  %v5858_v34 = vld [vmem:[#allocation3 + $0x70] sm:$0x1]  ;;  %v5862_v46 = vld [vmem:[#allocation3 + $0x74] sm:$0x1]  ;;  %v4494_v1 = vmax.f32 %v4458_v6, 0.0  ;;  %v4460_v0 = vadd.f32 %v15746_v63, %v4417_v28  ;;  %v4422_v29 = vmul.f32 %v15706_v19, %v12432_v31 }
 0x355   : > { %5214 = vst.msk [vmem:[#allocation2 + $0xdb] sm:$0xff] %vm17692_vm1, %v5178_v58  ;;  %vm17697_vm10 = vmmov %vm17695_vm8  ;;  %v5866_v54 = vld [vmem:[#allocation3 + $0x78] sm:$0x1]  ;;  %v5868_v50 = vld [vmem:[#allocation3 + $0x7a] sm:$0x1]  ;;  %v4497_v11 = vmax.f32 %v4461_v15, 0.0  ;;  %v4462_v7 = vadd.f32 %v15746_v63, %v4419_v40 }
 0x356   : > { %5855 = vst.msk [vmem:[#allocation4 + $0x29] sm:$0x1] %vm17695_vm8, %v5854_v35  ;;  %vm17698_vm14 = vmmov %vm17695_vm8  ;;  %v4420_v26 = vmul.f32 %v15706_v19, %v12430_v10  ;;  %v17703_v32 = vld [vmem:[#allocation90_spill] sm:$0xff]  ;;  %v5180_v55 = vsel %vm15736_vm12, %v4495_v43, -3.4028235e+38  ;;  %v17707_v13 = vld [vmem:[#allocation49_spill] sm:$0xff]  ;;  %v4465_v17 = vadd.f32 %v15746_v63, %v4422_v29 }
 0x357   : > { %5857 = vst.msk [vmem:[#allocation4 + $0x2a] sm:$0x1] %vm17697_vm10, %v5856_v25  ;;  %vm17699_vm6 = vmmov %vm17695_vm8  ;;  %v12433_v24 = vadd.f32 %v15666_v23, %v17703_v32  ;;  %v5948_v61 = vld [vmem:[#allocation4 + $0x19] sm:$0xff]  ;;  %v5179_v36 = vsel %vm15754_vm2, %v4494_v1, -3.4028235e+38  ;;  %v4496_v18 = vmax.f32 %v4460_v0, 0.0 }
 0x358   : > { %5859 = vst.msk [vmem:[#allocation4 + $0x2b] sm:$0x1] %vm17698_vm14, %v5858_v34  ;;  %vm17700_vm9 = vmmov %vm17692_vm1  ;;  %v4463_v48 = vadd.f32 %v15746_v63, %v4420_v26  ;;  %v17708_v57 = vld [vmem:[#allocation113_spill] sm:$0xff]  ;;  %v17716_v41 = vld [vmem:[#allocation115_spill] sm:$0xff]  ;;  %v5182_v4 = vsel %vm15765_vm11, %v4497_v11, -3.4028235e+38 }
 0x359   : > { %5861 = vst.msk [vmem:[#allocation4 + $0x2c] sm:$0x1] %vm17699_vm6, %v5860_v16  ;;  %vm17701_vm3 = vmmov %vm17699_vm6  ;;  %v17709_v53 = vsel %vm15285_vm0, %v17707_v13, %v17708_v57  ;;  %v4421_v58 = vmul.f32 %v15706_v19, %v12433_v24  ;;  %v17715_v56 = vld [vmem:[#allocation61_spill] sm:$0xff]  ;;  %v17721_v35 = vld [vmem:[#allocation104_spill] sm:$0xff]  ;;  %v5181_v25 = vsel %vm15778_vm13, %v4496_v18, -3.4028235e+38 }
 0x35a   : > { %5213 = vst.msk [vmem:[#allocation2 + $0xd3] sm:$0xff] %vm17700_vm9, %v5177_v5  ;;  %vm17702_vm7 = vmmov %vm17701_vm3  ;;  %vm15862_vm10 = vcmp.lt.s32.totalorder %v17709_v53, 16  ;;  %v17717_v39 = vsel %vm15308_vm5, %v17715_v56, %v17716_v41  ;;  %v5249_v20 = vld [vmem:[#allocation2 + $0xc0] sm:$0xff]  ;;  %v4499_v47 = vmax.f32 %v4463_v48, 0.0  ;;  %v12434_v52 = vadd.f32 %v15671_v37, %v17721_v35  ;;  %v17722_v42 = vld [vmem:[#allocation106_spill] sm:$0xff] }
 0x35b   : > { %5863 = vst.msk [vmem:[#allocation4 + $0x2d] sm:$0x1] %vm17701_vm3, %v5862_v46  ;;  %vm17704_vm1 = vmmov %vm17701_vm3  ;;  %vm15877_vm0 = vcmp.lt.s32.totalorder %v17717_v39, 16  ;;  %v5285_v44 = vld [vmem:[#allocation2 + $0xc1] sm:$0xff]  ;;  %v12435_v27 = vadd.f32 %v15673_v14, %v17722_v42  ;;  %v5358_v62 = vld [vmem:[#allocation2 + $0xca] sm:$0xff]  ;;  %v4498_v34 = vmax.f32 %v4462_v7, 0.0  ;;  %v4464_v16 = vadd.f32 %v15746_v63, %v4421_v58 }
 0x35c   : > { %5865 = vst.msk [vmem:[#allocation4 + $0x2e] sm:$0x1] %vm17702_vm7, %v5864_v12  ;;  %vm17705_vm8 = vmmov %vm17704_vm1  ;;  %v5321_v10 = vmax.f32 %v5249_v20, %v5285_v44  ;;  %v5357_v22 = vld [vmem:[#allocation2 + $0xc2] sm:$0xff]  ;;  %v5430_v5 = vmax.f32 %v15741_v33, %v5358_v62  ;;  %v5184_v14 = vsel %vm15793_vm4, %v4499_v47, -3.4028235e+38  ;;  %v5466_v28 = vld [vmem:[#allocation2 + $0xcb] sm:$0xff] }
 0x35d   : > { %5867 = vst.msk [vmem:[#allocation4 + $0x2f] sm:$0x1] %vm17704_vm1, %v5866_v54  ;;  %vm17712_vm14 = vmmov %vm17700_vm9  ;;  %v5429_v21 = vmax.f32 %v15727_v3, %v5357_v22  ;;  %v5536_v6 = vld [vmem:[#allocation2 + $0xbc] sm:$0xff]  ;;  %v5537_v37 = vld [vmem:[#allocation2 + $0xc4] sm:$0xff]  ;;  %v5183_v43 = vsel %vm15818_vm15, %v4498_v34, -3.4028235e+38  ;;  %v4423_v39 = vmul.f32 %v15706_v19, %v12435_v27 }
 0x35e   : > { %5869 = vst.msk [vmem:[#allocation4 + $0x30] sm:$0x1] %vm17705_vm8, %v5868_v50  ;;  %11718 = vmatmul.mubr.msk.f32.gmra.mrb[38].mxu1 %vm17712_vm14, %v5948_v61  ;;  %vm17713_vm6 = vmmov %vm17700_vm9  ;;  %v5393_v49 = vmax.f32 %v5321_v10, %v5357_v22  ;;  %v5465_v31 = vld [vmem:[#allocation2 + $0xc3] sm:$0xff]  ;;  %v5608_v2 = vmax.f32 %v5570_v38, %v5536_v6  ;;  %v5502_v33 = vmax.f32 %v5430_v5, %v5466_v28  ;;  %v4501_v40 = vmax.f32 %v4465_v17, 0.0  ;;  %v17730_v7 = vld [vmem:[#allocation59_spill] sm:$0xff] }
 0x35f   : > { %5216 = vst.msk [vmem:[#allocation2 + $0xeb] sm:$0xff] %vm17713_vm6, %v5180_v55  ;;  %vm17720_vm12 = vmmov %vm17713_vm6  ;;  %v5644_v46 = vld [vmem:[#allocation2 + $0xbd] sm:$0xff]  ;;  %v5501_v3 = vmax.f32 %v5429_v21, %v5465_v31  ;;  %v4500_v54 = vmax.f32 %v4464_v16, 0.0  ;;  %v4424_v38 = vmul.f32 %v15706_v19, %v12434_v52  ;;  %v17727_v11 = vld [vmem:[#allocation62_spill] sm:$0xff] }
 0x360   : > { %5215 = vst.msk [vmem:[#allocation2 + $0xe3] sm:$0xff] %vm17720_vm12, %v5179_v36  ;;  %vm17723_vm5 = vmmov %vm17713_vm6  ;;  %v5716_v12 = vld [vmem:[#allocation2 + $0xbe] sm:$0xff]  ;;  %v5680_v15 = vmax.f32 %v5608_v2, %v5644_v46  ;;  %vm17728_vm13 = vnez %v17727_v11  ;;  %v17729_v48 = vld [vmem:[#allocation18_spill] sm:$0xff]  ;;  %v5186_v17 = vsel %vm15862_vm10, %v4501_v40, -3.4028235e+38 }
 0x361   : > { %5218 = vst.msk [vmem:[#allocation2 + $0xfb] sm:$0xff] %vm17723_vm5, %v5182_v4  ;;  %vm17724_vm2 = vmmov %vm17723_vm5  ;;  %v5252_v26 = vld [vmem:[#allocation2 + $0xd8] sm:$0xff]  ;;  %v5573_v50 = vmax.f32 %v5501_v3, %v5537_v37  ;;  %v5538_v32 = vld [vmem:[#allocation2 + $0xcc] sm:$0xff]  ;;  %v17731_v9 = vsel %vm17728_vm13, %v17729_v48, %v17730_v7  ;;  %v5185_v56 = vsel %vm15877_vm0, %v4500_v54, -3.4028235e+38  ;;  %v4467_v41 = vadd.f32 %v15746_v63, %v4424_v38 }
 0x362   : > { %5217 = vst.msk [vmem:[#allocation2 + $0xf3] sm:$0xff] %vm17724_vm2, %v5181_v25  ;;  %vm17725_vm11 = vmmov %vm17724_vm2  ;;  %v5288_v45 = vld [vmem:[#allocation2 + $0xd9] sm:$0xff]  ;;  %v5752_v0 = vmax.f32 %v5680_v15, %v5716_v12  ;;  %v5574_v55 = vmax.f32 %v5502_v33, %v5538_v32  ;;  %vm15910_vm15 = vcmp.lt.s32.totalorder %v17731_v9, 16  ;;  %v17737_v10 = vld [vmem:[#allocation50_spill] sm:$0xff]  ;;  %v4466_v3 = vadd.f32 %v15746_v63, %v4423_v39 }
 0x363   : > { %5220 = vst.msk [vmem:[#allocation2 + $0x10b] sm:$0xff] %vm17725_vm11, %v5184_v14  ;;  %vm17726_vm4 = vmmov %vm17724_vm2  ;;  %v5324_v1 = vmax.f32 %v5252_v26, %v5288_v45  ;;  %v5359_v60 = vld [vmem:[#allocation2 + $0xd2] sm:$0xff]  ;;  %v5360_v59 = vld [vmem:[#allocation2 + $0xda] sm:$0xff]  ;;  %vm17738_vm1 = vnez %v17737_v10  ;;  %v4503_v46 = vmax.f32 %v4467_v41, 0.0  ;;  %vm17753_vm13 = vcmask 57344  }
 0x364   : > { %5219 = vst.msk [vmem:[#allocation2 + $0x103] sm:$0xff] %vm17726_vm4, %v5183_v43  ;;  %v5431_v29 = vmax.f32 %v5393_v49, %v5359_v60  ;;  %v5467_v61 = vld [vmem:[#allocation2 + $0xd3] sm:$0xff]  ;;  %vm17734_vm9 = vmmov %vm17724_vm2  ;;  %v17739_v22 = vld [vmem:[#allocation54_spill] sm:$0xff] }
 0x365   : > { %v5396_v24 = vmax.f32 %v5324_v1, %v5360_v59  ;;  %v5539_v8 = vld [vmem:[#allocation2 + $0xd4] sm:$0xff]  ;;  %5788 = vst.msk [vmem:[#allocation3 + $0x98] sm:$0xff] %vm17734_vm9, %v5752_v0  ;;  %vm17735_vm3 = vmmov %vm17724_vm2  ;;  %v17740_v62 = vld [vmem:[#allocation45_spill] sm:$0xff]  ;;  %v5188_v63 = vsel %vm15910_vm15, %v4503_v46, -3.4028235e+38 }
 0x366   : > { %v5503_v57 = vmax.f32 %v5431_v29, %v5467_v61  ;;  %v5611_v53 = vmax.f32 %v5573_v50, %v5539_v8  ;;  %v5647_v36 = vld [vmem:[#allocation2 + $0xd5] sm:$0xff]  ;;  %5222 = vst.msk [vmem:[#allocation2 + $0x11b] sm:$0xff] %vm17735_vm3, %v5186_v17  ;;  %vm17736_vm7 = vmmov %vm17724_vm2  ;;  %v5470_v52 = vld [vmem:[#allocation2 + $0xeb] sm:$0xff]  ;;  %v17741_v30 = vsel %vm17738_vm1, %v17739_v22, %v17740_v62  ;;  %v4502_v61 = vmax.f32 %v4466_v3, 0.0 }
 0x367   : > { %v5253_v18 = vld [vmem:[#allocation2 + $0xe0] sm:$0xff]  ;;  %v5362_v47 = vld [vmem:[#allocation2 + $0xea] sm:$0xff]  ;;  %5221 = vst.msk [vmem:[#allocation2 + $0x113] sm:$0xff] %vm17736_vm7, %v5185_v56  ;;  %v5719_v23 = vld [vmem:[#allocation2 + $0xd6] sm:$0xff]  ;;  %vm15928_vm8 = vcmp.lt.s32.totalorder %v17741_v30, 16 }
 0x368   : > { %v5289_v58 = vld [vmem:[#allocation2 + $0xe1] sm:$0xff]  ;;  %v5575_v20 = vmax.f32 %v5503_v57, %v5539_v8  ;;  %v5683_v44 = vmax.f32 %v5611_v53, %v5647_v36  ;;  %v5434_v42 = vmax.f32 %v5396_v24, %v5362_v47  ;;  %vm17744_vm10 = vmmov %vm17724_vm2  ;;  %v5187_v36 = vsel %vm15928_vm8, %v4502_v61, -3.4028235e+38 }
 0x369   : > { %v5361_v51 = vld [vmem:[#allocation2 + $0xe2] sm:$0xff]  ;;  %v5325_v4 = vmax.f32 %v5253_v18, %v5289_v58  ;;  %v5256_v37 = vld [vmem:[#allocation2 + $0xf8] sm:$0xff]  ;;  %v5542_v45 = vld [vmem:[#allocation2 + $0xec] sm:$0xff] }
 0x36a   : > { %v5540_v35 = vld [vmem:[#allocation2 + $0xdc] sm:$0xff]  ;;  %v5755_v19 = vmax.f32 %v5683_v44, %v5719_v23  ;;  %v5541_v34 = vld [vmem:[#allocation2 + $0xe4] sm:$0xff]  ;;  %v5506_v14 = vmax.f32 %v5434_v42, %v5470_v52  ;;  %v5363_v31 = vld [vmem:[#allocation2 + $0xf2] sm:$0xff] }
 0x36b   : > { %v5397_v27 = vmax.f32 %v5325_v4, %v5361_v51  ;;  %v5612_v16 = vmax.f32 %v5574_v55, %v5540_v35  ;;  %v5648_v21 = vld [vmem:[#allocation2 + $0xdd] sm:$0xff]  ;;  %v5649_v5 = vld [vmem:[#allocation2 + $0xe5] sm:$0xff]  ;;  %v5613_v6 = vmax.f32 %v5575_v20, %v5541_v34  ;;  %v5471_v54 = vld [vmem:[#allocation2 + $0xf3] sm:$0xff] }
 0x36c   : > { %5791 = vst.msk [vmem:[#allocation3 + $0xb0] sm:$0xff] %vm17744_vm10, %v5755_v19  ;;  %v5292_v49 = vld [vmem:[#allocation2 + $0xf9] sm:$0xff]  ;;  %v5721_v43 = vld [vmem:[#allocation2 + $0xe6] sm:$0xff]  ;;  %v5578_v1 = vmax.f32 %v5506_v14, %v5542_v45  ;;  %vm17745_vm14 = vmmov %vm17724_vm2 }
 0x36d   : > { %v5684_v28 = vmax.f32 %v5612_v16, %v5648_v21  ;;  %v5364_v2 = vld [vmem:[#allocation2 + $0xfa] sm:$0xff]  ;;  %v5685_v12 = vmax.f32 %v5613_v6, %v5649_v5  ;;  %v5328_v15 = vmax.f32 %v5256_v37, %v5292_v49  ;;  %v5435_v26 = vmax.f32 %v5397_v27, %v5363_v31  ;;  %v5258_v29 = vld [vmem:[#allocation2 + $0x108] sm:$0xff]  ;;  %vm17746_vm6 = vmmov %vm17724_vm2 }
 0x36e   : > { %v5720_v33 = vld [vmem:[#allocation2 + $0xde] sm:$0xff]  ;;  %v5543_v50 = vld [vmem:[#allocation2 + $0xf4] sm:$0xff]  ;;  %v5294_v24 = vld [vmem:[#allocation2 + $0x109] sm:$0xff] }
 0x36f   : > { %v5756_v40 = vmax.f32 %v5684_v28, %v5720_v33  ;;  %v5757_v60 = vmax.f32 %v5685_v12, %v5721_v43  ;;  %v5400_v59 = vmax.f32 %v5328_v15, %v5364_v2  ;;  %v5507_v38 = vmax.f32 %v5435_v26, %v5471_v54  ;;  %v5257_v0 = vld [vmem:[#allocation2 + $0x100] sm:$0xff]  ;;  %v5366_v7 = vld [vmem:[#allocation2 + $0x10a] sm:$0xff]  ;;  %vm17747_vm0 = vmmov %vm17724_vm2 }
 0x370   : > { %v5293_v32 = vld [vmem:[#allocation2 + $0x101] sm:$0xff]  ;;  %v5330_v11 = vmax.f32 %v5258_v29, %v5294_v24  ;;  %5224 = vst.msk [vmem:[#allocation2 + $0x12b] sm:$0xff] %vm17747_vm0, %v5188_v63  ;;  %v5474_v9 = vld [vmem:[#allocation2 + $0x10b] sm:$0xff]  ;;  %vm17748_vm12 = vmmov %vm17747_vm0 }
 0x371   : > { %5792 = vst.msk [vmem:[#allocation3 + $0xb8] sm:$0xff] %vm17745_vm14, %v5756_v40  ;;  %v5579_v8 = vmax.f32 %v5507_v38, %v5543_v50  ;;  %v5329_v55 = vmax.f32 %v5257_v0, %v5293_v32  ;;  %v5365_v48 = vld [vmem:[#allocation2 + $0x102] sm:$0xff]  ;;  %v5438_v57 = vmax.f32 %v5400_v59, %v5366_v7  ;;  %v5367_v39 = vld [vmem:[#allocation2 + $0x112] sm:$0xff]  ;;  %v5368_v47 = vld [vmem:[#allocation2 + $0x11a] sm:$0xff] }
 0x372   : > { %5793 = vst.msk [vmem:[#allocation3 + $0xc0] sm:$0xff] %vm17746_vm6, %v5757_v60  ;;  %v5544_v53 = vld [vmem:[#allocation2 + $0xfc] sm:$0xff]  ;;  %v5402_v17 = vmax.f32 %v5330_v11, %v5366_v7  ;;  %v5545_v13 = vld [vmem:[#allocation2 + $0x104] sm:$0xff]  ;;  %v5546_v35 = vld [vmem:[#allocation2 + $0x10c] sm:$0xff] }
 0x373   : > { %v5401_v18 = vmax.f32 %v5329_v55, %v5365_v48  ;;  %v5652_v58 = vld [vmem:[#allocation2 + $0xfd] sm:$0xff]  ;;  %5223 = vst.msk [vmem:[#allocation2 + $0x123] sm:$0xff] %vm17748_vm12, %v5187_v36  ;;  %v5616_v51 = vmax.f32 %v5578_v1, %v5544_v53  ;;  %v5617_v56 = vmax.f32 %v5579_v8, %v5545_v13  ;;  %v5653_v41 = vld [vmem:[#allocation2 + $0x105] sm:$0xff]  ;;  %v5510_v20 = vmax.f32 %v5438_v57, %v5474_v9  ;;  %v5475_v25 = vld [vmem:[#allocation2 + $0x113] sm:$0xff] }
 0x374   : > { %v5724_v23 = vld [vmem:[#allocation2 + $0xfe] sm:$0xff]  ;;  %v5725_v52 = vld [vmem:[#allocation2 + $0x106] sm:$0xff]  ;;  %v5440_v22 = vmax.f32 %v5402_v17, %v5368_v47  ;;  %v5547_v19 = vld [vmem:[#allocation2 + $0x114] sm:$0xff] }
 0x375   : > { %v5688_v44 = vmax.f32 %v5616_v51, %v5652_v58  ;;  %v5689_v4 = vmax.f32 %v5617_v56, %v5653_v41  ;;  %v5476_v42 = vld [vmem:[#allocation2 + $0x11b] sm:$0xff]  ;;  %v5439_v10 = vmax.f32 %v5401_v18, %v5367_v39  ;;  %v5949_v27 = vld [vmem:[#allocation4 + $0x21] sm:$0xff]  ;;  %vm17749_vm5 = vmmov %vm17747_vm0  ;;  %v5582_v21 = vmax.f32 %v5510_v20, %v5546_v35 }
 0x376   : > { %11720 = vmatprep.mubr.msk.f32.mxu1 %vm17749_vm5, %v5949_v27  ;;  %v5512_v16 = vmax.f32 %v5440_v22, %v5476_v42  ;;  %vm17750_vm2 = vmmov %vm17747_vm0  ;;  %v5950_v33 = vld [vmem:[#allocation4 + $0x29] sm:$0xff]  ;;  %v5872_v40 = vld [vmem:[#allocation3 + $0x92] sm:$0x1] }
 0x377   : > { %v5760_v62 = vmax.f32 %v5688_v44, %v5724_v23  ;;  %v5761_v30 = vmax.f32 %v5689_v4, %v5725_v52  ;;  %v5511_v34 = vmax.f32 %v5439_v10, %v5475_v25  ;;  %vm17751_vm11 = vmmov %vm17747_vm0  ;;  %v5550_v6 = vld [vmem:[#allocation2 + $0x12c] sm:$0xff]  ;;  %v5870_v43 = vld [vmem:[#allocation3 + $0x90] sm:$0x1] }
 0x378   : > { %v5658_v46 = vld [vmem:[#allocation2 + $0x12d] sm:$0xff]  ;;  %vm17752_vm4 = vmmov %vm17747_vm0  ;;  %5871 = vst.msk [vmem:[#allocation4 + $0x33] sm:$0x1] %vm17753_vm13, %v5870_v43  ;;  %v5874_v54 = vld [vmem:[#allocation3 + $0x94] sm:$0x1] }
 0x379   : > { %5796 = vst.msk [vmem:[#allocation3 + $0xd8] sm:$0xff] %vm17750_vm2, %v5760_v62  ;;  %v5583_v5 = vmax.f32 %v5511_v34, %v5547_v19  ;;  %11721 = vmatmul.mubr.msk.f32.gmra.mrb[40].mxu1 %vm17752_vm4, %v5950_v33  ;;  %v5876_v50 = vld [vmem:[#allocation3 + $0x96] sm:$0x1]  ;;  %v5730_v1 = vld [vmem:[#allocation2 + $0x12e] sm:$0xff]  ;;  %vm17754_vm15 = vmmov %vm17753_vm13 }
 0x37a   : > { %5797 = vst.msk [vmem:[#allocation3 + $0xe0] sm:$0xff] %vm17751_vm11, %v5761_v30  ;;  %v5548_v37 = vld [vmem:[#allocation2 + $0x11c] sm:$0xff]  ;;  %v5549_v14 = vld [vmem:[#allocation2 + $0x124] sm:$0xff]  ;;  %vm17755_vm9 = vmmov %vm17753_vm13 }
 0x37b   : > { %v5584_v28 = vmax.f32 %v5512_v16, %v5548_v37  ;;  %v5620_v49 = vmax.f32 %v5582_v21, %v5548_v37  ;;  %v5656_v31 = vld [vmem:[#allocation2 + $0x11d] sm:$0xff]  ;;  %v5657_v2 = vld [vmem:[#allocation2 + $0x125] sm:$0xff]  ;;  %v5621_v3 = vmax.f32 %v5583_v5, %v5549_v14  ;;  %5873 = vst.msk [vmem:[#allocation4 + $0x34] sm:$0x1] %vm17754_vm15, %v5872_v40  ;;  %vm17756_vm3 = vmmov %vm17755_vm9 }
 0x37c   : > { %v5728_v12 = vld [vmem:[#allocation2 + $0x11e] sm:$0xff]  ;;  %v5729_v45 = vld [vmem:[#allocation2 + $0x126] sm:$0xff]  ;;  %5875 = vst.msk [vmem:[#allocation4 + $0x35] sm:$0x1] %vm17755_vm9, %v5874_v54  ;;  %vm17757_vm7 = vmmov %vm17756_vm3 }
 0x37d   : > { %v5622_v15 = vmax.f32 %v5584_v28, %v5550_v6  ;;  %v5692_v26 = vmax.f32 %v5620_v49, %v5656_v31  ;;  %v5693_v60 = vmax.f32 %v5621_v3, %v5657_v2  ;;  %5877 = vst.msk [vmem:[#allocation4 + $0x36] sm:$0x1] %vm17756_vm3, %v5876_v50  ;;  %v5878_v59 = vld [vmem:[#allocation3 + $0x98] sm:$0x1]  ;;  %v5880_v38 = vld [vmem:[#allocation3 + $0x9a] sm:$0x1]  ;;  %vm17758_vm1 = vmmov %vm17756_vm3 }
 0x37e   : > { %v5882_v0 = vld [vmem:[#allocation3 + $0x9c] sm:$0x1]  ;;  %5879 = vst.msk [vmem:[#allocation4 + $0x37] sm:$0x1] %vm17757_vm7, %v5878_v59  ;;  %vm17759_vm8 = vmmov %vm17758_vm1  ;;  %v5884_v24 = vld [vmem:[#allocation3 + $0x9e] sm:$0x1] }
 0x37f   : > { %v5694_v29 = vmax.f32 %v5622_v15, %v5658_v46  ;;  %v5764_v32 = vmax.f32 %v5692_v26, %v5728_v12  ;;  %5881 = vst.msk [vmem:[#allocation4 + $0x38] sm:$0x1] %vm17758_vm1, %v5880_v38  ;;  %v5886_v63 = vld [vmem:[#allocation3 + $0xb4] sm:$0x1]  ;;  %v5888_v61 = vld [vmem:[#allocation3 + $0xb6] sm:$0x1]  ;;  %v5765_v8 = vmax.f32 %v5693_v60, %v5729_v45  ;;  %vm17760_vm10 = vmmov %vm17758_vm1 }
 0x380   : > { %5883 = vst.msk [vmem:[#allocation4 + $0x39] sm:$0x1] %vm17759_vm8, %v5882_v0  ;;  %vm17761_vm14 = vmmov %vm17758_vm1  ;;  %v5890_v55 = vld [vmem:[#allocation3 + $0xb8] sm:$0x1]  ;;  %v5892_v11 = vld [vmem:[#allocation3 + $0xba] sm:$0x1] }
 0x381   : > { %5885 = vst.msk [vmem:[#allocation4 + $0x3a] sm:$0x1] %vm17760_vm10, %v5884_v24  ;;  %vm17762_vm6 = vmmov %vm17758_vm1  ;;  %v5894_v48 = vld [vmem:[#allocation3 + $0xbc] sm:$0x1]  ;;  %v5766_v7 = vmax.f32 %v5694_v29, %v5730_v1  ;;  %v5896_v9 = vld [vmem:[#allocation3 + $0xbe] sm:$0x1] }
 0x382   : > { %5887 = vst.msk [vmem:[#allocation4 + $0x3d] sm:$0x1] %vm17761_vm14, %v5886_v63  ;;  %vm17763_vm12 = vmmov %vm17758_vm1  ;;  %v5898_v57 = vld [vmem:[#allocation3 + $0xc0] sm:$0x1]  ;;  %v5900_v53 = vld [vmem:[#allocation3 + $0xc2] sm:$0x1] }
 0x383   : > { %5889 = vst.msk [vmem:[#allocation4 + $0x3e] sm:$0x1] %vm17762_vm6, %v5888_v61  ;;  %vm17764_vm5 = vmmov %vm17758_vm1  ;;  %v5902_v36 = vld [vmem:[#allocation3 + $0xd8] sm:$0x1]  ;;  %v5904_v18 = vld [vmem:[#allocation3 + $0xda] sm:$0x1] }
 0x384   : > { %5800 = vst.msk [vmem:[#allocation3 + $0xf8] sm:$0xff] %vm17747_vm0, %v5764_v32  ;;  %vm17765_vm2 = vmmov %vm17758_vm1  ;;  %v5906_v17 = vld [vmem:[#allocation3 + $0xdc] sm:$0x1]  ;;  %v5908_v13 = vld [vmem:[#allocation3 + $0xde] sm:$0x1]  ;;  %v17808_v26 = vmov 0.0  }
 0x385   : > { %5891 = vst.msk [vmem:[#allocation4 + $0x3f] sm:$0x1] %vm17763_vm12, %v5890_v55  ;;  %vm17766_vm11 = vmmov %vm17747_vm0  ;;  %v5910_v58 = vld [vmem:[#allocation3 + $0xe0] sm:$0x1]  ;;  %v5912_v51 = vld [vmem:[#allocation3 + $0xe2] sm:$0x1] }
 0x386   : > { %5893 = vst.msk [vmem:[#allocation4 + $0x40] sm:$0x1] %vm17764_vm5, %v5892_v11  ;;  %vm17767_vm4 = vmmov %vm17758_vm1  ;;  %v5914_v56 = vld [vmem:[#allocation3 + $0xe4] sm:$0x1]  ;;  %v5916_v41 = vld [vmem:[#allocation3 + $0xe6] sm:$0x1] }
 0x387   : > { %5895 = vst.msk [vmem:[#allocation4 + $0x41] sm:$0x1] %vm17765_vm2, %v5894_v48  ;;  %vm17768_vm13 = vmmov %vm17758_vm1  ;;  %v5951_v39 = vld [vmem:[#allocation4 + $0x31] sm:$0xff]  ;;  %v5934_v23 = vld [vmem:[#allocation4] sm:$0xff]  ;;  %v17807_v15 = vmov -3.4028235e+38  }
 0x388   : > { %5801 = vst.msk [vmem:[#allocation3 + $0x100] sm:$0xff] %vm17766_vm11, %v5765_v8  ;;  %vm17769_vm15 = vmmov %vm17758_vm1  ;;  %v5935_v25 = vld [vmem:[#allocation4 + $0x8] sm:$0xff]  ;;  %v5936_v27 = vld [vmem:[#allocation4 + $0x10] sm:$0xff] }
 0x389   : > { %5897 = vst.msk [vmem:[#allocation4 + $0x42] sm:$0x1] %vm17767_vm4, %v5896_v9  ;;  %vm17770_vm9 = vmmov %vm17747_vm0  ;;  %v10411_v19 = vld [vmem:[%s17057_s4 + $0x18] sm:$0xff]  ;;  %v12987_v34 = vld [vmem:[%s17057_s4 + $0x10] sm:$0xff] }
 0x38a   : > { %5899 = vst.msk [vmem:[#allocation4 + $0x43] sm:$0x1] %vm17768_vm13, %v5898_v57  ;;  %vm17771_vm3 = vmmov %vm17758_vm1  ;;  %v5937_v16 = vld [vmem:[#allocation4 + $0x18] sm:$0xff]  ;;  %v5938_v21 = vld [vmem:[#allocation4 + $0x20] sm:$0xff] }
 0x38b   : > { %5901 = vst.msk [vmem:[#allocation4 + $0x44] sm:$0x1] %vm17769_vm15, %v5900_v53  ;;  %vm17772_vm7 = vmmov %vm17758_vm1  ;;  %v5918_v44 = vld [vmem:[#allocation3 + $0xfc] sm:$0x1]  ;;  %v5920_v4 = vld [vmem:[#allocation3 + $0xfe] sm:$0x1] }
 0x38c   : > { %5802 = vst.msk [vmem:[#allocation3 + $0x108] sm:$0xff] %vm17770_vm9, %v5766_v7  ;;  %vm17773_vm8 = vmmov %vm17758_vm1  ;;  %v5939_v5 = vld [vmem:[#allocation4 + $0x28] sm:$0xff]  ;;  %v5940_v6 = vld [vmem:[#allocation4 + $0x30] sm:$0xff] }
 0x38d   : > { %5903 = vst.msk [vmem:[#allocation4 + $0x47] sm:$0x1] %vm17771_vm3, %v5902_v36  ;;  %vm17774_vm10 = vmmov %vm17758_vm1  ;;  %v5952_v20 = vld [vmem:[#allocation4 + $0x39] sm:$0xff]  ;;  %v6247_v28 = vld [vmem:[#allocation4 + $0x2] sm:$0xff] }
 0x38e   : > { %5905 = vst.msk [vmem:[#allocation4 + $0x48] sm:$0x1] %vm17772_vm7, %v5904_v18  ;;  %vm17775_vm14 = vmmov %vm17758_vm1  ;;  %v5941_v37 = vld [vmem:[#allocation4 + $0x38] sm:$0xff]  ;;  %v6248_v31 = vld [vmem:[#allocation4 + $0xa] sm:$0xff] }
 0x38f   : > { %5907 = vst.msk [vmem:[#allocation4 + $0x49] sm:$0x1] %vm17758_vm1, %v5906_v17  ;;  %vm17776_vm6 = vmmov %vm17758_vm1  ;;  %v5922_v47 = vld [vmem:[#allocation3 + $0x100] sm:$0x1]  ;;  %v5924_v52 = vld [vmem:[#allocation3 + $0x102] sm:$0x1] }
 0x390   : > { %5909 = vst.msk [vmem:[#allocation4 + $0x4a] sm:$0x1] %vm17773_vm8, %v5908_v13  ;;  %vm17777_vm0 = vmmov %vm17758_vm1  ;;  %v5926_v42 = vld [vmem:[#allocation3 + $0x104] sm:$0x1]  ;;  %v5928_v10 = vld [vmem:[#allocation3 + $0x106] sm:$0x1] }
 0x391   : > { %5911 = vst.msk [vmem:[#allocation4 + $0x4b] sm:$0x1] %vm17774_vm10, %v5910_v58  ;;  %vm17778_vm12 = vmmov %vm17770_vm9  ;;  %v10422_v2 = vld [vmem:[%s17057_s4 + $0x20] sm:$0xff]  ;;  %v6250_v3 = vld [vmem:[#allocation4 + $0x1a] sm:$0xff] }
 0x392   : > { %5913 = vst.msk [vmem:[#allocation4 + $0x4c] sm:$0x1] %vm17775_vm14, %v5912_v51  ;;  %11723 = vmatprep.mubr.msk.f32.mxu1 %vm17778_vm12, %v5951_v39  ;;  %vm17779_vm5 = vmmov %vm17770_vm9  ;;  %v6249_v46 = vld [vmem:[#allocation4 + $0x12] sm:$0xff]  ;;  %v6251_v12 = vld [vmem:[#allocation4 + $0x22] sm:$0xff] }
 0x393   : > { %5915 = vst.msk [vmem:[#allocation4 + $0x4d] sm:$0x1] %vm17776_vm6, %v5914_v56  ;;  %11724 = vmatmul.mubr.msk.f32.gmra.mrb[42].mxu1 %vm17779_vm5, %v5952_v20  ;;  %vm17780_vm2 = vmmov %vm17777_vm0  ;;  %v5930_v62 = vld [vmem:[#allocation3 + $0x108] sm:$0x1]  ;;  %v5932_v30 = vld [vmem:[#allocation3 + $0x10a] sm:$0x1] }
 0x394   : > { %5917 = vst.msk [vmem:[#allocation4 + $0x4e] sm:$0x1] %vm17777_vm0, %v5916_v41  ;;  %vm17781_vm11 = vmmov %vm17777_vm0  ;;  %v5942_v14 = vld [vmem:[#allocation4 + $0x40] sm:$0xff]  ;;  %v6252_v33 = vld [vmem:[#allocation4 + $0x2a] sm:$0xff] }
 0x395   : > { %v5953_v35 = vld [vmem:[#allocation4 + $0x41] sm:$0xff]  ;;  %5919 = vst.msk [vmem:[#allocation4 + $0x51] sm:$0x1] %vm17780_vm2, %v5918_v44  ;;  %vm17782_vm4 = vmmov %vm17777_vm0  ;;  %v6253_v43 = vld [vmem:[#allocation4 + $0x32] sm:$0xff] }
 0x396   : > { %5921 = vst.msk [vmem:[#allocation4 + $0x52] sm:$0x1] %vm17781_vm11, %v5920_v4  ;;  %vm17783_vm13 = vmmov %vm17779_vm5  ;;  %v6254_v45 = vld [vmem:[#allocation4 + $0x3a] sm:$0xff]  ;;  %v6255_v40 = vld [vmem:[#allocation4 + $0x42] sm:$0xff] }
 0x397   : > { %5923 = vst.msk [vmem:[#allocation4 + $0x53] sm:$0x1] %vm17782_vm4, %v5922_v47  ;;  %11726 = vmatprep.mubr.msk.f32.mxu1 %vm17783_vm13, %v5953_v35  ;;  %vm17784_vm15 = vmmov %vm17777_vm0  ;;  %v10433_v50 = vld [vmem:[%s17057_s4 + $0x28] sm:$0xff]  ;;  %v6581_v60 = vld [vmem:[#allocation4 + $0xb] sm:$0xff] }
 0x398   : > { %5925 = vst.msk [vmem:[#allocation4 + $0x54] sm:$0x1] %vm17784_vm15, %v5924_v52  ;;  %vm17785_vm9 = vmmov %vm17777_vm0  ;;  %v6582_v59 = vld [vmem:[#allocation4 + $0x13] sm:$0xff]  ;;  %v10444_v38 = vld [vmem:[%s17057_s4 + $0x30] sm:$0xff] }
 0x399   : > { %5927 = vst.msk [vmem:[#allocation4 + $0x55] sm:$0x1] %vm17785_vm9, %v5926_v42  ;;  %vm17786_vm3 = vmmov %vm17777_vm0  ;;  %v6583_v0 = vld [vmem:[#allocation4 + $0x1b] sm:$0xff]  ;;  %v6584_v29 = vld [vmem:[#allocation4 + $0x23] sm:$0xff] }
 0x39a   : > { %5929 = vst.msk [vmem:[#allocation4 + $0x56] sm:$0x1] %vm17786_vm3, %v5928_v10  ;;  %vm17787_vm7 = vmmov %vm17779_vm5  ;;  %v6585_v32 = vld [vmem:[#allocation4 + $0x2b] sm:$0xff]  ;;  %v6586_v24 = vld [vmem:[#allocation4 + $0x33] sm:$0xff] }
 0x39b   : > { %v5954_v22 = vld [vmem:[#allocation4 + $0x49] sm:$0xff]  ;;  %vm17788_vm1 = vmmov %vm17777_vm0  ;;  %v6587_v63 = vld [vmem:[#allocation4 + $0x3b] sm:$0xff] }
 0x39c   : > { %11727 = vmatmul.mubr.msk.f32.gmra.mrb[44].mxu1 %vm17787_vm7, %v5954_v22  ;;  %5931 = vst.msk [vmem:[#allocation4 + $0x57] sm:$0x1] %vm17788_vm1, %v5930_v62  ;;  %vm17789_vm8 = vmmov %vm17779_vm5  ;;  %v5943_v49 = vld [vmem:[#allocation4 + $0x48] sm:$0xff]  ;;  %v6749_v48 = vld [vmem:[#allocation4 + $0x14] sm:$0xff] }
 0x39d   : > { %11731 = vmatprep.mubr.msk.f32.mxu1 %vm17789_vm8, %v5934_v23  ;;  %vm17790_vm10 = vmmov %vm17777_vm0  ;;  %v6256_v54 = vld [vmem:[#allocation4 + $0x4a] sm:$0xff]  ;;  %v6750_v9 = vld [vmem:[#allocation4 + $0x1c] sm:$0xff] }
 0x39e   : > { %5933 = vst.msk [vmem:[#allocation4 + $0x58] sm:$0x1] %vm17790_vm10, %v5932_v30  ;;  %vm17791_vm14 = vmmov %vm17779_vm5  ;;  %vm550_vm10 = vcmask 130048   ;;  %v6588_v61 = vld [vmem:[#allocation4 + $0x43] sm:$0xff]  ;;  %v6589_v8 = vld [vmem:[#allocation4 + $0x4b] sm:$0xff] }
 0x39f   : > { %vm17792_vm6 = vmmov %vm17779_vm5  ;;  %553 = vst.msk [vmem:[#allocation5 + $0x10] sm:$0xff] %vm550_vm10, %v17807_v15  ;;  %v6748_v11 = vld [vmem:[#allocation4 + $0xc] sm:$0xff]  ;;  %v6751_v57 = vld [vmem:[#allocation4 + $0x24] sm:$0xff] }
 0x3a0   : > { %11732 = vmatmul.mubr.msk.f32.vlgmr.msra.gmra.mrb[36].mxu1 %vm17791_vm14, %v5935_v25  ;;  %vm17793_vm0 = vmmov %vm17779_vm5  ;;  %554 = vst.msk [vmem:[#allocation5 + $0x18] sm:$0xff] %vm550_vm10, %v17807_v15  ;;  %v10455_v7 = vld [vmem:[%s17057_s4 + $0x38] sm:$0xff]  ;;  %v6753_v36 = vld [vmem:[#allocation4 + $0x34] sm:$0xff] }
 0x3a1   : > { %11747 = vmatpush3.msra.mxu1 %v12987_v34  ;;  %11734 = vmatprep.mubr.msk.f32.mxu1 %vm17792_vm6, %v5936_v27  ;;  %vm17794_vm12 = vmmov %vm17793_vm0  ;;  %551 = vst.msk [vmem:[#allocation5] sm:$0xff] %vm550_vm10, %v17807_v15  ;;  %v6752_v53 = vld [vmem:[#allocation4 + $0x2c] sm:$0xff]  ;;  %v6754_v18 = vld [vmem:[#allocation4 + $0x3c] sm:$0xff] }
 0x3a2   : > { %11763 = vmatprep.subr.mxu1 %v10411_v19  ;;  %vm17795_vm5 = vmmov %vm17793_vm0  ;;  %552 = vst.msk [vmem:[#allocation5 + $0x8] sm:$0xff] %vm550_vm10, %v17807_v15  ;;  %v6755_v17 = vld [vmem:[#allocation4 + $0x44] sm:$0xff]  ;;  %v6756_v13 = vld [vmem:[#allocation4 + $0x4c] sm:$0xff] }
 0x3a3   : > { %vm17796_vm2 = vmmov %vm17793_vm0  ;;  %555 = vst.msk [vmem:[#allocation5 + $0x20] sm:$0xff] %vm550_vm10, %v17807_v15  ;;  %v10466_v51 = vld [vmem:[%s17057_s4 + $0x40] sm:$0xff]  ;;  %v6924_v56 = vld [vmem:[#allocation4 + $0x5c] sm:$0xff] }
 0x3a4   : > { %11735 = vmatmul.mubr.msk.f32.gmra.mrb[38].mxu1 %vm17793_vm0, %v5937_v16  ;;  %vm17797_vm11 = vmmov %vm17793_vm0  ;;  %556 = vst.msk [vmem:[#allocation5 + $0x28] sm:$0xff] %vm550_vm10, %v17807_v15  ;;  %v7082_v41 = vld [vmem:[#allocation4 + $0x15] sm:$0xff]  ;;  %v7083_v39 = vld [vmem:[#allocation4 + $0x1d] sm:$0xff] }
 0x3a5   : > { %11737 = vmatprep.mubr.msk.f32.mxu1 %vm17794_vm12, %v5938_v21  ;;  %vm17798_vm4 = vmmov %vm17793_vm0  ;;  %557 = vst.msk [vmem:[#allocation5 + $0x30] sm:$0xff] %vm550_vm10, %v17807_v15  ;;  %v6423_v1 = vld [vmem:[#allocation4 + $0x52] sm:$0xff]  ;;  %v7084_v20 = vld [vmem:[#allocation4 + $0x25] sm:$0xff] }
 0x3a6   : > { %vm17799_vm13 = vmmov %vm17793_vm0  ;;  %558 = vst.msk [vmem:[#allocation5 + $0x38] sm:$0xff] %vm550_vm10, %v17807_v15  ;;  %v6590_v55 = vld [vmem:[#allocation4 + $0x53] sm:$0xff]  ;;  %v7087_v47 = vld [vmem:[#allocation4 + $0x3d] sm:$0xff] }
 0x3a7   : > { %vm17800_vm15 = vmmov %vm17793_vm0  ;;  %559 = vst.msk [vmem:[#allocation5 + $0x40] sm:$0xff] %vm550_vm10, %v17807_v15  ;;  %v6757_v58 = vld [vmem:[#allocation4 + $0x54] sm:$0xff]  ;;  %v7088_v35 = vld [vmem:[#allocation4 + $0x45] sm:$0xff] }
 0x3a8   : > { %11738 = vmatmul.mubr.msk.f32.gmra.mrb[40].mxu1 %vm17795_vm5, %v5939_v5  ;;  %vm17801_vm9 = vmmov %vm17793_vm0  ;;  %560 = vst.msk [vmem:[#allocation5 + $0x48] sm:$0xff] %vm550_vm10, %v17807_v15  ;;  %v7085_v44 = vld [vmem:[#allocation4 + $0x2d] sm:$0xff]  ;;  %v7086_v4 = vld [vmem:[#allocation4 + $0x35] sm:$0xff] }
 0x3a9   : > { %11740 = vmatprep.mubr.msk.f32.mxu1 %vm17796_vm2, %v5940_v6  ;;  %vm17802_vm3 = vmmov %vm17793_vm0  ;;  %561 = vst.msk [vmem:[#allocation5 + $0x50] sm:$0xff] %vm550_vm10, %v17807_v15  ;;  %v7089_v23 = vld [vmem:[#allocation4 + $0x4d] sm:$0xff]  ;;  %v7090_v52 = vld [vmem:[#allocation4 + $0x55] sm:$0xff] }
 0x3aa   : > { %vm17803_vm7 = vmmov %vm17793_vm0  ;;  %562 = vst.msk [vmem:[#allocation5 + $0x58] sm:$0xff] %vm550_vm10, %v17807_v15  ;;  %v7091_v42 = vld [vmem:[#allocation4 + $0x5d] sm:$0xff]  ;;  %v7251_v62 = vld [vmem:[#allocation4 + $0x26] sm:$0xff] }
 0x3ab   : > { %vm17804_vm1 = vmmov %vm17793_vm0  ;;  %563 = vst.msk [vmem:[#allocation5 + $0x60] sm:$0xff] %vm550_vm10, %v17807_v15  ;;  %v7249_v10 = vld [vmem:[#allocation4 + $0x16] sm:$0xff]  ;;  %v7250_v22 = vld [vmem:[#allocation4 + $0x1e] sm:$0xff] }
 0x3ac   : > { %11741 = vmatmul.mubr.msk.f32.gmra.mrb[42].mxu1 %vm17797_vm11, %v5941_v37  ;;  %vm17805_vm8 = vmmov %vm17793_vm0  ;;  %566 = vst.msk [vmem:[#allocation7] sm:$0xff] %vm550_vm10, %v17808_v26  ;;  %v7252_v30 = vld [vmem:[#allocation4 + $0x2e] sm:$0xff]  ;;  %v7253_v25 = vld [vmem:[#allocation4 + $0x36] sm:$0xff]  ;;  %v13054_v37 = vmov 0.0|0.0  }
 0x3ad   : > { %11743 = vmatprep.mubr.msk.f32.mxu1 %vm17798_vm4, %v5942_v14  ;;  %vm17806_vm14 = vmmov %vm17793_vm0  ;;  %567 = vst.msk [vmem:[#allocation7 + $0x8] sm:$0xff] %vm550_vm10, %v17808_v26  ;;  %v7255_v27 = vld [vmem:[#allocation4 + $0x46] sm:$0xff]  ;;  %v7256_v34 = vld [vmem:[#allocation4 + $0x4e] sm:$0xff] }
 0x3ae   : > { %568 = vst.msk [vmem:[#allocation7 + $0x10] sm:$0xff] %vm550_vm10, %v17808_v26  ;;  %569 = vst.msk [vmem:[#allocation7 + $0x18] sm:$0xff] %vm550_vm10, %v17808_v26  ;;  %v7257_v16 = vld [vmem:[#allocation4 + $0x56] sm:$0xff]  ;;  %v7258_v21 = vld [vmem:[#allocation4 + $0x5e] sm:$0xff] }
 0x3af   : > { %570 = vst.msk [vmem:[#allocation7 + $0x20] sm:$0xff] %vm550_vm10, %v17808_v26  ;;  %vm17809_vm6 = vmmov %vm17793_vm0  ;;  %v10479_v5 = vld [vmem:[%s17060_s7 + $0x10] sm:$0xff]  ;;  %v10480_v6 = vld [vmem:[%s17060_s7 + $0x18] sm:$0xff] }
 0x3b0   : > { %11744 = vmatmul.mubr.msk.f32.gmra.mrb[44].mxu1 %vm17799_vm13, %v5943_v49  ;;  %vm17810_vm12 = vmmov %vm17793_vm0  ;;  %v12222_v14 = vpack.c.bf16 %v10480_v6, %v10479_v5  ;;  %v16204_v5 = vld [vmem:[#allocation5] sm:$0xff] }
 0x3b1   : > { %11748 = vmatprep.mubr.msk.f32.mxu1 %vm17800_vm15, %v6247_v28  ;;  %vm17811_vm5 = vmmov %vm17793_vm0  ;;  %v17867_v28 = vld [vmem:[#allocation26_spill] sm:$0xff]  ;;  %v16206_v6 = vld [vmem:[#allocation5 + $0x1] sm:$0xff] }
 0x3b2   : > { %vm17812_vm2 = vmmov %vm17793_vm0 }
 0x3b3   : > { %vm17813_vm11 = vmmov %vm17793_vm0 }
 0x3b4   : > { %11749 = vmatmul.mubr.msk.f32.vlgmr.msra.gmra.mrb[36].mxu1 %vm17801_vm9, %v6248_v31  ;;  %vm17814_vm4 = vmmov %vm17793_vm0 }
 0x3b5   : > { %11764 = vmatpush3.msra.mxu1 %v10411_v19  ;;  %11751 = vmatprep.mubr.msk.f32.mxu1 %vm17802_vm3, %v6249_v46  ;;  %vm17815_vm13 = vmmov %vm17793_vm0  ;;  %v7254_v19 = vld [vmem:[#allocation4 + $0x3e] sm:$0xff] }
 0x3b6   : > { %11780 = vmatprep.subr.mxu1 %v10422_v2  ;;  %vm17816_vm15 = vmmov %vm17793_vm0 }
 0x3b7   : > { %vm17817_vm9 = vmmov %vm17793_vm0 }
 0x3b8   : > { %11752 = vmatmul.mubr.msk.f32.gmra.mrb[38].mxu1 %vm17803_vm7, %v6250_v3  ;;  %vm17818_vm3 = vmmov %vm17793_vm0 }
 0x3b9   : > { %11754 = vmatprep.mubr.msk.f32.mxu1 %vm17804_vm1, %v6251_v12  ;;  %vm17819_vm7 = vmmov %vm17793_vm0 }
 0x3ba   : > { %vm17820_vm1 = vmmov %vm17793_vm0 }
 0x3bc   : > { %11755 = vmatmul.mubr.msk.f32.gmra.mrb[40].mxu1 %vm17805_vm8, %v6252_v33  ;;  %vm17821_vm8 = vmmov %vm17793_vm0 }
 0x3bd   : > { %11757 = vmatprep.mubr.msk.f32.mxu1 %vm17806_vm14, %v6253_v43  ;;  %vm17822_vm14 = vmmov %vm17793_vm0 }
 0x3c0   : > { %11758 = vmatmul.mubr.msk.f32.gmra.mrb[42].mxu1 %vm17809_vm6, %v6254_v45  ;;  %vm17823_vm6 = vmmov %vm17793_vm0 }
 0x3c1   : > { %11760 = vmatprep.mubr.msk.f32.mxu1 %vm17793_vm0, %v6255_v40 }
 0x3c4   : > { %11761 = vmatmul.mubr.msk.f32.gmra.mrb[44].mxu1 %vm17810_vm12, %v6256_v54  ;;  %vm17824_vm12 = vmmov %vm17793_vm0 }
 0x3c5   : > { %11765 = vmatprep.mubr.msk.f32.mxu1 %vm17811_vm5, %v6248_v31  ;;  %vm17825_vm5 = vmmov %vm17793_vm0  ;;  %v16133_v49 = vmul.u32.u64.low 3435973837, %v17867_v28  ;;  %v16134_v31 = vmul.u32.u64.high 3435973837, %v17867_v28, %v16133_v49 }
 0x3c8   : > { %11766 = vmatmul.mubr.msk.f32.vlgmr.msra.gmra.mrb[36].mxu1 %vm17812_vm2, %v6249_v46  ;;  %vm17826_vm2 = vmmov %vm17793_vm0 }
 0x3c9   : > { %11781 = vmatpush3.msra.mxu1 %v10422_v2  ;;  %11768 = vmatprep.mubr.msk.f32.mxu1 %vm17813_vm11, %v6250_v3  ;;  %vm17827_vm11 = vmmov %vm17793_vm0  ;;  %v17868_v2 = vld [vmem:[#allocation23_spill] sm:$0xff] }
 0x3ca   : > { %11797 = vmatprep.subr.mxu1 %v10433_v50  ;;  %v16137_v46 = vmul.u32.u64.low 3435973837, %v17868_v2  ;;  %v16138_v3 = vmul.u32.u64.high 3435973837, %v17868_v2, %v16137_v46 }
 0x3cc   : > { %11769 = vmatmul.mubr.msk.f32.gmra.mrb[38].mxu1 %vm17814_vm4, %v6251_v12  ;;  %vm17828_vm4 = vmmov %vm17793_vm0  ;;  %v17869_v12 = vld [vmem:[#allocation27_spill] sm:$0xff] }
 0x3cd   : > { %11771 = vmatprep.mubr.msk.f32.mxu1 %vm17815_vm13, %v6252_v33  ;;  %vm17829_vm13 = vmmov %vm17793_vm0 }
 0x3d0   : > { %11772 = vmatmul.mubr.msk.f32.gmra.mrb[40].mxu1 %vm17816_vm15, %v6253_v43  ;;  %vm17830_vm15 = vmmov %vm17793_vm0  ;;  %v16141_v33 = vmul.u32.u64.low 3435973837, %v17869_v12  ;;  %v16142_v43 = vmul.u32.u64.high 3435973837, %v17869_v12, %v16141_v33 }
 0x3d1   : > { %11774 = vmatprep.mubr.msk.f32.mxu1 %vm17817_vm9, %v6254_v45  ;;  %vm17831_vm9 = vmmov %vm17793_vm0  ;;  %v7477_v45 = vshrl.u32 %v16134_v31, 3  ;;  %v16213_v31 = vld [vmem:[%s17058_s5] ss:$0 sm:$0xff] }
 0x3d4   : > { %11775 = vmatmul.mubr.msk.f32.gmra.mrb[42].mxu1 %vm17818_vm3, %v6255_v40  ;;  %vm17832_vm3 = vmmov %vm17793_vm0  ;;  %v7466_v40 = vshrl.u32 %v16138_v3, 3 }
 0x3d5   : > { %11777 = vmatprep.mubr.msk.f32.mxu1 %vm17819_vm7, %v6256_v54  ;;  %vm17833_vm7 = vmmov %vm17793_vm0  ;;  %v7499_v54 = vshrl.u32 %v16142_v43, 3 }
 0x3d8   : > { %11778 = vmatmul.mubr.msk.f32.gmra.mrb[44].mxu1 %vm17820_vm1, %v6423_v1  ;;  %vm17834_vm1 = vmmov %vm17793_vm0 }
 0x3d9   : > { %11782 = vmatprep.mubr.msk.f32.mxu1 %vm17821_vm8, %v6581_v60  ;;  %vm17835_vm8 = vmmov %vm17793_vm0 }
 0x3dc   : > { %11783 = vmatmul.mubr.msk.f32.vlgmr.msra.gmra.mrb[36].mxu1 %vm17822_vm14, %v6582_v59  ;;  %vm17836_vm14 = vmmov %vm17793_vm0  ;;  %v17871_v59 = vld [vmem:[#allocation31_spill] sm:$0xff] }
 0x3dd   : > { %11798 = vmatpush3.msra.mxu1 %v10433_v50  ;;  %11785 = vmatprep.mubr.msk.f32.mxu1 %vm17823_vm6, %v6583_v0  ;;  %vm17837_vm6 = vmmov %vm17793_vm0  ;;  %v17870_v50 = vld [vmem:[#allocation28_spill] sm:$0xff] }
 0x3de   : > { %11814 = vmatprep.subr.mxu1 %v10444_v38  ;;  %v16148_v1 = vmul.u32.u64.low 3435973837, %v17870_v50  ;;  %v16149_v60 = vmul.u32.u64.high 3435973837, %v17870_v50, %v16148_v1 }
 0x3e0   : > { %11786 = vmatmul.mubr.msk.f32.gmra.mrb[38].mxu1 %vm17793_vm0, %v6584_v29  ;;  %v7478_v29 = vmul.u32 10, %v7477_v45  ;;  %v16228_v45 = vld [vmem:[%s17059_s6] ss:$0 sm:$0xff] }
 0x3e1   : > { %11788 = vmatprep.mubr.msk.f32.mxu1 %vm17824_vm12, %v6585_v32  ;;  %vm17838_vm12 = vmmov %vm17793_vm0  ;;  %v7467_v32 = vmul.u32 10, %v7466_v40 }
 0x3e4   : > { %11789 = vmatmul.mubr.msk.f32.gmra.mrb[40].mxu1 %vm17825_vm5, %v6586_v24  ;;  %vm17839_vm5 = vmmov %vm17793_vm0  ;;  %v7500_v24 = vmul.u32 10, %v7499_v54  ;;  %v7670_v54 = vmax.f32 %v16204_v5, %v16206_v6 }
 0x3e5   : > { %11791 = vmatprep.mubr.msk.f32.mxu1 %vm17826_vm2, %v6587_v63  ;;  %vm17840_vm2 = vmmov %vm17793_vm0  ;;  %v17872_v63 = vld [vmem:[#allocation33_spill] sm:$0xff] }
 0x3e8   : > { %11792 = vmatmul.mubr.msk.f32.gmra.mrb[42].mxu1 %vm17827_vm11, %v6588_v61  ;;  %vm17841_vm11 = vmmov %vm17793_vm0 }
 0x3e9   : > { %11794 = vmatprep.mubr.msk.f32.mxu1 %vm17828_vm4, %v6589_v8  ;;  %vm17842_vm4 = vmmov %vm17793_vm0  ;;  %v16156_v61 = vmul.u32.u64.low 3435973837, %v17872_v63  ;;  %v16157_v8 = vmul.u32.u64.high 3435973837, %v17872_v63, %v16156_v61 }
 0x3ec   : > { %11795 = vmatmul.mubr.msk.f32.gmra.mrb[44].mxu1 %vm17829_vm13, %v6590_v55  ;;  %vm17843_vm13 = vmmov %vm17793_vm0  ;;  %v17873_v55 = vld [vmem:[#allocation35_spill] sm:$0xff] }
 0x3ed   : > { %11799 = vmatprep.mubr.msk.f32.mxu1 %vm17830_vm15, %v6748_v11  ;;  %vm17844_vm15 = vmmov %vm17793_vm0 }
 0x3f0   : > { %11800 = vmatmul.mubr.msk.f32.vlgmr.msra.gmra.mrb[36].mxu1 %vm17831_vm9, %v6749_v48  ;;  %vm17845_vm9 = vmmov %vm17793_vm0 }
 0x3f1   : > { %11815 = vmatpush3.msra.mxu1 %v10444_v38  ;;  %11802 = vmatprep.mubr.msk.f32.mxu1 %vm17832_vm3, %v6750_v9  ;;  %vm17846_vm3 = vmmov %vm17793_vm0  ;;  %v16152_v38 = vmul.u32.u64.low 3435973837, %v17871_v59  ;;  %v16153_v0 = vmul.u32.u64.high 3435973837, %v17871_v59, %v16152_v38 }
 0x3f2   : > { %11831 = vmatprep.subr.mxu1 %v10455_v7 }
 0x3f4   : > { %11803 = vmatmul.mubr.msk.f32.gmra.mrb[38].mxu1 %vm17833_vm7, %v6751_v57  ;;  %vm17847_vm7 = vmmov %vm17793_vm0 }
 0x3f5   : > { %11805 = vmatprep.mubr.msk.f32.mxu1 %vm17834_vm1, %v6752_v53  ;;  %vm17848_vm1 = vmmov %vm17793_vm0 }
 0x3f8   : > { %11806 = vmatmul.mubr.msk.f32.gmra.mrb[40].mxu1 %vm17835_vm8, %v6753_v36  ;;  %vm17849_vm8 = vmmov %vm17793_vm0 }
 0x3f9   : > { %11808 = vmatprep.mubr.msk.f32.mxu1 %vm17836_vm14, %v6754_v18  ;;  %vm17850_vm14 = vmmov %vm17793_vm0 }
 0x3fc   : > { %11809 = vmatmul.mubr.msk.f32.gmra.mrb[42].mxu1 %vm17837_vm6, %v6755_v17  ;;  %vm17851_vm6 = vmmov %vm17793_vm0 }
 0x3fd   : > { %11811 = vmatprep.mubr.msk.f32.mxu1 %vm17793_vm0, %v6756_v13 }
 0x400   : > { %11812 = vmatmul.mubr.msk.f32.gmra.mrb[44].mxu1 %vm17838_vm12, %v6757_v58  ;;  %vm17852_vm12 = vmmov %vm17793_vm0 }
 0x401   : > { %11816 = vmatprep.mubr.msk.f32.mxu1 %vm17839_vm5, %v6749_v48  ;;  %vm17853_vm5 = vmmov %vm17793_vm0  ;;  %v16160_v11 = vmul.u32.u64.low 3435973837, %v17873_v55  ;;  %v16161_v48 = vmul.u32.u64.high 3435973837, %v17873_v55, %v16160_v11 }
 0x404   : > { %11817 = vmatmul.mubr.msk.f32.vlgmr.msra.gmra.mrb[36].mxu1 %vm17840_vm2, %v6750_v9  ;;  %vm17854_vm2 = vmmov %vm17793_vm0  ;;  %v7468_v9 = vsub.s32 %v17868_v2, %v7467_v32 }
 0x405   : > { %11832 = vmatpush3.msra.mxu1 %v10455_v7  ;;  %11819 = vmatprep.mubr.msk.f32.mxu1 %vm17841_vm11, %v6751_v57  ;;  %vm17855_vm11 = vmmov %vm17793_vm0  ;;  %v7479_v7 = vsub.s32 %v17867_v28, %v7478_v29  ;;  %v7501_v57 = vsub.s32 %v17869_v12, %v7500_v24 }
 0x406   : > { %11848 = vmatprep.subr.mxu1 %v10466_v51 }
 0x408   : > { %11820 = vmatmul.mubr.msk.f32.gmra.mrb[38].mxu1 %vm17842_vm4, %v6752_v53  ;;  %vm17856_vm4 = vmmov %vm17793_vm0  ;;  %v7488_v53 = vshrl.u32 %v16149_v60, 3 }
 0x409   : > { %11822 = vmatprep.mubr.msk.f32.mxu1 %vm17843_vm13, %v6753_v36  ;;  %vm17857_vm13 = vmmov %vm17793_vm0  ;;  %v17874_v36 = vld [vmem:[#allocation38_spill] sm:$0xff] }
 0x40c   : > { %11823 = vmatmul.mubr.msk.f32.gmra.mrb[40].mxu1 %vm17844_vm15, %v6754_v18  ;;  %vm17858_vm15 = vmmov %vm17793_vm0 }
 0x40d   : > { %11825 = vmatprep.mubr.msk.f32.mxu1 %vm17845_vm9, %v6755_v17  ;;  %vm17859_vm9 = vmmov %vm17793_vm0  ;;  %v16168_v18 = vmul.u32.u64.low 3435973837, %v17874_v36  ;;  %v16169_v17 = vmul.u32.u64.high 3435973837, %v17874_v36, %v16168_v18 }
 0x410   : > { %11826 = vmatmul.mubr.msk.f32.gmra.mrb[42].mxu1 %vm17846_vm3, %v6756_v13  ;;  %vm17860_vm3 = vmmov %vm17793_vm0  ;;  %v7521_v13 = vshrl.u32 %v16153_v0, 3 }
 0x411   : > { %11828 = vmatprep.mubr.msk.f32.mxu1 %vm17847_vm7, %v6757_v58  ;;  %vm17861_vm7 = vmmov %vm17793_vm0  ;;  %v7489_v58 = vmul.u32 10, %v7488_v53 }
 0x414   : > { %11829 = vmatmul.mubr.msk.f32.gmra.mrb[44].mxu1 %vm17848_vm1, %v6924_v56  ;;  %vm17862_vm1 = vmmov %vm17793_vm0  ;;  %v7510_v56 = vshrl.u32 %v16157_v8, 3 }
 0x415   : > { %11833 = vmatprep.mubr.msk.f32.mxu1 %vm17849_vm8, %v7082_v41  ;;  %vm17863_vm8 = vmmov %vm17793_vm0  ;;  %v17875_v41 = vld [vmem:[#allocation39_spill] sm:$0xff] }
 0x418   : > { %11834 = vmatmul.mubr.msk.f32.vlgmr.msra.gmra.mrb[36].mxu1 %vm17850_vm14, %v7083_v39  ;;  %vm17864_vm14 = vmmov %vm17793_vm0 }
 0x419   : > { %11849 = vmatpush3.msra.mxu1 %v10466_v51  ;;  %11836 = vmatprep.mubr.msk.f32.mxu1 %vm17851_vm6, %v7084_v20  ;;  %vm17865_vm6 = vmmov %vm17793_vm0  ;;  %v7522_v51 = vmul.u32 10, %v7521_v13  ;;  %v16174_v39 = vmul.u32.u64.low 3435973837, %v17875_v41  ;;  %v16175_v20 = vmul.u32.u64.high 3435973837, %v17875_v41, %v16174_v39 }
 0x41a   : > { %12221 = vmatprep.subr.bf16.mxu1 %v13054_v37 }
 0x41b   : > { %v7565_v3 = vshrl.u32 %v16175_v20, 3 }
 0x41c   : > { %11837 = vmatmul.mubr.msk.f32.gmra.mrb[38].mxu1 %vm17793_vm0, %v7085_v44  ;;  %v7543_v44 = vshrl.u32 %v16161_v48, 3 }
 0x41d   : > { %11839 = vmatprep.mubr.msk.f32.mxu1 %vm17852_vm12, %v7086_v4  ;;  %vm17866_vm12 = vmmov %vm17793_vm0  ;;  %v17876_v4 = vld [vmem:[#allocation41_spill] sm:$0xff]  ;;  %v7566_v8 = vmul.u32 10, %v7565_v3 }
 0x41f   : > { %v16294_v20 = vsub.s32 %v17875_v41, %v7566_v8 }
 0x420   : > { %11840 = vmatmul.mubr.msk.f32.gmra.mrb[40].mxu1 %vm17853_vm5, %v7087_v47  ;;  %vm13055_vm5 = vmmov 0  }
 0x421   : > { %11842 = vmatprep.mubr.msk.f32.mxu1 %vm17854_vm2, %v7088_v35  ;;  %vm7571_vm2 = vcmp.ne.s32.totalorder %v7479_v7, 0  ;;  %v16179_v47 = vmul.u32.u64.low 3435973837, %v17876_v4  ;;  %v16180_v35 = vmul.u32.u64.high 3435973837, %v17876_v4, %v16179_v47 }
 0x423   : > { %v7554_v33 = vshrl.u32 %v16180_v35, 3 }
 0x424   : > { %11843 = vmatmul.mubr.msk.f32.gmra.mrb[42].mxu1 %vm17855_vm11, %v7089_v23  ;;  %vm7581_vm11 = vcmp.lt.s32.totalorder %v7479_v7, 0 }
 0x425   : > { %11845 = vmatprep.mubr.msk.f32.mxu1 %vm17856_vm4, %v7090_v52  ;;  %vm7570_vm4 = vcmp.ne.s32.totalorder %v7468_v9, 0  ;;  %v7601_v52 = vadd.s32 10, %v7479_v7  ;;  %v7555_v11 = vmul.u32 10, %v7554_v33 }
 0x427   : > { %v16304_v23 = vsub.s32 %v17876_v4, %v7555_v11 }
 0x428   : > { %11846 = vmatmul.mubr.msk.f32.gmra.mrb[44].mxu1 %vm17857_vm13, %v7091_v42  ;;  %vm7580_vm13 = vcmp.lt.s32.totalorder %v7468_v9, 0  ;;  %v7600_v42 = vadd.s32 10, %v7468_v9 }
 0x429   : > { %11850 = vmatprep.mubr.msk.f32.mxu1 %vm17858_vm15, %v7249_v10  ;;  %vm7573_vm15 = vcmp.ne.s32.totalorder %v7501_v57, 0 }
 0x42c   : > { %11851 = vmatmul.mubr.msk.f32.vlgmr.msra.gmra.mrb[36].mxu1 %vm17859_vm9, %v7250_v22  ;;  %vm7583_vm9 = vcmp.lt.s32.totalorder %v7501_v57, 0  ;;  %v7603_v22 = vadd.s32 10, %v7501_v57 }
 0x42d   : > { %11853 = vmatprep.mubr.msk.f32.mxu1 %vm17860_vm3, %v7251_v62  ;;  %12223 = vmatpush3.bf16.msra.mxu1 %v12222_v14  ;;  %vm16182_vm3 = vmand %vm7581_vm11, %vm7571_vm2  ;;  %v7490_v62 = vsub.s32 %v17870_v50, %v7489_v58 }
 0x42e   : > { %12224 = vmatprep.subr.bf16.mxu1 %v13054_v37 }
 0x42f   : > { %v7602_v60 = vadd.s32 10, %v7490_v62 }
 0x430   : > { %11854 = vmatmul.mubr.msk.f32.gmra.mrb[38].mxu1 %vm17861_vm7, %v7252_v30  ;;  %vm16186_vm7 = vmand %vm7580_vm13, %vm7570_vm4  ;;  %v7532_v30 = vshrl.u32 %v16169_v17, 3 }
 0x431   : > { %11856 = vmatprep.mubr.msk.f32.mxu1 %vm17862_vm1, %v7253_v25  ;;  %vm16193_vm1 = vmand %vm7583_vm9, %vm7573_vm15 }
 0x432   : > { %v7613_v14 = vsel %vm16193_vm1, %v7603_v22, %v7501_v57  ;;  %v7533_v49 = vmul.u32 10, %v7532_v30 }
 0x433   : > { %vm16246_vm4 = vcmp.lt.s32.totalorder %v7613_v14, 8 }
 0x434   : > { %11857 = vmatmul.mubr.msk.f32.gmra.mrb[40].mxu1 %vm17863_vm8, %v7254_v19  ;;  %v16198_v19 = vsub.s32 %v17871_v59, %v7522_v51  ;;  %vm7572_vm8 = vcmp.ne.s32.totalorder %v7490_v62, 0 }
 0x435   : > { %11859 = vmatprep.mubr.msk.f32.mxu1 %vm17864_vm14, %v7255_v27  ;;  %v7511_v27 = vmul.u32 10, %v7510_v56  ;;  %vm7582_vm14 = vcmp.lt.s32.totalorder %v7490_v62, 0 }
 0x436   : > { %vm16236_vm2 = vmand %vm7582_vm14, %vm7572_vm8  ;;  %v7605_v59 = vadd.s32 10, %v16198_v19 }
 0x437   : > { %v16218_v46 = vsub.s32 %v17872_v63, %v7511_v27  ;;  %v16259_v63 = vsub.s32 %v17874_v36, %v7533_v49 }
 0x438   : > { %11860 = vmatmul.mubr.msk.f32.gmra.mrb[42].mxu1 %vm17865_vm6, %v7256_v34  ;;  %v7544_v34 = vmul.u32 10, %v7543_v44  ;;  %vm7575_vm6 = vcmp.ne.s32.totalorder %v16198_v19, 0 }
 0x439   : > { %11862 = vmatprep.mubr.msk.f32.mxu1 %vm17793_vm0, %v7257_v16  ;;  %v7611_v16 = vsel %vm16182_vm3, %v7601_v52, %v7479_v7  ;;  %vm7585_vm0 = vcmp.lt.s32.totalorder %v16198_v19, 0  ;;  %vm7574_vm15 = vcmp.ne.s32.totalorder %v16218_v46, 0  ;;  %vm7584_vm9 = vcmp.lt.s32.totalorder %v16218_v46, 0 }
 0x43a   : > { %v16222_v12 = vsub.s32 %v17873_v55, %v7544_v34  ;;  %vm16254_vm13 = vmand %vm7585_vm0, %vm7575_vm6  ;;  %v7604_v53 = vadd.s32 10, %v16218_v46  ;;  %vm7576_vm8 = vcmp.ne.s32.totalorder %v16259_v63, 0  ;;  %vm7586_vm6 = vcmp.lt.s32.totalorder %v16259_v63, 0 }
 0x43b   : > { %v7615_v57 = vsel %vm16254_vm13, %v7605_v59, %v16198_v19  ;;  %vm16277_vm1 = vmand %vm7584_vm9, %vm7574_vm15  ;;  %v7606_v22 = vadd.s32 10, %v16259_v63  ;;  %vm7589_vm13 = vcmp.lt.s32.totalorder %v16294_v20, 0  ;;  %vm7578_vm15 = vcmp.ne.s32.totalorder %v16304_v23, 0 }
 0x43c   : > { %11863 = vmatmul.mubr.msk.f32.gmra.mrb[44].mxu1 %vm17866_vm12, %v7258_v21  ;;  %v7610_v21 = vsel %vm16186_vm7, %v7600_v42, %v7468_v9  ;;  %vm16230_vm12 = vcmp.lt.s32.totalorder %v7611_v16, 8  ;;  %vm7577_vm3 = vcmp.ne.s32.totalorder %v16222_v12, 0  ;;  %vm7587_vm7 = vcmp.lt.s32.totalorder %v16222_v12, 0 }
 0x43d   : > { %11869 = vmatprep.mubr.msk.f32.mxu1 %vm13055_vm5, %v17808_v26  ;;  %vm16242_vm11 = vcmp.lt.s32.totalorder %v7610_v21, 8  ;;  %v7612_v9 = vsel %vm16236_vm2, %v7602_v60, %v7490_v62  ;;  %v7607_v58 = vadd.s32 10, %v16222_v12  ;;  %vm16288_vm14 = vmand %vm7587_vm7, %vm7577_vm3  ;;  %vm16310_vm2 = vcmp.lt.s32.totalorder %v7615_v57, 8  ;;  %v7680_v21 = vld [vmem:[#allocation5 + $0x2] sm:$0xff] }
 0x43e   : > { %vm16299_vm0 = vcmp.lt.s32.totalorder %v7612_v9, 8  ;;  %v7614_v25 = vsel %vm16277_vm1, %v7604_v53, %v16218_v46  ;;  %vm7588_vm9 = vcmp.lt.s32.totalorder %v16304_v23, 0 }
 0x43f   : > { %v7617_v19 = vsel %vm16288_vm14, %v7607_v58, %v16222_v12  ;;  %vm16366_vm7 = vmand %vm7588_vm9, %vm7578_vm15 }
 0x440   : > { %vm16373_vm1 = vcmp.lt.s32.totalorder %v7617_v19, 8 }
 0x4ff   : > { %v11852_v43 = vpop.f32.mrb[36].mxu1 }
 0x500   : > { %v7424_v38 = vmul.f32 %v11852_v43, %v16213_v31  ;;  %v7357_v0 = vpop.f32.mrb[37].mxu1  ;;  %v7609_v43 = vadd.s32 10, %v16294_v20 }
 0x501   : > { %v7423_v61 = vmul.f32 %v16213_v31, %v7357_v0  ;;  %v7690_v0 = vmax.f32 %v7670_v54, %v7680_v21 }
 0x502   : > { %v7441_v55 = vadd.f32 %v16228_v45, %v7424_v38  ;;  %v7608_v38 = vadd.s32 10, %v16304_v23 }
 0x503   : > { %v7440_v48 = vadd.f32 %v16228_v45, %v7423_v61  ;;  %v11855_v7 = vpop.f32.mrb[38].mxu1 }
 0x504   : > { %v7451_v36 = vmax.f32 %v7441_v55, 0.0  ;;  %v7426_v18 = vmul.f32 %v11855_v7, %v16213_v31  ;;  %v7367_v17 = vpop.f32.mrb[39].mxu1 }
 0x505   : > { %v7450_v51 = vmax.f32 %v7440_v48, 0.0  ;;  %v7425_v56 = vmul.f32 %v16213_v31, %v7367_v17 }
 0x506   : > { %v7631_v44 = vsel %vm16230_vm12, %v7451_v36, -3.4028235e+38  ;;  %v7443_v47 = vadd.f32 %v16228_v45, %v7426_v18  ;;  %vm16327_vm12 = vmand %vm7586_vm6, %vm7576_vm8  ;;  %v7618_v18 = vsel %vm16366_vm7, %v7608_v38, %v16304_v23 }
 0x507   : > { %7641 = vst.msk [vmem:[#allocation5 + $0x13] sm:$0xff] %vm550_vm10, %v7631_v44  ;;  %v7630_v52 = vsel %vm16242_vm11, %v7450_v51, -3.4028235e+38  ;;  %v7442_v41 = vadd.f32 %v16228_v45, %v7425_v56  ;;  %v11858_v42 = vpop.f32.mrb[40].mxu1  ;;  %vm7579_vm11 = vcmp.ne.s32.totalorder %v16294_v20, 0  ;;  %v7616_v33 = vsel %vm16327_vm12, %v7606_v22, %v16259_v63 }
 0x508   : > { %7640 = vst.msk [vmem:[#allocation5 + $0xb] sm:$0xff] %vm550_vm10, %v7630_v52  ;;  %v7453_v62 = vmax.f32 %v7443_v47, 0.0  ;;  %v7428_v4 = vmul.f32 %v11858_v42, %v16213_v31  ;;  %v7377_v30 = vpop.f32.mrb[41].mxu1  ;;  %vm16353_vm3 = vmand %vm7589_vm13, %vm7579_vm11  ;;  %vm16377_vm8 = vcmp.lt.s32.totalorder %v7616_v33, 8  ;;  %vm7628_vm6 = vcmp.lt.s32.totalorder %v7618_v18, 8 }
 0x509   : > { %v7452_v34 = vmax.f32 %v7442_v41, 0.0  ;;  %v7427_v16 = vmul.f32 %v16213_v31, %v7377_v30  ;;  %v7619_v48 = vsel %vm16353_vm3, %v7609_v43, %v16294_v20 }
 0x50a   : > { %v7633_v14 = vsel %vm16246_vm4, %v7453_v62, -3.4028235e+38  ;;  %v7445_v49 = vadd.f32 %v16228_v45, %v7428_v4  ;;  %vm7624_vm4 = vcmp.lt.s32.totalorder %v7614_v25, 8  ;;  %vm16395_vm14 = vcmp.lt.s32.totalorder %v7619_v48, 8 }
 0x50b   : > { %7643 = vst.msk [vmem:[#allocation5 + $0x23] sm:$0xff] %vm550_vm10, %v7633_v14  ;;  %v7632_v46 = vsel %vm16299_vm0, %v7452_v34, -3.4028235e+38  ;;  %v7444_v3 = vadd.f32 %v16228_v45, %v7427_v16  ;;  %v11861_v12 = vpop.f32.mrb[42].mxu1  ;;  %vm572_vm0 = vcmask 261120  }
 0x50c   : > { %7642 = vst.msk [vmem:[#allocation5 + $0x1b] sm:$0xff] %vm550_vm10, %v7632_v46  ;;  %v7455_v40 = vmax.f32 %v7445_v49, 0.0  ;;  %v7430_v1 = vmul.f32 %v11861_v12, %v16213_v31  ;;  %v7387_v60 = vpop.f32.mrb[43].mxu1 }
 0x50d   : > { %v7454_v29 = vmax.f32 %v7444_v3, 0.0  ;;  %v7429_v32 = vmul.f32 %v16213_v31, %v7387_v60  ;;  %573 = vst.msk [vmem:[#allocation8] sm:$0xff] %vm572_vm0, %v17807_v15  ;;  %574 = vst.msk [vmem:[#allocation8 + $0x8] sm:$0xff] %vm572_vm0, %v17807_v15 }
 0x50e   : > { %v7635_v63 = vsel %vm16310_vm2, %v7455_v40, -3.4028235e+38  ;;  %v7447_v61 = vadd.f32 %v16228_v45, %v7430_v1  ;;  %575 = vst.msk [vmem:[#allocation8 + $0x10] sm:$0xff] %vm572_vm0, %v17807_v15  ;;  %576 = vst.msk [vmem:[#allocation8 + $0x18] sm:$0xff] %vm572_vm0, %v17807_v15  ;;  %vm7813_vm2 = vcmask 122880  }
 0x50f   : > { %v7652_v6 = vld [vmem:[#allocation5 + $0x10] sm:$0xff]  ;;  %7645 = vst.msk [vmem:[#allocation5 + $0x33] sm:$0xff] %vm550_vm10, %v7635_v63  ;;  %v7634_v54 = vsel %vm7624_vm4, %v7454_v29, -3.4028235e+38  ;;  %v7446_v55 = vadd.f32 %v16228_v45, %v7429_v32  ;;  %v11864_v11 = vpop.f32.mrb[44].mxu1 }
 0x510   : > { %v7662_v7 = vld [vmem:[#allocation5 + $0x11] sm:$0xff]  ;;  %7644 = vst.msk [vmem:[#allocation5 + $0x2b] sm:$0xff] %vm550_vm10, %v7634_v54  ;;  %v7457_v57 = vmax.f32 %v7447_v61, 0.0  ;;  %v7432_v53 = vmul.f32 %v11864_v11, %v16213_v31  ;;  %v7397_v36 = vpop.f32.mrb[45].mxu1 }
 0x511   : > { %v7681_v9 = vld [vmem:[#allocation5 + $0xa] sm:$0xff]  ;;  %v7672_v17 = vmax.f32 %v7652_v6, %v7662_v7  ;;  %v7456_v58 = vmax.f32 %v7446_v55, 0.0  ;;  %v7431_v51 = vmul.f32 %v16213_v31, %v7397_v36  ;;  %v7682_v56 = vld [vmem:[#allocation5 + $0x12] sm:$0xff]  ;;  %577 = vst.msk [vmem:[#allocation8 + $0x20] sm:$0xff] %vm572_vm0, %v17807_v15  ;;  %580 = vst.msk [vmem:[#allocation10] sm:$0xff] %vm572_vm0, %v17808_v26 }
 0x512   : > { %v7701_v13 = vmax.f32 %v7690_v0, %v7681_v9  ;;  %v7711_v39 = vld [vmem:[#allocation5 + $0xb] sm:$0xff]  ;;  %v7637_v20 = vsel %vm16373_vm1, %v7457_v57, -3.4028235e+38  ;;  %v7449_v44 = vadd.f32 %v16228_v45, %v7432_v53  ;;  %v7714_v1 = vld [vmem:[#allocation5 + $0x23] sm:$0xff]  ;;  %581 = vst.msk [vmem:[#allocation10 + $0x8] sm:$0xff] %vm572_vm0, %v17808_v26  ;;  %582 = vst.msk [vmem:[#allocation10 + $0x10] sm:$0xff] %vm572_vm0, %v17808_v26 }
 0x513   : > { %v7692_v35 = vmax.f32 %v7672_v17, %v7682_v56  ;;  %v7653_v41 = vld [vmem:[#allocation5 + $0x18] sm:$0xff]  ;;  %7647 = vst.msk [vmem:[#allocation5 + $0x43] sm:$0xff] %vm550_vm10, %v7637_v20  ;;  %v7636_v31 = vsel %vm16377_vm8, %v7456_v58, -3.4028235e+38  ;;  %v7448_v42 = vadd.f32 %v16228_v45, %v7431_v51  ;;  %v7731_v10 = vld [vmem:[#allocation5 + $0xc] sm:$0xff]  ;;  %v7684_v27 = vld [vmem:[#allocation5 + $0x22] sm:$0xff] }
 0x514   : > { %v7721_v52 = vmax.f32 %v7701_v13, %v7711_v39  ;;  %v7663_v23 = vld [vmem:[#allocation5 + $0x19] sm:$0xff]  ;;  %7646 = vst.msk [vmem:[#allocation5 + $0x3b] sm:$0xff] %vm550_vm10, %v7636_v31  ;;  %v7459_v4 = vmax.f32 %v7449_v44, 0.0 }
 0x515   : > { %v7673_v22 = vmax.f32 %v7653_v41, %v7663_v23  ;;  %v7683_v62 = vld [vmem:[#allocation5 + $0x1a] sm:$0xff]  ;;  %v7458_v19 = vmax.f32 %v7448_v42, 0.0 }
 0x516   : > { %v7741_v30 = vmax.f32 %v7721_v52, %v7731_v10  ;;  %v7703_v25 = vmax.f32 %v7692_v35, %v7683_v62  ;;  %v7713_v16 = vld [vmem:[#allocation5 + $0x1b] sm:$0xff]  ;;  %v7639_v14 = vsel %vm16395_vm14, %v7459_v4, -3.4028235e+38  ;;  %v7716_v36 = vld [vmem:[#allocation5 + $0x33] sm:$0xff] }
 0x517   : > { %v7693_v34 = vmax.f32 %v7673_v22, %v7683_v62  ;;  %v7732_v21 = vld [vmem:[#allocation5 + $0x14] sm:$0xff]  ;;  %v7733_v46 = vld [vmem:[#allocation5 + $0x1c] sm:$0xff]  ;;  %v7655_v12 = vld [vmem:[#allocation5 + $0x28] sm:$0xff]  ;;  %7649 = vst.msk [vmem:[#allocation5 + $0x53] sm:$0xff] %vm550_vm10, %v7639_v14  ;;  %v7638_v33 = vsel %vm7628_vm6, %v7458_v19, -3.4028235e+38 }
 0x518   : > { %v7723_v49 = vmax.f32 %v7703_v25, %v7713_v16  ;;  %v7752_v45 = vmax.f32 %v7741_v30, %v7732_v21  ;;  %v7762_v3 = vld [vmem:[#allocation5 + $0x15] sm:$0xff]  ;;  %v7665_v40 = vld [vmem:[#allocation5 + $0x29] sm:$0xff]  ;;  %7648 = vst.msk [vmem:[#allocation5 + $0x4b] sm:$0xff] %vm550_vm10, %v7638_v33  ;;  %vm8851_vm6 = vcmask 253952  }
 0x519   : > { %v7704_v43 = vmax.f32 %v7693_v34, %v7684_v27  ;;  %v7675_v38 = vmax.f32 %v7655_v12, %v7665_v40  ;;  %v7685_v0 = vld [vmem:[#allocation5 + $0x2a] sm:$0xff]  ;;  %v7782_v29 = vld [vmem:[#allocation5 + $0x16] sm:$0xff] }
 0x51a   : > { %v7743_v60 = vmax.f32 %v7723_v49, %v7733_v46  ;;  %v7772_v59 = vmax.f32 %v7752_v45, %v7762_v3  ;;  %v7686_v32 = vld [vmem:[#allocation5 + $0x32] sm:$0xff]  ;;  %v7734_v63 = vld [vmem:[#allocation5 + $0x24] sm:$0xff] }
 0x51b   : > { %v7724_v24 = vmax.f32 %v7704_v43, %v7714_v1  ;;  %v7695_v8 = vmax.f32 %v7675_v38, %v7685_v0  ;;  %v7735_v5 = vld [vmem:[#allocation5 + $0x2c] sm:$0xff]  ;;  %v7657_v11 = vld [vmem:[#allocation5 + $0x38] sm:$0xff]  ;;  %v7658_v48 = vld [vmem:[#allocation5 + $0x40] sm:$0xff] }
 0x51c   : > { %v7792_v61 = vmax.f32 %v7772_v59, %v7782_v29  ;;  %v7754_v6 = vmax.f32 %v7743_v60, %v7734_v63  ;;  %v7764_v55 = vld [vmem:[#allocation5 + $0x25] sm:$0xff]  ;;  %v7667_v57 = vld [vmem:[#allocation5 + $0x39] sm:$0xff]  ;;  %v7765_v58 = vld [vmem:[#allocation5 + $0x2d] sm:$0xff] }
 0x51d   : > { %v7744_v54 = vmax.f32 %v7724_v24, %v7734_v63  ;;  %v7706_v7 = vmax.f32 %v7695_v8, %v7686_v32  ;;  %v7668_v53 = vld [vmem:[#allocation5 + $0x41] sm:$0xff]  ;;  %v7677_v13 = vmax.f32 %v7657_v11, %v7667_v57  ;;  %v7736_v20 = vld [vmem:[#allocation5 + $0x34] sm:$0xff] }
 0x51e   : > { %7802 = vst.msk [vmem:[#allocation6] sm:$0xff] %vm550_vm10, %v7792_v61  ;;  %v7774_v9 = vmax.f32 %v7754_v6, %v7764_v55  ;;  %v7687_v15 = vld [vmem:[#allocation5 + $0x3a] sm:$0xff]  ;;  %v7784_v17 = vld [vmem:[#allocation5 + $0x26] sm:$0xff]  ;;  %v7678_v56 = vmax.f32 %v7658_v48, %v7668_v53  ;;  %v7785_v52 = vld [vmem:[#allocation5 + $0x2e] sm:$0xff] }
 0x51f   : > { %v7755_v18 = vmax.f32 %v7744_v54, %v7735_v5  ;;  %v7726_v39 = vmax.f32 %v7706_v7, %v7716_v36  ;;  %v7688_v47 = vld [vmem:[#allocation5 + $0x42] sm:$0xff]  ;;  %v7697_v35 = vmax.f32 %v7677_v13, %v7687_v15  ;;  %v7689_v22 = vld [vmem:[#allocation5 + $0x4a] sm:$0xff]  ;;  %v7740_v40 = vld [vmem:[#allocation5 + $0x54] sm:$0xff] }
 0x520   : > { %v7794_v51 = vmax.f32 %v7774_v9, %v7784_v17  ;;  %v7698_v41 = vmax.f32 %v7678_v56, %v7688_v47  ;;  %v7737_v23 = vld [vmem:[#allocation5 + $0x3c] sm:$0xff]  ;;  %v7719_v27 = vld [vmem:[#allocation5 + $0x4b] sm:$0xff] }
 0x521   : > { %v7775_v44 = vmax.f32 %v7755_v18, %v7765_v58  ;;  %v7746_v31 = vmax.f32 %v7726_v39, %v7736_v20  ;;  %v7708_v10 = vmax.f32 %v7697_v35, %v7688_v47  ;;  %v7718_v62 = vld [vmem:[#allocation5 + $0x43] sm:$0xff]  ;;  %v7739_v49 = vld [vmem:[#allocation5 + $0x4c] sm:$0xff]  ;;  %v7770_v63 = vld [vmem:[#allocation5 + $0x55] sm:$0xff] }
 0x522   : > { %7804 = vst.msk [vmem:[#allocation6 + $0x10] sm:$0xff] %vm550_vm10, %v7794_v51  ;;  %v7767_v30 = vld [vmem:[#allocation5 + $0x3d] sm:$0xff]  ;;  %v7709_v25 = vmax.f32 %v7698_v41, %v7689_v22  ;;  %v7769_v29 = vld [vmem:[#allocation5 + $0x4d] sm:$0xff] }
 0x523   : > { %v7795_v42 = vmax.f32 %v7775_v44, %v7785_v52  ;;  %v7757_v4 = vmax.f32 %v7746_v31, %v7737_v23  ;;  %v7787_v19 = vld [vmem:[#allocation5 + $0x3e] sm:$0xff]  ;;  %v7728_v34 = vmax.f32 %v7708_v10, %v7718_v62  ;;  %v7849_v24 = vld [vmem:[%s17060_s7 + $0x8] sm:$0xff]  ;;  %v7790_v55 = vld [vmem:[#allocation5 + $0x56] sm:$0xff] }
 0x524   : > { %v7738_v16 = vld [vmem:[#allocation5 + $0x44] sm:$0xff]  ;;  %v7729_v14 = vmax.f32 %v7709_v25, %v7719_v27  ;;  %v7789_v5 = vld [vmem:[#allocation5 + $0x4e] sm:$0xff]  ;;  %v10493_v41 = vld [vmem:[%s17060_s7 + $0x38] sm:$0xff] }
 0x525   : > { %7805 = vst.msk [vmem:[#allocation6 + $0x18] sm:$0xff] %vm550_vm10, %v7795_v42  ;;  %v7777_v21 = vmax.f32 %v7757_v4, %v7767_v30  ;;  %v7812_v46 = vld [vmem:[#allocation6] sm:$0x1]  ;;  %v7748_v45 = vmax.f32 %v7728_v34, %v7738_v16  ;;  %v7815_v3 = vld [vmem:[#allocation6 + $0x2] sm:$0x1]  ;;  %v7848_v32 = vld [vmem:[%s17060_s7] sm:$0xff] }
 0x526   : > { %7814 = vst.msk [vmem:[#allocation7 + $0x7] sm:$0x1] %vm7813_vm2, %v7812_v46  ;;  %v7817_v12 = vld [vmem:[#allocation6 + $0x4] sm:$0x1]  ;;  %v7819_v33 = vld [vmem:[#allocation6 + $0x6] sm:$0x1]  ;;  %v7749_v1 = vmax.f32 %v7729_v14, %v7739_v49  ;;  %v12225_v48 = vpack.c.bf16 %v7849_v24, %v7848_v32 }
 0x527   : > { %v7797_v43 = vmax.f32 %v7777_v21, %v7787_v19  ;;  %7816 = vst.msk [vmem:[#allocation7 + $0x8] sm:$0x1] %vm7813_vm2, %v7815_v3  ;;  %7818 = vst.msk [vmem:[#allocation7 + $0x9] sm:$0x1] %vm7813_vm2, %v7817_v12  ;;  %v7759_v60 = vmax.f32 %v7748_v45, %v7739_v49  ;;  %v10487_v56 = vld [vmem:[%s17060_s7 + $0x20] sm:$0xff]  ;;  %v10488_v39 = vld [vmem:[%s17060_s7 + $0x28] sm:$0xff] }
 0x528   : > { %7820 = vst.msk [vmem:[#allocation7 + $0xa] sm:$0x1] %vm7813_vm2, %v7819_v33  ;;  %v7760_v0 = vmax.f32 %v7749_v1, %v7740_v40  ;;  %v12228_v44 = vpack.c.bf16 %v10488_v39, %v10487_v56  ;;  %v10492_v52 = vld [vmem:[%s17060_s7 + $0x30] sm:$0xff]  ;;  %v10497_v22 = vld [vmem:[%s17060_s7 + $0x40] sm:$0xff]  ;;  %v10498_v62 = vld [vmem:[%s17060_s7 + $0x48] sm:$0xff] }
 0x529   : > { %v7821_v59 = vld [vmem:[#allocation6 + $0x14] sm:$0x1]  ;;  %v7823_v38 = vld [vmem:[#allocation6 + $0x16] sm:$0x1]  ;;  %7807 = vst.msk [vmem:[#allocation6 + $0x28] sm:$0xff] %vm550_vm10, %v7797_v43  ;;  %v7779_v61 = vmax.f32 %v7759_v60, %v7769_v29  ;;  %v12231_v31 = vpack.c.bf16 %v10493_v41, %v10492_v52  ;;  %v12234_v30 = vpack.c.bf16 %v10498_v62, %v10497_v22  ;;  %v10502_v27 = vld [vmem:[%s17060_s7 + $0x50] sm:$0xff] }
 0x52a   : > { %7822 = vst.msk [vmem:[#allocation7 + $0xd] sm:$0x1] %vm7813_vm2, %v7821_v59  ;;  %7824 = vst.msk [vmem:[#allocation7 + $0xe] sm:$0x1] %vm7813_vm2, %v7823_v38  ;;  %v7780_v8 = vmax.f32 %v7760_v0, %v7770_v63  ;;  %v10503_v34 = vld [vmem:[%s17060_s7 + $0x58] sm:$0xff]  ;;  %v10507_v46 = vld [vmem:[%s17060_s7 + $0x60] sm:$0xff] }
 0x52b   : > { %v7799_v11 = vmax.f32 %v7779_v61, %v7789_v5  ;;  %v12237_v21 = vpack.c.bf16 %v10503_v34, %v10502_v27  ;;  %v10508_v45 = vld [vmem:[%s17060_s7 + $0x68] sm:$0xff]  ;;  %v10512_v33 = vld [vmem:[%s17060_s7 + $0x70] sm:$0xff]  ;;  %v10513_v43 = vld [vmem:[%s17060_s7 + $0x78] sm:$0xff] }
 0x52c   : > { %v7825_v6 = vld [vmem:[#allocation6 + $0x18] sm:$0x1]  ;;  %v7827_v54 = vld [vmem:[#allocation6 + $0x1a] sm:$0x1]  ;;  %v7800_v7 = vmax.f32 %v7780_v8, %v7790_v55  ;;  %v12240_v12 = vpack.c.bf16 %v10508_v45, %v10507_v46  ;;  %v12243_v1 = vpack.c.bf16 %v10513_v43, %v10512_v33  ;;  %v10517_v38 = vld [vmem:[%s17060_s7 + $0x80] sm:$0xff] }
 0x52d   : > { %7826 = vst.msk [vmem:[#allocation7 + $0xf] sm:$0x1] %vm7813_vm2, %v7825_v6  ;;  %7828 = vst.msk [vmem:[#allocation7 + $0x10] sm:$0x1] %vm7813_vm2, %v7827_v54  ;;  %v7845_v47 = vld [vmem:[#allocation7] sm:$0xff]  ;;  %v10518_v0 = vld [vmem:[%s17060_s7 + $0x88] sm:$0xff] }
 0x52e   : > { %7809 = vst.msk [vmem:[#allocation6 + $0x38] sm:$0xff] %vm550_vm10, %v7799_v11  ;;  %v7850_v9 = vld [vmem:[#allocation7 + $0x1] sm:$0xff]  ;;  %7810 = vst.msk [vmem:[#allocation6 + $0x40] sm:$0xff] %vm550_vm10, %v7800_v7  ;;  %v12246_v32 = vpack.c.bf16 %v10518_v0, %v10517_v38  ;;  %v10526_v54 = vld [vmem:[%s17063_s10 + $0x30] sm:$0xff] }
 0x52f   : > { %11870 = vmatmul.mubr.msk.f32.vlgmr.msra.gmra.mrb[46].mxu1 %vm550_vm10, %v7850_v9  ;;  %v8034_v42 = vld [vmem:[#allocation7 + $0x2] sm:$0xff]  ;;  %v10527_v11 = vld [vmem:[%s17063_s10 + $0x38] sm:$0xff]  ;;  %v16598_v7 = vmul.u32.u64.low 2863311531, %v17868_v2  ;;  %v16599_v9 = vmul.u32.u64.high 2863311531, %v17868_v2, %v16598_v7 }
 0x530   : > { %12226 = vmatpush3.bf16.msra.mxu1 %v12225_v48  ;;  %11872 = vmatprep.mubr.msk.f32.mxu1 %vm13055_vm5, %v17808_v26  ;;  %v7829_v57 = vld [vmem:[#allocation6 + $0x28] sm:$0x1]  ;;  %v7831_v53 = vld [vmem:[#allocation6 + $0x2a] sm:$0x1]  ;;  %v7833_v15 = vld [vmem:[#allocation6 + $0x2c] sm:$0x1]  ;;  %v12252_v48 = vpack.c.bf16 %v10527_v11, %v10526_v54 }
 0x531   : > { %7830 = vst.msk [vmem:[#allocation7 + $0x13] sm:$0x1] %vm7813_vm2, %v7829_v57  ;;  %7832 = vst.msk [vmem:[#allocation7 + $0x14] sm:$0x1] %vm7813_vm2, %v7831_v53  ;;  %v7835_v36 = vld [vmem:[#allocation6 + $0x2e] sm:$0x1]  ;;  %12227 = vmatprep.subr.bf16.mxu1 %v13054_v37 }
 0x532   : > { %7834 = vst.msk [vmem:[#allocation7 + $0x15] sm:$0x1] %vm7813_vm2, %v7833_v15  ;;  %7836 = vst.msk [vmem:[#allocation7 + $0x16] sm:$0x1] %vm7813_vm2, %v7835_v36  ;;  %v8132_v25 = vld [vmem:[#allocation7 + $0x6] sm:$0xff]  ;;  %v8526_v61 = vld [vmem:[#allocation7 + $0x1d] sm:$0xff] }
 0x533   : > { %v8230_v14 = vld [vmem:[#allocation7 + $0x7] sm:$0xff]  ;;  %v8624_v8 = vld [vmem:[#allocation7 + $0x1e] sm:$0xff]  ;;  %v16602_v57 = vmul.u32.u64.low 2863311531, %v17867_v28  ;;  %v16603_v53 = vmul.u32.u64.high 2863311531, %v17867_v28, %v16602_v57  ;;  %v8749_v15 = vshrl.u32 %v16599_v9, 2 }
 0x534   : > { %v7851_v18 = vld [vmem:[#allocation7 + $0x9] sm:$0xff]  ;;  %v10524_v5 = vld [vmem:[%s17063_s10 + $0x20] sm:$0xff] }
 0x535   : > { %11873 = vmatmul.mubr.msk.f32.gmra.mrb[48].mxu1 %vm550_vm10, %v7851_v18  ;;  %v7837_v17 = vld [vmem:[#allocation6 + $0x3c] sm:$0x1]  ;;  %v7839_v13 = vld [vmem:[#allocation6 + $0x3e] sm:$0x1]  ;;  %v7841_v58 = vld [vmem:[#allocation6 + $0x40] sm:$0x1] }
 0x536   : > { %11875 = vmatprep.mubr.msk.f32.mxu1 %vm13055_vm5, %v17808_v26  ;;  %7838 = vst.msk [vmem:[#allocation7 + $0x19] sm:$0x1] %vm7813_vm2, %v7837_v17  ;;  %7840 = vst.msk [vmem:[#allocation7 + $0x1a] sm:$0x1] %vm7813_vm2, %v7839_v13  ;;  %v7843_v51 = vld [vmem:[#allocation6 + $0x42] sm:$0x1] }
 0x537   : > { %7842 = vst.msk [vmem:[#allocation7 + $0x1b] sm:$0x1] %vm7813_vm2, %v7841_v58  ;;  %7844 = vst.msk [vmem:[#allocation7 + $0x1c] sm:$0x1] %vm7813_vm2, %v7843_v51  ;;  %v7846_v35 = vld [vmem:[#allocation7 + $0x8] sm:$0xff]  ;;  %v8750_v17 = vmul.u32 6, %v8749_v15 }
 0x538   : > { %v8035_v10 = vld [vmem:[#allocation7 + $0xa] sm:$0xff]  ;;  %v16607_v36 = vmul.u32.u64.low 2863311531, %v17870_v50  ;;  %v16608_v18 = vmul.u32.u64.high 2863311531, %v17870_v50, %v16607_v36  ;;  %v8760_v13 = vshrl.u32 %v16603_v53, 2 }
 0x539   : > { %v7852_v20 = vld [vmem:[#allocation7 + $0x11] sm:$0xff]  ;;  %v10525_v6 = vld [vmem:[%s17063_s10 + $0x28] sm:$0xff]  ;;  %v8751_v58 = vsub.s32 %v17868_v2, %v8750_v17  ;;  %v10523_v2 = vld [vmem:[%s17062_s9] ss:$0 sm:$0xff] }
 0x53a   : > { %11876 = vmatmul.mubr.msk.f32.gmra.mrb[50].mxu1 %vm550_vm10, %v7852_v20  ;;  %v7847_v23 = vld [vmem:[#allocation7 + $0x10] sm:$0xff]  ;;  %v12249_v55 = vpack.c.bf16 %v10525_v6, %v10524_v5  ;;  %v8761_v51 = vmul.u32 6, %v8760_v13  ;;  %v8771_v56 = vshrl.u32 %v16608_v18, 2 }
 0x53b   : > { %11882 = vmatprep.mubr.msk.f32.mxu1 %vm13055_vm5, %v17808_v26  ;;  %v8133_v19 = vld [vmem:[#allocation7 + $0xe] sm:$0xff]  ;;  %vm8779_vm12 = vcmp.lt.s32.totalorder %v8751_v58, 0 }
 0x53c   : > { %v8231_v49 = vld [vmem:[#allocation7 + $0xf] sm:$0xff]  ;;  %v8762_v39 = vsub.s32 %v17867_v28, %v8761_v51  ;;  %v8772_v20 = vmul.u32 6, %v8771_v56 }
 0x53d   : > { %v8036_v4 = vld [vmem:[#allocation7 + $0x12] sm:$0xff] }
 0x53e   : > { %11883 = vmatmul.mubr.msk.f32.vlgmr.msra.gmra.mrb[46].mxu1 %vm550_vm10, %v7845_v47  ;;  %v8134_v16 = vld [vmem:[#allocation7 + $0x16] sm:$0xff]  ;;  %v8426_v60 = vld [vmem:[#allocation7 + $0xc] sm:$0xff]  ;;  %v10522_v47 = vld [vmem:[%s17061_s8] ss:$0 sm:$0xff]  ;;  %vm8777_vm13 = vcmp.ne.s32.totalorder %v8762_v39, 0  ;;  %vm8780_vm15 = vcmp.lt.s32.totalorder %v8762_v39, 0 }
 0x53f   : > { %12229 = vmatpush3.bf16.msra.mxu1 %v12228_v44  ;;  %11885 = vmatprep.mubr.msk.f32.mxu1 %vm13055_vm5, %v17808_v26  ;;  %v8232_v3 = vld [vmem:[#allocation7 + $0x17] sm:$0xff]  ;;  %v8524_v24 = vld [vmem:[#allocation7 + $0xd] sm:$0xff]  ;;  %v8785_v44 = vadd.s32 6, %v8751_v58  ;;  %v8786_v28 = vadd.s32 6, %v8762_v39  ;;  %vm8783_vm9 = vmand %vm8780_vm15, %vm8777_vm13 }
 0x540   : > { %12230 = vmatprep.subr.bf16.mxu1 %v13054_v37  ;;  %v8330_v40 = vld [vmem:[#allocation7 + $0x18] sm:$0xff] }
 0x541   : > { %v8427_v59 = vld [vmem:[#allocation7 + $0x14] sm:$0xff]  ;;  %v8428_v29 = vld [vmem:[#allocation7 + $0x1c] sm:$0xff] }
 0x542   : > { %11886 = vmatmul.mubr.msk.f32.gmra.mrb[48].mxu1 %vm550_vm10, %v7846_v35  ;;  %v8525_v63 = vld [vmem:[#allocation7 + $0x15] sm:$0xff] }
 0x543   : > { %11888 = vmatprep.mubr.msk.f32.mxu1 %vm13055_vm5, %v17808_v26 }
 0x546   : > { %11889 = vmatmul.mubr.msk.f32.gmra.mrb[50].mxu1 %vm550_vm10, %v7847_v23 }
 0x547   : > { %11895 = vmatprep.mubr.msk.f32.mxu1 %vm13055_vm5, %v17808_v26 }
 0x54a   : > { %11896 = vmatmul.mubr.msk.f32.vlgmr.msra.gmra.mrb[46].mxu1 %vm550_vm10, %v8034_v42 }
 0x54b   : > { %12232 = vmatpush3.bf16.msra.mxu1 %v12231_v31  ;;  %11898 = vmatprep.mubr.msk.f32.mxu1 %vm13055_vm5, %v17808_v26 }
 0x54c   : > { %12233 = vmatprep.subr.bf16.mxu1 %v13054_v37 }
 0x54e   : > { %11899 = vmatmul.mubr.msk.f32.gmra.mrb[48].mxu1 %vm550_vm10, %v8035_v10 }
 0x54f   : > { %11901 = vmatprep.mubr.msk.f32.mxu1 %vm13055_vm5, %v17808_v26 }
 0x552   : > { %11902 = vmatmul.mubr.msk.f32.gmra.mrb[50].mxu1 %vm550_vm10, %v8036_v4  ;;  %v8789_v4 = vsel %vm8783_vm9, %v8786_v28, %v8762_v39  ;;  %v10530_v28 = vld [vmem:[%s17063_s10 + $0x40] sm:$0xff] }
 0x553   : > { %11908 = vmatprep.mubr.msk.f32.mxu1 %vm13055_vm5, %v17808_v26  ;;  %vm8792_vm8 = vcmp.lt.s32.totalorder %v8789_v4, 4 }
 0x556   : > { %11909 = vmatmul.mubr.msk.f32.vlgmr.msra.gmra.mrb[46].mxu1 %vm550_vm10, %v8132_v25 }
 0x557   : > { %12235 = vmatpush3.bf16.msra.mxu1 %v12234_v30  ;;  %11911 = vmatprep.mubr.msk.f32.mxu1 %vm13055_vm5, %v17808_v26 }
 0x558   : > { %12236 = vmatprep.subr.bf16.mxu1 %v13054_v37 }
 0x55a   : > { %11912 = vmatmul.mubr.msk.f32.gmra.mrb[48].mxu1 %vm550_vm10, %v8133_v19 }
 0x55b   : > { %11914 = vmatprep.mubr.msk.f32.mxu1 %vm13055_vm5, %v17808_v26 }
 0x55e   : > { %11915 = vmatmul.mubr.msk.f32.gmra.mrb[50].mxu1 %vm550_vm10, %v8134_v16 }
 0x55f   : > { %11921 = vmatprep.mubr.msk.f32.mxu1 %vm13055_vm5, %v17808_v26 }
 0x562   : > { %11922 = vmatmul.mubr.msk.f32.vlgmr.msra.gmra.mrb[46].mxu1 %vm550_vm10, %v8230_v14 }
 0x563   : > { %12238 = vmatpush3.bf16.msra.mxu1 %v12237_v21  ;;  %11924 = vmatprep.mubr.msk.f32.mxu1 %vm13055_vm5, %v17808_v26 }
 0x564   : > { %12239 = vmatprep.subr.bf16.mxu1 %v13054_v37 }
 0x566   : > { %11925 = vmatmul.mubr.msk.f32.gmra.mrb[48].mxu1 %vm550_vm10, %v8231_v49 }
 0x567   : > { %11927 = vmatprep.mubr.msk.f32.mxu1 %vm13055_vm5, %v17808_v26 }
 0x56a   : > { %11928 = vmatmul.mubr.msk.f32.gmra.mrb[50].mxu1 %vm550_vm10, %v8232_v3 }
 0x56b   : > { %11934 = vmatprep.mubr.msk.f32.mxu1 %vm13055_vm5, %v17808_v26 }
 0x56e   : > { %11935 = vmatmul.mubr.msk.f32.vlgmr.msra.gmra.mrb[46].mxu1 %vm550_vm10, %v7846_v35  ;;  %v8773_v35 = vsub.s32 %v17870_v50, %v8772_v20  ;;  %v8860_v20 = vld [vmem:[%s17063_s10] sm:$0xff] }
 0x56f   : > { %12241 = vmatpush3.bf16.msra.mxu1 %v12240_v12  ;;  %11937 = vmatprep.mubr.msk.f32.mxu1 %vm13055_vm5, %v17808_v26 }
 0x570   : > { %12242 = vmatprep.subr.bf16.mxu1 %v13054_v37  ;;  %vm8778_vm4 = vcmp.ne.s32.totalorder %v8773_v35, 0  ;;  %vm8781_vm3 = vcmp.lt.s32.totalorder %v8773_v35, 0  ;;  %v8787_v50 = vadd.s32 6, %v8773_v35 }
 0x571   : > { %vm8784_vm1 = vmand %vm8781_vm3, %vm8778_vm4 }
 0x572   : > { %11938 = vmatmul.mubr.msk.f32.gmra.mrb[48].mxu1 %vm550_vm10, %v7847_v23  ;;  %v8790_v21 = vsel %vm8784_vm1, %v8787_v50, %v8773_v35  ;;  %v10535_v50 = vld [vmem:[%s17063_s10 + $0x60] sm:$0xff] }
 0x573   : > { %11940 = vmatprep.mubr.msk.f32.mxu1 %vm13055_vm5, %v17808_v26  ;;  %vm8793_vm14 = vcmp.lt.s32.totalorder %v8790_v21, 4 }
 0x576   : > { %11941 = vmatmul.mubr.msk.f32.gmra.mrb[50].mxu1 %vm550_vm10, %v8330_v40 }
 0x577   : > { %11947 = vmatprep.mubr.msk.f32.mxu1 %vm13055_vm5, %v17808_v26 }
 0x57a   : > { %11948 = vmatmul.mubr.msk.f32.vlgmr.msra.gmra.mrb[46].mxu1 %vm550_vm10, %v8426_v60 }
 0x57b   : > { %12244 = vmatpush3.bf16.msra.mxu1 %v12243_v1  ;;  %11950 = vmatprep.mubr.msk.f32.mxu1 %vm13055_vm5, %v17808_v26 }
 0x57c   : > { %12245 = vmatprep.subr.bf16.mxu1 %v13054_v37 }
 0x57e   : > { %11951 = vmatmul.mubr.msk.f32.gmra.mrb[48].mxu1 %vm550_vm10, %v8427_v59 }
 0x57f   : > { %11953 = vmatprep.mubr.msk.f32.mxu1 %vm13055_vm5, %v17808_v26 }
 0x582   : > { %11954 = vmatmul.mubr.msk.f32.gmra.mrb[50].mxu1 %vm550_vm10, %v8428_v29 }
 0x583   : > { %11960 = vmatprep.mubr.msk.f32.mxu1 %vm13055_vm5, %v17808_v26 }
 0x586   : > { %11961 = vmatmul.mubr.msk.f32.vlgmr.msra.gmra.mrb[46].mxu1 %vm550_vm10, %v8524_v24 }
 0x587   : > { %12247 = vmatpush3.bf16.msra.mxu1 %v12246_v32  ;;  %11963 = vmatprep.mubr.msk.f32.mxu1 %vm13055_vm5, %v17808_v26 }
 0x588   : > { %12248 = vmatprep.subr.bf16.mxu1 %v13054_v37 }
 0x58a   : > { %11964 = vmatmul.mubr.msk.f32.gmra.mrb[48].mxu1 %vm550_vm10, %v8525_v63 }
 0x58b   : > { %11966 = vmatprep.mubr.msk.f32.mxu1 %vm13055_vm5, %v17808_v26 }
 0x58e   : > { %11967 = vmatmul.mubr.msk.f32.gmra.mrb[50].mxu1 %vm550_vm10, %v8526_v61 }
 0x58f   : > { %11973 = vmatprep.mubr.msk.f32.mxu1 %vm13055_vm5, %v17808_v26 }
 0x592   : > { %11974 = vmatmul.mubr.msk.f32.vlgmr.msra.gmra.mrb[46].mxu1 %vm550_vm10, %v8133_v19 }
 0x593   : > { %11976 = vmatprep.mubr.msk.f32.mxu1 %vm13055_vm5, %v17808_v26  ;;  %12250 = vmatpush3.bf16.msra.mxu1 %v12249_v55 }
 0x594   : > { %12251 = vmatprep.subr.bf16.mxu1 %v13054_v37 }
 0x596   : > { %11977 = vmatmul.mubr.msk.f32.gmra.mrb[48].mxu1 %vm550_vm10, %v8134_v16 }
 0x597   : > { %11979 = vmatprep.mubr.msk.f32.mxu1 %vm13055_vm5, %v17808_v26  ;;  %12253 = vmatpush3.bf16.msra.mxu1 %v12252_v48 }
 0x598   : > { %12254 = vmatprep.subr.bf16.mxu1 %v13054_v37 }
 0x59a   : > { %11980 = vmatmul.mubr.msk.f32.gmra.mrb[50].mxu1 %vm550_vm10, %v8624_v8  ;;  %vm8776_vm10 = vcmp.ne.s32.totalorder %v8751_v58, 0 }
 0x59b   : > { %11990 = vmatprep.mubr.msk.f32.mxu1 %vm13055_vm5, %v17808_v26  ;;  %vm8782_vm11 = vmand %vm8779_vm12, %vm8776_vm10 }
 0x59c   : > { %v8788_v23 = vsel %vm8782_vm11, %v8785_v44, %v8751_v58  ;;  %v8861_v44 = vld [vmem:[%s17063_s10 + $0x8] sm:$0xff] }
 0x59d   : > { %vm8791_vm7 = vcmp.lt.s32.totalorder %v8788_v23, 4 }
 0x665   : > { %v8703_v52 = vpop.f32.mrb[46].mxu1 }
 0x666   : > { %v8727_v41 = vmul.f32 %v10522_v47, %v8703_v52  ;;  %v11975_v31 = vpop.f32.mrb[47].mxu1  ;;  %v12255_v52 = vpack.c.bf16 %v8861_v44, %v8860_v20  ;;  %v9599_v20 = vld [vmem:[%s17066_s13 + $0x18] sm:$0xff] }
 0x668   : > { %v8737_v42 = vadd.f32 %v10523_v2, %v8727_v41  ;;  %v8863_v41 = vld [vmem:[%s17063_s10 + $0x18] sm:$0xff] }
 0x669   : > { %v8708_v10 = vpop.f32.mrb[48].mxu1 }
 0x66a   : > { %v8740_v22 = vmax.f32 %v8737_v42, 0.0  ;;  %v8728_v62 = vmul.f32 %v10522_v47, %v8708_v10  ;;  %v11978_v30 = vpop.f32.mrb[49].mxu1  ;;  %v10531_v42 = vld [vmem:[%s17063_s10 + $0x48] sm:$0xff] }
 0x66b   : > { %v12261_v10 = vpack.c.bf16 %v10531_v42, %v10530_v28  ;;  %v9604_v28 = vld [vmem:[%s17066_s13 + $0x40] sm:$0xff]  ;;  %v9605_v42 = vld [vmem:[%s17066_s13 + $0x48] sm:$0xff] }
 0x66c   : > { %v8794_v25 = vsel %vm8791_vm7, %v8740_v22, -3.4028235e+38  ;;  %v8738_v19 = vadd.f32 %v10523_v2, %v8728_v62  ;;  %v10532_v22 = vld [vmem:[%s17063_s10 + $0x50] sm:$0xff]  ;;  %v10533_v62 = vld [vmem:[%s17063_s10 + $0x58] sm:$0xff] }
 0x66d   : > { %8797 = vst.msk [vmem:[#allocation8 + $0x7] sm:$0xff] %vm572_vm0, %v8794_v25  ;;  %v8713_v27 = vpop.f32.mrb[50].mxu1  ;;  %v12264_v30 = vpack.c.bf16 %v10533_v62, %v10532_v22  ;;  %v10536_v25 = vld [vmem:[%s17063_s10 + $0x68] sm:$0xff]  ;;  %v9606_v22 = vld [vmem:[%s17066_s13 + $0x50] sm:$0xff]  ;;  %v9607_v62 = vld [vmem:[%s17066_s13 + $0x58] sm:$0xff] }
 0x66e   : > { %v8741_v34 = vmax.f32 %v8738_v19, 0.0  ;;  %v8729_v16 = vmul.f32 %v10522_v47, %v8713_v27  ;;  %v11981_v14 = vpop.f32.mrb[51].mxu1  ;;  %v12267_v19 = vpack.c.bf16 %v10536_v25, %v10535_v50  ;;  %v10537_v27 = vld [vmem:[%s17063_s10 + $0x70] sm:$0xff]  ;;  %v9609_v50 = vld [vmem:[%s17066_s13 + $0x68] sm:$0xff] }
 0x66f   : > { %v10540_v14 = vld [vmem:[%s17063_s10 + $0x80] sm:$0xff] }
 0x670   : > { %v8795_v49 = vsel %vm8792_vm8, %v8741_v34, -3.4028235e+38  ;;  %v8739_v46 = vadd.f32 %v10523_v2, %v8729_v16  ;;  %v8862_v2 = vld [vmem:[%s17063_s10 + $0x10] sm:$0xff]  ;;  %v10538_v34 = vld [vmem:[%s17063_s10 + $0x78] sm:$0xff] }
 0x671   : > { %8798 = vst.msk [vmem:[#allocation8 + $0xf] sm:$0xff] %vm572_vm0, %v8795_v49  ;;  %v12258_v31 = vpack.c.bf16 %v8863_v41, %v8862_v2  ;;  %v12270_v21 = vpack.c.bf16 %v10538_v34, %v10537_v27  ;;  %v10541_v49 = vld [vmem:[%s17063_s10 + $0x88] sm:$0xff]  ;;  %v9602_v41 = vld [vmem:[%s17066_s13 + $0x30] sm:$0xff]  ;;  %v9611_v27 = vld [vmem:[%s17066_s13 + $0x78] sm:$0xff] }
 0x672   : > { %v8742_v45 = vmax.f32 %v8739_v46, 0.0  ;;  %v12273_v46 = vpack.c.bf16 %v10541_v49, %v10540_v14  ;;  %v10566_v14 = vld [vmem:[%s17065_s12] ss:$0 sm:$0xff] }
 0x674   : > { %v8800_v3 = vld [vmem:[#allocation8] sm:$0xff]  ;;  %v8796_v33 = vsel %vm8793_vm14, %v8742_v45, -3.4028235e+38 }
 0x675   : > { %v8803_v12 = vld [vmem:[#allocation8 + $0x1] sm:$0xff]  ;;  %8799 = vst.msk [vmem:[#allocation8 + $0x17] sm:$0xff] %vm572_vm0, %v8796_v33 }
 0x676   : > { %v8806_v43 = vmax.f32 %v8800_v3, %v8803_v12  ;;  %v8809_v40 = vld [vmem:[#allocation8 + $0x2] sm:$0xff] }
 0x677   : > { %v8815_v60 = vld [vmem:[#allocation8 + $0x6] sm:$0xff] }
 0x678   : > { %v8812_v1 = vmax.f32 %v8806_v43, %v8809_v40  ;;  %v8801_v59 = vld [vmem:[#allocation8 + $0x8] sm:$0xff]  ;;  %v10542_v45 = vld [vmem:[%s17063_s10 + $0x90] sm:$0xff]  ;;  %v10545_v43 = vld [vmem:[%s17063_s10 + $0xa0] sm:$0xff] }
 0x679   : > { %v8804_v38 = vld [vmem:[#allocation8 + $0x9] sm:$0xff]  ;;  %v10546_v40 = vld [vmem:[%s17063_s10 + $0xa8] sm:$0xff] }
 0x67a   : > { %v8818_v0 = vmax.f32 %v8812_v1, %v8815_v60  ;;  %v8807_v29 = vmax.f32 %v8801_v59, %v8804_v38  ;;  %v8821_v32 = vld [vmem:[#allocation8 + $0x7] sm:$0xff]  ;;  %v8822_v55 = vld [vmem:[#allocation8 + $0xf] sm:$0xff]  ;;  %v12279_v1 = vpack.c.bf16 %v10546_v40, %v10545_v43 }
 0x67b   : > { %v8810_v24 = vld [vmem:[#allocation8 + $0xa] sm:$0xff]  ;;  %v10547_v60 = vld [vmem:[%s17063_s10 + $0xb0] sm:$0xff] }
 0x67c   : > { %v8824_v63 = vmax.f32 %v8818_v0, %v8821_v32  ;;  %v8813_v61 = vmax.f32 %v8807_v29, %v8810_v24  ;;  %v8816_v8 = vld [vmem:[#allocation8 + $0xe] sm:$0xff]  ;;  %v8817_v57 = vld [vmem:[#allocation8 + $0x16] sm:$0xff]  ;;  %v10569_v40 = vld [vmem:[%s17066_s13 + $0x90] sm:$0xff] }
 0x67d   : > { %v8802_v5 = vld [vmem:[#allocation8 + $0x10] sm:$0xff]  ;;  %v10543_v3 = vld [vmem:[%s17063_s10 + $0x98] sm:$0xff]  ;;  %v10551_v32 = vld [vmem:[%s17063_s10 + $0xc8] sm:$0xff] }
 0x67e   : > { %v8819_v6 = vmax.f32 %v8813_v61, %v8816_v8  ;;  %v8828_v54 = vmax.f32 %v8824_v63, %v8801_v59  ;;  %v8831_v11 = vld [vmem:[#allocation8 + $0xc] sm:$0xff]  ;;  %v8832_v36 = vld [vmem:[#allocation8 + $0x14] sm:$0xff]  ;;  %v12276_v33 = vpack.c.bf16 %v10543_v3, %v10542_v45  ;;  %v10552_v63 = vld [vmem:[%s17063_s10 + $0xd0] sm:$0xff] }
 0x67f   : > { %v8837_v9 = vld [vmem:[#allocation8 + $0xd] sm:$0xff]  ;;  %v8838_v13 = vld [vmem:[#allocation8 + $0x15] sm:$0xff] }
 0x680   : > { %v8825_v48 = vmax.f32 %v8819_v6, %v8822_v55  ;;  %v8834_v7 = vmax.f32 %v8828_v54, %v8831_v11  ;;  %v10548_v59 = vld [vmem:[%s17063_s10 + $0xb8] sm:$0xff]  ;;  %v10550_v29 = vld [vmem:[%s17063_s10 + $0xc0] sm:$0xff]  ;;  %v10556_v54 = vld [vmem:[%s17063_s10 + $0xe8] sm:$0xff] }
 0x681   : > { %v12282_v0 = vpack.c.bf16 %v10548_v59, %v10547_v60  ;;  %v12285_v24 = vpack.c.bf16 %v10551_v32, %v10550_v29  ;;  %v10553_v61 = vld [vmem:[%s17063_s10 + $0xd8] sm:$0xff]  ;;  %v10555_v6 = vld [vmem:[%s17063_s10 + $0xe0] sm:$0xff]  ;;  %v10557_v11 = vld [vmem:[%s17063_s10 + $0xf0] sm:$0xff] }
 0x682   : > { %v8840_v53 = vmax.f32 %v8834_v7, %v8837_v9  ;;  %v8829_v15 = vmax.f32 %v8825_v48, %v8802_v5  ;;  %v12288_v5 = vpack.c.bf16 %v10553_v61, %v10552_v63  ;;  %v12291_v55 = vpack.c.bf16 %v10556_v54, %v10555_v6  ;;  %v10558_v48 = vld [vmem:[%s17063_s10 + $0xf8] sm:$0xff]  ;;  %v10573_v32 = vld [vmem:[%s17066_s13 + $0xb0] sm:$0xff]  ;;  %v10575_v61 = vld [vmem:[%s17066_s13 + $0xc0] sm:$0xff] }
 0x683   : > { %v12294_v9 = vpack.c.bf16 %v10558_v48, %v10557_v11  ;;  %v10577_v6 = vld [vmem:[%s17066_s13 + $0xd0] sm:$0xff]  ;;  %v10578_v54 = vld [vmem:[%s17066_s13 + $0xd8] sm:$0xff]  ;;  %v10579_v11 = vld [vmem:[%s17066_s13 + $0xe0] sm:$0xff] }
 0x684   : > { %v8844_v18 = vmax.f32 %v8840_v53, %v8816_v8  ;;  %v8835_v17 = vmax.f32 %v8829_v15, %v8832_v36  ;;  %v10561_v53 = vld [vmem:[%s17063_s10 + $0x108] sm:$0xff]  ;;  %v10562_v36 = vld [vmem:[%s17063_s10 + $0x110] sm:$0xff] }
 0x685   : > { %v10580_v48 = vld [vmem:[%s17066_s13 + $0xe8] sm:$0xff] }
 0x686   : > { %8847 = vst.msk [vmem:[#allocation9] sm:$0xff] %vm572_vm0, %v8844_v18  ;;  %v8841_v58 = vmax.f32 %v8835_v17, %v8838_v13  ;;  %v10563_v18 = vld [vmem:[%s17063_s10 + $0x118] sm:$0xff] }
 0x687   : > { %v12300_v13 = vpack.c.bf16 %v10563_v18, %v10562_v36  ;;  %v10584_v36 = vld [vmem:[%s17066_s13 + $0x108] sm:$0xff] }
 0x688   : > { %v8845_v51 = vmax.f32 %v8841_v58, %v8817_v57  ;;  %v10560_v57 = vld [vmem:[%s17063_s10 + $0x100] sm:$0xff] }
 0x689   : > { %v12297_v15 = vpack.c.bf16 %v10561_v53, %v10560_v57  ;;  %v9596_v58 = vld [vmem:[%s17066_s13] sm:$0xff]  ;;  %v10582_v57 = vld [vmem:[%s17066_s13 + $0xf8] sm:$0xff] }
 0x68a   : > { %8848 = vst.msk [vmem:[#allocation9 + $0x8] sm:$0xff] %vm572_vm0, %v8845_v51  ;;  %v9597_v51 = vld [vmem:[%s17066_s13 + $0x8] sm:$0xff] }
 0x68d   : > { %v8850_v56 = vld [vmem:[#allocation9] sm:$0x1]  ;;  %v8853_v39 = vld [vmem:[#allocation9 + $0x2] sm:$0x1] }
 0x68e   : > { %8852 = vst.msk [vmem:[#allocation10 + $0x5] sm:$0x1] %vm8851_vm6, %v8850_v56  ;;  %8854 = vst.msk [vmem:[#allocation10 + $0x6] sm:$0x1] %vm8851_vm6, %v8853_v39  ;;  %v12303_v56 = vpack.c.bf16 %v9597_v51, %v9596_v58  ;;  %v9598_v39 = vld [vmem:[%s17066_s13 + $0x10] sm:$0xff] }
 0x691   : > { %v8855_v47 = vld [vmem:[#allocation9 + $0xc] sm:$0x1]  ;;  %v8857_v35 = vld [vmem:[#allocation9 + $0xe] sm:$0x1] }
 0x692   : > { %8856 = vst.msk [vmem:[#allocation10 + $0x9] sm:$0x1] %vm8851_vm6, %v8855_v47  ;;  %8858 = vst.msk [vmem:[#allocation10 + $0xa] sm:$0x1] %vm8851_vm6, %v8857_v35  ;;  %v12306_v47 = vpack.c.bf16 %v9599_v20, %v9598_v39  ;;  %v9600_v35 = vld [vmem:[%s17066_s13 + $0x20] sm:$0xff]  ;;  %v10588_v39 = vld [vmem:[%s17066_s13 + $0x128] sm:$0xff] }
 0x695   : > { %v8864_v23 = vld [vmem:[#allocation10 + $0x1] sm:$0xff] }
 0x696   : > { %11991 = vmatmul.mubr.msk.f32.vlgmr.msra.gmra.mrb[52].mxu1 %vm572_vm0, %v8864_v23  ;;  %v8859_v4 = vld [vmem:[#allocation10] sm:$0xff] }
 0x697   : > { %12256 = vmatpush3.bf16.msra.mxu1 %v12255_v52  ;;  %12001 = vmatprep.mubr.msk.f32.mxu1 %vm13055_vm5, %v17808_v26  ;;  %v9601_v52 = vld [vmem:[%s17066_s13 + $0x28] sm:$0xff]  ;;  %v9603_v23 = vld [vmem:[%s17066_s13 + $0x38] sm:$0xff] }
 0x698   : > { %12257 = vmatprep.subr.bf16.mxu1 %v13054_v37  ;;  %v12309_v2 = vpack.c.bf16 %v9601_v52, %v9600_v35  ;;  %v10591_v52 = vld [vmem:[%s17066_s13 + $0x140] sm:$0xff] }
 0x699   : > { %v9016_v16 = vld [vmem:[#allocation10 + $0x2] sm:$0xff]  ;;  %v9496_v44 = vld [vmem:[#allocation10 + $0xa] sm:$0xff] }
 0x69a   : > { %v9096_v12 = vld [vmem:[#allocation10 + $0x4] sm:$0xff] }
 0x69b   : > { %12259 = vmatpush3.bf16.msra.mxu1 %v12258_v31  ;;  %v9176_v38 = vld [vmem:[#allocation10 + $0x5] sm:$0xff]  ;;  %v12312_v31 = vpack.c.bf16 %v9603_v23, %v9602_v41  ;;  %v10593_v23 = vld [vmem:[%s17066_s13 + $0x150] sm:$0xff] }
 0x69c   : > { %12260 = vmatprep.subr.bf16.mxu1 %v13054_v37  ;;  %v9256_v8 = vld [vmem:[#allocation10 + $0x6] sm:$0xff] }
 0x69d   : > { %v9336_v7 = vld [vmem:[#allocation10 + $0x8] sm:$0xff] }
 0x69e   : > { %12002 = vmatmul.mubr.msk.f32.vlgmr.msra.gmra.mrb[52].mxu1 %vm572_vm0, %v8859_v4  ;;  %v9416_v17 = vld [vmem:[#allocation10 + $0x9] sm:$0xff] }
 0x69f   : > { %12262 = vmatpush3.bf16.msra.mxu1 %v12261_v10  ;;  %12012 = vmatprep.mubr.msk.f32.mxu1 %vm13055_vm5, %v17808_v26  ;;  %v12315_v10 = vpack.c.bf16 %v9605_v42, %v9604_v28  ;;  %v9608_v4 = vld [vmem:[%s17066_s13 + $0x60] sm:$0xff] }
 0x6a0   : > { %12263 = vmatprep.subr.bf16.mxu1 %v13054_v37  ;;  %v12321_v25 = vpack.c.bf16 %v9609_v50, %v9608_v4  ;;  %v10595_v42 = vld [vmem:[%s17066_s13 + $0x160] sm:$0xff]  ;;  %v10598_v4 = vld [vmem:[%s17066_s13 + $0x178] sm:$0xff] }
 0x6a1   : > { %v10599_v50 = vld [vmem:[%s17066_s13 + $0x180] sm:$0xff] }
 0x6a3   : > { %12265 = vmatpush3.bf16.msra.mxu1 %v12264_v30  ;;  %v12318_v30 = vpack.c.bf16 %v9607_v62, %v9606_v22  ;;  %v10597_v62 = vld [vmem:[%s17066_s13 + $0x170] sm:$0xff] }
 0x6a4   : > { %12266 = vmatprep.subr.bf16.mxu1 %v13054_v37 }
 0x6a6   : > { %12013 = vmatmul.mubr.msk.f32.vlgmr.msra.gmra.mrb[52].mxu1 %vm572_vm0, %v9016_v16  ;;  %v10565_v16 = vld [vmem:[%s17064_s11] ss:$0 sm:$0xff] }
 0x6a7   : > { %12268 = vmatpush3.bf16.msra.mxu1 %v12267_v19  ;;  %12023 = vmatprep.mubr.msk.f32.mxu1 %vm13055_vm5, %v17808_v26  ;;  %v9610_v19 = vld [vmem:[%s17066_s13 + $0x70] sm:$0xff] }
 0x6a8   : > { %12269 = vmatprep.subr.bf16.mxu1 %v13054_v37  ;;  %v12324_v34 = vpack.c.bf16 %v9611_v27, %v9610_v19  ;;  %v10601_v27 = vld [vmem:[%s17066_s13 + $0x190] sm:$0xff] }
 0x6ab   : > { %12271 = vmatpush3.bf16.msra.mxu1 %v12270_v21 }
 0x6ac   : > { %12272 = vmatprep.subr.bf16.mxu1 %v13054_v37 }
 0x6ae   : > { %12024 = vmatmul.mubr.msk.f32.vlgmr.msra.gmra.mrb[52].mxu1 %vm572_vm0, %v9096_v12  ;;  %v10567_v12 = vld [vmem:[%s17066_s13 + $0x80] sm:$0xff] }
 0x6af   : > { %12274 = vmatpush3.bf16.msra.mxu1 %v12273_v46  ;;  %12034 = vmatprep.mubr.msk.f32.mxu1 %vm13055_vm5, %v17808_v26 }
 0x6b0   : > { %12275 = vmatprep.subr.bf16.mxu1 %v13054_v37 }
 0x6b3   : > { %12277 = vmatpush3.bf16.msra.mxu1 %v12276_v33  ;;  %v10568_v33 = vld [vmem:[%s17066_s13 + $0x88] sm:$0xff] }
 0x6b4   : > { %12278 = vmatprep.subr.bf16.mxu1 %v13054_v37  ;;  %v12327_v43 = vpack.c.bf16 %v10568_v33, %v10567_v12  ;;  %v10607_v12 = vld [vmem:[%s17066_s13 + $0x1c0] sm:$0xff]  ;;  %v10608_v33 = vld [vmem:[%s17066_s13 + $0x1c8] sm:$0xff] }
 0x6b6   : > { %12035 = vmatmul.mubr.msk.f32.vlgmr.msra.gmra.mrb[52].mxu1 %vm572_vm0, %v9176_v38  ;;  %v10571_v38 = vld [vmem:[%s17066_s13 + $0xa0] sm:$0xff] }
 0x6b7   : > { %12280 = vmatpush3.bf16.msra.mxu1 %v12279_v1  ;;  %12045 = vmatprep.mubr.msk.f32.mxu1 %vm13055_vm5, %v17808_v26  ;;  %v10570_v1 = vld [vmem:[%s17066_s13 + $0x98] sm:$0xff] }
 0x6b8   : > { %12281 = vmatprep.subr.bf16.mxu1 %v13054_v37  ;;  %v12330_v59 = vpack.c.bf16 %v10570_v1, %v10569_v40  ;;  %v10609_v40 = vld [vmem:[%s17066_s13 + $0x1d0] sm:$0xff]  ;;  %v10610_v1 = vld [vmem:[%s17066_s13 + $0x1d8] sm:$0xff] }
 0x6bb   : > { %12283 = vmatpush3.bf16.msra.mxu1 %v12282_v0  ;;  %v10572_v0 = vld [vmem:[%s17066_s13 + $0xa8] sm:$0xff] }
 0x6bc   : > { %12284 = vmatprep.subr.bf16.mxu1 %v13054_v37  ;;  %v12333_v29 = vpack.c.bf16 %v10572_v0, %v10571_v38  ;;  %v10612_v38 = vld [vmem:[%s17066_s13 + $0x1e8] sm:$0xff] }
 0x6be   : > { %12046 = vmatmul.mubr.msk.f32.vlgmr.msra.gmra.mrb[52].mxu1 %vm572_vm0, %v9256_v8  ;;  %v10576_v8 = vld [vmem:[%s17066_s13 + $0xc8] sm:$0xff] }
 0x6bf   : > { %12286 = vmatpush3.bf16.msra.mxu1 %v12285_v24  ;;  %12056 = vmatprep.mubr.msk.f32.mxu1 %vm13055_vm5, %v17808_v26  ;;  %v10574_v24 = vld [vmem:[%s17066_s13 + $0xb8] sm:$0xff] }
 0x6c0   : > { %12287 = vmatprep.subr.bf16.mxu1 %v13054_v37  ;;  %v12336_v63 = vpack.c.bf16 %v10574_v24, %v10573_v32  ;;  %v10614_v32 = vld [vmem:[%s17066_s13 + $0x1f8] sm:$0xff] }
 0x6c3   : > { %12289 = vmatpush3.bf16.msra.mxu1 %v12288_v5  ;;  %v12339_v5 = vpack.c.bf16 %v10576_v8, %v10575_v61  ;;  %v9594_v61 = vld [vmem:[%s17067_s14] sm:$0x1] }
 0x6c4   : > { %12290 = vmatprep.subr.bf16.mxu1 %v13054_v37 }
 0x6c6   : > { %12057 = vmatmul.mubr.msk.f32.vlgmr.msra.gmra.mrb[52].mxu1 %vm572_vm0, %v9336_v7  ;;  %v12345_v7 = vpack.c.bf16 %v10580_v48, %v10579_v11 }
 0x6c7   : > { %12292 = vmatpush3.bf16.msra.mxu1 %v12291_v55  ;;  %12067 = vmatprep.mubr.msk.f32.mxu1 %vm13055_vm5, %v17808_v26  ;;  %v12342_v55 = vpack.c.bf16 %v10578_v54, %v10577_v6 }
 0x6c8   : > { %12293 = vmatprep.subr.bf16.mxu1 %v13054_v37 }
 0x6cb   : > { %12295 = vmatpush3.bf16.msra.mxu1 %v12294_v9  ;;  %v10581_v9 = vld [vmem:[%s17066_s13 + $0xf0] sm:$0xff] }
 0x6cc   : > { %12296 = vmatprep.subr.bf16.mxu1 %v13054_v37  ;;  %v12348_v53 = vpack.c.bf16 %v10582_v57, %v10581_v9 }
 0x6ce   : > { %12068 = vmatmul.mubr.msk.f32.vlgmr.msra.gmra.mrb[52].mxu1 %vm572_vm0, %v9416_v17  ;;  %v10585_v17 = vld [vmem:[%s17066_s13 + $0x110] sm:$0xff] }
 0x6cf   : > { %12298 = vmatpush3.bf16.msra.mxu1 %v12297_v15  ;;  %12078 = vmatprep.mubr.msk.f32.mxu1 %vm13055_vm5, %v17808_v26  ;;  %v10583_v15 = vld [vmem:[%s17066_s13 + $0x100] sm:$0xff] }
 0x6d0   : > { %12299 = vmatprep.subr.bf16.mxu1 %v13054_v37  ;;  %v12351_v18 = vpack.c.bf16 %v10584_v36, %v10583_v15 }
 0x6d3   : > { %12301 = vmatpush3.bf16.msra.mxu1 %v12300_v13  ;;  %v10586_v13 = vld [vmem:[%s17066_s13 + $0x118] sm:$0xff] }
 0x6d4   : > { %12302 = vmatprep.subr.bf16.mxu1 %v13054_v37  ;;  %v12354_v51 = vpack.c.bf16 %v10586_v13, %v10585_v17 }
 0x6d6   : > { %12079 = vmatmul.mubr.msk.f32.vlgmr.msra.gmra.mrb[52].mxu1 %vm572_vm0, %v9496_v44  ;;  %v10589_v44 = vld [vmem:[%s17066_s13 + $0x130] sm:$0xff] }
 0x6d7   : > { %12304 = vmatpush3.bf16.msra.mxu1 %v12303_v56  ;;  %12113 = vmatprep.mubr.msk.f32.mxu1 %vm13055_vm5, %v17808_v26  ;;  %v10587_v56 = vld [vmem:[%s17066_s13 + $0x120] sm:$0xff] }
 0x6d8   : > { %12305 = vmatprep.subr.bf16.mxu1 %v13054_v37  ;;  %v12357_v20 = vpack.c.bf16 %v10588_v39, %v10587_v56 }
 0x6db   : > { %12307 = vmatpush3.bf16.msra.mxu1 %v12306_v47  ;;  %v10590_v47 = vld [vmem:[%s17066_s13 + $0x138] sm:$0xff] }
 0x6dc   : > { %12308 = vmatprep.subr.bf16.mxu1 %v13054_v37  ;;  %v12360_v35 = vpack.c.bf16 %v10590_v47, %v10589_v44 }
 0x6df   : > { %12310 = vmatpush3.bf16.msra.mxu1 %v12309_v2  ;;  %v10592_v2 = vld [vmem:[%s17066_s13 + $0x148] sm:$0xff] }
 0x6e0   : > { %12311 = vmatprep.subr.bf16.mxu1 %v13054_v37  ;;  %v12363_v41 = vpack.c.bf16 %v10592_v2, %v10591_v52 }
 0x6e3   : > { %12313 = vmatpush3.bf16.msra.mxu1 %v12312_v31  ;;  %v10594_v31 = vld [vmem:[%s17066_s13 + $0x158] sm:$0xff] }
 0x6e4   : > { %12314 = vmatprep.subr.bf16.mxu1 %v13054_v37  ;;  %v12366_v28 = vpack.c.bf16 %v10594_v31, %v10593_v23 }
 0x6e7   : > { %12316 = vmatpush3.bf16.msra.mxu1 %v12315_v10  ;;  %v10596_v10 = vld [vmem:[%s17066_s13 + $0x168] sm:$0xff] }
 0x6e8   : > { %12317 = vmatprep.subr.bf16.mxu1 %v13054_v37  ;;  %v12369_v22 = vpack.c.bf16 %v10596_v10, %v10595_v42 }
 0x6eb   : > { %12319 = vmatpush3.bf16.msra.mxu1 %v12318_v30  ;;  %v12372_v30 = vpack.c.bf16 %v10598_v4, %v10597_v62 }
 0x6ec   : > { %12320 = vmatprep.subr.bf16.mxu1 %v13054_v37 }
 0x6ef   : > { %12322 = vmatpush3.bf16.msra.mxu1 %v12321_v25  ;;  %v10600_v25 = vld [vmem:[%s17066_s13 + $0x188] sm:$0xff] }
 0x6f0   : > { %12323 = vmatprep.subr.bf16.mxu1 %v13054_v37  ;;  %v12375_v19 = vpack.c.bf16 %v10600_v25, %v10599_v50 }
 0x6f3   : > { %12325 = vmatpush3.bf16.msra.mxu1 %v12324_v34  ;;  %v10602_v34 = vld [vmem:[%s17066_s13 + $0x198] sm:$0xff] }
 0x6f4   : > { %12326 = vmatprep.subr.bf16.mxu1 %v13054_v37 }
 0x7a9   : > { %v9571_v21 = vpop.f32.mrb[52].mxu1 }
 0x7aa   : > { %v9583_v49 = vmul.f32 %v10565_v16, %v9571_v21  ;;  %v12080_v46 = vpop.f32.mrb[53].mxu1  ;;  %v12378_v21 = vpack.c.bf16 %v10602_v34, %v10601_v27 }
 0x7ac   : > { %v9591_v45 = vadd.f32 %v10566_v14, %v9583_v49  ;;  %v10603_v14 = vld [vmem:[%s17066_s13 + $0x1a0] sm:$0xff]  ;;  %v10604_v49 = vld [vmem:[%s17066_s13 + $0x1a8] sm:$0xff] }
 0x7ad   : > { %v12381_v46 = vpack.c.bf16 %v10604_v49, %v10603_v14 }
 0x7ae   : > { %v9592_v3 = vmax.f32 %v9591_v45, 0.0  ;;  %v10605_v45 = vld [vmem:[%s17066_s13 + $0x1b0] sm:$0xff] }
 0x7b0   : > { %9593 = vst [vmem:[#allocation11] sm:$0xff] %v9592_v3 }
 0x7b7   : > { %v9595_v60 = vld [vmem:[#allocation11] sm:$0x1]  ;;  %v9683_v58 = vld [vmem:[#allocation11 + $0x1] sm:$0x1]  ;;  %v9772_v16 = vld [vmem:[#allocation11 + $0x4] sm:$0x1] }
 0x7b8   : > { %12114 = vmatmul.mubr.f32.vlgmr.msra.gmra.mrb[54].mxu1 %v9595_v60  ;;  %v12390_v60 = vpack.c.bf16 %v10610_v1, %v10609_v40 }
 0x7b9   : > { %12328 = vmatpush3.bf16.msra.mxu1 %v12327_v43  ;;  %12148 = vmatprep.mubr.msk.f32.mxu1 %vm13055_vm5, %v17808_v26  ;;  %v12387_v43 = vpack.c.bf16 %v10608_v33, %v10607_v12 }
 0x7ba   : > { %12329 = vmatprep.subr.bf16.mxu1 %v13054_v37 }
 0x7bd   : > { %12331 = vmatpush3.bf16.msra.mxu1 %v12330_v59  ;;  %v10611_v59 = vld [vmem:[%s17066_s13 + $0x1e0] sm:$0xff] }
 0x7be   : > { %12332 = vmatprep.subr.bf16.mxu1 %v13054_v37  ;;  %v12393_v0 = vpack.c.bf16 %v10612_v38, %v10611_v59 }
 0x7c1   : > { %12334 = vmatpush3.bf16.msra.mxu1 %v12333_v29  ;;  %v10613_v29 = vld [vmem:[%s17066_s13 + $0x1f0] sm:$0xff] }
 0x7c2   : > { %12335 = vmatprep.subr.bf16.mxu1 %v13054_v37  ;;  %v12396_v24 = vpack.c.bf16 %v10614_v32, %v10613_v29 }
 0x7c5   : > { %12337 = vmatpush3.bf16.msra.mxu1 %v12336_v63  ;;  %v9861_v63 = vld [vmem:[#allocation11 + $0x5] sm:$0x1] }
 0x7c6   : > { %12338 = vmatprep.subr.bf16.mxu1 %v13054_v37 }
 0x7c9   : > { %12340 = vmatpush3.bf16.msra.mxu1 %v12339_v5 }
 0x7ca   : > { %12341 = vmatprep.subr.bf16.mxu1 %v13054_v37 }
 0x7cd   : > { %12343 = vmatpush3.bf16.msra.mxu1 %v12342_v55 }
 0x7ce   : > { %12344 = vmatprep.subr.bf16.mxu1 %v13054_v37 }
 0x7d1   : > { %12346 = vmatpush3.bf16.msra.mxu1 %v12345_v7 }
 0x7d2   : > { %12347 = vmatprep.subr.bf16.mxu1 %v13054_v37 }
 0x7d5   : > { %12349 = vmatpush3.bf16.msra.mxu1 %v12348_v53 }
 0x7d6   : > { %12350 = vmatprep.subr.bf16.mxu1 %v13054_v37 }
 0x7d8   : > { %12149 = vmatmul.mubr.f32.vlgmr.msra.gmra.mrb[54].mxu1 %v9683_v58 }
 0x7d9   : > { %12352 = vmatpush3.bf16.msra.mxu1 %v12351_v18  ;;  %12183 = vmatprep.mubr.msk.f32.mxu1 %vm13055_vm5, %v17808_v26 }
 0x7da   : > { %12353 = vmatprep.subr.bf16.mxu1 %v13054_v37 }
 0x7dd   : > { %12355 = vmatpush3.bf16.msra.mxu1 %v12354_v51 }
 0x7de   : > { %12356 = vmatprep.subr.bf16.mxu1 %v13054_v37 }
 0x7e1   : > { %12358 = vmatpush3.bf16.msra.mxu1 %v12357_v20 }
 0x7e2   : > { %12359 = vmatprep.subr.bf16.mxu1 %v13054_v37 }
 0x7e5   : > { %12361 = vmatpush3.bf16.msra.mxu1 %v12360_v35 }
 0x7e6   : > { %12362 = vmatprep.subr.bf16.mxu1 %v13054_v37 }
 0x7e9   : > { %12364 = vmatpush3.bf16.msra.mxu1 %v12363_v41 }
 0x7ea   : > { %12365 = vmatprep.subr.bf16.mxu1 %v13054_v37 }
 0x7ed   : > { %12367 = vmatpush3.bf16.msra.mxu1 %v12366_v28 }
 0x7ee   : > { %12368 = vmatprep.subr.bf16.mxu1 %v13054_v37 }
 0x7f1   : > { %12370 = vmatpush3.bf16.msra.mxu1 %v12369_v22 }
 0x7f2   : > { %12371 = vmatprep.subr.bf16.mxu1 %v13054_v37 }
 0x7f5   : > { %12373 = vmatpush3.bf16.msra.mxu1 %v12372_v30 }
 0x7f6   : > { %12374 = vmatprep.subr.bf16.mxu1 %v13054_v37 }
 0x7f8   : > { %12184 = vmatmul.mubr.f32.vlgmr.msra.gmra.mrb[54].mxu1 %v9772_v16 }
 0x7f9   : > { %12376 = vmatpush3.bf16.msra.mxu1 %v12375_v19  ;;  %12218 = vmatprep.mubr.msk.f32.mxu1 %vm13055_vm5, %v17808_v26  ;;  %v10606_v26 = vld [vmem:[%s17066_s13 + $0x1b8] sm:$0xff]  ;;  %vm9950_vm5 = vcmask 73728  }
 0x7fa   : > { %12377 = vmatprep.subr.bf16.mxu1 %v13054_v37  ;;  %v12384_v3 = vpack.c.bf16 %v10606_v26, %v10605_v45 }
 0x7fd   : > { %12379 = vmatpush3.bf16.msra.mxu1 %v12378_v21 }
 0x7fe   : > { %12380 = vmatprep.subr.bf16.mxu1 %v13054_v37 }
 0x801   : > { %12382 = vmatpush3.bf16.msra.mxu1 %v12381_v46 }
 0x802   : > { %12383 = vmatprep.subr.bf16.mxu1 %v13054_v37 }
 0x805   : > { %12385 = vmatpush3.bf16.msra.mxu1 %v12384_v3 }
 0x806   : > { %12386 = vmatprep.subr.bf16.mxu1 %v13054_v37 }
 0x809   : > { %12388 = vmatpush3.bf16.msra.mxu1 %v12387_v43 }
 0x80a   : > { %12389 = vmatprep.subr.bf16.mxu1 %v13054_v37 }
 0x80d   : > { %12391 = vmatpush3.bf16.msra.mxu1 %v12390_v60 }
 0x80e   : > { %12392 = vmatprep.subr.bf16.mxu1 %v13054_v37 }
 0x811   : > { %12394 = vmatpush3.bf16.msra.mxu1 %v12393_v0 }
 0x812   : > { %12395 = vmatprep.subr.bf16.mxu1 %v13054_v37 }
 0x815   : > { %12397 = vmatpush3.bf16.msra.mxu1 %v12396_v24 }
 0x818   : > { %12219 = vmatmul.mubr.f32.vlgmr.msra.gmra.mrb[54].mxu1 %v9861_v63 }
 0x8eb   : > { %v9945_v8 = vpop.f32.mrb[54].mxu1 }
 0x8ec   : > { %v12436_v5 = vadd.f32 %v9945_v8, %v9594_v61  ;;  %v12220_v6 = vpop.f32.mrb[55].mxu1 }
 0x8ee   : > { %v9951_v54 = vsel %vm9950_vm5, %v12436_v5, -inf }
 0x8ef   : > { %9952 = vmax.xlane.f32.xlu0 %v9951_v54 }
 0x97c   : > { %v9953_v55 = vpop.xlane.xlu0 %9952 }
 0x97d   : > { %v9954_v11 = vsub.f32 %v12436_v5, %v9953_v55 }
 0x97f   : > { %v9955_v48 = vmul.f32 1.442695, %v9954_v11 }
 0x981   : > { %12981 = vpow2.f32 %v9955_v48 }
 0x98b   : > { %v12982_v37 = vpop.eup %12981 }
 0x98c   : > { %v9957_v7 = vsel %vm9950_vm5, %v12982_v37, 0.0 }
 0x98d   : > { %9958 = vadd.xlane.f32.xlu0 %v9957_v7 }
 0xa1a   : > { %v9959_v9 = vpop.xlane.xlu0 %9958 }
 0xa1b   : > { %12983 = vrcp.f32 %v9959_v9 }
 0xa25   : > { %v12984_v57 = vpop.eup %12983 }
 0xa26   : > { %v9961_v53 = vmul.f32 %v12984_v57, %v12982_v37 }
 0xa28   : > { %9962 = vst.msk [vmem:[%s486_s16] sm:$0x1] %vm9950_vm5, %v9961_v53 }
 0xa29   : > { %13001 = shalt.err (!%p12998_p3)
}
 0xa2a   : > { %s13002_s30 = scalar_lea.hbm %s17010_s27, 16  ;;  %s13006_s17 = scalar_lea.hbm %s17068_s15, 32 }
 0xa2b   : > { %p13003_p4 = scmp.ne.s32.totalorder %s17010_s27, %s13002_s30  ;;  %p13007_p9 = scmp.lt.u32.totalorder %s17010_s27, %s17068_s15 }
 0xa2c   : > { %p13008_p10 = scmp.lt.u32.totalorder %s13006_s17, %s13002_s30  ;;  %p13010_p12 = scmp.lt.u32.totalorder %s13002_s30, %s17010_s27 }
 0xa2d   : > { %p13004_p7 = pnand %p13003_p4, %p13175_p5 }
 0xa2e   : > { %p13009_p11 = por %p13008_p10, %p13007_p9 }
 0xa2f   : > { %p13005_p8 = pneg %p13004_p7 }
 0xa30   : > { %p13011_p13 = por %p13010_p12, %p13009_p11 }
 0xa32   : > { %p13012_p0 = pnand %p13011_p13, %p13005_p8 }
 0xa34   : > { %13015 = shalt.err (!%p13012_p0)
}
 0xa35   : > { %12938 = dma.vmem_to_hbm [thread:$0]  (%p13175_p5), %s17012_s0, 16, %s17010_s27, %s9964_s25  }
 0xa36 PF: > { %p12944_p1 = scmp.ge.s32.totalorder %s13050_s21, 2  ;;  %s9988_s3 = sand.u32 1, %s13038_s18  }
 0xa37   : > { %s9989_s26 = scalar_lea.sflag [#allocation13], %s9988_s3 }
 0xa38   : > { %p12941_p2 = pnand %p12944_p1, %p13179_p6 }
 0xa3a   : > { %13033 = dma.done.wait (!%p12941_p2), %s9989_s26, 16  }
 0xa3b   : > { %13035 = vsyncadd (!%p12941_p2), %s9989_s26, 4294967280  ;;  %s17913_s22 = sld [smem:[#allocation15_spill]]  ;;  %p25_p3 = scmp.ge.s32.totalorder %s13162_s24, 4  }
 0xa3c   : > { %s17914_s18 = smov %s13042_s19  ;;  %s17915_s19 = smov %s13046_s20 }
 0xa3d   : > { %s17917_s21 = smov %s13162_s24  ;;  %27 = sbr.rel (!%p25_p3) target bundleno = 8 (0x8), region = 150 }
 0xa41   : > { %s17916_s20 = smov %s17913_s22 }
 0xa44   :  { %9993 = vsyncpa [#allocation13], 1 }
 0xa45   :  { %9995 = vsyncpa [#allocation13 + $0x1], 1 }

</bundles_post_ra>
